<compile_context>
chip_gen: v6e
topology: v6e:2x2x1
jax: 0.10.0
libtpu: 0.0.40
codegen_flags: <defaults>
</compile_context>

<pallas_src>
import jax
import jax.numpy as jnp
from jax.experimental import pallas as pl
from jax.experimental.pallas import tpu as pltpu


def _round_up(x, m):
    return ((x + m - 1) // m) * m


def triple_conv_kernel(x_ref, w1_ref, w2_ref, w3_ref, s1_ref, s2_ref, s3_ref,
                       o_ref, buf_a, buf_b):
    """Fused 3x (3x3 'same' conv + folded-BN shift + ReLU) for one batch element.

    x_ref : (1, H, W, Cin)        unpadded NHWC input tile
    w*_ref: (3, 3, Cpad, Cpad)    HWIO weights, BN scale folded in, zero-padded
    s*_ref: (1, Cpad)             BN shift (zero in padded channels)
    o_ref : (1, H, W*Cout)        lane-dense flattened NHWC output tile
    buf_a, buf_b: (H+2, W+2, Cpad) f32 VMEM ping-pong activation buffers (halo'd)
    """
    Hp2, Wp2, Cpad = buf_a.shape
    H, W = Hp2 - 2, Wp2 - 2
    Cin = x_ref.shape[-1]
    Cout = o_ref.shape[-1] // W

    # Zero the scratch (halo + padded channels). Cheap VMEM memset per grid
    # step; keeps the 'same' padding and channel padding exact for every batch.
    buf_a[...] = jnp.zeros_like(buf_a)
    buf_b[...] = jnp.zeros_like(buf_b)

    # Stage the Cin-channel input into the interior of the padded, lane-dense
    # scratch; padded channels stay zero so they contribute nothing downstream.
    buf_a[1:H + 1, 1:W + 1, :Cin] = x_ref[0].astype(jnp.float32)

    def conv_bn_relu(src_ref, w_ref, s_ref):
        # 3x3 shift-and-matmul. One contiguous W-shifted slab per dw (3 slab
        # copies/layer); the 3 dh taps are sublane-aligned row windows of the
        # flattened slab, so each of the 9 dots is an MXU-native
        # (H*W, Cpad) x (Cpad, Cpad) matmul with no per-tap relayout copy.
        acc = jnp.zeros((H * W, Cpad), jnp.float32)
        for dw in range(3):
            slab = src_ref[:, dw:dw + W, :].reshape(Hp2 * W, Cpad)
            for dh in range(3):
                acc = acc + jnp.dot(slab[dh * W:dh * W + H * W, :],
                                    w_ref[dh, dw],
                                    preferred_element_type=jnp.float32)
        return jnp.maximum(acc + s_ref[0], 0.0)   # folded-BN shift + ReLU

    y1 = conv_bn_relu(buf_a, w1_ref, s1_ref)
    buf_b[1:H + 1, 1:W + 1, :] = y1.reshape(H, W, Cpad)

    y2 = conv_bn_relu(buf_b, w2_ref, s2_ref)
    buf_a[1:H + 1, 1:W + 1, :] = y2.reshape(H, W, Cpad)

    y3 = conv_bn_relu(buf_a, w3_ref, s3_ref)

    # Lane-dense HBM store: drop the padded channels and flatten (W, Cout) so
    # the last output dim is W*Cout (= 128 here) -> unmasked stores.
    out = y3.reshape(H, W, Cpad)[:, :, :Cout].reshape(1, H, W * Cout)
    o_ref[...] = out.astype(o_ref.dtype)


def triple_conv(x_nchw, params, eps=1e-5):
    """params: list of 3 tuples (w_hwio, gamma, beta, running_mean, running_var)."""
    x = jnp.transpose(x_nchw, (0, 2, 3, 1))   # NCHW -> NHWC (glue)
    N, H, W, Cin = x.shape
    Cout = params[-1][0].shape[-1]
    Cpad = _round_up(max([Cin] + [p[0].shape[-1] for p in params]), 128)

    # Fold BN into the conv weights (scale) + a per-channel shift; zero-pad the
    # channel dims to Cpad so every in-kernel matmul is lane/MXU dense.
    ws, shifts = [], []
    for (w, g, b, m, v) in params:
        ci, co = w.shape[2], w.shape[3]
        scale = (g / jnp.sqrt(v + eps)).astype(jnp.float32)
        shift = (b - m * (g / jnp.sqrt(v + eps))).astype(jnp.float32)
        wf = w.astype(jnp.float32) * scale[None, None, None, :]
        wp = jnp.zeros((3, 3, Cpad, Cpad), jnp.float32).at[:, :, :ci, :co].set(wf)
        sp = jnp.zeros((1, Cpad), jnp.float32).at[0, :co].set(shift)
        ws.append(wp)
        shifts.append(sp)

    # Explicit VMEM budget: 2 halo'd activation scratch buffers + double-
    # buffered weight / shift / IO blocks, with 2x headroom, capped at 64 MiB
    # so the same plan fits v7x's physical VMEM (v5e/v6e have 128 MiB).
    vmem_bytes = 4 * (2 * (H + 2) * (W + 2) * Cpad        # activation scratch
                      + 2 * 3 * 9 * Cpad * Cpad           # weights (x2 buffers)
                      + 2 * 3 * Cpad                      # shifts
                      + 2 * H * W * Cin                   # input blocks
                      + 2 * H * W * Cout)                 # output blocks
    vmem_limit = int(min(max(2 * vmem_bytes, 16 * 2**20), 64 * 2**20))

    # NOTE: for large H/W this whole-image-in-VMEM plan should switch to
    # row-block tiling (grid=(N, H//tH), 1-pixel-per-fused-layer = 3-row
    # recompute halo) so a "parallel" spatial axis also load-balances the two
    # v7x TensorCores; at the test sizes one image (+halo) is only ~170 KB.
    out_flat = pl.pallas_call(
        triple_conv_kernel,
        out_shape=jax.ShapeDtypeStruct((N, H, W * Cout), x.dtype),
        grid=(N,),
        in_specs=[
            pl.BlockSpec((1, H, W, Cin), lambda b: (b, 0, 0, 0)),
            pl.BlockSpec((3, 3, Cpad, Cpad), lambda b: (0, 0, 0, 0)),
            pl.BlockSpec((3, 3, Cpad, Cpad), lambda b: (0, 0, 0, 0)),
            pl.BlockSpec((3, 3, Cpad, Cpad), lambda b: (0, 0, 0, 0)),
            pl.BlockSpec((1, Cpad), lambda b: (0, 0)),
            pl.BlockSpec((1, Cpad), lambda b: (0, 0)),
            pl.BlockSpec((1, Cpad), lambda b: (0, 0)),
        ],
        out_specs=pl.BlockSpec((1, H, W * Cout), lambda b: (b, 0, 0)),
        scratch_shapes=[
            pltpu.VMEM((H + 2, W + 2, Cpad), jnp.float32),
            pltpu.VMEM((H + 2, W + 2, Cpad), jnp.float32),
        ],
        compiler_params=pltpu.CompilerParams(
            dimension_semantics=("parallel",),
            vmem_limit_bytes=vmem_limit),
    )(x, ws[0], ws[1], ws[2], shifts[0], shifts[1], shifts[2])

    y = out_flat.reshape(N, H, W, Cout)
    return jnp.transpose(y, (0, 3, 1, 2))     # NHWC -> NCHW


# ----------------------------- pure-JAX reference -----------------------------

def _ref_layer(x_nhwc, w, gamma, beta, mean, var, eps=1e-5):
    y = jax.lax.conv_general_dilated(
        x_nhwc, w, window_strides=(1, 1), padding="SAME",
        dimension_numbers=("NHWC", "HWIO", "NHWC"))
    scale = gamma / jnp.sqrt(var + eps)
    return jnp.maximum(y * scale + (beta - mean * scale), 0.0)


def _ref_triple(x_nchw, params):
    x = jnp.transpose(x_nchw, (0, 2, 3, 1))
    for (w, g, b, m, v) in params:
        x = _ref_layer(x, w, g, b, m, v)
    return jnp.transpose(x, (0, 3, 1, 2))


if __name__ == "__main__":
    key = jax.random.PRNGKey(0)
    N, Cin, Cout, H, W = 2, 4, 8, 16, 16
    keys = jax.random.split(key, 4)

    x_nchw = jax.random.normal(keys[0], (N, Cin, H, W), dtype=jnp.float32)

    def make_params(k, cin, cout):
        k1, k2, k3, k4, k5 = jax.random.split(k, 5)
        w = 0.1 * jax.random.normal(k1, (3, 3, cin, cout), dtype=jnp.float32)
        gamma = 1.0 + 0.1 * jax.random.normal(k2, (cout,), dtype=jnp.float32)
        beta = 0.1 * jax.random.normal(k3, (cout,), dtype=jnp.float32)
        mean = 0.1 * jax.random.normal(k4, (cout,), dtype=jnp.float32)
        var = jnp.abs(jax.random.normal(k5, (cout,), dtype=jnp.float32)) + 0.5
        return (w, gamma, beta, mean, var)

    params = [
        make_params(keys[1], Cin, Cout),
        make_params(keys[2], Cout, Cout),
        make_params(keys[3], Cout, Cout),
    ]

    y = jax.block_until_ready(triple_conv(x_nchw, params))
    y_ref = jax.block_until_ready(_ref_triple(x_nchw, params))

    assert y.shape == (N, Cout, H, W), y.shape
    max_err = float(jnp.max(jnp.abs(y - y_ref)))
    assert jnp.allclose(y, y_ref, atol=1e-4, rtol=1e-4), max_err

    print("KERNEL_OK")
</pallas_src>

<mosaic_0001>
module attributes {stable_mosaic.version = 11 : i64} {
  func.func @triple_conv_kernel(%arg0: i32, %arg1: memref<1x16x16x4xf32, #tpu.memory_space<vmem>>, %arg2: memref<3x3x128x128xf32, #tpu.memory_space<vmem>>, %arg3: memref<3x3x128x128xf32, #tpu.memory_space<vmem>>, %arg4: memref<3x3x128x128xf32, #tpu.memory_space<vmem>>, %arg5: memref<1x128xf32, #tpu.memory_space<vmem>>, %arg6: memref<1x128xf32, #tpu.memory_space<vmem>>, %arg7: memref<1x128xf32, #tpu.memory_space<vmem>>, %arg8: memref<1x16x128xf32, #tpu.memory_space<vmem>>, %arg9: memref<18x18x128xf32, #tpu.memory_space<vmem>>, %arg10: memref<18x18x128xf32, #tpu.memory_space<vmem>>) attributes {dimension_semantics = [#tpu.dimension_semantics<parallel>], iteration_bounds = array<i64: 2>, scalar_prefetch = 0 : i64, scratch_operands = 2 : i64, tpu.core_type = #tpu.core_type<tc>, window_params = [{transform_indices = @transform_0, window_bounds = array<i64: 1, 16, 16, 4>}, {pipeline_mode = #tpu.pipeline_mode<synchronous>, transform_indices = @transform_1, window_bounds = array<i64: 3, 3, 128, 128>}, {pipeline_mode = #tpu.pipeline_mode<synchronous>, transform_indices = @transform_2, window_bounds = array<i64: 3, 3, 128, 128>}, {pipeline_mode = #tpu.pipeline_mode<synchronous>, transform_indices = @transform_3, window_bounds = array<i64: 3, 3, 128, 128>}, {pipeline_mode = #tpu.pipeline_mode<synchronous>, transform_indices = @transform_4, window_bounds = array<i64: 1, 128>}, {pipeline_mode = #tpu.pipeline_mode<synchronous>, transform_indices = @transform_5, window_bounds = array<i64: 1, 128>}, {pipeline_mode = #tpu.pipeline_mode<synchronous>, transform_indices = @transform_6, window_bounds = array<i64: 1, 128>}, {transform_indices = @transform_7, window_bounds = array<i64: 1, 16, 128>}]} {
    %cst = arith.constant 0.000000e+00 : f32
    %0 = vector.broadcast %cst : f32 to vector<18x18x128xf32>
    %c0 = arith.constant 0 : index
    %c0_0 = arith.constant 0 : index
    %c0_1 = arith.constant 0 : index
    %1 = vector.load %arg9[%c0, %c0_0, %c0_1] : memref<18x18x128xf32, #tpu.memory_space<vmem>>, vector<18x18x128xf32>
    tpu.vector_store %arg9[%c0, %c0_0, %c0_1], %0 {strides = array<i32>} : memref<18x18x128xf32, #tpu.memory_space<vmem>>, vector<18x18x128xf32>,
    %cst_2 = arith.constant 0.000000e+00 : f32
    %2 = vector.broadcast %cst_2 : f32 to vector<18x18x128xf32>
    %c0_3 = arith.constant 0 : index
    %c0_4 = arith.constant 0 : index
    %c0_5 = arith.constant 0 : index
    %3 = vector.load %arg10[%c0_3, %c0_4, %c0_5] : memref<18x18x128xf32, #tpu.memory_space<vmem>>, vector<18x18x128xf32>
    tpu.vector_store %arg10[%c0_3, %c0_4, %c0_5], %2 {strides = array<i32>} : memref<18x18x128xf32, #tpu.memory_space<vmem>>, vector<18x18x128xf32>,
    %c0_6 = arith.constant 0 : index
    %c0_7 = arith.constant 0 : index
    %c0_8 = arith.constant 0 : index
    %c0_9 = arith.constant 0 : index
    %4 = vector.load %arg1[%c0_6, %c0_7, %c0_8, %c0_9] : memref<1x16x16x4xf32, #tpu.memory_space<vmem>>, vector<1x16x16x4xf32>
    %5 = vector.shape_cast %4 : vector<1x16x16x4xf32> to vector<16x16x4xf32>
    %c1 = arith.constant 1 : index
    %c1_10 = arith.constant 1 : index
    %c0_11 = arith.constant 0 : index
    %6 = vector.load %arg9[%c1, %c1_10, %c0_11] : memref<18x18x128xf32, #tpu.memory_space<vmem>>, vector<16x16x4xf32>
    tpu.vector_store %arg9[%c1, %c1_10, %c0_11], %5 {strides = array<i32>} : memref<18x18x128xf32, #tpu.memory_space<vmem>>, vector<16x16x4xf32>,
    %cst_12 = arith.constant 0.000000e+00 : f32
    %7 = vector.broadcast %cst_12 : f32 to vector<256x128xf32>
    %c0_13 = arith.constant 0 : index
    %c0_14 = arith.constant 0 : index
    %c0_15 = arith.constant 0 : index
    %8 = vector.load %arg9[%c0_13, %c0_14, %c0_15] : memref<18x18x128xf32, #tpu.memory_space<vmem>>, vector<18x16x128xf32>
    %9 = vector.shape_cast %8 : vector<18x16x128xf32> to vector<288x128xf32>
    %10 = vector.extract_strided_slice %9 {offsets = [0, 0], sizes = [256, 128], strides = [1, 1]} : vector<288x128xf32> to vector<256x128xf32>
    %c0_16 = arith.constant 0 : index
    %c0_17 = arith.constant 0 : index
    %c0_18 = arith.constant 0 : index
    %c0_19 = arith.constant 0 : index
    %11 = vector.load %arg2[%c0_16, %c0_17, %c0_18, %c0_19] : memref<3x3x128x128xf32, #tpu.memory_space<vmem>>, vector<1x1x128x128xf32>
    %12 = vector.shape_cast %11 : vector<1x1x128x128xf32> to vector<128x128xf32>
    %cst_20 = arith.constant dense<0.000000e+00> : vector<256x128xf32>
    %13 = tpu.matmul %10, %12, %cst_20 {dimension_numbers = #tpu.dot_dimension_numbers<[1], [0], [0], [1], [0, 0, 1, 1], [], []>} : vector<256x128xf32>, vector<128x128xf32>, vector<256x128xf32> -> vector<256x128xf32>
    %14 = arith.addf %7, %13 : vector<256x128xf32>
    %15 = vector.extract_strided_slice %9 {offsets = [16, 0], sizes = [256, 128], strides = [1, 1]} : vector<288x128xf32> to vector<256x128xf32>
    %c1_21 = arith.constant 1 : index
    %c0_22 = arith.constant 0 : index
    %c0_23 = arith.constant 0 : index
    %c0_24 = arith.constant 0 : index
    %16 = vector.load %arg2[%c1_21, %c0_22, %c0_23, %c0_24] : memref<3x3x128x128xf32, #tpu.memory_space<vmem>>, vector<1x1x128x128xf32>
    %17 = vector.shape_cast %16 : vector<1x1x128x128xf32> to vector<128x128xf32>
    %cst_25 = arith.constant dense<0.000000e+00> : vector<256x128xf32>
    %18 = tpu.matmul %15, %17, %cst_25 {dimension_numbers = #tpu.dot_dimension_numbers<[1], [0], [0], [1], [0, 0, 1, 1], [], []>} : vector<256x128xf32>, vector<128x128xf32>, vector<256x128xf32> -> vector<256x128xf32>
    %19 = arith.addf %14, %18 : vector<256x128xf32>
    %20 = vector.extract_strided_slice %9 {offsets = [32, 0], sizes = [256, 128], strides = [1, 1]} : vector<288x128xf32> to vector<256x128xf32>
    %c2 = arith.constant 2 : index
    %c0_26 = arith.constant 0 : index
    %c0_27 = arith.constant 0 : index
    %c0_28 = arith.constant 0 : index
    %21 = vector.load %arg2[%c2, %c0_26, %c0_27, %c0_28] : memref<3x3x128x128xf32, #tpu.memory_space<vmem>>, vector<1x1x128x128xf32>
    %22 = vector.shape_cast %21 : vector<1x1x128x128xf32> to vector<128x128xf32>
    %cst_29 = arith.constant dense<0.000000e+00> : vector<256x128xf32>
    %23 = tpu.matmul %20, %22, %cst_29 {dimension_numbers = #tpu.dot_dimension_numbers<[1], [0], [0], [1], [0, 0, 1, 1], [], []>} : vector<256x128xf32>, vector<128x128xf32>, vector<256x128xf32> -> vector<256x128xf32>
    %24 = arith.addf %19, %23 : vector<256x128xf32>
    %c0_30 = arith.constant 0 : index
    %c1_31 = arith.constant 1 : index
    %c0_32 = arith.constant 0 : index
    %25 = vector.load %arg9[%c0_30, %c1_31, %c0_32] : memref<18x18x128xf32, #tpu.memory_space<vmem>>, vector<18x16x128xf32>
    %26 = vector.shape_cast %25 : vector<18x16x128xf32> to vector<288x128xf32>
    %27 = vector.extract_strided_slice %26 {offsets = [0, 0], sizes = [256, 128], strides = [1, 1]} : vector<288x128xf32> to vector<256x128xf32>
    %c0_33 = arith.constant 0 : index
    %c1_34 = arith.constant 1 : index
    %c0_35 = arith.constant 0 : index
    %c0_36 = arith.constant 0 : index
    %28 = vector.load %arg2[%c0_33, %c1_34, %c0_35, %c0_36] : memref<3x3x128x128xf32, #tpu.memory_space<vmem>>, vector<1x1x128x128xf32>
    %29 = vector.shape_cast %28 : vector<1x1x128x128xf32> to vector<128x128xf32>
    %cst_37 = arith.constant dense<0.000000e+00> : vector<256x128xf32>
    %30 = tpu.matmul %27, %29, %cst_37 {dimension_numbers = #tpu.dot_dimension_numbers<[1], [0], [0], [1], [0, 0, 1, 1], [], []>} : vector<256x128xf32>, vector<128x128xf32>, vector<256x128xf32> -> vector<256x128xf32>
    %31 = arith.addf %24, %30 : vector<256x128xf32>
    %32 = vector.extract_strided_slice %26 {offsets = [16, 0], sizes = [256, 128], strides = [1, 1]} : vector<288x128xf32> to vector<256x128xf32>
    %c1_38 = arith.constant 1 : index
    %c1_39 = arith.constant 1 : index
    %c0_40 = arith.constant 0 : index
    %c0_41 = arith.constant 0 : index
    %33 = vector.load %arg2[%c1_38, %c1_39, %c0_40, %c0_41] : memref<3x3x128x128xf32, #tpu.memory_space<vmem>>, vector<1x1x128x128xf32>
    %34 = vector.shape_cast %33 : vector<1x1x128x128xf32> to vector<128x128xf32>
    %cst_42 = arith.constant dense<0.000000e+00> : vector<256x128xf32>
    %35 = tpu.matmul %32, %34, %cst_42 {dimension_numbers = #tpu.dot_dimension_numbers<[1], [0], [0], [1], [0, 0, 1, 1], [], []>} : vector<256x128xf32>, vector<128x128xf32>, vector<256x128xf32> -> vector<256x128xf32>
    %36 = arith.addf %31, %35 : vector<256x128xf32>
    %37 = vector.extract_strided_slice %26 {offsets = [32, 0], sizes = [256, 128], strides = [1, 1]} : vector<288x128xf32> to vector<256x128xf32>
    %c2_43 = arith.constant 2 : index
    %c1_44 = arith.constant 1 : index
    %c0_45 = arith.constant 0 : index
    %c0_46 = arith.constant 0 : index
    %38 = vector.load %arg2[%c2_43, %c1_44, %c0_45, %c0_46] : memref<3x3x128x128xf32, #tpu.memory_space<vmem>>, vector<1x1x128x128xf32>
    %39 = vector.shape_cast %38 : vector<1x1x128x128xf32> to vector<128x128xf32>
    %cst_47 = arith.constant dense<0.000000e+00> : vector<256x128xf32>
    %40 = tpu.matmul %37, %39, %cst_47 {dimension_numbers = #tpu.dot_dimension_numbers<[1], [0], [0], [1], [0, 0, 1, 1], [], []>} : vector<256x128xf32>, vector<128x128xf32>, vector<256x128xf32> -> vector<256x128xf32>
    %41 = arith.addf %36, %40 : vector<256x128xf32>
    %c0_48 = arith.constant 0 : index
    %c2_49 = arith.constant 2 : index
    %c0_50 = arith.constant 0 : index
    %42 = vector.load %arg9[%c0_48, %c2_49, %c0_50] : memref<18x18x128xf32, #tpu.memory_space<vmem>>, vector<18x16x128xf32>
    %43 = vector.shape_cast %42 : vector<18x16x128xf32> to vector<288x128xf32>
    %44 = vector.extract_strided_slice %43 {offsets = [0, 0], sizes = [256, 128], strides = [1, 1]} : vector<288x128xf32> to vector<256x128xf32>
    %c0_51 = arith.constant 0 : index
    %c2_52 = arith.constant 2 : index
    %c0_53 = arith.constant 0 : index
    %c0_54 = arith.constant 0 : index
    %45 = vector.load %arg2[%c0_51, %c2_52, %c0_53, %c0_54] : memref<3x3x128x128xf32, #tpu.memory_space<vmem>>, vector<1x1x128x128xf32>
    %46 = vector.shape_cast %45 : vector<1x1x128x128xf32> to vector<128x128xf32>
    %cst_55 = arith.constant dense<0.000000e+00> : vector<256x128xf32>
    %47 = tpu.matmul %44, %46, %cst_55 {dimension_numbers = #tpu.dot_dimension_numbers<[1], [0], [0], [1], [0, 0, 1, 1], [], []>} : vector<256x128xf32>, vector<128x128xf32>, vector<256x128xf32> -> vector<256x128xf32>
    %48 = arith.addf %41, %47 : vector<256x128xf32>
    %49 = vector.extract_strided_slice %43 {offsets = [16, 0], sizes = [256, 128], strides = [1, 1]} : vector<288x128xf32> to vector<256x128xf32>
    %c1_56 = arith.constant 1 : index
    %c2_57 = arith.constant 2 : index
    %c0_58 = arith.constant 0 : index
    %c0_59 = arith.constant 0 : index
    %50 = vector.load %arg2[%c1_56, %c2_57, %c0_58, %c0_59] : memref<3x3x128x128xf32, #tpu.memory_space<vmem>>, vector<1x1x128x128xf32>
    %51 = vector.shape_cast %50 : vector<1x1x128x128xf32> to vector<128x128xf32>
    %cst_60 = arith.constant dense<0.000000e+00> : vector<256x128xf32>
    %52 = tpu.matmul %49, %51, %cst_60 {dimension_numbers = #tpu.dot_dimension_numbers<[1], [0], [0], [1], [0, 0, 1, 1], [], []>} : vector<256x128xf32>, vector<128x128xf32>, vector<256x128xf32> -> vector<256x128xf32>
    %53 = arith.addf %48, %52 : vector<256x128xf32>
    %54 = vector.extract_strided_slice %43 {offsets = [32, 0], sizes = [256, 128], strides = [1, 1]} : vector<288x128xf32> to vector<256x128xf32>
    %c2_61 = arith.constant 2 : index
    %c2_62 = arith.constant 2 : index
    %c0_63 = arith.constant 0 : index
    %c0_64 = arith.constant 0 : index
    %55 = vector.load %arg2[%c2_61, %c2_62, %c0_63, %c0_64] : memref<3x3x128x128xf32, #tpu.memory_space<vmem>>, vector<1x1x128x128xf32>
    %56 = vector.shape_cast %55 : vector<1x1x128x128xf32> to vector<128x128xf32>
    %cst_65 = arith.constant dense<0.000000e+00> : vector<256x128xf32>
    %57 = tpu.matmul %54, %56, %cst_65 {dimension_numbers = #tpu.dot_dimension_numbers<[1], [0], [0], [1], [0, 0, 1, 1], [], []>} : vector<256x128xf32>, vector<128x128xf32>, vector<256x128xf32> -> vector<256x128xf32>
    %58 = arith.addf %53, %57 : vector<256x128xf32>
    %c0_66 = arith.constant 0 : index
    %c0_67 = arith.constant 0 : index
    %59 = vector.load %arg5[%c0_66, %c0_67] : memref<1x128xf32, #tpu.memory_space<vmem>>, vector<1x128xf32>
    %60 = vector.shape_cast %59 : vector<1x128xf32> to vector<128xf32>
    %61 = vector.shape_cast %60 : vector<128xf32> to vector<1x128xf32>
    %62 = vector.broadcast %61 : vector<1x128xf32> to vector<256x128xf32>
    %63 = arith.addf %58, %62 : vector<256x128xf32>
    %cst_68 = arith.constant 0.000000e+00 : f32
    %64 = vector.broadcast %cst_68 : f32 to vector<256x128xf32>
    %65 = arith.maximumf %63, %64 : vector<256x128xf32>
    %66 = vector.shape_cast %65 : vector<256x128xf32> to vector<16x16x128xf32>
    %c1_69 = arith.constant 1 : index
    %c1_70 = arith.constant 1 : index
    %c0_71 = arith.constant 0 : index
    %67 = vector.load %arg10[%c1_69, %c1_70, %c0_71] : memref<18x18x128xf32, #tpu.memory_space<vmem>>, vector<16x16x128xf32>
    tpu.vector_store %arg10[%c1_69, %c1_70, %c0_71], %66 {strides = array<i32>} : memref<18x18x128xf32, #tpu.memory_space<vmem>>, vector<16x16x128xf32>,
    %cst_72 = arith.constant 0.000000e+00 : f32
    %68 = vector.broadcast %cst_72 : f32 to vector<256x128xf32>
    %c0_73 = arith.constant 0 : index
    %c0_74 = arith.constant 0 : index
    %c0_75 = arith.constant 0 : index
    %69 = vector.load %arg10[%c0_73, %c0_74, %c0_75] : memref<18x18x128xf32, #tpu.memory_space<vmem>>, vector<18x16x128xf32>
    %70 = vector.shape_cast %69 : vector<18x16x128xf32> to vector<288x128xf32>
    %71 = vector.extract_strided_slice %70 {offsets = [0, 0], sizes = [256, 128], strides = [1, 1]} : vector<288x128xf32> to vector<256x128xf32>
    %c0_76 = arith.constant 0 : index
    %c0_77 = arith.constant 0 : index
    %c0_78 = arith.constant 0 : index
    %c0_79 = arith.constant 0 : index
    %72 = vector.load %arg3[%c0_76, %c0_77, %c0_78, %c0_79] : memref<3x3x128x128xf32, #tpu.memory_space<vmem>>, vector<1x1x128x128xf32>
    %73 = vector.shape_cast %72 : vector<1x1x128x128xf32> to vector<128x128xf32>
    %cst_80 = arith.constant dense<0.000000e+00> : vector<256x128xf32>
    %74 = tpu.matmul %71, %73, %cst_80 {dimension_numbers = #tpu.dot_dimension_numbers<[1], [0], [0], [1], [0, 0, 1, 1], [], []>} : vector<256x128xf32>, vector<128x128xf32>, vector<256x128xf32> -> vector<256x128xf32>
    %75 = arith.addf %68, %74 : vector<256x128xf32>
    %76 = vector.extract_strided_slice %70 {offsets = [16, 0], sizes = [256, 128], strides = [1, 1]} : vector<288x128xf32> to vector<256x128xf32>
    %c1_81 = arith.constant 1 : index
    %c0_82 = arith.constant 0 : index
    %c0_83 = arith.constant 0 : index
    %c0_84 = arith.constant 0 : index
    %77 = vector.load %arg3[%c1_81, %c0_82, %c0_83, %c0_84] : memref<3x3x128x128xf32, #tpu.memory_space<vmem>>, vector<1x1x128x128xf32>
    %78 = vector.shape_cast %77 : vector<1x1x128x128xf32> to vector<128x128xf32>
    %cst_85 = arith.constant dense<0.000000e+00> : vector<256x128xf32>
    %79 = tpu.matmul %76, %78, %cst_85 {dimension_numbers = #tpu.dot_dimension_numbers<[1], [0], [0], [1], [0, 0, 1, 1], [], []>} : vector<256x128xf32>, vector<128x128xf32>, vector<256x128xf32> -> vector<256x128xf32>
    %80 = arith.addf %75, %79 : vector<256x128xf32>
    %81 = vector.extract_strided_slice %70 {offsets = [32, 0], sizes = [256, 128], strides = [1, 1]} : vector<288x128xf32> to vector<256x128xf32>
    %c2_86 = arith.constant 2 : index
    %c0_87 = arith.constant 0 : index
    %c0_88 = arith.constant 0 : index
    %c0_89 = arith.constant 0 : index
    %82 = vector.load %arg3[%c2_86, %c0_87, %c0_88, %c0_89] : memref<3x3x128x128xf32, #tpu.memory_space<vmem>>, vector<1x1x128x128xf32>
    %83 = vector.shape_cast %82 : vector<1x1x128x128xf32> to vector<128x128xf32>
    %cst_90 = arith.constant dense<0.000000e+00> : vector<256x128xf32>
    %84 = tpu.matmul %81, %83, %cst_90 {dimension_numbers = #tpu.dot_dimension_numbers<[1], [0], [0], [1], [0, 0, 1, 1], [], []>} : vector<256x128xf32>, vector<128x128xf32>, vector<256x128xf32> -> vector<256x128xf32>
    %85 = arith.addf %80, %84 : vector<256x128xf32>
    %c0_91 = arith.constant 0 : index
    %c1_92 = arith.constant 1 : index
    %c0_93 = arith.constant 0 : index
    %86 = vector.load %arg10[%c0_91, %c1_92, %c0_93] : memref<18x18x128xf32, #tpu.memory_space<vmem>>, vector<18x16x128xf32>
    %87 = vector.shape_cast %86 : vector<18x16x128xf32> to vector<288x128xf32>
    %88 = vector.extract_strided_slice %87 {offsets = [0, 0], sizes = [256, 128], strides = [1, 1]} : vector<288x128xf32> to vector<256x128xf32>
    %c0_94 = arith.constant 0 : index
    %c1_95 = arith.constant 1 : index
    %c0_96 = arith.constant 0 : index
    %c0_97 = arith.constant 0 : index
    %89 = vector.load %arg3[%c0_94, %c1_95, %c0_96, %c0_97] : memref<3x3x128x128xf32, #tpu.memory_space<vmem>>, vector<1x1x128x128xf32>
    %90 = vector.shape_cast %89 : vector<1x1x128x128xf32> to vector<128x128xf32>
    %cst_98 = arith.constant dense<0.000000e+00> : vector<256x128xf32>
    %91 = tpu.matmul %88, %90, %cst_98 {dimension_numbers = #tpu.dot_dimension_numbers<[1], [0], [0], [1], [0, 0, 1, 1], [], []>} : vector<256x128xf32>, vector<128x128xf32>, vector<256x128xf32> -> vector<256x128xf32>
    %92 = arith.addf %85, %91 : vector<256x128xf32>
    %93 = vector.extract_strided_slice %87 {offsets = [16, 0], sizes = [256, 128], strides = [1, 1]} : vector<288x128xf32> to vector<256x128xf32>
    %c1_99 = arith.constant 1 : index
    %c1_100 = arith.constant 1 : index
    %c0_101 = arith.constant 0 : index
    %c0_102 = arith.constant 0 : index
    %94 = vector.load %arg3[%c1_99, %c1_100, %c0_101, %c0_102] : memref<3x3x128x128xf32, #tpu.memory_space<vmem>>, vector<1x1x128x128xf32>
    %95 = vector.shape_cast %94 : vector<1x1x128x128xf32> to vector<128x128xf32>
    %cst_103 = arith.constant dense<0.000000e+00> : vector<256x128xf32>
    %96 = tpu.matmul %93, %95, %cst_103 {dimension_numbers = #tpu.dot_dimension_numbers<[1], [0], [0], [1], [0, 0, 1, 1], [], []>} : vector<256x128xf32>, vector<128x128xf32>, vector<256x128xf32> -> vector<256x128xf32>
    %97 = arith.addf %92, %96 : vector<256x128xf32>
    %98 = vector.extract_strided_slice %87 {offsets = [32, 0], sizes = [256, 128], strides = [1, 1]} : vector<288x128xf32> to vector<256x128xf32>
    %c2_104 = arith.constant 2 : index
    %c1_105 = arith.constant 1 : index
    %c0_106 = arith.constant 0 : index
    %c0_107 = arith.constant 0 : index
    %99 = vector.load %arg3[%c2_104, %c1_105, %c0_106, %c0_107] : memref<3x3x128x128xf32, #tpu.memory_space<vmem>>, vector<1x1x128x128xf32>
    %100 = vector.shape_cast %99 : vector<1x1x128x128xf32> to vector<128x128xf32>
    %cst_108 = arith.constant dense<0.000000e+00> : vector<256x128xf32>
    %101 = tpu.matmul %98, %100, %cst_108 {dimension_numbers = #tpu.dot_dimension_numbers<[1], [0], [0], [1], [0, 0, 1, 1], [], []>} : vector<256x128xf32>, vector<128x128xf32>, vector<256x128xf32> -> vector<256x128xf32>
    %102 = arith.addf %97, %101 : vector<256x128xf32>
    %c0_109 = arith.constant 0 : index
    %c2_110 = arith.constant 2 : index
    %c0_111 = arith.constant 0 : index
    %103 = vector.load %arg10[%c0_109, %c2_110, %c0_111] : memref<18x18x128xf32, #tpu.memory_space<vmem>>, vector<18x16x128xf32>
    %104 = vector.shape_cast %103 : vector<18x16x128xf32> to vector<288x128xf32>
    %105 = vector.extract_strided_slice %104 {offsets = [0, 0], sizes = [256, 128], strides = [1, 1]} : vector<288x128xf32> to vector<256x128xf32>
    %c0_112 = arith.constant 0 : index
    %c2_113 = arith.constant 2 : index
    %c0_114 = arith.constant 0 : index
    %c0_115 = arith.constant 0 : index
    %106 = vector.load %arg3[%c0_112, %c2_113, %c0_114, %c0_115] : memref<3x3x128x128xf32, #tpu.memory_space<vmem>>, vector<1x1x128x128xf32>
    %107 = vector.shape_cast %106 : vector<1x1x128x128xf32> to vector<128x128xf32>
    %cst_116 = arith.constant dense<0.000000e+00> : vector<256x128xf32>
    %108 = tpu.matmul %105, %107, %cst_116 {dimension_numbers = #tpu.dot_dimension_numbers<[1], [0], [0], [1], [0, 0, 1, 1], [], []>} : vector<256x128xf32>, vector<128x128xf32>, vector<256x128xf32> -> vector<256x128xf32>
    %109 = arith.addf %102, %108 : vector<256x128xf32>
    %110 = vector.extract_strided_slice %104 {offsets = [16, 0], sizes = [256, 128], strides = [1, 1]} : vector<288x128xf32> to vector<256x128xf32>
    %c1_117 = arith.constant 1 : index
    %c2_118 = arith.constant 2 : index
    %c0_119 = arith.constant 0 : index
    %c0_120 = arith.constant 0 : index
    %111 = vector.load %arg3[%c1_117, %c2_118, %c0_119, %c0_120] : memref<3x3x128x128xf32, #tpu.memory_space<vmem>>, vector<1x1x128x128xf32>
    %112 = vector.shape_cast %111 : vector<1x1x128x128xf32> to vector<128x128xf32>
    %cst_121 = arith.constant dense<0.000000e+00> : vector<256x128xf32>
    %113 = tpu.matmul %110, %112, %cst_121 {dimension_numbers = #tpu.dot_dimension_numbers<[1], [0], [0], [1], [0, 0, 1, 1], [], []>} : vector<256x128xf32>, vector<128x128xf32>, vector<256x128xf32> -> vector<256x128xf32>
    %114 = arith.addf %109, %113 : vector<256x128xf32>
    %115 = vector.extract_strided_slice %104 {offsets = [32, 0], sizes = [256, 128], strides = [1, 1]} : vector<288x128xf32> to vector<256x128xf32>
    %c2_122 = arith.constant 2 : index
    %c2_123 = arith.constant 2 : index
    %c0_124 = arith.constant 0 : index
    %c0_125 = arith.constant 0 : index
    %116 = vector.load %arg3[%c2_122, %c2_123, %c0_124, %c0_125] : memref<3x3x128x128xf32, #tpu.memory_space<vmem>>, vector<1x1x128x128xf32>
    %117 = vector.shape_cast %116 : vector<1x1x128x128xf32> to vector<128x128xf32>
    %cst_126 = arith.constant dense<0.000000e+00> : vector<256x128xf32>
    %118 = tpu.matmul %115, %117, %cst_126 {dimension_numbers = #tpu.dot_dimension_numbers<[1], [0], [0], [1], [0, 0, 1, 1], [], []>} : vector<256x128xf32>, vector<128x128xf32>, vector<256x128xf32> -> vector<256x128xf32>
    %119 = arith.addf %114, %118 : vector<256x128xf32>
    %c0_127 = arith.constant 0 : index
    %c0_128 = arith.constant 0 : index
    %120 = vector.load %arg6[%c0_127, %c0_128] : memref<1x128xf32, #tpu.memory_space<vmem>>, vector<1x128xf32>
    %121 = vector.shape_cast %120 : vector<1x128xf32> to vector<128xf32>
    %122 = vector.shape_cast %121 : vector<128xf32> to vector<1x128xf32>
    %123 = vector.broadcast %122 : vector<1x128xf32> to vector<256x128xf32>
    %124 = arith.addf %119, %123 : vector<256x128xf32>
    %cst_129 = arith.constant 0.000000e+00 : f32
    %125 = vector.broadcast %cst_129 : f32 to vector<256x128xf32>
    %126 = arith.maximumf %124, %125 : vector<256x128xf32>
    %127 = vector.shape_cast %126 : vector<256x128xf32> to vector<16x16x128xf32>
    %c1_130 = arith.constant 1 : index
    %c1_131 = arith.constant 1 : index
    %c0_132 = arith.constant 0 : index
    %128 = vector.load %arg9[%c1_130, %c1_131, %c0_132] : memref<18x18x128xf32, #tpu.memory_space<vmem>>, vector<16x16x128xf32>
    tpu.vector_store %arg9[%c1_130, %c1_131, %c0_132], %127 {strides = array<i32>} : memref<18x18x128xf32, #tpu.memory_space<vmem>>, vector<16x16x128xf32>,
    %cst_133 = arith.constant 0.000000e+00 : f32
    %129 = vector.broadcast %cst_133 : f32 to vector<256x128xf32>
    %c0_134 = arith.constant 0 : index
    %c0_135 = arith.constant 0 : index
    %c0_136 = arith.constant 0 : index
    %130 = vector.load %arg9[%c0_134, %c0_135, %c0_136] : memref<18x18x128xf32, #tpu.memory_space<vmem>>, vector<18x16x128xf32>
    %131 = vector.shape_cast %130 : vector<18x16x128xf32> to vector<288x128xf32>
    %132 = vector.extract_strided_slice %131 {offsets = [0, 0], sizes = [256, 128], strides = [1, 1]} : vector<288x128xf32> to vector<256x128xf32>
    %c0_137 = arith.constant 0 : index
    %c0_138 = arith.constant 0 : index
    %c0_139 = arith.constant 0 : index
    %c0_140 = arith.constant 0 : index
    %133 = vector.load %arg4[%c0_137, %c0_138, %c0_139, %c0_140] : memref<3x3x128x128xf32, #tpu.memory_space<vmem>>, vector<1x1x128x128xf32>
    %134 = vector.shape_cast %133 : vector<1x1x128x128xf32> to vector<128x128xf32>
    %cst_141 = arith.constant dense<0.000000e+00> : vector<256x128xf32>
    %135 = tpu.matmul %132, %134, %cst_141 {dimension_numbers = #tpu.dot_dimension_numbers<[1], [0], [0], [1], [0, 0, 1, 1], [], []>} : vector<256x128xf32>, vector<128x128xf32>, vector<256x128xf32> -> vector<256x128xf32>
    %136 = arith.addf %129, %135 : vector<256x128xf32>
    %137 = vector.extract_strided_slice %131 {offsets = [16, 0], sizes = [256, 128], strides = [1, 1]} : vector<288x128xf32> to vector<256x128xf32>
    %c1_142 = arith.constant 1 : index
    %c0_143 = arith.constant 0 : index
    %c0_144 = arith.constant 0 : index
    %c0_145 = arith.constant 0 : index
    %138 = vector.load %arg4[%c1_142, %c0_143, %c0_144, %c0_145] : memref<3x3x128x128xf32, #tpu.memory_space<vmem>>, vector<1x1x128x128xf32>
    %139 = vector.shape_cast %138 : vector<1x1x128x128xf32> to vector<128x128xf32>
    %cst_146 = arith.constant dense<0.000000e+00> : vector<256x128xf32>
    %140 = tpu.matmul %137, %139, %cst_146 {dimension_numbers = #tpu.dot_dimension_numbers<[1], [0], [0], [1], [0, 0, 1, 1], [], []>} : vector<256x128xf32>, vector<128x128xf32>, vector<256x128xf32> -> vector<256x128xf32>
    %141 = arith.addf %136, %140 : vector<256x128xf32>
    %142 = vector.extract_strided_slice %131 {offsets = [32, 0], sizes = [256, 128], strides = [1, 1]} : vector<288x128xf32> to vector<256x128xf32>
    %c2_147 = arith.constant 2 : index
    %c0_148 = arith.constant 0 : index
    %c0_149 = arith.constant 0 : index
    %c0_150 = arith.constant 0 : index
    %143 = vector.load %arg4[%c2_147, %c0_148, %c0_149, %c0_150] : memref<3x3x128x128xf32, #tpu.memory_space<vmem>>, vector<1x1x128x128xf32>
    %144 = vector.shape_cast %143 : vector<1x1x128x128xf32> to vector<128x128xf32>
    %cst_151 = arith.constant dense<0.000000e+00> : vector<256x128xf32>
    %145 = tpu.matmul %142, %144, %cst_151 {dimension_numbers = #tpu.dot_dimension_numbers<[1], [0], [0], [1], [0, 0, 1, 1], [], []>} : vector<256x128xf32>, vector<128x128xf32>, vector<256x128xf32> -> vector<256x128xf32>
    %146 = arith.addf %141, %145 : vector<256x128xf32>
    %c0_152 = arith.constant 0 : index
    %c1_153 = arith.constant 1 : index
    %c0_154 = arith.constant 0 : index
    %147 = vector.load %arg9[%c0_152, %c1_153, %c0_154] : memref<18x18x128xf32, #tpu.memory_space<vmem>>, vector<18x16x128xf32>
    %148 = vector.shape_cast %147 : vector<18x16x128xf32> to vector<288x128xf32>
    %149 = vector.extract_strided_slice %148 {offsets = [0, 0], sizes = [256, 128], strides = [1, 1]} : vector<288x128xf32> to vector<256x128xf32>
    %c0_155 = arith.constant 0 : index
    %c1_156 = arith.constant 1 : index
    %c0_157 = arith.constant 0 : index
    %c0_158 = arith.constant 0 : index
    %150 = vector.load %arg4[%c0_155, %c1_156, %c0_157, %c0_158] : memref<3x3x128x128xf32, #tpu.memory_space<vmem>>, vector<1x1x128x128xf32>
    %151 = vector.shape_cast %150 : vector<1x1x128x128xf32> to vector<128x128xf32>
    %cst_159 = arith.constant dense<0.000000e+00> : vector<256x128xf32>
    %152 = tpu.matmul %149, %151, %cst_159 {dimension_numbers = #tpu.dot_dimension_numbers<[1], [0], [0], [1], [0, 0, 1, 1], [], []>} : vector<256x128xf32>, vector<128x128xf32>, vector<256x128xf32> -> vector<256x128xf32>
    %153 = arith.addf %146, %152 : vector<256x128xf32>
    %154 = vector.extract_strided_slice %148 {offsets = [16, 0], sizes = [256, 128], strides = [1, 1]} : vector<288x128xf32> to vector<256x128xf32>
    %c1_160 = arith.constant 1 : index
    %c1_161 = arith.constant 1 : index
    %c0_162 = arith.constant 0 : index
    %c0_163 = arith.constant 0 : index
    %155 = vector.load %arg4[%c1_160, %c1_161, %c0_162, %c0_163] : memref<3x3x128x128xf32, #tpu.memory_space<vmem>>, vector<1x1x128x128xf32>
    %156 = vector.shape_cast %155 : vector<1x1x128x128xf32> to vector<128x128xf32>
    %cst_164 = arith.constant dense<0.000000e+00> : vector<256x128xf32>
    %157 = tpu.matmul %154, %156, %cst_164 {dimension_numbers = #tpu.dot_dimension_numbers<[1], [0], [0], [1], [0, 0, 1, 1], [], []>} : vector<256x128xf32>, vector<128x128xf32>, vector<256x128xf32> -> vector<256x128xf32>
    %158 = arith.addf %153, %157 : vector<256x128xf32>
    %159 = vector.extract_strided_slice %148 {offsets = [32, 0], sizes = [256, 128], strides = [1, 1]} : vector<288x128xf32> to vector<256x128xf32>
    %c2_165 = arith.constant 2 : index
    %c1_166 = arith.constant 1 : index
    %c0_167 = arith.constant 0 : index
    %c0_168 = arith.constant 0 : index
    %160 = vector.load %arg4[%c2_165, %c1_166, %c0_167, %c0_168] : memref<3x3x128x128xf32, #tpu.memory_space<vmem>>, vector<1x1x128x128xf32>
    %161 = vector.shape_cast %160 : vector<1x1x128x128xf32> to vector<128x128xf32>
    %cst_169 = arith.constant dense<0.000000e+00> : vector<256x128xf32>
    %162 = tpu.matmul %159, %161, %cst_169 {dimension_numbers = #tpu.dot_dimension_numbers<[1], [0], [0], [1], [0, 0, 1, 1], [], []>} : vector<256x128xf32>, vector<128x128xf32>, vector<256x128xf32> -> vector<256x128xf32>
    %163 = arith.addf %158, %162 : vector<256x128xf32>
    %c0_170 = arith.constant 0 : index
    %c2_171 = arith.constant 2 : index
    %c0_172 = arith.constant 0 : index
    %164 = vector.load %arg9[%c0_170, %c2_171, %c0_172] : memref<18x18x128xf32, #tpu.memory_space<vmem>>, vector<18x16x128xf32>
    %165 = vector.shape_cast %164 : vector<18x16x128xf32> to vector<288x128xf32>
    %166 = vector.extract_strided_slice %165 {offsets = [0, 0], sizes = [256, 128], strides = [1, 1]} : vector<288x128xf32> to vector<256x128xf32>
    %c0_173 = arith.constant 0 : index
    %c2_174 = arith.constant 2 : index
    %c0_175 = arith.constant 0 : index
    %c0_176 = arith.constant 0 : index
    %167 = vector.load %arg4[%c0_173, %c2_174, %c0_175, %c0_176] : memref<3x3x128x128xf32, #tpu.memory_space<vmem>>, vector<1x1x128x128xf32>
    %168 = vector.shape_cast %167 : vector<1x1x128x128xf32> to vector<128x128xf32>
    %cst_177 = arith.constant dense<0.000000e+00> : vector<256x128xf32>
    %169 = tpu.matmul %166, %168, %cst_177 {dimension_numbers = #tpu.dot_dimension_numbers<[1], [0], [0], [1], [0, 0, 1, 1], [], []>} : vector<256x128xf32>, vector<128x128xf32>, vector<256x128xf32> -> vector<256x128xf32>
    %170 = arith.addf %163, %169 : vector<256x128xf32>
    %171 = vector.extract_strided_slice %165 {offsets = [16, 0], sizes = [256, 128], strides = [1, 1]} : vector<288x128xf32> to vector<256x128xf32>
    %c1_178 = arith.constant 1 : index
    %c2_179 = arith.constant 2 : index
    %c0_180 = arith.constant 0 : index
    %c0_181 = arith.constant 0 : index
    %172 = vector.load %arg4[%c1_178, %c2_179, %c0_180, %c0_181] : memref<3x3x128x128xf32, #tpu.memory_space<vmem>>, vector<1x1x128x128xf32>
    %173 = vector.shape_cast %172 : vector<1x1x128x128xf32> to vector<128x128xf32>
    %cst_182 = arith.constant dense<0.000000e+00> : vector<256x128xf32>
    %174 = tpu.matmul %171, %173, %cst_182 {dimension_numbers = #tpu.dot_dimension_numbers<[1], [0], [0], [1], [0, 0, 1, 1], [], []>} : vector<256x128xf32>, vector<128x128xf32>, vector<256x128xf32> -> vector<256x128xf32>
    %175 = arith.addf %170, %174 : vector<256x128xf32>
    %176 = vector.extract_strided_slice %165 {offsets = [32, 0], sizes = [256, 128], strides = [1, 1]} : vector<288x128xf32> to vector<256x128xf32>
    %c2_183 = arith.constant 2 : index
    %c2_184 = arith.constant 2 : index
    %c0_185 = arith.constant 0 : index
    %c0_186 = arith.constant 0 : index
    %177 = vector.load %arg4[%c2_183, %c2_184, %c0_185, %c0_186] : memref<3x3x128x128xf32, #tpu.memory_space<vmem>>, vector<1x1x128x128xf32>
    %178 = vector.shape_cast %177 : vector<1x1x128x128xf32> to vector<128x128xf32>
    %cst_187 = arith.constant dense<0.000000e+00> : vector<256x128xf32>
    %179 = tpu.matmul %176, %178, %cst_187 {dimension_numbers = #tpu.dot_dimension_numbers<[1], [0], [0], [1], [0, 0, 1, 1], [], []>} : vector<256x128xf32>, vector<128x128xf32>, vector<256x128xf32> -> vector<256x128xf32>
    %180 = arith.addf %175, %179 : vector<256x128xf32>
    %c0_188 = arith.constant 0 : index
    %c0_189 = arith.constant 0 : index
    %181 = vector.load %arg7[%c0_188, %c0_189] : memref<1x128xf32, #tpu.memory_space<vmem>>, vector<1x128xf32>
    %182 = vector.shape_cast %181 : vector<1x128xf32> to vector<128xf32>
    %183 = vector.shape_cast %182 : vector<128xf32> to vector<1x128xf32>
    %184 = vector.broadcast %183 : vector<1x128xf32> to vector<256x128xf32>
    %185 = arith.addf %180, %184 : vector<256x128xf32>
    %cst_190 = arith.constant 0.000000e+00 : f32
    %186 = vector.broadcast %cst_190 : f32 to vector<256x128xf32>
    %187 = arith.maximumf %185, %186 : vector<256x128xf32>
    %188 = vector.shape_cast %187 : vector<256x128xf32> to vector<16x16x128xf32>
    %189 = vector.extract_strided_slice %188 {offsets = [0, 0, 0], sizes = [16, 16, 8], strides = [1, 1, 1]} : vector<16x16x128xf32> to vector<16x16x8xf32>
    %190 = vector.shape_cast %189 : vector<16x16x8xf32> to vector<1x16x128xf32>
    %c0_191 = arith.constant 0 : index
    %c0_192 = arith.constant 0 : index
    %c0_193 = arith.constant 0 : index
    %191 = vector.load %arg8[%c0_191, %c0_192, %c0_193] : memref<1x16x128xf32, #tpu.memory_space<vmem>>, vector<1x16x128xf32>
    tpu.vector_store %arg8[%c0_191, %c0_192, %c0_193], %190 {strides = array<i32>} : memref<1x16x128xf32, #tpu.memory_space<vmem>>, vector<1x16x128xf32>,
    return
  }
  func.func @transform_0(%arg0: i32) -> (i32, i32, i32, i32) {
    %c0_i32 = arith.constant 0 : i32
    %c0_i32_0 = arith.constant 0 : i32
    %c0_i32_1 = arith.constant 0 : i32
    %c0_i32_2 = arith.constant 0 : i32
    return %arg0, %c0_i32, %c0_i32_0, %c0_i32_1 : i32, i32, i32, i32
  }
  func.func @transform_1(%arg0: i32) -> (i32, i32, i32, i32) {
    %c0_i32 = arith.constant 0 : i32
    %c0_i32_0 = arith.constant 0 : i32
    %c0_i32_1 = arith.constant 0 : i32
    %c0_i32_2 = arith.constant 0 : i32
    %c0_i32_3 = arith.constant 0 : i32
    return %c0_i32, %c0_i32_0, %c0_i32_1, %c0_i32_2 : i32, i32, i32, i32
  }
  func.func @transform_2(%arg0: i32) -> (i32, i32, i32, i32) {
    %c0_i32 = arith.constant 0 : i32
    %c0_i32_0 = arith.constant 0 : i32
    %c0_i32_1 = arith.constant 0 : i32
    %c0_i32_2 = arith.constant 0 : i32
    %c0_i32_3 = arith.constant 0 : i32
    return %c0_i32, %c0_i32_0, %c0_i32_1, %c0_i32_2 : i32, i32, i32, i32
  }
  func.func @transform_3(%arg0: i32) -> (i32, i32, i32, i32) {
    %c0_i32 = arith.constant 0 : i32
    %c0_i32_0 = arith.constant 0 : i32
    %c0_i32_1 = arith.constant 0 : i32
    %c0_i32_2 = arith.constant 0 : i32
    %c0_i32_3 = arith.constant 0 : i32
    return %c0_i32, %c0_i32_0, %c0_i32_1, %c0_i32_2 : i32, i32, i32, i32
  }
  func.func @transform_4(%arg0: i32) -> (i32, i32) {
    %c0_i32 = arith.constant 0 : i32
    %c0_i32_0 = arith.constant 0 : i32
    %c0_i32_1 = arith.constant 0 : i32
    return %c0_i32, %c0_i32_0 : i32, i32
  }
  func.func @transform_5(%arg0: i32) -> (i32, i32) {
    %c0_i32 = arith.constant 0 : i32
    %c0_i32_0 = arith.constant 0 : i32
    %c0_i32_1 = arith.constant 0 : i32
    return %c0_i32, %c0_i32_0 : i32, i32
  }
  func.func @transform_6(%arg0: i32) -> (i32, i32) {
    %c0_i32 = arith.constant 0 : i32
    %c0_i32_0 = arith.constant 0 : i32
    %c0_i32_1 = arith.constant 0 : i32
    return %c0_i32, %c0_i32_0 : i32, i32
  }
  func.func @transform_7(%arg0: i32) -> (i32, i32, i32) {
    %c0_i32 = arith.constant 0 : i32
    %c0_i32_0 = arith.constant 0 : i32
    %c0_i32_1 = arith.constant 0 : i32
    return %arg0, %c0_i32, %c0_i32_0 : i32, i32, i32
  }
}

</mosaic_0001>

<bundles_post_ra>
// kernel: tpu_custom_call.1
= control target key start
LH: loop header
LB: loop body
LE: loop exit
PB: predicated region body
PF: predicated region fallthrough
CT: control target
= control target key end

     0   :  { %12 = vsyncpa [#allocation5], 0  ;;  %s16918_s0 = inlined_call_operand.vmem [shape: f32[2,16,16,4], index: 0, kind: input, shape index: {}]   ;;  %s16919_s1 = inlined_call_operand.hbm [shape: f32[3,3,128,128], index: 1, kind: input, shape index: {}]   ;;  %s16920_s2 = inlined_call_operand.hbm [shape: f32[3,3,128,128], index: 2, kind: input, shape index: {}]   ;;  %s16921_s3 = inlined_call_operand.hbm [shape: f32[3,3,128,128], index: 3, kind: input, shape index: {}]   ;;  %s16922_s4 = inlined_call_operand.vmem [shape: f32[1,128], index: 4, kind: input, shape index: {}]   ;;  %s16923_s5 = inlined_call_operand.vmem [shape: f32[1,128], index: 5, kind: input, shape index: {}]   ;;  %s16924_s6 = inlined_call_operand.vmem [shape: f32[1,128], index: 6, kind: input, shape index: {}]   ;;  %s16925_s7 = inlined_call_operand.hbm [shape: f32[2,16,128], index: 7, kind: output, shape index: {}]  }
   0x1   :  { %13 = vsyncpa [#allocation8], 0 }
   0x2   :  { %14 = vsyncpa [#allocation6], 0 }
   0x3   :  { %16 = vsyncpa [#allocation6 + $0x1], 0  ;;  %s12958_s24 = smov 0   ;;  %s12960_s25 = smov 0  }
   0x4   :  { %s12962_s26 = smov 0   ;;  %s12964_s27 = smov 0  }
   0x5 LB: > { %s12979_s28 = sadd.s32 4294967295, %s12891_s27   ;;  %s9118_s29 = sadd.s32 4294967294, %s12891_s27   ;;  %s12891_s27 = sphi %s12964_s27, %s17458_s27   ;;  %s12887_s26 = sphi %s12962_s26, %s17457_s26   ;;  %s12883_s25 = sphi %s12960_s25, %s17456_s25   ;;  %s12879_s24 = sphi %s12958_s24, %s17455_s24  }
   0x6   : > { %s12983_s30 = sadd.s32 1, %s12891_s27   ;;  %s181_s8 = sadd.s32 1, %s12887_s26 }
   0x7   : > { %s178_s9 = ssub.s32 %s12891_s27, %s12983_s30  ;;  %p191_p0 = scmp.ne.s32.totalorder %s12887_s26, %s12883_s25 }
   0x8   : > { %p179_p1 = scmp.eq.s32.totalorder %s178_s9, 0  ;;  %p192_p2 = scmp.eq.s32.totalorder %s12979_s28, 1 }
   0x9   : > { %p197_p3 = scmp.ne.s32.totalorder %s12883_s25, %s12879_s24  ;;  %p198_p4 = scmp.eq.s32.totalorder %s9118_s29, 1 }
   0xa   : > { %s12994_s10 = scalar_select %p179_p1, %s12887_s26, %s181_s8  }
   0xb   : > { %p12996_p5 = por %p192_p2, %p191_p0  ;;  %p13000_p6 = por %p198_p4, %p197_p3 }
   0xc   : > { %p9119_p7 = scmp.ge.s32.totalorder %s12891_s27, 1  ;;  %p205_p8 = scmp.lt.s32.totalorder %s12891_s27, 3 }
   0xd   : > { %s16979_s11 = scalar_select %p12996_p5, 1, 0 }
   0xe   : > { %s16980_s12 = scalar_select %p13000_p6, 1, 0 }
   0xf   : > { %p16926_p9 = scmp.eq.s32.totalorder %s12979_s28, 0  ;;  %p13007_p10 = pnand %p9119_p7, %p205_p8 }
  0x10   : > { %s12893_s14 = smov [#allocation7]   ;;  %s12894_s17 = smov [#allocation4]  }
  0x11   : > { %p12643_p11 = pneg %p13007_p10  ;;  %s230_s15 = sshll.u32 %s12893_s14, 4  ;;  %s231_s15 = int_to_ptr.vmem [resolvable:$true] %s230_s15 }
  0x12   : > { %s217_s18 = sshll.u32 %s12894_s17, 4  ;;  %s12895_s19 = smov [#allocation9]   ;;  %s218_s18 = int_to_ptr.vmem [resolvable:$true] %s217_s18 }
  0x13   : > { %p13015_p12 = pnand %p16926_p9, %p12643_p11  ;;  %s243_s20 = sshll.u32 %s12895_s19, 4  ;;  %s244_s20 = int_to_ptr.vmem [resolvable:$true] %s243_s20 }
  0x14   : > { %s12756_s21 = scalar_lea.vmem %s231_s15, 18432  ;;  %p12764_p3 = scmp.lt.s32.totalorder %s231_s15, %s231_s15 }
  0x15   : > { %p12747_p13 = pneg %p13015_p12  ;;  %p12757_p0 = scmp.ne.s32.totalorder %s231_s15, %s12756_s21 }
  0x16   : > { %p12765_p4 = scmp.lt.s32.totalorder %s12756_s21, %s12756_s21 }
  0x17   : > { %p12759_p1 = pnand %p12757_p0, %p12747_p13 }
  0x18   : > { %p12766_p7 = por %p12765_p4, %p12764_p3 }
  0x19   : > { %p12760_p2 = pneg %p12759_p1 }
  0x1b   : > { %p12767_p8 = pnand %p12766_p7, %p12760_p2 }
  0x1d   : > { %12770 = shalt.err (!%p12767_p8)
}
  0x1e   : > { %s12896_s22 = smov 128   ;;  %s12897_s23 = smov 8  }
  0x1f   : > { %12649 = dma.hbm_to_vmem [thread:$0]  (!%p13015_p12), %s16920_s2, 18432, %s231_s15, [#allocation8], %s12896_s22, %s12896_s22, %s12897_s23  }
  0x20   : > { %s12782_s9 = scalar_lea.vmem %s218_s18, 18432  ;;  %p12790_p9 = scmp.lt.s32.totalorder %s218_s18, %s218_s18 }
  0x21   : > { %p12783_p11 = scmp.ne.s32.totalorder %s218_s18, %s12782_s9  ;;  %p12791_p6 = scmp.lt.s32.totalorder %s12782_s9, %s12782_s9 }
  0x23   : > { %p12785_p0 = pnand %p12783_p11, %p12747_p13  ;;  %p12792_p3 = por %p12791_p6, %p12790_p9 }
  0x25   : > { %p12786_p1 = pneg %p12785_p0 }
  0x27   : > { %p12793_p2 = pnand %p12792_p3, %p12786_p1 }
  0x29   : > { %12796 = shalt.err (!%p12793_p2)
}
  0x2a   : > { %12646 = dma.hbm_to_vmem [thread:$0]  (!%p13015_p12), %s16919_s1, 18432, %s218_s18, [#allocation5], %s12896_s22, %s12896_s22, %s12897_s23  }
  0x2b   : > { %s12808_s15 = scalar_lea.vmem %s244_s20, 18432  ;;  %p12816_p11 = scmp.lt.s32.totalorder %s244_s20, %s244_s20 }
  0x2c   : > { %p12809_p4 = scmp.ne.s32.totalorder %s244_s20, %s12808_s15  ;;  %p12817_p0 = scmp.lt.s32.totalorder %s12808_s15, %s12808_s15 }
  0x2e   : > { %p12811_p7 = pnand %p12809_p4, %p12747_p13  ;;  %p12818_p5 = por %p12817_p0, %p12816_p11 }
  0x30   : > { %p12812_p8 = pneg %p12811_p7 }
  0x32   : > { %p12819_p6 = pnand %p12818_p5, %p12812_p8 }
  0x34   : > { %12822 = shalt.err (!%p12819_p6)
}
  0x35   : > { %12652 = dma.hbm_to_vmem [thread:$0]  (!%p13015_p12), %s16921_s3, 18432, %s244_s20, [#allocation8], %s12896_s22, %s12896_s22, %s12897_s23  }
  0x36   : > { %276 = sbr.rel (%p13007_p10) target bundleno = 1758 (0x6de), region = 48 }
  0x3b   : > { %p16983_p9 = scmp.eq.s32.totalorder %s12979_s28, 0 }
  0x3d   : > { %12866 = dma.done.wait (%p16983_p9), [#allocation5], 18432   ;;  %p16984_p13 = pmov %p16983_p9 }
  0x3e   : > { %p16985_p1 = pmov %p16983_p9 }
  0x3f   : > { %12868 = vsyncadd (%p16984_p13), [#allocation5], 4294948864 }
  0x40   : > { %12870 = dma.done.wait (%p16985_p1), [#allocation8], 36864   ;;  %p16986_p5 = pmov %p16985_p1 }
  0x41   : > { %p316_p3 = scmp.lt.s32.totalorder %s12979_s28, 1  ;;  %v12898_v0 = vmov 0.0   ;;  %v563_v1 = vld [vmem:[#allocation4 + $0x1f8] sm:$0xff]  ;;  %v562_v2 = vld [vmem:[#allocation4 + $0x1f0] sm:$0xff]  ;;  %v561_v3 = vld [vmem:[#allocation4 + $0x1e8] sm:$0xff]  ;;  %vm462_vm0 = vcmask 31744  }
  0x42   : > { %12872 = vsyncadd (%p16986_p5), [#allocation8], 4294930432  ;;  %348 = vst [vmem:[#allocation2 + $0xd8] sm:$0xff] %v12898_v0  ;;  %12597 = vmatprep.subr.mxu1 %v563_v1  ;;  %10437 = vmatprep.subr.mxu0 %v563_v1  ;;  %v560_v4 = vld [vmem:[#allocation4 + $0x1e0] sm:$0xff]  ;;  %v559_v7 = vld [vmem:[#allocation4 + $0x1d8] sm:$0xff]  ;;  %s12901_s15 = smov 64  }
  0x43   : > { %349 = vst [vmem:[#allocation2 + $0xe0] sm:$0xff] %v12898_v0  ;;  %321 = vst [vmem:[#allocation2] sm:$0xff] %v12898_v0  ;;  %s317_s13 = scalar_select %p316_p3, %s12979_s28, 1  ;;  %12613 = vmatpush3.msra.mxu1 %v563_v1  ;;  %10438 = vmatpush3.msra.mxu0 %v563_v1  ;;  %v558_v11 = vld [vmem:[#allocation4 + $0x1d0] sm:$0xff]  ;;  %v557_v15 = vld [vmem:[#allocation4 + $0x1c8] sm:$0xff]  ;;  %vm8964_vm1 = vcmask 64512  }
  0x44   : > { %322 = vst [vmem:[#allocation2 + $0x8] sm:$0xff] %v12898_v0  ;;  %323 = vst [vmem:[#allocation2 + $0x10] sm:$0x3] %v12898_v0  ;;  %12598 = vmatprep.subr.mxu1 %v562_v2  ;;  %10439 = vmatprep.subr.mxu0 %v562_v2  ;;  %v556_v19 = vld [vmem:[#allocation4 + $0x1c0] sm:$0xff]  ;;  %v555_v22 = vld [vmem:[#allocation4 + $0x1b8] sm:$0xff]  ;;  %s12902_s19 = smov 16  }
  0x45   : > { %324 = vst [vmem:[#allocation2 + $0x18] sm:$0xff] %v12898_v0  ;;  %325 = vst [vmem:[#allocation2 + $0x20] sm:$0xff] %v12898_v0  ;;  %s9139_s16 = sshll.u32 %s317_s13, 8  ;;  %12614 = vmatpush3.msra.mxu1 %v562_v2  ;;  %10440 = vmatpush3.msra.mxu0 %v562_v2  ;;  %v554_v25 = vld [vmem:[#allocation4 + $0x1b0] sm:$0xff]  ;;  %v553_v27 = vld [vmem:[#allocation4 + $0x1a8] sm:$0xff]  ;;  %s12903_s21 = smov 72  }
  0x46   : > { %326 = vst [vmem:[#allocation2 + $0x28] sm:$0x3] %v12898_v0  ;;  %327 = vst [vmem:[#allocation2 + $0x30] sm:$0xff] %v12898_v0  ;;  %s13170_s22 = scalar_lea.vmem %s16918_s0, %s9139_s16  ;;  %12599 = vmatprep.subr.mxu1 %v561_v3  ;;  %10441 = vmatprep.subr.mxu0 %v561_v3  ;;  %v552_v29 = vld [vmem:[#allocation4 + $0x1a0] sm:$0xff]  ;;  %v551_v33 = vld [vmem:[#allocation4 + $0x198] sm:$0xff]  ;;  %s12904_s13 = smov 80  }
  0x47   : > { %328 = vst [vmem:[#allocation2 + $0x38] sm:$0xff] %v12898_v0  ;;  %329 = vst [vmem:[#allocation2 + $0x40] sm:$0x3] %v12898_v0  ;;  %v445_v5 = vld [vmem:[%s13170_s22 + $0x80] sm:$0xff]  ;;  %12615 = vmatpush3.msra.mxu1 %v561_v3  ;;  %10442 = vmatpush3.msra.mxu0 %v561_v3  ;;  %v446_v8 = vld [vmem:[%s13170_s22 + $0x88] sm:$0xff]  ;;  %s12905_s16 = smov 88  }
  0x48   : > { %330 = vst [vmem:[#allocation2 + $0x48] sm:$0xff] %v12898_v0  ;;  %331 = vst [vmem:[#allocation2 + $0x50] sm:$0xff] %v12898_v0  ;;  %v429_v6 = vld [vmem:[%s13170_s22] sm:$0xff]  ;;  %v430_v9 = vld [vmem:[%s13170_s22 + $0x8] sm:$0xff]  ;;  %12600 = vmatprep.subr.mxu1 %v560_v4  ;;  %10443 = vmatprep.subr.mxu0 %v560_v4  ;;  %s12906_s18 = smov 8   ;;  %s12907_s20 = smov 24  }
  0x49   : > { %332 = vst [vmem:[#allocation2 + $0x58] sm:$0x3] %v12898_v0  ;;  %333 = vst [vmem:[#allocation2 + $0x60] sm:$0xff] %v12898_v0  ;;  %v447_v10 = vld [vmem:[%s13170_s22 + $0x90] sm:$0xff]  ;;  %12616 = vmatpush3.msra.mxu1 %v560_v4  ;;  %10444 = vmatpush3.msra.mxu0 %v560_v4  ;;  %v448_v13 = vld [vmem:[%s13170_s22 + $0x98] sm:$0xff]  ;;  %s12909_s23 = smov 40  }
  0x4a   : > { %334 = vst [vmem:[#allocation2 + $0x68] sm:$0xff] %v12898_v0  ;;  %335 = vst [vmem:[#allocation2 + $0x70] sm:$0x3] %v12898_v0  ;;  %v431_v12 = vld [vmem:[%s13170_s22 + $0x10] sm:$0xff]  ;;  %12601 = vmatprep.subr.mxu1 %v559_v7  ;;  %10445 = vmatprep.subr.mxu0 %v559_v7  ;;  %v432_v14 = vld [vmem:[%s13170_s22 + $0x18] sm:$0xff]  ;;  %s12910_s29 = smov 48  }
  0x4b   : > { %336 = vst [vmem:[#allocation2 + $0x78] sm:$0xff] %v12898_v0  ;;  %337 = vst [vmem:[#allocation2 + $0x80] sm:$0xff] %v12898_v0  ;;  %12617 = vmatpush3.msra.mxu1 %v559_v7  ;;  %10446 = vmatpush3.msra.mxu0 %v559_v7  ;;  %v449_v16 = vld [vmem:[%s13170_s22 + $0xa0] sm:$0xff]  ;;  %v450_v18 = vld [vmem:[%s13170_s22 + $0xa8] sm:$0xff]  ;;  %s12911_s8 = smov 56   ;;  %s12912_s9 = smov 96  }
  0x4c   : > { %338 = vst [vmem:[#allocation2 + $0x88] sm:$0x3] %v12898_v0  ;;  %339 = vst [vmem:[#allocation2 + $0x90] sm:$0xff] %v12898_v0  ;;  %12602 = vmatprep.subr.mxu1 %v558_v11  ;;  %10447 = vmatprep.subr.mxu0 %v558_v11  ;;  %v433_v17 = vld [vmem:[%s13170_s22 + $0x20] sm:$0xff]  ;;  %v434_v20 = vld [vmem:[%s13170_s22 + $0x28] sm:$0xff]  ;;  %s12913_s14 = smov 104  }
  0x4d   : > { %340 = vst [vmem:[#allocation2 + $0x98] sm:$0xff] %v12898_v0  ;;  %341 = vst [vmem:[#allocation2 + $0xa0] sm:$0x3] %v12898_v0  ;;  %12618 = vmatpush3.msra.mxu1 %v558_v11  ;;  %10448 = vmatpush3.msra.mxu0 %v558_v11  ;;  %v451_v21 = vld [vmem:[%s13170_s22 + $0xb0] sm:$0xff]  ;;  %v452_v24 = vld [vmem:[%s13170_s22 + $0xb8] sm:$0xff]  ;;  %s12914_s17 = smov 112  }
  0x4e   : > { %342 = vst [vmem:[#allocation2 + $0xa8] sm:$0xff] %v12898_v0  ;;  %343 = vst [vmem:[#allocation2 + $0xb0] sm:$0xff] %v12898_v0  ;;  %12603 = vmatprep.subr.mxu1 %v557_v15  ;;  %10449 = vmatprep.subr.mxu0 %v557_v15  ;;  %v435_v23 = vld [vmem:[%s13170_s22 + $0x30] sm:$0xff]  ;;  %v436_v26 = vld [vmem:[%s13170_s22 + $0x38] sm:$0xff]  ;;  %vm8967_vm2 = vcmask 130048   ;;  %vm8970_vm3 = vcmask 195584  }
  0x4f   : > { %344 = vst [vmem:[#allocation2 + $0xb8] sm:$0x3] %v12898_v0  ;;  %345 = vst [vmem:[#allocation2 + $0xc0] sm:$0xff] %v12898_v0  ;;  %12619 = vmatpush3.msra.mxu1 %v557_v15  ;;  %10450 = vmatpush3.msra.mxu0 %v557_v15  ;;  %v453_v28 = vld [vmem:[%s13170_s22 + $0xc0] sm:$0xff]  ;;  %v454_v31 = vld [vmem:[%s13170_s22 + $0xc8] sm:$0xff]  ;;  %vm8973_vm4 = vcmask 261120  }
  0x50   : > { %346 = vst [vmem:[#allocation2 + $0xc8] sm:$0xff] %v12898_v0  ;;  %347 = vst [vmem:[#allocation2 + $0xd0] sm:$0x3] %v12898_v0  ;;  %12604 = vmatprep.subr.mxu1 %v556_v19  ;;  %10451 = vmatprep.subr.mxu0 %v556_v19  ;;  %v437_v30 = vld [vmem:[%s13170_s22 + $0x40] sm:$0xff]  ;;  %v438_v32 = vld [vmem:[%s13170_s22 + $0x48] sm:$0xff]  ;;  %vm8976_vm5 = vcmask 326656  }
  0x51   : > { %350 = vst [vmem:[#allocation2 + $0xe8] sm:$0x3] %v12898_v0  ;;  %351 = vst [vmem:[#allocation2 + $0xf0] sm:$0xff] %v12898_v0  ;;  %12620 = vmatpush3.msra.mxu1 %v556_v19  ;;  %10452 = vmatpush3.msra.mxu0 %v556_v19  ;;  %v455_v34 = vld [vmem:[%s13170_s22 + $0xd0] sm:$0xff]  ;;  %v456_v37 = vld [vmem:[%s13170_s22 + $0xd8] sm:$0xff]  ;;  %vm8979_vm6 = vcmask 392192  }
  0x52   : > { %352 = vst [vmem:[#allocation2 + $0xf8] sm:$0xff] %v12898_v0  ;;  %353 = vst [vmem:[#allocation2 + $0x100] sm:$0x3] %v12898_v0  ;;  %12605 = vmatprep.subr.mxu1 %v555_v22  ;;  %10453 = vmatprep.subr.mxu0 %v555_v22  ;;  %v550_v35 = vld [vmem:[#allocation4 + $0x190] sm:$0xff]  ;;  %v440_v38 = vld [vmem:[%s13170_s22 + $0x58] sm:$0xff]  ;;  %vm8982_vm7 = vcmask 457728  }
  0x53   : > { %354 = vst [vmem:[#allocation2 + $0x108] sm:$0xff] %v12898_v0  ;;  %355 = vst [vmem:[#allocation2 + $0x110] sm:$0xff] %v12898_v0  ;;  %12621 = vmatpush3.msra.mxu1 %v555_v22  ;;  %10454 = vmatpush3.msra.mxu0 %v555_v22  ;;  %v439_v36 = vld [vmem:[%s13170_s22 + $0x50] sm:$0xff]  ;;  %v549_v39 = vld [vmem:[#allocation4 + $0x188] sm:$0xff]  ;;  %vm8985_vm8 = vcmask 523264   ;;  %vm8988_vm9 = vcmask 588800  }
  0x54   : > { %356 = vst [vmem:[#allocation2 + $0x118] sm:$0x3] %v12898_v0  ;;  %357 = vst [vmem:[#allocation2 + $0x120] sm:$0xff] %v12898_v0  ;;  %12606 = vmatprep.subr.mxu1 %v554_v25  ;;  %10455 = vmatprep.subr.mxu0 %v554_v25  ;;  %v457_v40 = vld [vmem:[%s13170_s22 + $0xe0] sm:$0xff]  ;;  %v458_v42 = vld [vmem:[%s13170_s22 + $0xe8] sm:$0xff]  ;;  %vm8991_vm10 = vcmask 654336  }
  0x55   : > { %358 = vst [vmem:[#allocation2 + $0x128] sm:$0xff] %v12898_v0  ;;  %359 = vst [vmem:[#allocation2 + $0x130] sm:$0x3] %v12898_v0  ;;  %12622 = vmatpush3.msra.mxu1 %v554_v25  ;;  %10456 = vmatpush3.msra.mxu0 %v554_v25  ;;  %v441_v41 = vld [vmem:[%s13170_s22 + $0x60] sm:$0xff]  ;;  %v442_v45 = vld [vmem:[%s13170_s22 + $0x68] sm:$0xff]  ;;  %vm8994_vm11 = vcmask 719872  }
  0x56   : > { %360 = vst [vmem:[#allocation2 + $0x138] sm:$0xff] %v12898_v0  ;;  %361 = vst [vmem:[#allocation2 + $0x140] sm:$0xff] %v12898_v0  ;;  %12607 = vmatprep.subr.mxu1 %v553_v27  ;;  %10457 = vmatprep.subr.mxu0 %v553_v27  ;;  %v548_v43 = vld [vmem:[#allocation4 + $0x180] sm:$0xff]  ;;  %v546_v47 = vld [vmem:[#allocation4 + $0x78] sm:$0xff]  ;;  %vm8997_vm12 = vcmask 785408   ;;  %vm9000_vm13 = vcmask 850944  }
  0x57   : > { %362 = vst [vmem:[#allocation2 + $0x148] sm:$0x3] %v12898_v0  ;;  %363 = vst [vmem:[#allocation2 + $0x150] sm:$0xff] %v12898_v0  ;;  %12623 = vmatpush3.msra.mxu1 %v553_v27  ;;  %10458 = vmatpush3.msra.mxu0 %v553_v27  ;;  %v459_v48 = vld [vmem:[%s13170_s22 + $0xf0] sm:$0xff]  ;;  %v460_v51 = vld [vmem:[%s13170_s22 + $0xf8] sm:$0xff]  ;;  %vm9003_vm14 = vcmask 916480  }
  0x58   : > { %364 = vst [vmem:[#allocation2 + $0x158] sm:$0xff] %v12898_v0  ;;  %365 = vst [vmem:[#allocation2 + $0x160] sm:$0x3] %v12898_v0  ;;  %12608 = vmatprep.subr.mxu1 %v552_v29  ;;  %10459 = vmatprep.subr.mxu0 %v552_v29  ;;  %v443_v50 = vld [vmem:[%s13170_s22 + $0x70] sm:$0xff]  ;;  %v1030_v53 = vld [vmem:[#allocation4 + $0x378] sm:$0xff]  ;;  %vm9006_vm15 = vcmask 982016  }
  0x59   : > { %366 = vst [vmem:[#allocation2 + $0x168] sm:$0xff] %v12898_v0  ;;  %367 = vst [vmem:[#allocation2 + $0x170] sm:$0xff] %v12898_v0  ;;  %12624 = vmatpush3.msra.mxu1 %v552_v29  ;;  %10460 = vmatpush3.msra.mxu0 %v552_v29  ;;  %v545_v54 = vld [vmem:[#allocation4 + $0x70] sm:$0xff]  ;;  %v444_v55 = vld [vmem:[%s13170_s22 + $0x78] sm:$0xff]  ;;  %s12908_s22 = smov 32   ;;  %p17453_p12 = scmp.ne.s32.totalorder %s16979_s11, 0 }
  0x5a   : > { %368 = vst [vmem:[#allocation2 + $0x178] sm:$0x3] %v12898_v0  ;;  %369 = vst [vmem:[#allocation2 + $0x180] sm:$0xff] %v12898_v0  ;;  %12609 = vmatprep.subr.mxu1 %v551_v33  ;;  %10461 = vmatprep.subr.mxu0 %v551_v33  ;;  %v1029_v57 = vld [vmem:[#allocation4 + $0x370] sm:$0xff]  ;;  %v544_v60 = vld [vmem:[#allocation4 + $0x68] sm:$0xff] }
  0x5b   : > { %370 = vst [vmem:[#allocation2 + $0x188] sm:$0xff] %v12898_v0  ;;  %371 = vst [vmem:[#allocation2 + $0x190] sm:$0x3] %v12898_v0  ;;  %12625 = vmatpush3.msra.mxu1 %v551_v33  ;;  %10462 = vmatpush3.msra.mxu0 %v551_v33  ;;  %v1028_v62 = vld [vmem:[#allocation4 + $0x368] sm:$0xff]  ;;  %v543_v63 = vld [vmem:[#allocation4 + $0x60] sm:$0xff] }
  0x5c   : > { %372 = vst [vmem:[#allocation2 + $0x198] sm:$0xff] %v12898_v0  ;;  %373 = vst [vmem:[#allocation2 + $0x1a0] sm:$0xff] %v12898_v0  ;;  %12610 = vmatprep.subr.mxu1 %v550_v35  ;;  %10463 = vmatprep.subr.mxu0 %v550_v35  ;;  %v1027_v2 = vld [vmem:[#allocation4 + $0x360] sm:$0xff]  ;;  %v1026_v7 = vld [vmem:[#allocation4 + $0x358] sm:$0xff] }
  0x5d   : > { %374 = vst [vmem:[#allocation2 + $0x1a8] sm:$0x3] %v12898_v0  ;;  %375 = vst [vmem:[#allocation3] sm:$0xff] %v12898_v0  ;;  %12626 = vmatpush3.msra.mxu1 %v550_v35  ;;  %10464 = vmatpush3.msra.mxu0 %v550_v35  ;;  %v1024_v15 = vld [vmem:[#allocation4 + $0x348] sm:$0xff] }
  0x5e   : > { %376 = vst [vmem:[#allocation3 + $0x8] sm:$0xff] %v12898_v0  ;;  %377 = vst [vmem:[#allocation3 + $0x10] sm:$0x3] %v12898_v0  ;;  %12611 = vmatprep.subr.mxu1 %v549_v39  ;;  %10465 = vmatprep.subr.mxu0 %v549_v39  ;;  %v536_v29 = vld [vmem:[#allocation4 + $0x28] sm:$0xff] }
  0x5f   : > { %378 = vst [vmem:[#allocation3 + $0x18] sm:$0xff] %v12898_v0  ;;  %379 = vst [vmem:[#allocation3 + $0x20] sm:$0xff] %v12898_v0  ;;  %12627 = vmatpush3.msra.mxu1 %v549_v39  ;;  %10466 = vmatpush3.msra.mxu0 %v549_v39  ;;  %v1018_v39 = vld [vmem:[#allocation4 + $0x318] sm:$0xff] }
  0x60   : > { %380 = vst [vmem:[#allocation3 + $0x28] sm:$0x3] %v12898_v0  ;;  %381 = vst [vmem:[#allocation3 + $0x30] sm:$0xff] %v12898_v0  ;;  %12612 = vmatprep.subr.mxu1 %v548_v43  ;;  %10467 = vmatprep.subr.mxu0 %v548_v43 }
  0x61   : > { %382 = vst [vmem:[#allocation3 + $0x38] sm:$0xff] %v12898_v0  ;;  %383 = vst [vmem:[#allocation3 + $0x40] sm:$0x3] %v12898_v0  ;;  %12628 = vmatpush3.msra.mxu1 %v548_v43  ;;  %10468 = vmatpush3.msra.mxu0 %v548_v43 }
  0x62   : > { %384 = vst [vmem:[#allocation3 + $0x48] sm:$0xff] %v12898_v0  ;;  %385 = vst [vmem:[#allocation3 + $0x50] sm:$0xff] %v12898_v0  ;;  %10517 = vmatprep.subr.mxu1 %v546_v47  ;;  %10597 = vmatprep.subr.mxu0 %v1030_v53 }
  0x63   : > { %386 = vst [vmem:[#allocation3 + $0x58] sm:$0x3] %v12898_v0  ;;  %387 = vst [vmem:[#allocation3 + $0x60] sm:$0xff] %v12898_v0 }
  0x64   : > { %388 = vst [vmem:[#allocation3 + $0x68] sm:$0xff] %v12898_v0  ;;  %389 = vst [vmem:[#allocation3 + $0x70] sm:$0x3] %v12898_v0 }
  0x65   : > { %390 = vst [vmem:[#allocation3 + $0x78] sm:$0xff] %v12898_v0  ;;  %391 = vst [vmem:[#allocation3 + $0x80] sm:$0xff] %v12898_v0 }
  0x66   : > { %392 = vst [vmem:[#allocation3 + $0x88] sm:$0x3] %v12898_v0  ;;  %393 = vst [vmem:[#allocation3 + $0x90] sm:$0xff] %v12898_v0 }
  0x67   : > { %394 = vst [vmem:[#allocation3 + $0x98] sm:$0xff] %v12898_v0  ;;  %395 = vst [vmem:[#allocation3 + $0xa0] sm:$0x3] %v12898_v0 }
  0x68   : > { %396 = vst [vmem:[#allocation3 + $0xa8] sm:$0xff] %v12898_v0  ;;  %397 = vst [vmem:[#allocation3 + $0xb0] sm:$0xff] %v12898_v0 }
  0x69   : > { %398 = vst [vmem:[#allocation3 + $0xb8] sm:$0x3] %v12898_v0  ;;  %399 = vst [vmem:[#allocation3 + $0xc0] sm:$0xff] %v12898_v0 }
  0x6a   : > { %400 = vst [vmem:[#allocation3 + $0xc8] sm:$0xff] %v12898_v0  ;;  %401 = vst [vmem:[#allocation3 + $0xd0] sm:$0x3] %v12898_v0 }
  0x6b   : > { %402 = vst [vmem:[#allocation3 + $0xd8] sm:$0xff] %v12898_v0  ;;  %403 = vst [vmem:[#allocation3 + $0xe0] sm:$0xff] %v12898_v0 }
  0x6c   : > { %404 = vst [vmem:[#allocation3 + $0xe8] sm:$0x3] %v12898_v0  ;;  %405 = vst [vmem:[#allocation3 + $0xf0] sm:$0xff] %v12898_v0 }
  0x6d   : > { %406 = vst [vmem:[#allocation3 + $0xf8] sm:$0xff] %v12898_v0  ;;  %407 = vst [vmem:[#allocation3 + $0x100] sm:$0x3] %v12898_v0 }
  0x6e   : > { %408 = vst [vmem:[#allocation3 + $0x108] sm:$0xff] %v12898_v0  ;;  %409 = vst [vmem:[#allocation3 + $0x110] sm:$0xff] %v12898_v0 }
  0x6f   : > { %410 = vst [vmem:[#allocation3 + $0x118] sm:$0x3] %v12898_v0  ;;  %411 = vst [vmem:[#allocation3 + $0x120] sm:$0xff] %v12898_v0 }
  0x70   : > { %412 = vst [vmem:[#allocation3 + $0x128] sm:$0xff] %v12898_v0  ;;  %413 = vst [vmem:[#allocation3 + $0x130] sm:$0x3] %v12898_v0 }
  0x71   : > { %414 = vst [vmem:[#allocation3 + $0x138] sm:$0xff] %v12898_v0  ;;  %415 = vst [vmem:[#allocation3 + $0x140] sm:$0xff] %v12898_v0 }
  0x72   : > { %416 = vst [vmem:[#allocation3 + $0x148] sm:$0x3] %v12898_v0  ;;  %417 = vst [vmem:[#allocation3 + $0x150] sm:$0xff] %v12898_v0 }
  0x73   : > { %418 = vst [vmem:[#allocation3 + $0x158] sm:$0xff] %v12898_v0  ;;  %419 = vst [vmem:[#allocation3 + $0x160] sm:$0x3] %v12898_v0 }
  0x74   : > { %420 = vst [vmem:[#allocation3 + $0x168] sm:$0xff] %v12898_v0  ;;  %421 = vst [vmem:[#allocation3 + $0x170] sm:$0xff] %v12898_v0 }
  0x75   : > { %422 = vst [vmem:[#allocation3 + $0x178] sm:$0x3] %v12898_v0  ;;  %423 = vst [vmem:[#allocation3 + $0x180] sm:$0xff] %v12898_v0 }
  0x76   : > { %424 = vst [vmem:[#allocation3 + $0x188] sm:$0xff] %v12898_v0  ;;  %425 = vst [vmem:[#allocation3 + $0x190] sm:$0x3] %v12898_v0 }
  0x77   : > { %426 = vst [vmem:[#allocation3 + $0x198] sm:$0xff] %v12898_v0  ;;  %427 = vst [vmem:[#allocation3 + $0x1a0] sm:$0xff] %v12898_v0 }
  0x78   : > { %428 = vst [vmem:[#allocation3 + $0x1a8] sm:$0x3] %v12898_v0  ;;  %479 = vst.msk [vmem:[#allocation2 + $0xd9] sm:$0xff] %vm462_vm0, %v445_v5  ;;  %v542_v5 = vld [vmem:[#allocation4 + $0x58] sm:$0xff] }
  0x79   : > { %463 = vst.msk [vmem:[#allocation2 + $0x19] sm:$0xff] %vm462_vm0, %v429_v6  ;;  %480 = vst.msk [vmem:[#allocation2 + $0xe1] sm:$0xff] %vm462_vm0, %v446_v8  ;;  %v541_v8 = vld [vmem:[#allocation4 + $0x50] sm:$0xff] }
  0x7a   : > { %464 = vst.msk [vmem:[#allocation2 + $0x21] sm:$0xff] %vm462_vm0, %v430_v9  ;;  %481 = vst.msk [vmem:[#allocation2 + $0xf1] sm:$0xff] %vm462_vm0, %v447_v10  ;;  %v1025_v10 = vld [vmem:[#allocation4 + $0x350] sm:$0xff] }
  0x7b   : > { %465 = vst.msk [vmem:[#allocation2 + $0x31] sm:$0xff] %vm462_vm0, %v431_v12  ;;  %482 = vst.msk [vmem:[#allocation2 + $0xf9] sm:$0xff] %vm462_vm0, %v448_v13  ;;  %v540_v13 = vld [vmem:[#allocation4 + $0x48] sm:$0xff] }
  0x7c   : > { %466 = vst.msk [vmem:[#allocation2 + $0x39] sm:$0xff] %vm462_vm0, %v432_v14  ;;  %483 = vst.msk [vmem:[#allocation2 + $0x109] sm:$0xff] %vm462_vm0, %v449_v16  ;;  %v539_v16 = vld [vmem:[#allocation4 + $0x40] sm:$0xff] }
  0x7d   : > { %467 = vst.msk [vmem:[#allocation2 + $0x49] sm:$0xff] %vm462_vm0, %v433_v17  ;;  %484 = vst.msk [vmem:[#allocation2 + $0x111] sm:$0xff] %vm462_vm0, %v450_v18  ;;  %v1023_v18 = vld [vmem:[#allocation4 + $0x340] sm:$0xff] }
  0x7e   : > { %468 = vst.msk [vmem:[#allocation2 + $0x51] sm:$0xff] %vm462_vm0, %v434_v20  ;;  %485 = vst.msk [vmem:[#allocation2 + $0x121] sm:$0xff] %vm462_vm0, %v451_v21  ;;  %v538_v21 = vld [vmem:[#allocation4 + $0x38] sm:$0xff] }
  0x7f   : > { %469 = vst.msk [vmem:[#allocation2 + $0x61] sm:$0xff] %vm462_vm0, %v435_v23  ;;  %486 = vst.msk [vmem:[#allocation2 + $0x129] sm:$0xff] %vm462_vm0, %v452_v24  ;;  %v13226_v44 = vld [vmem:[#allocation2 + $0xd8] sm:$0xff]  ;;  %v537_v24 = vld [vmem:[#allocation4 + $0x30] sm:$0xff] }
  0x80   : > { %470 = vst.msk [vmem:[#allocation2 + $0x69] sm:$0xff] %vm462_vm0, %v436_v26  ;;  %487 = vst.msk [vmem:[#allocation2 + $0x139] sm:$0xff] %vm462_vm0, %v453_v28  ;;  %v13229_v46 = vld [vmem:[#allocation2 + $0x18] sm:$0xff]  ;;  %v13233_v49 = vld [vmem:[#allocation2 + $0xe0] sm:$0xff]  ;;  %10493 = vmatprep.mubr.f32.mxu1 %v13226_v44 }
  0x81   : > { %471 = vst.msk [vmem:[#allocation2 + $0x79] sm:$0xff] %vm462_vm0, %v437_v30  ;;  %488 = vst.msk [vmem:[#allocation2 + $0x141] sm:$0xff] %vm462_vm0, %v454_v31  ;;  %v13239_v52 = vld [vmem:[#allocation2 + $0x20] sm:$0xff]  ;;  %10469 = vmatprep.mubr.f32.mxu0 %v13229_v46  ;;  %10494 = vmatmul.mubr.f32.vlgmr.msra.gmra.mxu1 %v13233_v49  ;;  %v13246_v56 = vld [vmem:[#allocation2 + $0xf0] sm:$0xff] }
  0x82   : > { %472 = vst.msk [vmem:[#allocation2 + $0x81] sm:$0xff] %vm462_vm0, %v438_v32  ;;  %489 = vst.msk [vmem:[#allocation2 + $0x151] sm:$0xff] %vm462_vm0, %v455_v34  ;;  %10470 = vmatmul.mubr.f32.vlgmr.msra.gmra.mxu0 %v13239_v52  ;;  %10518 = vmatpush3.msra.mxu1 %v546_v47  ;;  %v13250_v58 = vld [vmem:[#allocation2 + $0x30] sm:$0xff]  ;;  %v13252_v59 = vld [vmem:[#allocation2 + $0xf8] sm:$0xff] }
  0x83   : > { %473 = vst.msk [vmem:[#allocation2 + $0x91] sm:$0xff] %vm462_vm0, %v439_v36  ;;  %490 = vst.msk [vmem:[#allocation2 + $0x159] sm:$0xff] %vm462_vm0, %v456_v37  ;;  %10519 = vmatprep.subr.mxu1 %v545_v54  ;;  %10598 = vmatpush3.msra.mxu0 %v1030_v53  ;;  %v13255_v61 = vld [vmem:[#allocation2 + $0x38] sm:$0xff]  ;;  %v13259_v1 = vld [vmem:[#allocation2 + $0x108] sm:$0xff] }
  0x84   : > { %474 = vst.msk [vmem:[#allocation2 + $0x99] sm:$0xff] %vm462_vm0, %v440_v38  ;;  %491 = vst.msk [vmem:[#allocation2 + $0x169] sm:$0xff] %vm462_vm0, %v457_v40  ;;  %10496 = vmatprep.mubr.f32.mxu1 %v13246_v56  ;;  %10520 = vmatpush3.msra.mxu1 %v545_v54  ;;  %v13262_v3 = vld [vmem:[#allocation2 + $0x48] sm:$0xff]  ;;  %v13264_v4 = vld [vmem:[#allocation2 + $0x110] sm:$0xff] }
  0x85   : > { %475 = vst.msk [vmem:[#allocation2 + $0xa9] sm:$0xff] %vm462_vm0, %v441_v41  ;;  %492 = vst.msk [vmem:[#allocation2 + $0x171] sm:$0xff] %vm462_vm0, %v458_v42  ;;  %10599 = vmatprep.subr.mxu0 %v1029_v57  ;;  %10472 = vmatprep.mubr.f32.mxu0 %v13250_v58  ;;  %v13267_v6 = vld [vmem:[#allocation2 + $0x50] sm:$0xff]  ;;  %v13271_v9 = vld [vmem:[#allocation2 + $0x120] sm:$0xff] }
  0x86   : > { %476 = vst.msk [vmem:[#allocation2 + $0xb1] sm:$0xff] %vm462_vm0, %v442_v45  ;;  %493 = vst.msk [vmem:[#allocation2 + $0x181] sm:$0xff] %vm462_vm0, %v459_v48  ;;  %10497 = vmatmul.mubr.f32.gmra.mxu1 %v13252_v59  ;;  %10521 = vmatprep.subr.mxu1 %v544_v60  ;;  %v13274_v11 = vld [vmem:[#allocation2 + $0x60] sm:$0xff]  ;;  %v13276_v12 = vld [vmem:[#allocation2 + $0x128] sm:$0xff] }
  0x87   : > { %477 = vst.msk [vmem:[#allocation2 + $0xc1] sm:$0xff] %vm462_vm0, %v443_v50  ;;  %494 = vst.msk [vmem:[#allocation2 + $0x189] sm:$0xff] %vm462_vm0, %v460_v51  ;;  %10600 = vmatpush3.msra.mxu0 %v1029_v57  ;;  %10522 = vmatpush3.msra.mxu1 %v544_v60  ;;  %v13279_v14 = vld [vmem:[#allocation2 + $0x68] sm:$0xff]  ;;  %v13283_v17 = vld [vmem:[#allocation2 + $0x138] sm:$0xff] }
  0x88   : > { %478 = vst.msk [vmem:[#allocation2 + $0xc9] sm:$0xff] %vm462_vm0, %v444_v55  ;;  %10473 = vmatmul.mubr.f32.gmra.mxu0 %v13255_v61  ;;  %10601 = vmatprep.subr.mxu0 %v1028_v62  ;;  %v13286_v19 = vld [vmem:[#allocation2 + $0x78] sm:$0xff]  ;;  %v13288_v20 = vld [vmem:[#allocation2 + $0x140] sm:$0xff]  ;;  %v1021_v26 = vld [vmem:[#allocation4 + $0x330] sm:$0xff] }
  0x89   : > { %10523 = vmatprep.subr.mxu1 %v543_v63  ;;  %10602 = vmatpush3.msra.mxu0 %v1028_v62  ;;  %v13291_v22 = vld [vmem:[#allocation2 + $0x80] sm:$0xff]  ;;  %v1022_v23 = vld [vmem:[#allocation4 + $0x338] sm:$0xff]  ;;  %v13295_v25 = vld [vmem:[#allocation2 + $0x150] sm:$0xff] }
  0x8a   : > { %10499 = vmatprep.mubr.f32.mxu1 %v13259_v1  ;;  %10524 = vmatpush3.msra.mxu1 %v543_v63  ;;  %v13298_v27 = vld [vmem:[#allocation2 + $0x90] sm:$0xff]  ;;  %v13300_v28 = vld [vmem:[#allocation2 + $0x158] sm:$0xff]  ;;  %v1020_v31 = vld [vmem:[#allocation4 + $0x328] sm:$0xff] }
  0x8b   : > { %10603 = vmatprep.subr.mxu0 %v1027_v2  ;;  %10475 = vmatprep.mubr.f32.mxu0 %v13262_v3  ;;  %v13303_v30 = vld [vmem:[#allocation2 + $0x98] sm:$0xff]  ;;  %v535_v32 = vld [vmem:[#allocation4 + $0x20] sm:$0xff]  ;;  %v13307_v33 = vld [vmem:[#allocation2 + $0x168] sm:$0xff] }
  0x8c   : > { %10500 = vmatmul.mubr.f32.gmra.mxu1 %v13264_v4  ;;  %10525 = vmatprep.subr.mxu1 %v542_v5  ;;  %v1019_v34 = vld [vmem:[#allocation4 + $0x320] sm:$0xff]  ;;  %v13310_v35 = vld [vmem:[#allocation2 + $0xa8] sm:$0xff]  ;;  %v13312_v36 = vld [vmem:[#allocation2 + $0x170] sm:$0xff] }
  0x8d   : > { %10604 = vmatpush3.msra.mxu0 %v1027_v2  ;;  %10526 = vmatpush3.msra.mxu1 %v542_v5  ;;  %v534_v37 = vld [vmem:[#allocation4 + $0x18] sm:$0xff]  ;;  %v13315_v38 = vld [vmem:[#allocation2 + $0xb0] sm:$0xff]  ;;  %v13319_v41 = vld [vmem:[#allocation2 + $0x180] sm:$0xff] }
  0x8e   : > { %10476 = vmatmul.mubr.f32.gmra.mxu0 %v13267_v6  ;;  %10605 = vmatprep.subr.mxu0 %v1026_v7  ;;  %v533_v40 = vld [vmem:[#allocation4 + $0x10] sm:$0xff]  ;;  %v13322_v43 = vld [vmem:[#allocation2 + $0xc0] sm:$0xff]  ;;  %v13324_v45 = vld [vmem:[#allocation2 + $0x188] sm:$0xff] }
  0x8f   : > { %10527 = vmatprep.subr.mxu1 %v541_v8  ;;  %10606 = vmatpush3.msra.mxu0 %v1026_v7  ;;  %v1017_v42 = vld [vmem:[#allocation4 + $0x310] sm:$0xff]  ;;  %v532_v47 = vld [vmem:[#allocation4 + $0x8] sm:$0xff]  ;;  %v531_v51 = vld [vmem:[#allocation4] sm:$0xff] }
  0x90   : > { %10502 = vmatprep.mubr.f32.mxu1 %v13271_v9  ;;  %10528 = vmatpush3.msra.mxu1 %v541_v8  ;;  %v13327_v48 = vld [vmem:[#allocation2 + $0xc8] sm:$0xff]  ;;  %v1015_v53 = vld [vmem:[#allocation4 + $0x300] sm:$0xff]  ;;  %v1340_v54 = vld [vmem:[#allocation4 + $0xf8] sm:$0xff] }
  0x91   : > { %10607 = vmatprep.subr.mxu0 %v1025_v10  ;;  %10478 = vmatprep.mubr.f32.mxu0 %v13274_v11  ;;  %v1016_v50 = vld [vmem:[#allocation4 + $0x308] sm:$0xff]  ;;  %v1614_v55 = vld [vmem:[#allocation4 + $0x278] sm:$0xff]  ;;  %v1339_v57 = vld [vmem:[#allocation4 + $0xf0] sm:$0xff] }
  0x92   : > { %10503 = vmatmul.mubr.f32.gmra.mxu1 %v13276_v12  ;;  %10529 = vmatprep.subr.mxu1 %v540_v13  ;;  %v1613_v60 = vld [vmem:[#allocation4 + $0x270] sm:$0xff]  ;;  %v1612_v62 = vld [vmem:[#allocation4 + $0x268] sm:$0xff]  ;;  %v1607_v7 = vld [vmem:[#allocation4 + $0x240] sm:$0xff] }
  0x93   : > { %10608 = vmatpush3.msra.mxu0 %v1025_v10  ;;  %10530 = vmatpush3.msra.mxu1 %v540_v13  ;;  %v1335_v63 = vld [vmem:[#allocation4 + $0xd0] sm:$0xff]  ;;  %v1608_v5 = vld [vmem:[#allocation4 + $0x248] sm:$0xff]  ;;  %v1332_v8 = vld [vmem:[#allocation4 + $0xb8] sm:$0xff] }
  0x94   : > { %10479 = vmatmul.mubr.f32.gmra.mxu0 %v13279_v14  ;;  %10609 = vmatprep.subr.mxu0 %v1024_v15  ;;  %v1609_v2 = vld [vmem:[#allocation4 + $0x250] sm:$0xff]  ;;  %v1606_v10 = vld [vmem:[#allocation4 + $0x238] sm:$0xff] }
  0x95   : > { %10531 = vmatprep.subr.mxu1 %v539_v16  ;;  %10610 = vmatpush3.msra.mxu0 %v1024_v15  ;;  %v1605_v13 = vld [vmem:[#allocation4 + $0x230] sm:$0xff]  ;;  %v1604_v15 = vld [vmem:[#allocation4 + $0x228] sm:$0xff] }
  0x96   : > { %10505 = vmatprep.mubr.f32.mxu1 %v13283_v17  ;;  %10532 = vmatpush3.msra.mxu1 %v539_v16  ;;  %v1325_v16 = vld [vmem:[#allocation4 + $0x80] sm:$0xff] }
  0x97   : > { %10611 = vmatprep.subr.mxu0 %v1023_v18  ;;  %10481 = vmatprep.mubr.f32.mxu0 %v13286_v19 }
  0x98   : > { %10506 = vmatmul.mubr.f32.gmra.mxu1 %v13288_v20  ;;  %10533 = vmatprep.subr.mxu1 %v538_v21 }
  0x99   : > { %10612 = vmatpush3.msra.mxu0 %v1023_v18  ;;  %10534 = vmatpush3.msra.mxu1 %v538_v21  ;;  %v1288_v18 = vld [vmem:[#allocation2 + $0x1] sm:$0xff]  ;;  %v1290_v21 = vld [vmem:[#allocation2 + $0x19] sm:$0xff] }
  0x9a   : > { %10482 = vmatmul.mubr.f32.gmra.mxu0 %v13291_v22  ;;  %10613 = vmatprep.subr.mxu0 %v1022_v23 }
  0x9b   : > { %10535 = vmatprep.subr.mxu1 %v537_v24  ;;  %10614 = vmatpush3.msra.mxu0 %v1022_v23  ;;  %v1291_v23 = vld [vmem:[#allocation2 + $0x21] sm:$0xff] }
  0x9c   : > { %10508 = vmatprep.mubr.f32.mxu1 %v13295_v25  ;;  %10536 = vmatpush3.msra.mxu1 %v537_v24  ;;  %v2198_v24 = vld [vmem:[#allocation4 + $0x178] sm:$0xff] }
  0x9d   : > { %10615 = vmatprep.subr.mxu0 %v1021_v26  ;;  %10484 = vmatprep.mubr.f32.mxu0 %v13298_v27 }
  0x9e   : > { %10509 = vmatmul.mubr.f32.gmra.mxu1 %v13300_v28  ;;  %10537 = vmatprep.subr.mxu1 %v536_v29 }
  0x9f   : > { %10616 = vmatpush3.msra.mxu0 %v1021_v26  ;;  %10538 = vmatpush3.msra.mxu1 %v536_v29  ;;  %v1887_v26 = vld [vmem:[#allocation4 + $0x3f0] sm:$0xff] }
  0xa0   : > { %10485 = vmatmul.mubr.f32.gmra.mxu0 %v13303_v30  ;;  %10617 = vmatprep.subr.mxu0 %v1020_v31  ;;  %v13400_v29 = vld [vmem:[#allocation2 + $0x49] sm:$0xff] }
  0xa1   : > { %10539 = vmatprep.subr.mxu1 %v535_v32  ;;  %10618 = vmatpush3.msra.mxu0 %v1020_v31  ;;  %v13403_v31 = vld [vmem:[#allocation2 + $0x51] sm:$0xff] }
  0xa2   : > { %10511 = vmatprep.mubr.f32.mxu1 %v13307_v33  ;;  %10540 = vmatpush3.msra.mxu1 %v535_v32  ;;  %v2196_v32 = vld [vmem:[#allocation4 + $0x168] sm:$0xff] }
  0xa3   : > { %10619 = vmatprep.subr.mxu0 %v1019_v34  ;;  %10487 = vmatprep.mubr.f32.mxu0 %v13310_v35 }
  0xa4   : > { %10512 = vmatmul.mubr.f32.gmra.mxu1 %v13312_v36  ;;  %10541 = vmatprep.subr.mxu1 %v534_v37 }
  0xa5   : > { %10620 = vmatpush3.msra.mxu0 %v1019_v34  ;;  %10542 = vmatpush3.msra.mxu1 %v534_v37  ;;  %v1885_v34 = vld [vmem:[#allocation4 + $0x3e0] sm:$0xff] }
  0xa6   : > { %10488 = vmatmul.mubr.f32.gmra.mxu0 %v13315_v38  ;;  %10621 = vmatprep.subr.mxu0 %v1018_v39  ;;  %v13416_v37 = vld [vmem:[#allocation2 + $0x79] sm:$0xff] }
  0xa7   : > { %10543 = vmatprep.subr.mxu1 %v533_v40  ;;  %10622 = vmatpush3.msra.mxu0 %v1018_v39  ;;  %v13419_v39 = vld [vmem:[#allocation2 + $0x81] sm:$0xff] }
  0xa8   : > { %10514 = vmatprep.mubr.f32.mxu1 %v13319_v41  ;;  %10544 = vmatpush3.msra.mxu1 %v533_v40  ;;  %v2194_v40 = vld [vmem:[#allocation4 + $0x158] sm:$0xff] }
  0xa9   : > { %10623 = vmatprep.subr.mxu0 %v1017_v42  ;;  %10490 = vmatprep.mubr.f32.mxu0 %v13322_v43 }
  0xaa   : > { %10515 = vmatmul.mubr.f32.gmra.mxu1 %v13324_v45  ;;  %10545 = vmatprep.subr.mxu1 %v532_v47 }
  0xab   : > { %10624 = vmatpush3.msra.mxu0 %v1017_v42  ;;  %10546 = vmatpush3.msra.mxu1 %v532_v47  ;;  %v1883_v42 = vld [vmem:[#allocation4 + $0x3d0] sm:$0xff] }
  0xac   : > { %10491 = vmatmul.mubr.f32.gmra.mxu0 %v13327_v48  ;;  %10625 = vmatprep.subr.mxu0 %v1016_v50  ;;  %v13432_v47 = vld [vmem:[#allocation2 + $0xa9] sm:$0xff] }
  0xad   : > { %10547 = vmatprep.subr.mxu1 %v531_v51  ;;  %10626 = vmatpush3.msra.mxu0 %v1016_v50  ;;  %v13435_v50 = vld [vmem:[#allocation2 + $0xb1] sm:$0xff] }
  0xae   : > { %10548 = vmatpush3.msra.mxu1 %v531_v51  ;;  %10549 = vmatprep.mubr.f32.mxu1 %v12898_v0  ;;  %v2192_v51 = vld [vmem:[#allocation4 + $0x148] sm:$0xff] }
  0xaf   : > { %10627 = vmatprep.subr.mxu0 %v1015_v53  ;;  %10550 = vmatmul.mubr.f32.vlgmr.msra.gmra.mxu1 %v12898_v0  ;;  %v1338_v0 = vld [vmem:[#allocation4 + $0xe8] sm:$0xff] }
  0xb0   : > { %10628 = vmatpush3.msra.mxu0 %v1015_v53  ;;  %10629 = vmatprep.mubr.f32.mxu0 %v13250_v58  ;;  %v13440_v53 = vld [vmem:[#allocation2 + $0xc1] sm:$0xff] }
  0xb1   : > { %10677 = vmatprep.subr.mxu1 %v1340_v54  ;;  %10630 = vmatmul.mubr.f32.vlgmr.msra.gmra.mxu0 %v13255_v61 }
  0xb2   : > { %10678 = vmatpush3.msra.mxu1 %v1340_v54  ;;  %10757 = vmatprep.subr.mxu0 %v1614_v55  ;;  %v1881_v54 = vld [vmem:[#allocation4 + $0x3c0] sm:$0xff] }
  0xb3   : > { %10552 = vmatprep.mubr.f32.mxu1 %v13229_v46  ;;  %10758 = vmatpush3.msra.mxu0 %v1614_v55  ;;  %v1337_v46 = vld [vmem:[#allocation4 + $0xe0] sm:$0xff]  ;;  %v13443_v55 = vld [vmem:[#allocation2 + $0xc9] sm:$0xff] }
  0xb4   : > { %10553 = vmatmul.mubr.f32.gmra.mxu1 %v13239_v52  ;;  %10632 = vmatprep.mubr.f32.mxu0 %v13262_v3  ;;  %v1611_v52 = vld [vmem:[#allocation4 + $0x260] sm:$0xff] }
  0xb5   : > { %10679 = vmatprep.subr.mxu1 %v1339_v57  ;;  %10633 = vmatmul.mubr.f32.gmra.mxu0 %v13267_v6 }
  0xb6   : > { %10680 = vmatpush3.msra.mxu1 %v1339_v57  ;;  %10759 = vmatprep.subr.mxu0 %v1613_v60  ;;  %v2191_v57 = vld [vmem:[#allocation4 + $0x140] sm:$0xff] }
  0xb7   : > { %10555 = vmatprep.mubr.f32.mxu1 %v13250_v58  ;;  %10760 = vmatpush3.msra.mxu0 %v1613_v60  ;;  %v1336_v58 = vld [vmem:[#allocation4 + $0xd8] sm:$0xff] }
  0xb8   : > { %10556 = vmatmul.mubr.f32.gmra.mxu1 %v13255_v61  ;;  %10635 = vmatprep.mubr.f32.mxu0 %v13274_v11  ;;  %v1610_v61 = vld [vmem:[#allocation4 + $0x258] sm:$0xff] }
  0xb9   : > { %10681 = vmatprep.subr.mxu1 %v1338_v0  ;;  %10636 = vmatmul.mubr.f32.gmra.mxu0 %v13279_v14  ;;  %v13448_v60 = vld [vmem:[#allocation2 + $0xd9] sm:$0xff] }
  0xba   : > { %10682 = vmatpush3.msra.mxu1 %v1338_v0  ;;  %10761 = vmatprep.subr.mxu0 %v1612_v62  ;;  %v1880_v0 = vld [vmem:[#allocation4 + $0x3b8] sm:$0xff] }
  0xbb   : > { %10558 = vmatprep.mubr.f32.mxu1 %v13262_v3  ;;  %10762 = vmatpush3.msra.mxu0 %v1612_v62  ;;  %v1334_v3 = vld [vmem:[#allocation4 + $0xc8] sm:$0xff] }
  0xbc   : > { %10559 = vmatmul.mubr.f32.gmra.mxu1 %v13267_v6  ;;  %10638 = vmatprep.mubr.f32.mxu0 %v13286_v19  ;;  %v1333_v6 = vld [vmem:[#allocation4 + $0xc0] sm:$0xff] }
  0xbd   : > { %10683 = vmatprep.subr.mxu1 %v1337_v46  ;;  %10639 = vmatmul.mubr.f32.gmra.mxu0 %v13291_v22  ;;  %v13451_v62 = vld [vmem:[#allocation2 + $0xe1] sm:$0xff] }
  0xbe   : > { %10684 = vmatpush3.msra.mxu1 %v1337_v46  ;;  %10763 = vmatprep.subr.mxu0 %v1611_v52  ;;  %v2190_v46 = vld [vmem:[#allocation4 + $0x138] sm:$0xff] }
  0xbf   : > { %10561 = vmatprep.mubr.f32.mxu1 %v13274_v11  ;;  %10764 = vmatpush3.msra.mxu0 %v1611_v52  ;;  %v1331_v11 = vld [vmem:[#allocation4 + $0xb0] sm:$0xff] }
  0xc0   : > { %10562 = vmatmul.mubr.f32.gmra.mxu1 %v13279_v14  ;;  %10641 = vmatprep.mubr.f32.mxu0 %v13298_v27  ;;  %v1330_v14 = vld [vmem:[#allocation4 + $0xa8] sm:$0xff]  ;;  %v13456_v52 = vld [vmem:[#allocation2 + $0xf1] sm:$0xff] }
  0xc1   : > { %10685 = vmatprep.subr.mxu1 %v1336_v58  ;;  %10642 = vmatmul.mubr.f32.gmra.mxu0 %v13303_v30 }
  0xc2   : > { %10686 = vmatpush3.msra.mxu1 %v1336_v58  ;;  %10765 = vmatprep.subr.mxu0 %v1610_v61  ;;  %v1879_v58 = vld [vmem:[#allocation4 + $0x3b0] sm:$0xff] }
  0xc3   : > { %10564 = vmatprep.mubr.f32.mxu1 %v13286_v19  ;;  %10766 = vmatpush3.msra.mxu0 %v1610_v61  ;;  %v12720_v19 = vld [vmem:[#allocation2] sm:$0xff] }
  0xc4   : > { %10565 = vmatmul.mubr.f32.gmra.mxu1 %v13291_v22  ;;  %10644 = vmatprep.mubr.f32.mxu0 %v13310_v35  ;;  %v1888_v22 = vld [vmem:[#allocation4 + $0x3f8] sm:$0xff] }
  0xc5   : > { %10687 = vmatprep.subr.mxu1 %v1335_v63  ;;  %10645 = vmatmul.mubr.f32.gmra.mxu0 %v13315_v38  ;;  %v13459_v61 = vld [vmem:[#allocation2 + $0xf9] sm:$0xff] }
  0xc6   : > { %10688 = vmatpush3.msra.mxu1 %v1335_v63  ;;  %10767 = vmatprep.subr.mxu0 %v1609_v2  ;;  %v2189_v63 = vld [vmem:[#allocation4 + $0x130] sm:$0xff] }
  0xc7   : > { %10567 = vmatprep.mubr.f32.mxu1 %v13298_v27  ;;  %10768 = vmatpush3.msra.mxu0 %v1609_v2  ;;  %v13396_v27 = vld [vmem:[#allocation2 + $0x39] sm:$0xff]  ;;  %v13464_v2 = vld [vmem:[#allocation2 + $0x109] sm:$0xff] }
  0xc8   : > { %10568 = vmatmul.mubr.f32.gmra.mxu1 %v13303_v30  ;;  %10647 = vmatprep.mubr.f32.mxu0 %v13322_v43  ;;  %v1886_v30 = vld [vmem:[#allocation4 + $0x3e8] sm:$0xff] }
  0xc9   : > { %10689 = vmatprep.subr.mxu1 %v1334_v3  ;;  %10648 = vmatmul.mubr.f32.gmra.mxu0 %v13327_v48 }
  0xca   : > { %10690 = vmatpush3.msra.mxu1 %v1334_v3  ;;  %10769 = vmatprep.subr.mxu0 %v1608_v5  ;;  %v1878_v3 = vld [vmem:[#allocation4 + $0x3a8] sm:$0xff] }
  0xcb   : > { %10570 = vmatprep.mubr.f32.mxu1 %v13310_v35  ;;  %10770 = vmatpush3.msra.mxu0 %v1608_v5  ;;  %v13411_v35 = vld [vmem:[#allocation2 + $0x69] sm:$0xff]  ;;  %v13467_v5 = vld [vmem:[#allocation2 + $0x111] sm:$0xff] }
  0xcc   : > { %10571 = vmatmul.mubr.f32.gmra.mxu1 %v13315_v38  ;;  %10650 = vmatprep.mubr.f32.mxu0 %v13226_v44  ;;  %v1884_v38 = vld [vmem:[#allocation4 + $0x3d8] sm:$0xff] }
  0xcd   : > { %10691 = vmatprep.subr.mxu1 %v1333_v6  ;;  %10651 = vmatmul.mubr.f32.gmra.mxu0 %v13233_v49 }
  0xce   : > { %10692 = vmatpush3.msra.mxu1 %v1333_v6  ;;  %10771 = vmatprep.subr.mxu0 %v1607_v7  ;;  %v2188_v6 = vld [vmem:[#allocation4 + $0x128] sm:$0xff] }
  0xcf   : > { %10573 = vmatprep.mubr.f32.mxu1 %v13322_v43  ;;  %10772 = vmatpush3.msra.mxu0 %v1607_v7  ;;  %v13427_v43 = vld [vmem:[#allocation2 + $0x99] sm:$0xff]  ;;  %v13472_v7 = vld [vmem:[#allocation2 + $0x121] sm:$0xff] }
  0xd0   : > { %10574 = vmatmul.mubr.f32.gmra.mxu1 %v13327_v48  ;;  %10653 = vmatprep.mubr.f32.mxu0 %v13246_v56  ;;  %v1882_v48 = vld [vmem:[#allocation4 + $0x3c8] sm:$0xff] }
  0xd1   : > { %10693 = vmatprep.subr.mxu1 %v1332_v8  ;;  %10654 = vmatmul.mubr.f32.gmra.mxu0 %v13252_v59 }
  0xd2   : > { %10694 = vmatpush3.msra.mxu1 %v1332_v8  ;;  %10773 = vmatprep.subr.mxu0 %v1606_v10  ;;  %v1877_v8 = vld [vmem:[#allocation4 + $0x3a0] sm:$0xff] }
  0xd3   : > { %10576 = vmatprep.mubr.f32.mxu1 %v13226_v44  ;;  %10774 = vmatpush3.msra.mxu0 %v1606_v10  ;;  %v1329_v44 = vld [vmem:[#allocation4 + $0xa0] sm:$0xff]  ;;  %v13475_v10 = vld [vmem:[#allocation2 + $0x129] sm:$0xff] }
  0xd4   : > { %10577 = vmatmul.mubr.f32.gmra.mxu1 %v13233_v49  ;;  %10656 = vmatprep.mubr.f32.mxu0 %v13259_v1  ;;  %v1603_v49 = vld [vmem:[#allocation4 + $0x220] sm:$0xff] }
  0xd5   : > { %10695 = vmatprep.subr.mxu1 %v1331_v11  ;;  %10657 = vmatmul.mubr.f32.gmra.mxu0 %v13264_v4 }
  0xd6   : > { %10696 = vmatpush3.msra.mxu1 %v1331_v11  ;;  %10775 = vmatprep.subr.mxu0 %v1605_v13  ;;  %v2187_v11 = vld [vmem:[#allocation4 + $0x120] sm:$0xff] }
  0xd7   : > { %10579 = vmatprep.mubr.f32.mxu1 %v13246_v56  ;;  %10776 = vmatpush3.msra.mxu0 %v1605_v13  ;;  %v1328_v56 = vld [vmem:[#allocation4 + $0x98] sm:$0xff] }
  0xd8   : > { %10580 = vmatmul.mubr.f32.gmra.mxu1 %v13252_v59  ;;  %10659 = vmatprep.mubr.f32.mxu0 %v13271_v9  ;;  %v1602_v59 = vld [vmem:[#allocation4 + $0x218] sm:$0xff] }
  0xd9   : > { %10697 = vmatprep.subr.mxu1 %v1330_v14  ;;  %10660 = vmatmul.mubr.f32.gmra.mxu0 %v13276_v12  ;;  %v13480_v13 = vld [vmem:[#allocation2 + $0x139] sm:$0xff] }
  0xda   : > { %10698 = vmatpush3.msra.mxu1 %v1330_v14  ;;  %10777 = vmatprep.subr.mxu0 %v1604_v15  ;;  %v1876_v14 = vld [vmem:[#allocation4 + $0x398] sm:$0xff] }
  0xdb   : > { %10582 = vmatprep.mubr.f32.mxu1 %v13259_v1  ;;  %10778 = vmatpush3.msra.mxu0 %v1604_v15  ;;  %v1327_v1 = vld [vmem:[#allocation4 + $0x90] sm:$0xff]  ;;  %v13483_v15 = vld [vmem:[#allocation2 + $0x141] sm:$0xff] }
  0xdc   : > { %10583 = vmatmul.mubr.f32.gmra.mxu1 %v13264_v4  ;;  %10662 = vmatprep.mubr.f32.mxu0 %v13283_v17  ;;  %v1601_v4 = vld [vmem:[#allocation4 + $0x210] sm:$0xff] }
  0xdd   : > { %10699 = vmatprep.subr.mxu1 %v1329_v44  ;;  %10663 = vmatmul.mubr.f32.gmra.mxu0 %v13288_v20 }
  0xde   : > { %10700 = vmatpush3.msra.mxu1 %v1329_v44  ;;  %10779 = vmatprep.subr.mxu0 %v1603_v49  ;;  %v2186_v44 = vld [vmem:[#allocation4 + $0x118] sm:$0xff] }
  0xdf   : > { %10585 = vmatprep.mubr.f32.mxu1 %v13271_v9  ;;  %10780 = vmatpush3.msra.mxu0 %v1603_v49  ;;  %v1326_v9 = vld [vmem:[#allocation4 + $0x88] sm:$0xff]  ;;  %v13488_v49 = vld [vmem:[#allocation2 + $0x151] sm:$0xff] }
  0xe0   : > { %10586 = vmatmul.mubr.f32.gmra.mxu1 %v13276_v12  ;;  %10665 = vmatprep.mubr.f32.mxu0 %v13295_v25  ;;  %v1600_v12 = vld [vmem:[#allocation4 + $0x208] sm:$0xff] }
  0xe1   : > { %10701 = vmatprep.subr.mxu1 %v1328_v56  ;;  %10666 = vmatmul.mubr.f32.gmra.mxu0 %v13300_v28 }
  0xe2   : > { %10702 = vmatpush3.msra.mxu1 %v1328_v56  ;;  %10781 = vmatprep.subr.mxu0 %v1602_v59  ;;  %v1875_v56 = vld [vmem:[#allocation4 + $0x390] sm:$0xff] }
  0xe3   : > { %10588 = vmatprep.mubr.f32.mxu1 %v13283_v17  ;;  %10782 = vmatpush3.msra.mxu0 %v1602_v59  ;;  %v1599_v17 = vld [vmem:[#allocation4 + $0x200] sm:$0xff] }
  0xe4   : > { %10589 = vmatmul.mubr.f32.gmra.mxu1 %v13288_v20  ;;  %10668 = vmatprep.mubr.f32.mxu0 %v13307_v33  ;;  %v1289_v20 = vld [vmem:[#allocation2 + $0x9] sm:$0xff]  ;;  %v13491_v59 = vld [vmem:[#allocation2 + $0x159] sm:$0xff] }
  0xe5   : > { %10703 = vmatprep.subr.mxu1 %v1327_v1  ;;  %10669 = vmatmul.mubr.f32.gmra.mxu0 %v13312_v36 }
  0xe6   : > { %10704 = vmatpush3.msra.mxu1 %v1327_v1  ;;  %10783 = vmatprep.subr.mxu0 %v1601_v4  ;;  %v2185_v1 = vld [vmem:[#allocation4 + $0x110] sm:$0xff] }
  0xe7   : > { %10591 = vmatprep.mubr.f32.mxu1 %v13295_v25  ;;  %10784 = vmatpush3.msra.mxu0 %v1601_v4  ;;  %v13394_v25 = vld [vmem:[#allocation2 + $0x31] sm:$0xff]  ;;  %v13496_v4 = vld [vmem:[#allocation2 + $0x169] sm:$0xff] }
  0xe8   : > { %10592 = vmatmul.mubr.f32.gmra.mxu1 %v13300_v28  ;;  %10671 = vmatprep.mubr.f32.mxu0 %v13319_v41  ;;  %v2197_v28 = vld [vmem:[#allocation4 + $0x170] sm:$0xff] }
  0xe9   : > { %10705 = vmatprep.subr.mxu1 %v1326_v9  ;;  %10672 = vmatmul.mubr.f32.gmra.mxu0 %v13324_v45  ;;  %v13424_v41 = vld [vmem:[#allocation2 + $0x91] sm:$0xff] }
  0xea   : > { %10706 = vmatpush3.msra.mxu1 %v1326_v9  ;;  %10785 = vmatprep.subr.mxu0 %v1600_v12  ;;  %v2193_v45 = vld [vmem:[#allocation4 + $0x150] sm:$0xff]  ;;  %v1874_v9 = vld [vmem:[#allocation4 + $0x388] sm:$0xff] }
  0xeb   : > { %10594 = vmatprep.mubr.f32.mxu1 %v13307_v33  ;;  %10786 = vmatpush3.msra.mxu0 %v1600_v12  ;;  %v13408_v33 = vld [vmem:[#allocation2 + $0x61] sm:$0xff]  ;;  %v13499_v12 = vld [vmem:[#allocation2 + $0x171] sm:$0xff] }
  0xec   : > { %10595 = vmatmul.mubr.f32.gmra.mxu1 %v13312_v36  ;;  %10674 = vmatprep.mubr.f32.mxu0 %v12720_v19  ;;  %v2195_v36 = vld [vmem:[#allocation4 + $0x160] sm:$0xff] }
  0xed   : > { %10707 = vmatprep.subr.mxu1 %v1325_v16  ;;  %10675 = vmatmul.mubr.f32.gmra.mxu0 %v12720_v19  ;;  %v13507_v19 = vld [vmem:[#allocation2 + $0x189] sm:$0xff] }
  0xee   : > { %10708 = vmatpush3.msra.mxu1 %v1325_v16  ;;  %10787 = vmatprep.subr.mxu0 %v1599_v17  ;;  %v2184_v16 = vld [vmem:[#allocation4 + $0x108] sm:$0xff] }
  0xef   : > { %10709 = vmatprep.mubr.f32.mxu1 %v1288_v18  ;;  %10788 = vmatpush3.msra.mxu0 %v1599_v17  ;;  %v13504_v17 = vld [vmem:[#allocation2 + $0x181] sm:$0xff] }
  0xf0   : > { %10710 = vmatmul.mubr.f32.vlgmr.msra.gmra.mxu1 %v1289_v20  ;;  %10789 = vmatprep.mubr.f32.mxu0 %v1290_v21  ;;  %v1873_v18 = vld [vmem:[#allocation4 + $0x380] sm:$0xff] }
  0xf1   : > { %10837 = vmatprep.subr.mxu1 %v1888_v22  ;;  %10790 = vmatmul.mubr.f32.vlgmr.msra.gmra.mxu0 %v1291_v23  ;;  %v2183_v20 = vld [vmem:[#allocation4 + $0x100] sm:$0xff] }
  0xf2   : > { %10838 = vmatpush3.msra.mxu1 %v1888_v22  ;;  %10917 = vmatprep.subr.mxu0 %v2198_v24  ;;  %v2472_v22 = vld [vmem:[#allocation4 + $0x2f8] sm:$0xff] }
  0xf3   : > { %10712 = vmatprep.mubr.f32.mxu1 %v1290_v21  ;;  %10918 = vmatpush3.msra.mxu0 %v2198_v24  ;;  %v2146_v21 = vld [vmem:[#allocation2 + $0x2] sm:$0xff]  ;;  %v2746_v24 = vld [vmem:[#allocation4 + $0x478] sm:$0xff] }
  0xf4   : > { %10713 = vmatmul.mubr.f32.gmra.mxu1 %v1291_v23  ;;  %10792 = vmatprep.mubr.f32.mxu0 %v13394_v25  ;;  %v2147_v23 = vld [vmem:[#allocation2 + $0xa] sm:$0xff] }
  0xf5   : > { %10839 = vmatprep.subr.mxu1 %v1887_v26  ;;  %10793 = vmatmul.mubr.f32.gmra.mxu0 %v13396_v27 }
  0xf6   : > { %10840 = vmatpush3.msra.mxu1 %v1887_v26  ;;  %10919 = vmatprep.subr.mxu0 %v2197_v28  ;;  %v13514_v26 = vld [vmem:[#allocation2 + $0x1a] sm:$0xff] }
  0xf7   : > { %10715 = vmatprep.mubr.f32.mxu1 %v13394_v25  ;;  %10920 = vmatpush3.msra.mxu0 %v2197_v28  ;;  %v2471_v28 = vld [vmem:[#allocation4 + $0x2f0] sm:$0xff] }
  0xf8   : > { %10716 = vmatmul.mubr.f32.gmra.mxu1 %v13396_v27  ;;  %10795 = vmatprep.mubr.f32.mxu0 %v13400_v29 }
  0xf9   : > { %10841 = vmatprep.subr.mxu1 %v1886_v30  ;;  %10796 = vmatmul.mubr.f32.gmra.mxu0 %v13403_v31 }
  0xfa   : > { %10842 = vmatpush3.msra.mxu1 %v1886_v30  ;;  %10921 = vmatprep.subr.mxu0 %v2196_v32  ;;  %v13517_v30 = vld [vmem:[#allocation2 + $0x22] sm:$0xff] }
  0xfb   : > { %10718 = vmatprep.mubr.f32.mxu1 %v13400_v29  ;;  %10922 = vmatpush3.msra.mxu0 %v2196_v32  ;;  %v2470_v32 = vld [vmem:[#allocation4 + $0x2e8] sm:$0xff] }
  0xfc   : > { %10719 = vmatmul.mubr.f32.gmra.mxu1 %v13403_v31  ;;  %10798 = vmatprep.mubr.f32.mxu0 %v13408_v33 }
  0xfd   : > { %10843 = vmatprep.subr.mxu1 %v1885_v34  ;;  %10799 = vmatmul.mubr.f32.gmra.mxu0 %v13411_v35 }
  0xfe   : > { %10844 = vmatpush3.msra.mxu1 %v1885_v34  ;;  %10923 = vmatprep.subr.mxu0 %v2195_v36  ;;  %v13525_v34 = vld [vmem:[#allocation2 + $0x3a] sm:$0xff] }
  0xff   : > { %10721 = vmatprep.mubr.f32.mxu1 %v13408_v33  ;;  %10924 = vmatpush3.msra.mxu0 %v2195_v36  ;;  %v2469_v36 = vld [vmem:[#allocation4 + $0x2e0] sm:$0xff] }
 0x100   : > { %10722 = vmatmul.mubr.f32.gmra.mxu1 %v13411_v35  ;;  %10801 = vmatprep.mubr.f32.mxu0 %v13416_v37 }
 0x101   : > { %10845 = vmatprep.subr.mxu1 %v1884_v38  ;;  %10802 = vmatmul.mubr.f32.gmra.mxu0 %v13419_v39 }
 0x102   : > { %10846 = vmatpush3.msra.mxu1 %v1884_v38  ;;  %10925 = vmatprep.subr.mxu0 %v2194_v40  ;;  %v13533_v38 = vld [vmem:[#allocation2 + $0x52] sm:$0xff] }
 0x103   : > { %10724 = vmatprep.mubr.f32.mxu1 %v13416_v37  ;;  %10926 = vmatpush3.msra.mxu0 %v2194_v40  ;;  %v2468_v40 = vld [vmem:[#allocation4 + $0x2d8] sm:$0xff] }
 0x104   : > { %10725 = vmatmul.mubr.f32.gmra.mxu1 %v13419_v39  ;;  %10804 = vmatprep.mubr.f32.mxu0 %v13424_v41 }
 0x105   : > { %10847 = vmatprep.subr.mxu1 %v1883_v42  ;;  %10805 = vmatmul.mubr.f32.gmra.mxu0 %v13427_v43 }
 0x106   : > { %10848 = vmatpush3.msra.mxu1 %v1883_v42  ;;  %10927 = vmatprep.subr.mxu0 %v2193_v45  ;;  %v13541_v42 = vld [vmem:[#allocation2 + $0x6a] sm:$0xff] }
 0x107   : > { %10727 = vmatprep.mubr.f32.mxu1 %v13424_v41  ;;  %10928 = vmatpush3.msra.mxu0 %v2193_v45  ;;  %v13548_v45 = vld [vmem:[#allocation2 + $0x7a] sm:$0xff] }
 0x108   : > { %10728 = vmatmul.mubr.f32.gmra.mxu1 %v13427_v43  ;;  %10807 = vmatprep.mubr.f32.mxu0 %v13432_v47 }
 0x109   : > { %10849 = vmatprep.subr.mxu1 %v1882_v48  ;;  %10808 = vmatmul.mubr.f32.gmra.mxu0 %v13435_v50 }
 0x10a   : > { %10850 = vmatpush3.msra.mxu1 %v1882_v48  ;;  %10929 = vmatprep.subr.mxu0 %v2192_v51  ;;  %v2467_v48 = vld [vmem:[#allocation4 + $0x2d0] sm:$0xff] }
 0x10b   : > { %10730 = vmatprep.mubr.f32.mxu1 %v13432_v47  ;;  %10930 = vmatpush3.msra.mxu0 %v2192_v51 }
 0x10c   : > { %10731 = vmatmul.mubr.f32.gmra.mxu1 %v13435_v50  ;;  %10810 = vmatprep.mubr.f32.mxu0 %v13440_v53 }
 0x10d   : > { %10851 = vmatprep.subr.mxu1 %v1881_v54  ;;  %10811 = vmatmul.mubr.f32.gmra.mxu0 %v13443_v55 }
 0x10e   : > { %10852 = vmatpush3.msra.mxu1 %v1881_v54  ;;  %10931 = vmatprep.subr.mxu0 %v2191_v57  ;;  %v2741_v54 = vld [vmem:[#allocation4 + $0x450] sm:$0xff] }
 0x10f   : > { %10733 = vmatprep.mubr.f32.mxu1 %v13440_v53  ;;  %10932 = vmatpush3.msra.mxu0 %v2191_v57 }
 0x110   : > { %10734 = vmatmul.mubr.f32.gmra.mxu1 %v13443_v55  ;;  %10813 = vmatprep.mubr.f32.mxu0 %v13448_v60 }
 0x111   : > { %10853 = vmatprep.subr.mxu1 %v1880_v0  ;;  %10814 = vmatmul.mubr.f32.gmra.mxu0 %v13451_v62 }
 0x112   : > { %10854 = vmatpush3.msra.mxu1 %v1880_v0  ;;  %10933 = vmatprep.subr.mxu0 %v2190_v46  ;;  %v13562_v0 = vld [vmem:[#allocation2 + $0x92] sm:$0xff] }
 0x113   : > { %10736 = vmatprep.mubr.f32.mxu1 %v13448_v60  ;;  %10934 = vmatpush3.msra.mxu0 %v2190_v46  ;;  %v2466_v46 = vld [vmem:[#allocation4 + $0x2c8] sm:$0xff] }
 0x114   : > { %10737 = vmatmul.mubr.f32.gmra.mxu1 %v13451_v62  ;;  %10816 = vmatprep.mubr.f32.mxu0 %v13456_v52 }
 0x115   : > { %10855 = vmatprep.subr.mxu1 %v1879_v58  ;;  %10817 = vmatmul.mubr.f32.gmra.mxu0 %v13459_v61 }
 0x116   : > { %10856 = vmatpush3.msra.mxu1 %v1879_v58  ;;  %10935 = vmatprep.subr.mxu0 %v2189_v63  ;;  %v13567_v58 = vld [vmem:[#allocation2 + $0x9a] sm:$0xff] }
 0x117   : > { %10739 = vmatprep.mubr.f32.mxu1 %v13456_v52  ;;  %10936 = vmatpush3.msra.mxu0 %v2189_v63 }
 0x118   : > { %10740 = vmatmul.mubr.f32.gmra.mxu1 %v13459_v61  ;;  %10819 = vmatprep.mubr.f32.mxu0 %v13464_v2 }
 0x119   : > { %10857 = vmatprep.subr.mxu1 %v1878_v3  ;;  %10820 = vmatmul.mubr.f32.gmra.mxu0 %v13467_v5 }
 0x11a   : > { %10858 = vmatpush3.msra.mxu1 %v1878_v3  ;;  %10937 = vmatprep.subr.mxu0 %v2188_v6 }
 0x11b   : > { %10742 = vmatprep.mubr.f32.mxu1 %v13464_v2  ;;  %10938 = vmatpush3.msra.mxu0 %v2188_v6  ;;  %v13576_v6 = vld [vmem:[#allocation2 + $0xaa] sm:$0xff] }
 0x11c   : > { %10743 = vmatmul.mubr.f32.gmra.mxu1 %v13467_v5  ;;  %10822 = vmatprep.mubr.f32.mxu0 %v13472_v7 }
 0x11d   : > { %10859 = vmatprep.subr.mxu1 %v1877_v8  ;;  %10823 = vmatmul.mubr.f32.gmra.mxu0 %v13475_v10 }
 0x11e   : > { %10860 = vmatpush3.msra.mxu1 %v1877_v8  ;;  %10939 = vmatprep.subr.mxu0 %v2187_v11  ;;  %v2465_v8 = vld [vmem:[#allocation4 + $0x2c0] sm:$0xff] }
 0x11f   : > { %10745 = vmatprep.mubr.f32.mxu1 %v13472_v7  ;;  %10940 = vmatpush3.msra.mxu0 %v2187_v11  ;;  %v2739_v11 = vld [vmem:[#allocation4 + $0x440] sm:$0xff] }
 0x120   : > { %10746 = vmatmul.mubr.f32.gmra.mxu1 %v13475_v10  ;;  %10825 = vmatprep.mubr.f32.mxu0 %v13480_v13 }
 0x121   : > { %10861 = vmatprep.subr.mxu1 %v1876_v14  ;;  %10826 = vmatmul.mubr.f32.gmra.mxu0 %v13483_v15 }
 0x122   : > { %10862 = vmatpush3.msra.mxu1 %v1876_v14  ;;  %10941 = vmatprep.subr.mxu0 %v2186_v44 }
 0x123   : > { %10748 = vmatprep.mubr.f32.mxu1 %v13480_v13  ;;  %10942 = vmatpush3.msra.mxu0 %v2186_v44  ;;  %v13588_v44 = vld [vmem:[#allocation2 + $0xc2] sm:$0xff] }
 0x124   : > { %10749 = vmatmul.mubr.f32.gmra.mxu1 %v13483_v15  ;;  %10828 = vmatprep.mubr.f32.mxu0 %v13488_v49 }
 0x125   : > { %10863 = vmatprep.subr.mxu1 %v1875_v56  ;;  %10829 = vmatmul.mubr.f32.gmra.mxu0 %v13491_v59 }
 0x126   : > { %10864 = vmatpush3.msra.mxu1 %v1875_v56  ;;  %10943 = vmatprep.subr.mxu0 %v2185_v1  ;;  %v2464_v56 = vld [vmem:[#allocation4 + $0x2b8] sm:$0xff] }
 0x127   : > { %10751 = vmatprep.mubr.f32.mxu1 %v13488_v49  ;;  %10944 = vmatpush3.msra.mxu0 %v2185_v1 }
 0x128   : > { %10752 = vmatmul.mubr.f32.gmra.mxu1 %v13491_v59  ;;  %10831 = vmatprep.mubr.f32.mxu0 %v13496_v4 }
 0x129   : > { %10865 = vmatprep.subr.mxu1 %v1874_v9  ;;  %10832 = vmatmul.mubr.f32.gmra.mxu0 %v13499_v12 }
 0x12a   : > { %10866 = vmatpush3.msra.mxu1 %v1874_v9  ;;  %10945 = vmatprep.subr.mxu0 %v2184_v16  ;;  %v2738_v9 = vld [vmem:[#allocation4 + $0x438] sm:$0xff] }
 0x12b   : > { %10754 = vmatprep.mubr.f32.mxu1 %v13496_v4  ;;  %10946 = vmatpush3.msra.mxu0 %v2184_v16 }
 0x12c   : > { %10755 = vmatmul.mubr.f32.gmra.mxu1 %v13499_v12  ;;  %10834 = vmatprep.mubr.f32.mxu0 %v13504_v17 }
 0x12d   : > { %10867 = vmatprep.subr.mxu1 %v1873_v18  ;;  %10835 = vmatmul.mubr.f32.gmra.mxu0 %v13507_v19 }
 0x12e   : > { %10868 = vmatpush3.msra.mxu1 %v1873_v18  ;;  %10947 = vmatprep.subr.mxu0 %v2183_v20  ;;  %v13602_v18 = vld [vmem:[#allocation2 + $0xda] sm:$0xff] }
 0x12f   : > { %10869 = vmatprep.mubr.f32.mxu1 %v13394_v25  ;;  %10948 = vmatpush3.msra.mxu0 %v2183_v20  ;;  %v2745_v25 = vld [vmem:[#allocation4 + $0x470] sm:$0xff] }
 0x130   : > { %10870 = vmatmul.mubr.f32.vlgmr.msra.gmra.mxu1 %v13396_v27  ;;  %10949 = vmatprep.mubr.f32.mxu0 %v2146_v21  ;;  %v13522_v27 = vld [vmem:[#allocation2 + $0x32] sm:$0xff] }
 0x131   : > { %10997 = vmatprep.subr.mxu1 %v2472_v22  ;;  %10950 = vmatmul.mubr.f32.vlgmr.msra.gmra.mxu0 %v2147_v23  ;;  %v2463_v20 = vld [vmem:[#allocation4 + $0x2b0] sm:$0xff] }
 0x132   : > { %10998 = vmatpush3.msra.mxu1 %v2472_v22  ;;  %11077 = vmatprep.subr.mxu0 %v2746_v24 }
 0x133   : > { %10872 = vmatprep.mubr.f32.mxu1 %v13400_v29  ;;  %11078 = vmatpush3.msra.mxu0 %v2746_v24  ;;  %v2744_v29 = vld [vmem:[#allocation4 + $0x468] sm:$0xff]  ;;  %v13616_v24 = vld [vmem:[#allocation2 + $0xf2] sm:$0xff] }
 0x134   : > { %10873 = vmatmul.mubr.f32.gmra.mxu1 %v13403_v31  ;;  %10952 = vmatprep.mubr.f32.mxu0 %v13514_v26  ;;  %v13530_v31 = vld [vmem:[#allocation2 + $0x4a] sm:$0xff] }
 0x135   : > { %10999 = vmatprep.subr.mxu1 %v2471_v28  ;;  %10953 = vmatmul.mubr.f32.gmra.mxu0 %v13517_v30 }
 0x136   : > { %11000 = vmatpush3.msra.mxu1 %v2471_v28  ;;  %11079 = vmatprep.subr.mxu0 %v2745_v25  ;;  %v2462_v28 = vld [vmem:[#allocation4 + $0x2a8] sm:$0xff] }
 0x137   : > { %10875 = vmatprep.mubr.f32.mxu1 %v13408_v33  ;;  %11080 = vmatpush3.msra.mxu0 %v2745_v25  ;;  %v2743_v33 = vld [vmem:[#allocation4 + $0x460] sm:$0xff]  ;;  %v2736_v25 = vld [vmem:[#allocation4 + $0x428] sm:$0xff] }
 0x138   : > { %10876 = vmatmul.mubr.f32.gmra.mxu1 %v13411_v35  ;;  %10955 = vmatprep.mubr.f32.mxu0 %v13522_v27  ;;  %v13538_v35 = vld [vmem:[#allocation2 + $0x62] sm:$0xff] }
 0x139   : > { %11001 = vmatprep.subr.mxu1 %v2470_v32  ;;  %10956 = vmatmul.mubr.f32.gmra.mxu0 %v13525_v34 }
 0x13a   : > { %11002 = vmatpush3.msra.mxu1 %v2470_v32  ;;  %11081 = vmatprep.subr.mxu0 %v2744_v29 }
 0x13b   : > { %10878 = vmatprep.mubr.f32.mxu1 %v13416_v37  ;;  %11082 = vmatpush3.msra.mxu0 %v2744_v29  ;;  %v2742_v37 = vld [vmem:[#allocation4 + $0x458] sm:$0xff]  ;;  %v13628_v29 = vld [vmem:[#allocation2 + $0x10a] sm:$0xff] }
 0x13c   : > { %10879 = vmatmul.mubr.f32.gmra.mxu1 %v13419_v39  ;;  %10958 = vmatprep.mubr.f32.mxu0 %v13530_v31 }
 0x13d   : > { %11003 = vmatprep.subr.mxu1 %v2469_v36  ;;  %10959 = vmatmul.mubr.f32.gmra.mxu0 %v13533_v38 }
 0x13e   : > { %11004 = vmatpush3.msra.mxu1 %v2469_v36  ;;  %11083 = vmatprep.subr.mxu0 %v2743_v33  ;;  %v2461_v36 = vld [vmem:[#allocation4 + $0x2a0] sm:$0xff] }
 0x13f   : > { %10881 = vmatprep.mubr.f32.mxu1 %v13424_v41  ;;  %11084 = vmatpush3.msra.mxu0 %v2743_v33  ;;  %v13553_v41 = vld [vmem:[#allocation2 + $0x82] sm:$0xff] }
 0x140   : > { %10882 = vmatmul.mubr.f32.gmra.mxu1 %v13427_v43  ;;  %10961 = vmatprep.mubr.f32.mxu0 %v13538_v35 }
 0x141   : > { %11005 = vmatprep.subr.mxu1 %v2468_v40  ;;  %v13545_v39 = vpop.f32.mrf.mxu1  ;;  %10962 = vmatmul.mubr.f32.gmra.mxu0 %v13541_v42 }
 0x142   : > { %11006 = vmatpush3.msra.mxu1 %v2468_v40  ;;  %v13550_v51 = vpop.f32.mrf.mxu0  ;;  %11085 = vmatprep.subr.mxu0 %v2742_v37  ;;  %v2735_v40 = vld [vmem:[#allocation4 + $0x420] sm:$0xff] }
 0x143   : > { %10884 = vmatprep.mubr.f32.mxu1 %v13432_v47  ;;  %v13555_v43 = vpop.f32.mrf.mxu1  ;;  %11086 = vmatpush3.msra.mxu0 %v2742_v37 }
 0x144   : > { %10885 = vmatmul.mubr.f32.gmra.mxu1 %v13435_v50  ;;  %v13558_v57 = vpop.f32.mrf.mxu0  ;;  %10964 = vmatprep.mubr.f32.mxu0 %v13548_v45  ;;  %v2740_v50 = vld [vmem:[#allocation4 + $0x448] sm:$0xff] }
 0x145   : > { %11007 = vmatprep.subr.mxu1 %v2467_v48  ;;  %10965 = vmatmul.mubr.f32.gmra.mxu0 %v13553_v41 }
 0x146   : > { %11008 = vmatpush3.msra.mxu1 %v2467_v48  ;;  %v13564_v47 = vpop.f32.mrf.mxu1  ;;  %11087 = vmatprep.subr.mxu0 %v2741_v54  ;;  %v13642_v48 = vld [vmem:[#allocation2 + $0x122] sm:$0xff] }
 0x147   : > { %10887 = vmatprep.mubr.f32.mxu1 %v13440_v53  ;;  %11088 = vmatpush3.msra.mxu0 %v2741_v54  ;;  %v2460_v54 = vld [vmem:[#allocation4 + $0x298] sm:$0xff] }
 0x148   : > { %10888 = vmatmul.mubr.f32.gmra.mxu1 %v13443_v55  ;;  %v13570_v63 = vpop.f32.mrf.mxu0  ;;  %v13572_v3 = vpop.f32.mrf.mxu1  ;;  %10967 = vmatprep.mubr.f32.mxu0 %v13562_v0  ;;  %v13581_v55 = vld [vmem:[#allocation2 + $0xb2] sm:$0xff] }
 0x149   : > { %11009 = vmatprep.subr.mxu1 %v2466_v46  ;;  %10968 = vmatmul.mubr.f32.gmra.mxu0 %v13567_v58 }
 0x14a   : > { %11010 = vmatpush3.msra.mxu1 %v2466_v46  ;;  %v13578_v53 = vpop.f32.mrf.mxu0  ;;  %11089 = vmatprep.subr.mxu0 %v2740_v50 }
 0x14b   : > { %10890 = vmatprep.mubr.f32.mxu1 %v13448_v60  ;;  %11090 = vmatpush3.msra.mxu0 %v2740_v50 }
 0x14c   : > { %10891 = vmatmul.mubr.f32.gmra.mxu1 %v13451_v62  ;;  %v13584_v14 = vpop.f32.mrf.mxu1  ;;  %10970 = vmatprep.mubr.f32.mxu0 %v13576_v6  ;;  %v13595_v62 = vld [vmem:[#allocation2 + $0xca] sm:$0xff] }
 0x14d   : > { %11011 = vmatprep.subr.mxu1 %v2465_v8  ;;  %10971 = vmatmul.mubr.f32.gmra.mxu0 %v13581_v55 }
 0x14e   : > { %11012 = vmatpush3.msra.mxu1 %v2465_v8  ;;  %v13590_v1 = vpop.f32.mrf.mxu0  ;;  %v13592_v60 = vpop.f32.mrf.mxu1  ;;  %11091 = vmatprep.subr.mxu0 %v2739_v11 }
 0x14f   : > { %10893 = vmatprep.mubr.f32.mxu1 %v13456_v52  ;;  %11092 = vmatpush3.msra.mxu0 %v2739_v11  ;;  %v13607_v52 = vld [vmem:[#allocation2 + $0xe2] sm:$0xff]  ;;  %v13656_v11 = vld [vmem:[#allocation2 + $0x13a] sm:$0xff] }
 0x150   : > { %10894 = vmatmul.mubr.f32.gmra.mxu1 %v13459_v61  ;;  %v13598_v16 = vpop.f32.mrf.mxu0  ;;  %10973 = vmatprep.mubr.f32.mxu0 %v13588_v44  ;;  %v2737_v61 = vld [vmem:[#allocation4 + $0x430] sm:$0xff] }
 0x151   : > { %11013 = vmatprep.subr.mxu1 %v2464_v56  ;;  %10974 = vmatmul.mubr.f32.gmra.mxu0 %v13595_v62 }
 0x152   : > { %11014 = vmatpush3.msra.mxu1 %v2464_v56  ;;  %v13604_v21 = vpop.f32.mrf.mxu1  ;;  %11093 = vmatprep.subr.mxu0 %v2738_v9  ;;  %v2459_v56 = vld [vmem:[#allocation4 + $0x290] sm:$0xff] }
 0x153   : > { %10896 = vmatprep.mubr.f32.mxu1 %v13464_v2  ;;  %11094 = vmatpush3.msra.mxu0 %v2738_v9  ;;  %v2733_v9 = vld [vmem:[#allocation4 + $0x410] sm:$0xff] }
 0x154   : > { %10897 = vmatmul.mubr.f32.gmra.mxu1 %v13467_v5  ;;  %v13610_v22 = vpop.f32.mrf.mxu0  ;;  %v13612_v23 = vpop.f32.mrf.mxu1  ;;  %10976 = vmatprep.mubr.f32.mxu0 %v13602_v18  ;;  %v13621_v5 = vld [vmem:[#allocation2 + $0xfa] sm:$0xff] }
 0x155   : > { %16987 = vst [vmem:[#allocation14_spill] sm:$0xff] %v13612_v23  ;;  %11015 = vmatprep.subr.mxu1 %v2463_v20  ;;  %10977 = vmatmul.mubr.f32.gmra.mxu0 %v13607_v52 }
 0x156   : > { %11016 = vmatpush3.msra.mxu1 %v2463_v20  ;;  %v13618_v2 = vpop.f32.mrf.mxu0  ;;  %11095 = vmatprep.subr.mxu0 %v2737_v61 }
 0x157   : > { %10899 = vmatprep.mubr.f32.mxu1 %v13472_v7  ;;  %11096 = vmatpush3.msra.mxu0 %v2737_v61  ;;  %v13668_v61 = vld [vmem:[#allocation2 + $0x152] sm:$0xff] }
 0x158   : > { %10900 = vmatmul.mubr.f32.gmra.mxu1 %v13475_v10  ;;  %v13624_v32 = vpop.f32.mrf.mxu1  ;;  %10979 = vmatprep.mubr.f32.mxu0 %v13616_v24  ;;  %v13635_v10 = vld [vmem:[#allocation2 + $0x112] sm:$0xff] }
 0x159   : > { %11017 = vmatprep.subr.mxu1 %v2462_v28  ;;  %10980 = vmatmul.mubr.f32.gmra.mxu0 %v13621_v5 }
 0x15a   : > { %11018 = vmatpush3.msra.mxu1 %v2462_v28  ;;  %v13630_v33 = vpop.f32.mrf.mxu0  ;;  %v13632_v7 = vpop.f32.mrf.mxu1  ;;  %11097 = vmatprep.subr.mxu0 %v2736_v25  ;;  %v2458_v28 = vld [vmem:[#allocation4 + $0x288] sm:$0xff] }
 0x15b   : > { %16988 = vst [vmem:[#allocation15_spill] sm:$0xff] %v13632_v7  ;;  %10902 = vmatprep.mubr.f32.mxu1 %v13480_v13  ;;  %11098 = vmatpush3.msra.mxu0 %v2736_v25  ;;  %v13647_v13 = vld [vmem:[#allocation2 + $0x12a] sm:$0xff]  ;;  %v2731_v7 = vld [vmem:[#allocation4 + $0x400] sm:$0xff] }
 0x15c   : > { %10903 = vmatmul.mubr.f32.gmra.mxu1 %v13483_v15  ;;  %v13638_v37 = vpop.f32.mrf.mxu0  ;;  %10982 = vmatprep.mubr.f32.mxu0 %v13628_v29  ;;  %v2734_v15 = vld [vmem:[#allocation4 + $0x418] sm:$0xff] }
 0x15d   : > { %11019 = vmatprep.subr.mxu1 %v2461_v36  ;;  %10983 = vmatmul.mubr.f32.gmra.mxu0 %v13635_v10 }
 0x15e   : > { %11020 = vmatpush3.msra.mxu1 %v2461_v36  ;;  %v13644_v46 = vpop.f32.mrf.mxu1  ;;  %11099 = vmatprep.subr.mxu0 %v2735_v40  ;;  %v2732_v36 = vld [vmem:[#allocation4 + $0x408] sm:$0xff] }
 0x15f   : > { %10905 = vmatprep.mubr.f32.mxu1 %v13488_v49  ;;  %11100 = vmatpush3.msra.mxu0 %v2735_v40 }
 0x160   : > { %10906 = vmatmul.mubr.f32.gmra.mxu1 %v13491_v59  ;;  %v13650_v50 = vpop.f32.mrf.mxu0  ;;  %v13652_v8 = vpop.f32.mrf.mxu1  ;;  %10985 = vmatprep.mubr.f32.mxu0 %v13642_v48  ;;  %v13661_v59 = vld [vmem:[#allocation2 + $0x142] sm:$0xff] }
 0x161   : > { %16989 = vst [vmem:[#allocation16_spill] sm:$0xff] %v13652_v8  ;;  %11021 = vmatprep.subr.mxu1 %v2460_v54  ;;  %10986 = vmatmul.mubr.f32.gmra.mxu0 %v13647_v13 }
 0x162   : > { %11022 = vmatpush3.msra.mxu1 %v2460_v54  ;;  %v13658_v49 = vpop.f32.mrf.mxu0  ;;  %11101 = vmatprep.subr.mxu0 %v2734_v15  ;;  %v1322_v54 = vld [vmem:[#allocation2 + $0x199] sm:$0xff] }
 0x163   : > { %10908 = vmatprep.mubr.f32.mxu1 %v13496_v4  ;;  %11102 = vmatpush3.msra.mxu0 %v2734_v15  ;;  %v1323_v15 = vld [vmem:[#allocation2 + $0x1a1] sm:$0xff] }
 0x164   : > { %10909 = vmatmul.mubr.f32.gmra.mxu1 %v13499_v12  ;;  %v13664_v20 = vpop.f32.mrf.mxu1  ;;  %10988 = vmatprep.mubr.f32.mxu0 %v13656_v11  ;;  %v13675_v12 = vld [vmem:[#allocation2 + $0x15a] sm:$0xff] }
 0x165   : > { %11023 = vmatprep.subr.mxu1 %v2459_v56  ;;  %10989 = vmatmul.mubr.f32.gmra.mxu0 %v13661_v59 }
 0x166   : > { %11024 = vmatpush3.msra.mxu1 %v2459_v56  ;;  %v13670_v25 = vpop.f32.mrf.mxu0  ;;  %v13672_v4 = vpop.f32.mrf.mxu1  ;;  %11103 = vmatprep.subr.mxu0 %v2733_v9 }
 0x167   : > { %16990 = vst [vmem:[#allocation17_spill] sm:$0xff] %v13672_v4  ;;  %10911 = vmatprep.mubr.f32.mxu1 %v13504_v17  ;;  %11104 = vmatpush3.msra.mxu0 %v2733_v9  ;;  %v13684_v4 = vld [vmem:[#allocation2 + $0x16a] sm:$0xff]  ;;  %v2457_v17 = vld [vmem:[#allocation4 + $0x280] sm:$0xff]  ;;  %v13686_v9 = vld [vmem:[#allocation2 + $0x172] sm:$0xff] }
 0x168   : > { %10912 = vmatmul.mubr.f32.gmra.mxu1 %v13507_v19  ;;  %v13678_v40 = vpop.f32.mrf.mxu0  ;;  %10991 = vmatprep.mubr.f32.mxu0 %v13668_v61 }
 0x169   : > { %11025 = vmatprep.subr.mxu1 %v2458_v28  ;;  %10992 = vmatmul.mubr.f32.gmra.mxu0 %v13675_v12 }
 0x16a   : > { %11026 = vmatpush3.msra.mxu1 %v2458_v28  ;;  %v13682_v56 = vpop.f32.mrf.mxu1  ;;  %11105 = vmatprep.subr.mxu0 %v2732_v36 }
 0x16b   : > { %10914 = vmatprep.mubr.f32.mxu1 %v1322_v54  ;;  %11106 = vmatpush3.msra.mxu0 %v2732_v36 }
 0x16c   : > { %10915 = vmatmul.mubr.f32.gmra.mxu1 %v1323_v15  ;;  %v13688_v19 = vpop.f32.mrf.mxu0  ;;  %v13690_v8 = vpop.f32.mrf.mxu1  ;;  %10994 = vmatprep.mubr.f32.mxu0 %v13684_v4 }
 0x16d   : > { %16991 = vst [vmem:[#allocation18_spill] sm:$0xff] %v13690_v8  ;;  %11027 = vmatprep.subr.mxu1 %v2457_v17  ;;  %10995 = vmatmul.mubr.f32.gmra.mxu0 %v13686_v9 }
 0x16e   : > { %11028 = vmatpush3.msra.mxu1 %v2457_v17  ;;  %v13694_v28 = vpop.f32.mrf.mxu0  ;;  %11107 = vmatprep.subr.mxu0 %v2731_v7 }
 0x16f   : > { %11029 = vmatprep.mubr.f32.mxu1 %v13514_v26  ;;  %11108 = vmatpush3.msra.mxu0 %v2731_v7  ;;  %v10551_v54 = vpop.f32.mrf.mxu1 }
 0x170   : > { %11030 = vmatmul.mubr.f32.vlgmr.msra.gmra.mxu1 %v13517_v30  ;;  %v861_v36 = vadd.f32 %v10551_v54, %v13550_v51  ;;  %11109 = vmatprep.mubr.f32.mxu0 %v13522_v27 }
 0x171   : > { %11032 = vmatprep.mubr.f32.mxu1 %v13522_v27  ;;  %v10631_v15 = vpop.f32.mrf.mxu0  ;;  %11110 = vmatmul.mubr.f32.vlgmr.msra.gmra.mxu0 %v13525_v34  ;;  %v855_v8 = vpop.f32.mrf.mxu1 }
 0x172   : > { %v13702_v17 = vadd.f32 %v10631_v15, %v861_v36  ;;  %v856_v23 = vadd.f32 %v855_v8, %v13558_v57  ;;  %11112 = vmatprep.mubr.f32.mxu0 %v13530_v31 }
 0x173   : > { %v1097_v26 = vpop.f32.mrf.mxu0 }
 0x174   : > { %v10554_v7 = vpop.f32.mrf.mxu1  ;;  %11033 = vmatmul.mubr.f32.gmra.mxu1 %v13525_v34  ;;  %v13707_v30 = vadd.f32 %v1097_v26, %v856_v23 }
 0x175   : > { %v871_v51 = vadd.f32 %v10554_v7, %v13570_v63  ;;  %11035 = vmatprep.mubr.f32.mxu1 %v13530_v31  ;;  %v10634_v27 = vpop.f32.mrf.mxu0  ;;  %11113 = vmatmul.mubr.f32.gmra.mxu0 %v13533_v38 }
 0x176   : > { %v865_v54 = vpop.f32.mrf.mxu1  ;;  %11115 = vmatprep.mubr.f32.mxu0 %v13538_v35 }
 0x177   : > { %v13712_v36 = vadd.f32 %v10634_v27, %v871_v51  ;;  %v866_v57 = vadd.f32 %v865_v54, %v13578_v53  ;;  %v1107_v8 = vpop.f32.mrf.mxu0 }
 0x178   : > { %v10557_v15 = vpop.f32.mrf.mxu1  ;;  %11036 = vmatmul.mubr.f32.gmra.mxu1 %v13533_v38 }
 0x179   : > { %v13717_v34 = vadd.f32 %v1107_v8, %v866_v57  ;;  %v881_v63 = vadd.f32 %v10557_v15, %v13590_v1  ;;  %11038 = vmatprep.mubr.f32.mxu1 %v13538_v35  ;;  %v10637_v31 = vpop.f32.mrf.mxu0  ;;  %11116 = vmatmul.mubr.f32.gmra.mxu0 %v13541_v42 }
 0x17a   : > { %v875_v23 = vpop.f32.mrf.mxu1  ;;  %11118 = vmatprep.mubr.f32.mxu0 %v13548_v45 }
 0x17b   : > { %v13722_v26 = vadd.f32 %v10637_v31, %v881_v63  ;;  %v876_v53 = vadd.f32 %v875_v23, %v13598_v16  ;;  %v1117_v7 = vpop.f32.mrf.mxu0 }
 0x17c   : > { %v10560_v51 = vpop.f32.mrf.mxu1  ;;  %11039 = vmatmul.mubr.f32.gmra.mxu1 %v13541_v42 }
 0x17d   : > { %v13727_v38 = vadd.f32 %v1117_v7, %v876_v53  ;;  %v891_v1 = vadd.f32 %v10560_v51, %v13610_v22  ;;  %11041 = vmatprep.mubr.f32.mxu1 %v13548_v45  ;;  %v10640_v35 = vpop.f32.mrf.mxu0  ;;  %11119 = vmatmul.mubr.f32.gmra.mxu0 %v13553_v41 }
 0x17e   : > { %v885_v27 = vpop.f32.mrf.mxu1  ;;  %11121 = vmatprep.mubr.f32.mxu0 %v13562_v0 }
 0x17f   : > { %v13732_v54 = vadd.f32 %v10640_v35, %v891_v1  ;;  %v886_v16 = vadd.f32 %v885_v27, %v13618_v2  ;;  %v1127_v57 = vpop.f32.mrf.mxu0  ;;  %v3175_v35 = vld [vmem:[#allocation7 + $0x1f0] sm:$0xff] }
 0x180   : > { %v10563_v8 = vpop.f32.mrf.mxu1  ;;  %11042 = vmatmul.mubr.f32.gmra.mxu1 %v13553_v41 }
 0x181   : > { %v13737_v42 = vadd.f32 %v1127_v57, %v886_v16  ;;  %v901_v22 = vadd.f32 %v10563_v8, %v13630_v33  ;;  %11044 = vmatprep.mubr.f32.mxu1 %v13562_v0  ;;  %v10643_v45 = vpop.f32.mrf.mxu0  ;;  %11122 = vmatmul.mubr.f32.gmra.mxu0 %v13567_v58  ;;  %v3176_v0 = vld [vmem:[#allocation7 + $0x1f8] sm:$0xff] }
 0x182   : > { %v895_v15 = vpop.f32.mrf.mxu1  ;;  %11124 = vmatprep.mubr.f32.mxu0 %v13576_v6  ;;  %11157 = vmatprep.subr.mxu1 %v3176_v0 }
 0x183   : > { %v13742_v63 = vadd.f32 %v10643_v45, %v901_v22  ;;  %v896_v2 = vadd.f32 %v895_v15, %v13638_v37  ;;  %v1137_v31 = vpop.f32.mrf.mxu0  ;;  %11158 = vmatpush3.msra.mxu1 %v3176_v0  ;;  %v3174_v22 = vld [vmem:[#allocation7 + $0x1e8] sm:$0xff] }
 0x184   : > { %v10566_v23 = vpop.f32.mrf.mxu1  ;;  %11045 = vmatmul.mubr.f32.gmra.mxu1 %v13567_v58  ;;  %11159 = vmatprep.subr.mxu1 %v3175_v35 }
 0x185   : > { %v13747_v41 = vadd.f32 %v1137_v31, %v896_v2  ;;  %v911_v33 = vadd.f32 %v10566_v23, %v13650_v50  ;;  %11047 = vmatprep.mubr.f32.mxu1 %v13576_v6  ;;  %v10646_v53 = vpop.f32.mrf.mxu0  ;;  %11125 = vmatmul.mubr.f32.gmra.mxu0 %v13581_v55  ;;  %v3173_v23 = vld [vmem:[#allocation7 + $0x1e0] sm:$0xff] }
 0x186   : > { %v905_v7 = vpop.f32.mrf.mxu1  ;;  %11127 = vmatprep.mubr.f32.mxu0 %v13588_v44  ;;  %11160 = vmatpush3.msra.mxu1 %v3175_v35 }
 0x187   : > { %v13752_v51 = vadd.f32 %v10646_v53, %v911_v33  ;;  %v906_v37 = vadd.f32 %v905_v7, %v13658_v49  ;;  %v1147_v58 = vpop.f32.mrf.mxu0  ;;  %11161 = vmatprep.subr.mxu1 %v3174_v22 }
 0x188   : > { %v10569_v1 = vpop.f32.mrf.mxu1  ;;  %11048 = vmatmul.mubr.f32.gmra.mxu1 %v13581_v55 }
 0x189   : > { %v13757_v50 = vadd.f32 %v1147_v58, %v906_v37  ;;  %v921_v6 = vadd.f32 %v10569_v1, %v13670_v25  ;;  %11050 = vmatprep.mubr.f32.mxu1 %v13588_v44  ;;  %v10649_v27 = vpop.f32.mrf.mxu0  ;;  %11128 = vmatmul.mubr.f32.gmra.mxu0 %v13595_v62 }
 0x18a   : > { %v915_v16 = vpop.f32.mrf.mxu1  ;;  %11130 = vmatprep.mubr.f32.mxu0 %v13602_v18  ;;  %11162 = vmatpush3.msra.mxu1 %v3174_v22 }
 0x18b   : > { %v13762_v49 = vadd.f32 %v10649_v27, %v921_v6  ;;  %v916_v57 = vadd.f32 %v915_v16, %v13678_v40  ;;  %v1157_v55 = vpop.f32.mrf.mxu0  ;;  %11163 = vmatprep.subr.mxu1 %v3173_v23 }
 0x18c   : > { %v10572_v8 = vpop.f32.mrf.mxu1  ;;  %11051 = vmatmul.mubr.f32.gmra.mxu1 %v13595_v62 }
 0x18d   : > { %v13767_v25 = vadd.f32 %v1157_v55, %v916_v57  ;;  %v931_v44 = vadd.f32 %v10572_v8, %v13688_v19  ;;  %11053 = vmatprep.mubr.f32.mxu1 %v13602_v18  ;;  %v10652_v45 = vpop.f32.mrf.mxu0  ;;  %11131 = vmatmul.mubr.f32.gmra.mxu0 %v13607_v52 }
 0x18e   : > { %v925_v15 = vpop.f32.mrf.mxu1  ;;  %11133 = vmatprep.mubr.f32.mxu0 %v13616_v24  ;;  %11164 = vmatpush3.msra.mxu1 %v3173_v23 }
 0x18f   : > { %v13772_v40 = vadd.f32 %v10652_v45, %v931_v44  ;;  %v926_v2 = vadd.f32 %v925_v15, %v13694_v28  ;;  %v1167_v62 = vpop.f32.mrf.mxu0 }
 0x190   : > { %v10575_v31 = vpop.f32.mrf.mxu1  ;;  %11054 = vmatmul.mubr.f32.gmra.mxu1 %v13607_v52 }
 0x191   : > { %v13777_v19 = vadd.f32 %v1167_v62, %v926_v2  ;;  %v941_v18 = vadd.f32 %v10575_v31, %v13545_v39  ;;  %11056 = vmatprep.mubr.f32.mxu1 %v13616_v24  ;;  %v10655_v33 = vpop.f32.mrf.mxu0  ;;  %11134 = vmatmul.mubr.f32.gmra.mxu0 %v13621_v5  ;;  %v3172_v24 = vld [vmem:[#allocation7 + $0x1d8] sm:$0xff]  ;;  %v3158_v62 = vld [vmem:[#allocation7 + $0x70] sm:$0xff] }
 0x192   : > { %v13782_v0 = vpop.f32.mrf.mxu1  ;;  %11136 = vmatprep.mubr.f32.mxu0 %v13628_v29  ;;  %11165 = vmatprep.subr.mxu1 %v3172_v24 }
 0x193   : > { %16992 = vst [vmem:[#allocation19_spill] sm:$0xff] %v13777_v19  ;;  %v13784_v28 = vadd.f32 %v10655_v33, %v941_v18  ;;  %v13787_v53 = vpop.f32.mrf.mxu0  ;;  %11166 = vmatpush3.msra.mxu1 %v3172_v24  ;;  %v3168_v18 = vld [vmem:[#allocation7 + $0x1b8] sm:$0xff]  ;;  %v2179_v24 = vld [vmem:[#allocation2 + $0x18a] sm:$0xff] }
 0x194   : > { %v10578_v52 = vpop.f32.mrf.mxu1  ;;  %11057 = vmatmul.mubr.f32.gmra.mxu1 %v13621_v5  ;;  %v3171_v5 = vld [vmem:[#allocation7 + $0x1d0] sm:$0xff] }
 0x195   : > { %v951_v39 = vadd.f32 %v10578_v52, %v13564_v47  ;;  %11059 = vmatprep.mubr.f32.mxu1 %v13628_v29  ;;  %v10658_v7 = vpop.f32.mrf.mxu0  ;;  %11137 = vmatmul.mubr.f32.gmra.mxu0 %v13635_v10  ;;  %v3157_v52 = vld [vmem:[#allocation7 + $0x68] sm:$0xff] }
 0x196   : > { %v13793_v37 = vpop.f32.mrf.mxu1  ;;  %11139 = vmatprep.mubr.f32.mxu0 %v13642_v48  ;;  %11167 = vmatprep.subr.mxu1 %v3171_v5 }
 0x197   : > { %v13795_v58 = vadd.f32 %v10658_v7, %v951_v39  ;;  %v13798_v1 = vpop.f32.mrf.mxu0  ;;  %11168 = vmatpush3.msra.mxu1 %v3171_v5 }
 0x198   : > { %v10581_v6 = vpop.f32.mrf.mxu1  ;;  %11060 = vmatmul.mubr.f32.gmra.mxu1 %v13635_v10  ;;  %v3170_v10 = vld [vmem:[#allocation7 + $0x1c8] sm:$0xff] }
 0x199   : > { %v961_v47 = vadd.f32 %v10581_v6, %v13584_v14  ;;  %11062 = vmatprep.mubr.f32.mxu1 %v13642_v48  ;;  %v10661_v29 = vpop.f32.mrf.mxu0  ;;  %11140 = vmatmul.mubr.f32.gmra.mxu0 %v13647_v13  ;;  %v3156_v6 = vld [vmem:[#allocation7 + $0x60] sm:$0xff] }
 0x19a   : > { %v13804_v35 = vpop.f32.mrf.mxu1  ;;  %11142 = vmatprep.mubr.f32.mxu0 %v13656_v11  ;;  %11169 = vmatprep.subr.mxu1 %v3170_v10 }
 0x19b   : > { %v13806_v27 = vadd.f32 %v10661_v29, %v961_v47  ;;  %v13809_v16 = vpop.f32.mrf.mxu0  ;;  %11170 = vmatpush3.msra.mxu1 %v3170_v10  ;;  %v3167_v29 = vld [vmem:[#allocation7 + $0x1b0] sm:$0xff]  ;;  %v3155_v10 = vld [vmem:[#allocation7 + $0x58] sm:$0xff] }
 0x19c   : > { %16993 = vst [vmem:[#allocation20_spill] sm:$0xff] %v13809_v16  ;;  %v10584_v57 = vpop.f32.mrf.mxu1  ;;  %11063 = vmatmul.mubr.f32.gmra.mxu1 %v13647_v13  ;;  %v3169_v13 = vld [vmem:[#allocation7 + $0x1c0] sm:$0xff] }
 0x19d   : > { %v971_v14 = vadd.f32 %v10584_v57, %v13604_v21  ;;  %11065 = vmatprep.mubr.f32.mxu1 %v13656_v11  ;;  %v10664_v48 = vpop.f32.mrf.mxu0  ;;  %11143 = vmatmul.mubr.f32.gmra.mxu0 %v13661_v59  ;;  %v3159_v11 = vld [vmem:[#allocation7 + $0x78] sm:$0xff] }
 0x19e   : > { %v13815_v55 = vpop.f32.mrf.mxu1  ;;  %11145 = vmatprep.mubr.f32.mxu0 %v13668_v61  ;;  %11171 = vmatprep.subr.mxu1 %v3169_v13 }
 0x19f   : > { %v13817_v8 = vadd.f32 %v10664_v48, %v971_v14  ;;  %v13820_v44 = vpop.f32.mrf.mxu0  ;;  %11237 = vmatprep.subr.mxu0 %v3159_v11  ;;  %11172 = vmatpush3.msra.mxu1 %v3169_v13  ;;  %v2181_v14 = vld [vmem:[#allocation2 + $0x1a2] sm:$0xff] }
 0x1a0   : > { %16994 = vst [vmem:[#allocation21_spill] sm:$0xff] %v13820_v44  ;;  %v10587_v22 = vpop.f32.mrf.mxu1  ;;  %11066 = vmatmul.mubr.f32.gmra.mxu1 %v13661_v59  ;;  %11238 = vmatpush3.msra.mxu0 %v3159_v11 }
 0x1a1   : > { %v981_v21 = vadd.f32 %v10587_v22, %v13624_v32  ;;  %11068 = vmatprep.mubr.f32.mxu1 %v13668_v61  ;;  %v10667_v45 = vpop.f32.mrf.mxu0  ;;  %11146 = vmatmul.mubr.f32.gmra.mxu0 %v13675_v12  ;;  %v2178_v32 = vld [vmem:[#allocation2 + $0x182] sm:$0xff]  ;;  %v3154_v22 = vld [vmem:[#allocation7 + $0x50] sm:$0xff] }
 0x1a2   : > { %v13826_v15 = vpop.f32.mrf.mxu1  ;;  %11148 = vmatprep.mubr.f32.mxu0 %v13684_v4  ;;  %11239 = vmatprep.subr.mxu0 %v3158_v62 }
 0x1a3   : > { %16995 = vst [vmem:[#allocation22_spill] sm:$0xff] %v13826_v15  ;;  %v13828_v2 = vadd.f32 %v10667_v45, %v981_v21  ;;  %v13831_v31 = vpop.f32.mrf.mxu0  ;;  %11240 = vmatpush3.msra.mxu0 %v3158_v62  ;;  %11173 = vmatprep.subr.mxu1 %v3168_v18  ;;  %v3166_v21 = vld [vmem:[#allocation7 + $0x1a8] sm:$0xff] }
 0x1a4   : > { %16996 = vst [vmem:[#allocation23_spill] sm:$0xff] %v13831_v31  ;;  %v10590_v59 = vpop.f32.mrf.mxu1  ;;  %11069 = vmatmul.mubr.f32.gmra.mxu1 %v13675_v12  ;;  %11241 = vmatprep.subr.mxu0 %v3157_v52  ;;  %v3153_v62 = vld [vmem:[#allocation7 + $0x48] sm:$0xff] }
 0x1a5   : > { %v991_v61 = vadd.f32 %v10590_v59, %v13644_v46  ;;  %11071 = vmatprep.mubr.f32.mxu1 %v13684_v4  ;;  %v10670_v23 = vpop.f32.mrf.mxu0  ;;  %11149 = vmatmul.mubr.f32.gmra.mxu0 %v13686_v9  ;;  %v2180_v46 = vld [vmem:[#allocation2 + $0x19a] sm:$0xff] }
 0x1a6   : > { %v13837_v33 = vpop.f32.mrf.mxu1  ;;  %11151 = vmatprep.mubr.f32.mxu0 %v2178_v32  ;;  %11174 = vmatpush3.msra.mxu1 %v3168_v18  ;;  %v3165_v18 = vld [vmem:[#allocation7 + $0x1a0] sm:$0xff] }
 0x1a7   : > { %16997 = vst [vmem:[#allocation24_spill] sm:$0xff] %v13837_v33  ;;  %v13839_v39 = vadd.f32 %v10670_v23, %v991_v61  ;;  %v13841_v12 = vpop.f32.mrf.mxu0  ;;  %11242 = vmatpush3.msra.mxu0 %v3157_v52  ;;  %11175 = vmatprep.subr.mxu1 %v3167_v29  ;;  %v3152_v61 = vld [vmem:[#allocation7 + $0x40] sm:$0xff] }
 0x1a8   : > { %16998 = vst [vmem:[#allocation25_spill] sm:$0xff] %v13841_v12  ;;  %v10593_v7 = vpop.f32.mrf.mxu1  ;;  %11072 = vmatmul.mubr.f32.gmra.mxu1 %v13686_v9  ;;  %11243 = vmatprep.subr.mxu0 %v3156_v6 }
 0x1a9   : > { %v1001_v4 = vadd.f32 %v10593_v7, %v13664_v20  ;;  %11074 = vmatprep.mubr.f32.mxu1 %v2178_v32  ;;  %v10673_v47 = vpop.f32.mrf.mxu0  ;;  %11152 = vmatmul.mubr.f32.gmra.mxu0 %v2179_v24  ;;  %v3151_v7 = vld [vmem:[#allocation7 + $0x38] sm:$0xff] }
 0x1aa   : > { %v13845_v5 = vpop.f32.mrf.mxu1  ;;  %11154 = vmatprep.mubr.f32.mxu0 %v2180_v46  ;;  %11244 = vmatpush3.msra.mxu0 %v3156_v6  ;;  %v13865_v6 = vld [vmem:[#allocation2] sm:$0xff] }
 0x1ab   : > { %16999 = vst [vmem:[#allocation26_spill] sm:$0xff] %v13845_v5  ;;  %v13847_v57 = vadd.f32 %v10673_v47, %v1001_v4  ;;  %v13849_v9 = vpop.f32.mrf.mxu0  ;;  %11245 = vmatprep.subr.mxu0 %v3155_v10  ;;  %11176 = vmatpush3.msra.mxu1 %v3167_v29  ;;  %v3150_v47 = vld [vmem:[#allocation7 + $0x30] sm:$0xff] }
 0x1ac   : > { %17000 = vst [vmem:[#allocation27_spill] sm:$0xff] %v13849_v9  ;;  %v10596_v48 = vpop.f32.mrf.mxu1  ;;  %11075 = vmatmul.mubr.f32.gmra.mxu1 %v2179_v24  ;;  %11246 = vmatpush3.msra.mxu0 %v3155_v10 }
 0x1ad   : > { %v1011_v20 = vadd.f32 %v10596_v48, %v13682_v56  ;;  %v10676_v13 = vpop.f32.mrf.mxu0  ;;  %11155 = vmatmul.mubr.f32.gmra.mxu0 %v2181_v14  ;;  %11247 = vmatprep.subr.mxu0 %v3154_v22  ;;  %v3149_v48 = vld [vmem:[#allocation7 + $0x28] sm:$0xff] }
 0x1ae   : > { %v13852_v11 = vpop.f32.mrf.mxu1  ;;  %11177 = vmatprep.subr.mxu1 %v3166_v21  ;;  %11248 = vmatpush3.msra.mxu0 %v3154_v22 }
 0x1af   : > { %17001 = vst [vmem:[#allocation28_spill] sm:$0xff] %v13852_v11  ;;  %v13854_v45 = vadd.f32 %v10676_v13, %v1011_v20  ;;  %v13856_v59 = vpop.f32.mrf.mxu0  ;;  %11178 = vmatpush3.msra.mxu1 %v3166_v21  ;;  %11249 = vmatprep.subr.mxu0 %v3153_v62  ;;  %v3148_v13 = vld [vmem:[#allocation7 + $0x20] sm:$0xff] }
 0x1b0   : > { %17002 = vst [vmem:[#allocation29_spill] sm:$0xff] %v13856_v59  ;;  %v10711_v32 = vpop.f32.mrf.mxu1  ;;  %11179 = vmatprep.subr.mxu1 %v3165_v18  ;;  %11250 = vmatpush3.msra.mxu0 %v3153_v62 }
 0x1b1   : > { %v1567_v56 = vadd.f32 %v10711_v32, %v13702_v17  ;;  %v10791_v23 = vpop.f32.mrf.mxu0  ;;  %11180 = vmatpush3.msra.mxu1 %v3165_v18  ;;  %11251 = vmatprep.subr.mxu0 %v3152_v61 }
 0x1b2   : > { %v13859_v52 = vpop.f32.mrf.mxu1  ;;  %11269 = vmatprep.mubr.f32.mxu0 %v13865_v6  ;;  %11252 = vmatpush3.msra.mxu0 %v3152_v61  ;;  %v3147_v61 = vld [vmem:[#allocation7 + $0x18] sm:$0xff] }
 0x1b3   : > { %v13861_v24 = vadd.f32 %v10791_v23, %v1567_v56  ;;  %v13863_v46 = vpop.f32.mrf.mxu0  ;;  %11253 = vmatprep.subr.mxu0 %v3151_v7  ;;  %v3164_v56 = vld [vmem:[#allocation7 + $0x198] sm:$0xff] }
 0x1b4   : > { %v10714_v4 = vpop.f32.mrf.mxu1  ;;  %11254 = vmatpush3.msra.mxu0 %v3151_v7  ;;  %11181 = vmatprep.subr.mxu1 %v3164_v56 }
 0x1b5   : > { %v1569_v17 = vadd.f32 %v10714_v4, %v13712_v36  ;;  %v10794_v29 = vpop.f32.mrf.mxu0  ;;  %11255 = vmatprep.subr.mxu0 %v3150_v47  ;;  %11182 = vmatpush3.msra.mxu1 %v3164_v56 }
 0x1b6   : > { %v13869_v14 = vpop.f32.mrf.mxu1  ;;  %11256 = vmatpush3.msra.mxu0 %v3150_v47 }
 0x1b7   : > { %v13871_v10 = vadd.f32 %v10794_v29, %v1569_v17  ;;  %v13873_v20 = vpop.f32.mrf.mxu0  ;;  %11257 = vmatprep.subr.mxu0 %v3149_v48  ;;  %v3163_v29 = vld [vmem:[#allocation7 + $0x190] sm:$0xff] }
 0x1b8   : > { %v10717_v22 = vpop.f32.mrf.mxu1  ;;  %11258 = vmatpush3.msra.mxu0 %v3149_v48  ;;  %v3145_v48 = vld [vmem:[#allocation7 + $0x8] sm:$0xff]  ;;  %11183 = vmatprep.subr.mxu1 %v3163_v29 }
 0x1b9   : > { %v1571_v21 = vadd.f32 %v10717_v22, %v13722_v26  ;;  %v10797_v62 = vpop.f32.mrf.mxu0  ;;  %11259 = vmatprep.subr.mxu0 %v3148_v13  ;;  %v3146_v26 = vld [vmem:[#allocation7 + $0x10] sm:$0xff]  ;;  %11184 = vmatpush3.msra.mxu1 %v3163_v29 }
 0x1ba   : > { %v13876_v36 = vpop.f32.mrf.mxu1  ;;  %11260 = vmatpush3.msra.mxu0 %v3148_v13  ;;  %v3144_v13 = vld [vmem:[#allocation7] sm:$0xff] }
 0x1bb   : > { %v13878_v32 = vadd.f32 %v10797_v62, %v1571_v21  ;;  %v13880_v18 = vpop.f32.mrf.mxu0  ;;  %11261 = vmatprep.subr.mxu0 %v3147_v61 }
 0x1bc   : > { %v10720_v23 = vpop.f32.mrf.mxu1  ;;  %11262 = vmatpush3.msra.mxu0 %v3147_v61  ;;  %v3161_v61 = vld [vmem:[#allocation7 + $0x180] sm:$0xff] }
 0x1bd   : > { %v1573_v7 = vadd.f32 %v10720_v23, %v13732_v54  ;;  %v10800_v4 = vpop.f32.mrf.mxu0  ;;  %11263 = vmatprep.subr.mxu0 %v3146_v26  ;;  %v3162_v54 = vld [vmem:[#allocation7 + $0x188] sm:$0xff] }
 0x1be   : > { %v13883_v17 = vpop.f32.mrf.mxu1  ;;  %11264 = vmatpush3.msra.mxu0 %v3146_v26  ;;  %11185 = vmatprep.subr.mxu1 %v3162_v54 }
 0x1bf   : > { %v13885_v47 = vadd.f32 %v10800_v4, %v1573_v7  ;;  %v13887_v22 = vpop.f32.mrf.mxu0  ;;  %11265 = vmatprep.subr.mxu0 %v3145_v48  ;;  %11186 = vmatpush3.msra.mxu1 %v3162_v54 }
 0x1c0   : > { %v10723_v21 = vpop.f32.mrf.mxu1  ;;  %11266 = vmatpush3.msra.mxu0 %v3145_v48  ;;  %11187 = vmatprep.subr.mxu1 %v3161_v61 }
 0x1c1   : > { %v1575_v62 = vadd.f32 %v10723_v21, %v13742_v63  ;;  %v10803_v56 = vpop.f32.mrf.mxu0  ;;  %11267 = vmatprep.subr.mxu0 %v3144_v13  ;;  %11188 = vmatpush3.msra.mxu1 %v3161_v61 }
 0x1c2   : > { %v13890_v23 = vpop.f32.mrf.mxu1  ;;  %11268 = vmatpush3.msra.mxu0 %v3144_v13 }
 0x1c3   : > { %v13892_v7 = vadd.f32 %v10803_v56, %v1575_v62  ;;  %v13894_v4 = vpop.f32.mrf.mxu0  ;;  %11270 = vmatmul.mubr.f32.vlgmr.msra.gmra.mxu0 %v13865_v6 }
 0x1c4   : > { %v10726_v59 = vpop.f32.mrf.mxu1 }
 0x1c5   : > { %v1577_v63 = vadd.f32 %v10726_v59, %v13752_v51  ;;  %v10806_v26 = vpop.f32.mrf.mxu0  ;;  %v13909_v51 = vld [vmem:[#allocation7 + $0x378] sm:$0xff] }
 0x1c6   : > { %v13897_v29 = vpop.f32.mrf.mxu1  ;;  %17005 = vst [vmem:[#allocation32_spill] sm:$0xff] %v13909_v51  ;;  %11317 = vmatprep.subr.mxu1 %v13909_v51 }
 0x1c7   : > { %v13900_v21 = vadd.f32 %v10806_v26, %v1577_v63  ;;  %v13902_v62 = vpop.f32.mrf.mxu0 }
 0x1c8   : > { %v10729_v48 = vpop.f32.mrf.mxu1 }
 0x1c9   : > { %17003 = vst [vmem:[#allocation30_spill] sm:$0xff] %v13900_v21  ;;  %v1579_v54 = vadd.f32 %v10729_v48, %v13762_v49  ;;  %v10809_v56 = vpop.f32.mrf.mxu0 }
 0x1ca   : > { %v13905_v11 = vpop.f32.mrf.mxu1 }
 0x1cb   : > { %v13907_v9 = vadd.f32 %v10809_v56, %v1579_v54  ;;  %v13911_v59 = vpop.f32.mrf.mxu0 }
 0x1cc   : > { %17006 = vst [vmem:[#allocation33_spill] sm:$0xff] %v13911_v59  ;;  %v10732_v13 = vpop.f32.mrf.mxu1 }
 0x1cd   : > { %17004 = vst [vmem:[#allocation31_spill] sm:$0xff] %v13907_v9  ;;  %v1581_v6 = vadd.f32 %v10732_v13, %v13772_v40  ;;  %v10812_v61 = vpop.f32.mrf.mxu0 }
 0x1ce   : > { %v13915_v63 = vpop.f32.mrf.mxu1 }
 0x1cf   : > { %17007 = vst [vmem:[#allocation34_spill] sm:$0xff] %v13915_v63  ;;  %v13917_v26 = vadd.f32 %v10812_v61, %v1581_v6  ;;  %v13919_v49 = vpop.f32.mrf.mxu0 }
 0x1d0   : > { %17009 = vst [vmem:[#allocation36_spill] sm:$0xff] %v13919_v49  ;;  %v10735_v48 = vpop.f32.mrf.mxu1 }
 0x1d1   : > { %17008 = vst [vmem:[#allocation35_spill] sm:$0xff] %v13917_v26  ;;  %v1583_v54 = vadd.f32 %v10735_v48, %v13784_v28  ;;  %v10815_v56 = vpop.f32.mrf.mxu0 }
 0x1d2   : > { %v13922_v5 = vpop.f32.mrf.mxu1 }
 0x1d3   : > { %17010 = vst [vmem:[#allocation37_spill] sm:$0xff] %v13922_v5  ;;  %v13924_v12 = vadd.f32 %v10815_v56, %v1583_v54  ;;  %v13926_v33 = vpop.f32.mrf.mxu0 }
 0x1d4   : > { %17012 = vst [vmem:[#allocation39_spill] sm:$0xff] %v13926_v33  ;;  %v10738_v31 = vpop.f32.mrf.mxu1 }
 0x1d5   : > { %17011 = vst [vmem:[#allocation38_spill] sm:$0xff] %v13924_v12  ;;  %v1585_v40 = vadd.f32 %v10738_v31, %v13795_v58  ;;  %v10818_v13 = vpop.f32.mrf.mxu0 }
 0x1d6   : > { %v13929_v51 = vpop.f32.mrf.mxu1 }
 0x1d7   : > { %17013 = vst [vmem:[#allocation40_spill] sm:$0xff] %v13929_v51  ;;  %v13931_v6 = vadd.f32 %v10818_v13, %v1585_v40  ;;  %v13933_v61 = vpop.f32.mrf.mxu0 }
 0x1d8   : > { %17015 = vst [vmem:[#allocation42_spill] sm:$0xff] %v13933_v61  ;;  %v10741_v26 = vpop.f32.mrf.mxu1 }
 0x1d9   : > { %17014 = vst [vmem:[#allocation41_spill] sm:$0xff] %v13931_v6  ;;  %v1587_v28 = vadd.f32 %v10741_v26, %v13806_v27  ;;  %v10821_v48 = vpop.f32.mrf.mxu0  ;;  %v3953_v26 = vld [vmem:[#allocation7 + $0xf8] sm:$0xff] }
 0x1da   : > { %v13936_v49 = vpop.f32.mrf.mxu1  ;;  %11397 = vmatprep.subr.mxu0 %v3953_v26 }
 0x1db   : > { %17016 = vst [vmem:[#allocation43_spill] sm:$0xff] %v13936_v49  ;;  %v13938_v54 = vadd.f32 %v10821_v48, %v1587_v28  ;;  %v13940_v56 = vpop.f32.mrf.mxu0  ;;  %11398 = vmatpush3.msra.mxu0 %v3953_v26  ;;  %v3952_v48 = vld [vmem:[#allocation7 + $0xf0] sm:$0xff] }
 0x1dc   : > { %17018 = vst [vmem:[#allocation45_spill] sm:$0xff] %v13940_v56  ;;  %v10744_v12 = vpop.f32.mrf.mxu1  ;;  %11399 = vmatprep.subr.mxu0 %v3952_v48 }
 0x1dd   : > { %17017 = vst [vmem:[#allocation44_spill] sm:$0xff] %v13938_v54  ;;  %v1589_v58 = vadd.f32 %v10744_v12, %v13817_v8  ;;  %v10824_v31 = vpop.f32.mrf.mxu0  ;;  %11400 = vmatpush3.msra.mxu0 %v3952_v48  ;;  %v3938_v54 = vld [vmem:[#allocation7 + $0x80] sm:$0xff] }
 0x1de   : > { %v13943_v33 = vpop.f32.mrf.mxu1 }
 0x1df   : > { %17019 = vst [vmem:[#allocation46_spill] sm:$0xff] %v13943_v33  ;;  %v13945_v40 = vadd.f32 %v10824_v31, %v1589_v58  ;;  %v13947_v13 = vpop.f32.mrf.mxu0  ;;  %v3951_v31 = vld [vmem:[#allocation7 + $0xe8] sm:$0xff] }
 0x1e0   : > { %17021 = vst [vmem:[#allocation48_spill] sm:$0xff] %v13947_v13  ;;  %v10747_v6 = vpop.f32.mrf.mxu1  ;;  %11401 = vmatprep.subr.mxu0 %v3951_v31 }
 0x1e1   : > { %17020 = vst [vmem:[#allocation47_spill] sm:$0xff] %v13945_v40  ;;  %v1591_v27 = vadd.f32 %v10747_v6, %v13828_v2  ;;  %v10827_v61 = vpop.f32.mrf.mxu0  ;;  %11402 = vmatpush3.msra.mxu0 %v3951_v31  ;;  %v3950_v6 = vld [vmem:[#allocation7 + $0xe0] sm:$0xff] }
 0x1e2   : > { %v13950_v49 = vpop.f32.mrf.mxu1  ;;  %11403 = vmatprep.subr.mxu0 %v3950_v6 }
 0x1e3   : > { %17022 = vst [vmem:[#allocation49_spill] sm:$0xff] %v13950_v49  ;;  %v13952_v28 = vadd.f32 %v10827_v61, %v1591_v27  ;;  %v13954_v8 = vpop.f32.mrf.mxu0  ;;  %11404 = vmatpush3.msra.mxu0 %v3950_v6 }
 0x1e4   : > { %17024 = vst [vmem:[#allocation51_spill] sm:$0xff] %v13954_v8  ;;  %v10750_v12 = vpop.f32.mrf.mxu1 }
 0x1e5   : > { %17023 = vst [vmem:[#allocation50_spill] sm:$0xff] %v13952_v28  ;;  %v1593_v58 = vadd.f32 %v10750_v12, %v13839_v39  ;;  %v10830_v40 = vpop.f32.mrf.mxu0  ;;  %v3949_v28 = vld [vmem:[#allocation7 + $0xd8] sm:$0xff]  ;;  %v3948_v12 = vld [vmem:[#allocation7 + $0xd0] sm:$0xff] }
 0x1e6   : > { %v13957_v13 = vpop.f32.mrf.mxu1  ;;  %11405 = vmatprep.subr.mxu0 %v3949_v28 }
 0x1e7   : > { %17025 = vst [vmem:[#allocation52_spill] sm:$0xff] %v13957_v13  ;;  %v13959_v2 = vadd.f32 %v10830_v40, %v1593_v58  ;;  %v13961_v61 = vpop.f32.mrf.mxu0  ;;  %11406 = vmatpush3.msra.mxu0 %v3949_v28 }
 0x1e8   : > { %17027 = vst [vmem:[#allocation54_spill] sm:$0xff] %v13961_v61  ;;  %v10753_v27 = vpop.f32.mrf.mxu1  ;;  %11407 = vmatprep.subr.mxu0 %v3948_v12 }
 0x1e9   : > { %17026 = vst [vmem:[#allocation53_spill] sm:$0xff] %v13959_v2  ;;  %v1595_v26 = vadd.f32 %v10753_v27, %v13847_v57  ;;  %v10833_v8 = vpop.f32.mrf.mxu0  ;;  %11408 = vmatpush3.msra.mxu0 %v3948_v12  ;;  %v3947_v2 = vld [vmem:[#allocation7 + $0xc8] sm:$0xff]  ;;  %v3946_v27 = vld [vmem:[#allocation7 + $0xc0] sm:$0xff]  ;;  %v3944_v12 = vld [vmem:[#allocation7 + $0xb0] sm:$0xff] }
 0x1ea   : > { %v13964_v39 = vpop.f32.mrf.mxu1  ;;  %11409 = vmatprep.subr.mxu0 %v3947_v2 }
 0x1eb   : > { %17028 = vst [vmem:[#allocation55_spill] sm:$0xff] %v13964_v39  ;;  %v13966_v48 = vadd.f32 %v10833_v8, %v1595_v26  ;;  %v13968_v40 = vpop.f32.mrf.mxu0  ;;  %11410 = vmatpush3.msra.mxu0 %v3947_v2  ;;  %v3945_v26 = vld [vmem:[#allocation7 + $0xb8] sm:$0xff]  ;;  %v3943_v2 = vld [vmem:[#allocation7 + $0xa8] sm:$0xff] }
 0x1ec   : > { %17030 = vst [vmem:[#allocation57_spill] sm:$0xff] %v13968_v40  ;;  %v10756_v58 = vpop.f32.mrf.mxu1  ;;  %11411 = vmatprep.subr.mxu0 %v3946_v27  ;;  %v3940_v40 = vld [vmem:[#allocation7 + $0x90] sm:$0xff] }
 0x1ed   : > { %17029 = vst [vmem:[#allocation56_spill] sm:$0xff] %v13966_v48  ;;  %v1597_v31 = vadd.f32 %v10756_v58, %v13854_v45  ;;  %v10836_v61 = vpop.f32.mrf.mxu0  ;;  %11412 = vmatpush3.msra.mxu0 %v3946_v27  ;;  %v3942_v27 = vld [vmem:[#allocation7 + $0xa0] sm:$0xff] }
 0x1ee   : > { %v13971_v57 = vpop.f32.mrf.mxu1  ;;  %11413 = vmatprep.subr.mxu0 %v3945_v26 }
 0x1ef   : > { %17031 = vst [vmem:[#allocation58_spill] sm:$0xff] %v13971_v57  ;;  %v13973_v6 = vadd.f32 %v10836_v61, %v1597_v31  ;;  %v13975_v8 = vpop.f32.mrf.mxu0  ;;  %11414 = vmatpush3.msra.mxu0 %v3945_v26  ;;  %v3941_v26 = vld [vmem:[#allocation7 + $0x98] sm:$0xff] }
 0x1f0   : > { %17033 = vst [vmem:[#allocation60_spill] sm:$0xff] %v13975_v8  ;;  %v13977_v28 = vpop.f32.mrf.mxu1  ;;  %11415 = vmatprep.subr.mxu0 %v3944_v12 }
 0x1f1   : > { %17032 = vst [vmem:[#allocation59_spill] sm:$0xff] %v13973_v6  ;;  %v13979_v48 = vpop.f32.mrf.mxu0  ;;  %11416 = vmatpush3.msra.mxu0 %v3944_v12 }
 0x1f2   : > { %v13981_v45 = vpop.f32.mrf.mxu1  ;;  %11417 = vmatprep.subr.mxu0 %v3943_v2 }
 0x1f3   : > { %v13983_v58 = vpop.f32.mrf.mxu0  ;;  %11418 = vmatpush3.msra.mxu0 %v3943_v2  ;;  %v3939_v2 = vld [vmem:[#allocation7 + $0x88] sm:$0xff] }
 0x1f4   : > { %v13985_v61 = vpop.f32.mrf.mxu1  ;;  %11419 = vmatprep.subr.mxu0 %v3942_v27 }
 0x1f5   : > { %v13987_v31 = vpop.f32.mrf.mxu0  ;;  %11420 = vmatpush3.msra.mxu0 %v3942_v27 }
 0x1f6   : > { %v13989_v6 = vpop.f32.mrf.mxu1  ;;  %11421 = vmatprep.subr.mxu0 %v3941_v26 }
 0x1f7   : > { %v13991_v8 = vpop.f32.mrf.mxu0  ;;  %11422 = vmatpush3.msra.mxu0 %v3941_v26 }
 0x1f8   : > { %v13993_v57 = vpop.f32.mrf.mxu1  ;;  %11423 = vmatprep.subr.mxu0 %v3940_v40 }
 0x1f9   : > { %v13995_v39 = vpop.f32.mrf.mxu0  ;;  %11424 = vmatpush3.msra.mxu0 %v3940_v40 }
 0x1fa   : > { %v13997_v13 = vpop.f32.mrf.mxu1  ;;  %11425 = vmatprep.subr.mxu0 %v3939_v2 }
 0x1fb   : > { %v13999_v12 = vpop.f32.mrf.mxu0  ;;  %11426 = vmatpush3.msra.mxu0 %v3939_v2 }
 0x1fc   : > { %v14001_v49 = vpop.f32.mrf.mxu1  ;;  %11427 = vmatprep.subr.mxu0 %v3938_v54 }
 0x1fd   : > { %v14003_v33 = vpop.f32.mrf.mxu0  ;;  %11428 = vmatpush3.msra.mxu0 %v3938_v54 }
 0x1fe   : > { %v14005_v56 = vpop.f32.mrf.mxu1 }
 0x1ff   : > { %v14007_v27 = vpop.f32.mrf.mxu0 }
 0x200   : > { %v14009_v51 = vpop.f32.mrf.mxu1 }
 0x201   : > { %v14011_v26 = vpop.f32.mrf.mxu0 }
 0x202   : > { %v14013_v5 = vpop.f32.mrf.mxu1 }
 0x203   : > { %v14015_v15 = vpop.f32.mrf.mxu0 }
 0x204   : > { %17034 = vst [vmem:[#allocation61_spill] sm:$0xff] %v14015_v15  ;;  %v14017_v40 = vpop.f32.mrf.mxu1 }
 0x205   : > { %17035 = vst [vmem:[#allocation62_spill] sm:$0xff] %v14017_v40  ;;  %v14019_v9 = vpop.f32.mrf.mxu0 }
 0x206   : > { %17036 = vst [vmem:[#allocation63_spill] sm:$0xff] %v14019_v9  ;;  %v14021_v63 = vpop.f32.mrf.mxu1 }
 0x207   : > { %17037 = vst [vmem:[#allocation64_spill] sm:$0xff] %v14021_v63  ;;  %v14023_v19 = vpop.f32.mrf.mxu0 }
 0x208   : > { %17038 = vst [vmem:[#allocation65_spill] sm:$0xff] %v14023_v19  ;;  %v14025_v2 = vpop.f32.mrf.mxu1 }
 0x209   : > { %17039 = vst [vmem:[#allocation66_spill] sm:$0xff] %v14025_v2  ;;  %v14027_v59 = vpop.f32.mrf.mxu0 }
 0x20a   : > { %17040 = vst [vmem:[#allocation67_spill] sm:$0xff] %v14027_v59  ;;  %v14029_v44 = vpop.f32.mrf.mxu1 }
 0x20b   : > { %17041 = vst [vmem:[#allocation68_spill] sm:$0xff] %v14029_v44  ;;  %v14031_v54 = vpop.f32.mrf.mxu0 }
 0x20c   : > { %17042 = vst [vmem:[#allocation69_spill] sm:$0xff] %v14031_v54  ;;  %v14033_v16 = vpop.f32.mrf.mxu1 }
 0x20d   : > { %17043 = vst [vmem:[#allocation70_spill] sm:$0xff] %v14033_v16  ;;  %v14035_v21 = vpop.f32.mrf.mxu0 }
 0x20e   : > { %17044 = vst [vmem:[#allocation71_spill] sm:$0xff] %v14035_v21  ;;  %v14037_v15 = vpop.f32.mrf.mxu1 }
 0x20f   : > { %17045 = vst [vmem:[#allocation72_spill] sm:$0xff] %v14037_v15  ;;  %v14039_v40 = vpop.f32.mrf.mxu0 }
 0x210   : > { %17046 = vst [vmem:[#allocation73_spill] sm:$0xff] %v14039_v40  ;;  %v14041_v9 = vpop.f32.mrf.mxu1 }
 0x211   : > { %17047 = vst [vmem:[#allocation74_spill] sm:$0xff] %v14041_v9  ;;  %v14043_v63 = vpop.f32.mrf.mxu0 }
 0x212   : > { %17048 = vst [vmem:[#allocation75_spill] sm:$0xff] %v14043_v63  ;;  %v14045_v19 = vpop.f32.mrf.mxu1 }
 0x213   : > { %17049 = vst [vmem:[#allocation76_spill] sm:$0xff] %v14045_v19  ;;  %v14047_v2 = vpop.f32.mrf.mxu0 }
 0x214   : > { %17050 = vst [vmem:[#allocation77_spill] sm:$0xff] %v14047_v2  ;;  %v14049_v59 = vpop.f32.mrf.mxu1 }
 0x215   : > { %17051 = vst [vmem:[#allocation78_spill] sm:$0xff] %v14049_v59  ;;  %v14051_v44 = vpop.f32.mrf.mxu0 }
 0x216   : > { %17052 = vst [vmem:[#allocation79_spill] sm:$0xff] %v14051_v44  ;;  %v14053_v54 = vpop.f32.mrf.mxu1 }
 0x217   : > { %17053 = vst [vmem:[#allocation80_spill] sm:$0xff] %v14053_v54  ;;  %v14055_v16 = vpop.f32.mrf.mxu0  ;;  %v14075_v54 = vld [vmem:[#allocation7 + $0x3f8] sm:$0xff] }
 0x218   : > { %17054 = vst [vmem:[#allocation81_spill] sm:$0xff] %v14055_v16  ;;  %v14057_v21 = vpop.f32.mrf.mxu1  ;;  %17063 = vst [vmem:[#allocation90_spill] sm:$0xff] %v14075_v54  ;;  %11557 = vmatprep.subr.mxu0 %v14075_v54 }
 0x219   : > { %v14059_v15 = vpop.f32.mrf.mxu0 }
 0x21a   : > { %17055 = vst [vmem:[#allocation82_spill] sm:$0xff] %v14059_v15  ;;  %v14061_v40 = vpop.f32.mrf.mxu1 }
 0x21b   : > { %17056 = vst [vmem:[#allocation83_spill] sm:$0xff] %v14061_v40  ;;  %v14063_v9 = vpop.f32.mrf.mxu0 }
 0x21c   : > { %17057 = vst [vmem:[#allocation84_spill] sm:$0xff] %v14063_v9  ;;  %v14065_v63 = vpop.f32.mrf.mxu1 }
 0x21d   : > { %17058 = vst [vmem:[#allocation85_spill] sm:$0xff] %v14065_v63  ;;  %v14067_v19 = vpop.f32.mrf.mxu0 }
 0x21e   : > { %17059 = vst [vmem:[#allocation86_spill] sm:$0xff] %v14067_v19  ;;  %v14069_v2 = vpop.f32.mrf.mxu1 }
 0x21f   : > { %17060 = vst [vmem:[#allocation87_spill] sm:$0xff] %v14069_v2  ;;  %v14071_v59 = vpop.f32.mrf.mxu0 }
 0x220   : > { %17061 = vst [vmem:[#allocation88_spill] sm:$0xff] %v14071_v59  ;;  %v14073_v44 = vpop.f32.mrf.mxu1  ;;  %v1566_v59 = vadd.f32 %v13859_v52, %v13707_v30  ;;  %v1570_v52 = vadd.f32 %v13876_v36, %v13727_v38  ;;  %v1572_v36 = vadd.f32 %v13883_v17, %v13737_v42  ;;  %v946_v42 = vadd.f32 %v13793_v37, %v13572_v3 }
 0x221   : > { %17062 = vst [vmem:[#allocation89_spill] sm:$0xff] %v14073_v44  ;;  %v14078_v16 = vpop.f32.mrf.mxu0  ;;  %v2121_v3 = vadd.f32 %v14001_v49, %v13885_v47 }
 0x222   : > { %17064 = vst [vmem:[#allocation91_spill] sm:$0xff] %v14078_v16  ;;  %v14080_v15 = vpop.f32.mrf.mxu1  ;;  %v1844_v38 = vadd.f32 %v13880_v18, %v1570_v52  ;;  %v936_v18 = vadd.f32 %v13782_v0, %v13555_v43 }
 0x223   : > { %17065 = vst [vmem:[#allocation92_spill] sm:$0xff] %v14080_v15  ;;  %v14082_v40 = vpop.f32.mrf.mxu0  ;;  %v1840_v15 = vadd.f32 %v13863_v46, %v1566_v59 }
 0x224   : > { %17066 = vst [vmem:[#allocation93_spill] sm:$0xff] %v14082_v40  ;;  %v14084_v9 = vpop.f32.mrf.mxu1  ;;  %v1568_v40 = vadd.f32 %v13869_v14, %v13717_v34  ;;  %v2118_v17 = vadd.f32 %v13997_v13, %v1844_v38 }
 0x225   : > { %17067 = vst [vmem:[#allocation94_spill] sm:$0xff] %v14084_v9  ;;  %v14086_v63 = vpop.f32.mrf.mxu0  ;;  %v2114_v30 = vadd.f32 %v13981_v45, %v1840_v15 }
 0x226   : > { %17068 = vst [vmem:[#allocation95_spill] sm:$0xff] %v14086_v63  ;;  %v14088_v19 = vpop.f32.mrf.mxu1  ;;  %v2115_v63 = vadd.f32 %v13977_v28, %v13861_v24  ;;  %v1842_v46 = vadd.f32 %v13873_v20, %v1568_v40  ;;  %v2117_v24 = vadd.f32 %v13985_v61, %v13871_v10  ;;  %v2119_v20 = vadd.f32 %v13993_v57, %v13878_v32  ;;  %v14132_v10 = vld [vmem:[%s16922_s4] ss:$0 sm:$0xff] }
 0x227   : > { %17069 = vst [vmem:[#allocation96_spill] sm:$0xff] %v14088_v19  ;;  %v14092_v44 = vpop.f32.mrf.mxu0  ;;  %v2424_v28 = vadd.f32 %v13983_v58, %v2114_v30 }
 0x228   : > { %v14094_v2 = vpop.f32.mrf.mxu1  ;;  %v2425_v34 = vadd.f32 %v13979_v48, %v2115_v63  ;;  %v2116_v15 = vadd.f32 %v13989_v6, %v1842_v46  ;;  %v2427_v58 = vadd.f32 %v13987_v31, %v2117_v24  ;;  %v1846_v31 = vadd.f32 %v13887_v22, %v1572_v36 }
 0x229   : > { %v14096_v54 = vpop.f32.mrf.mxu0  ;;  %v2429_v43 = vadd.f32 %v13995_v39, %v2119_v20  ;;  %v14158_v22 = vadd.f32 %v13798_v1, %v946_v42  ;;  %v1576_v1 = vadd.f32 %v13897_v29, %v13757_v50  ;;  %v956_v50 = vadd.f32 %v13804_v35, %v13592_v60  ;;  %v17072_v29 = vld [vmem:[#allocation14_spill] sm:$0xff] }
 0x22a   : > { %17070 = vst [vmem:[#allocation97_spill] sm:$0xff] %v14096_v54  ;;  %v14098_v16 = vpop.f32.mrf.mxu1  ;;  %v2426_v40 = vadd.f32 %v13991_v8, %v2116_v15  ;;  %v1578_v35 = vadd.f32 %v13905_v11, %v13767_v25  ;;  %v17076_v25 = vld [vmem:[#allocation21_spill] sm:$0xff] }
 0x22b   : > { %17071 = vst [vmem:[#allocation98_spill] sm:$0xff] %v14098_v16  ;;  %v14105_v19 = vpop.f32.mrf.mxu0  ;;  %v1850_v60 = vadd.f32 %v13902_v62, %v1576_v1  ;;  %v17080_v1 = vld [vmem:[#allocation19_spill] sm:$0xff] }
 0x22c   : > { %v14107_v9 = vpop.f32.mrf.mxu1 }
 0x22d   : > { %v14112_v54 = vpop.f32.mrf.mxu0 }
 0x22e   : > { %v14114_v16 = vpop.f32.mrf.mxu1 }
 0x22f   : > { %v14120_v14 = vpop.f32.mrf.mxu0 }
 0x230   : > { %v11031_v59 = vpop.f32.mrf.mxu1 }
 0x231   : > { %v2699_v45 = vadd.f32 %v11031_v59, %v2425_v34  ;;  %v11111_v63 = vpop.f32.mrf.mxu0  ;;  %v1574_v34 = vadd.f32 %v13890_v23, %v13747_v41  ;;  %v2428_v41 = vadd.f32 %v13999_v12, %v2118_v17  ;;  %v2120_v23 = vadd.f32 %v14005_v56, %v1846_v31 }
 0x232   : > { %v2539_v48 = vpop.f32.mrf.mxu1  ;;  %v2431_v12 = vadd.f32 %v14003_v33, %v2121_v3  ;;  %v2123_v56 = vadd.f32 %v14009_v51, %v13892_v7  ;;  %v966_v33 = vadd.f32 %v13815_v55, %v17072_v29 }
 0x233   : > { %v2973_v61 = vadd.f32 %v11111_v63, %v2699_v45  ;;  %v2698_v6 = vadd.f32 %v2539_v48, %v2424_v28  ;;  %v2813_v32 = vpop.f32.mrf.mxu0  ;;  %v14155_v28 = vadd.f32 %v13787_v53, %v936_v18  ;;  %v1848_v38 = vadd.f32 %v13894_v4, %v1574_v34 }
 0x234   : > { %v11034_v57 = vpop.f32.mrf.mxu1  ;;  %v2430_v7 = vadd.f32 %v14007_v27, %v2120_v23  ;;  %v2433_v55 = vadd.f32 %v14011_v26, %v2123_v56  ;;  %v17074_v27 = vld [vmem:[#allocation62_spill] sm:$0xff]  ;;  %v14208_v11 = vadd.f32 %v17076_v25, %v966_v33  ;;  %v17077_v26 = vld [vmem:[#allocation61_spill] sm:$0xff] }
 0x235   : > { %v14142_v30 = vadd.f32 %v14132_v10, %v2973_v61  ;;  %v2972_v52 = vadd.f32 %v2813_v32, %v2698_v6  ;;  %v2701_v46 = vadd.f32 %v11034_v57, %v2427_v58  ;;  %v11114_v0 = vpop.f32.mrf.mxu0  ;;  %v2122_v51 = vadd.f32 %v14013_v5, %v1848_v38  ;;  %v17073_v5 = vld [vmem:[#allocation30_spill] sm:$0xff] }
 0x236   : > { %v2549_v37 = vpop.f32.mrf.mxu1  ;;  %v2125_v57 = vadd.f32 %v17074_v27, %v17073_v5  ;;  %v17087_v27 = vld [vmem:[#allocation65_spill] sm:$0xff] }
 0x237   : > { %v16937_v13 = vmax.f32 %v14142_v30, 0.0  ;;  %v14152_v8 = vadd.f32 %v14132_v10, %v2972_v52  ;;  %v2975_v24 = vadd.f32 %v11114_v0, %v2701_v46  ;;  %v2700_v59 = vadd.f32 %v2549_v37, %v2426_v40  ;;  %v2823_v47 = vpop.f32.mrf.mxu0  ;;  %v17078_v37 = vld [vmem:[#allocation64_spill] sm:$0xff] }
 0x238   : > { %v11037_v49 = vpop.f32.mrf.mxu1  ;;  %v2432_v0 = vadd.f32 %v17077_v26, %v2122_v51 }
 0x239   : > { %3077 = vst [vmem:[#allocation3 + $0x21] sm:$0xff] %v16937_v13  ;;  %v16938_v39 = vmax.f32 %v14152_v8, 0.0  ;;  %v14166_v15 = vadd.f32 %v14132_v10, %v2975_v24  ;;  %v2974_v45 = vadd.f32 %v2823_v47, %v2700_v59  ;;  %v2703_v53 = vadd.f32 %v11037_v49, %v2429_v43  ;;  %v11117_v36 = vpop.f32.mrf.mxu0  ;;  %v17075_v43 = vld [vmem:[#allocation20_spill] sm:$0xff] }
 0x23a   : > { %v2559_v20 = vpop.f32.mrf.mxu1  ;;  %v14205_v3 = vadd.f32 %v17075_v43, %v956_v50  ;;  %v2124_v24 = vadd.f32 %v17078_v37, %v1850_v60  ;;  %v3642_v60 = vld [vmem:[#allocation7 + $0x370] sm:$0xff] }
 0x23b   : > { %3076 = vst [vmem:[#allocation3 + $0x19] sm:$0xff] %v16938_v39  ;;  %v16935_v63 = vmax.f32 %v14166_v15, 0.0  ;;  %v14178_v48 = vadd.f32 %v14132_v10, %v2974_v45  ;;  %v2977_v58 = vadd.f32 %v11117_v36, %v2703_v53  ;;  %v2702_v4 = vadd.f32 %v2559_v20, %v2428_v41  ;;  %v2833_v61 = vpop.f32.mrf.mxu0  ;;  %v17079_v53 = vld [vmem:[#allocation33_spill] sm:$0xff]  ;;  %v17082_v36 = vld [vmem:[#allocation63_spill] sm:$0xff]  ;;  %v17089_v37 = vld [vmem:[#allocation32_spill] sm:$0xff] }
 0x23c   : > { %v11040_v6 = vpop.f32.mrf.mxu1  ;;  %v1852_v38 = vadd.f32 %v17079_v53, %v1578_v35  ;;  %v2435_v20 = vadd.f32 %v17082_v36, %v2125_v57  ;;  %v17085_v35 = vld [vmem:[#allocation15_spill] sm:$0xff]  ;;  %v2434_v57 = vadd.f32 %v17087_v27, %v2124_v24 }
 0x23d   : > { %3079 = vst [vmem:[#allocation3 + $0x39] sm:$0xff] %v16935_v63  ;;  %v16936_v18 = vmax.f32 %v14178_v48, 0.0  ;;  %v14190_v42 = vadd.f32 %v14132_v10, %v2977_v58  ;;  %v2976_v17 = vadd.f32 %v2833_v61, %v2702_v4  ;;  %v2705_v32 = vadd.f32 %v11040_v6, %v2431_v12  ;;  %v11120_v40 = vpop.f32.mrf.mxu0  ;;  %v17081_v12 = vld [vmem:[#allocation34_spill] sm:$0xff]  ;;  %v17083_v58 = vld [vmem:[#allocation31_spill] sm:$0xff] }
 0x23e   : > { %v2569_v52 = vpop.f32.mrf.mxu1  ;;  %v1580_v56 = vadd.f32 %v17081_v12, %v17080_v1  ;;  %v17084_v4 = vld [vmem:[#allocation66_spill] sm:$0xff] }
 0x23f   : > { %3078 = vst [vmem:[#allocation3 + $0x31] sm:$0xff] %v16936_v18  ;;  %v16933_v46 = vmax.f32 %v14190_v42, 0.0  ;;  %v14202_v31 = vadd.f32 %v14132_v10, %v2976_v17  ;;  %v2979_v34 = vadd.f32 %v11120_v40, %v2705_v32  ;;  %v2704_v62 = vadd.f32 %v2569_v52, %v2430_v7  ;;  %v2843_v59 = vpop.f32.mrf.mxu0  ;;  %v17088_v40 = vld [vmem:[#allocation68_spill] sm:$0xff]  ;;  %v17094_v1 = vld [vmem:[#allocation70_spill] sm:$0xff] }
 0x240   : > { %v11043_v41 = vpop.f32.mrf.mxu1  ;;  %v2127_v50 = vadd.f32 %v17084_v4, %v17083_v58  ;;  %v2126_v52 = vadd.f32 %v17088_v40, %v1852_v38  ;;  %v17093_v38 = vld [vmem:[#allocation35_spill] sm:$0xff] }
 0x241   : > { %3081 = vst [vmem:[#allocation3 + $0x51] sm:$0xff] %v16933_v46  ;;  %v16934_v23 = vmax.f32 %v14202_v31, 0.0  ;;  %v14216_v47 = vadd.f32 %v14132_v10, %v2979_v34  ;;  %v2978_v49 = vadd.f32 %v2843_v59, %v2704_v62  ;;  %v2707_v45 = vadd.f32 %v11043_v41, %v2433_v55  ;;  %v11123_v29 = vpop.f32.mrf.mxu0  ;;  %v17086_v55 = vld [vmem:[#allocation22_spill] sm:$0xff]  ;;  %v17090_v59 = vld [vmem:[#allocation36_spill] sm:$0xff]  ;;  %v17091_v41 = vld [vmem:[#allocation37_spill] sm:$0xff] }
 0x242   : > { %v2579_v33 = vpop.f32.mrf.mxu1  ;;  %v3110_v7 = vld [vmem:[#allocation3 + $0x18] sm:$0xff]  ;;  %v3111_v51 = vld [vmem:[#allocation3 + $0x20] sm:$0xff]  ;;  %v976_v5 = vadd.f32 %v17086_v55, %v17085_v35  ;;  %v1854_v24 = vadd.f32 %v17090_v59, %v1580_v56  ;;  %v2129_v12 = vadd.f32 %v17094_v1, %v17093_v38 }
 0x243   : > { %3080 = vst [vmem:[#allocation3 + $0x49] sm:$0xff] %v16934_v23  ;;  %v16931_v61 = vmax.f32 %v14216_v47, 0.0  ;;  %v14228_v6 = vadd.f32 %v14132_v10, %v2978_v49  ;;  %v2981_v17 = vadd.f32 %v11123_v29, %v2707_v45  ;;  %v2706_v32 = vadd.f32 %v2579_v33, %v2432_v0  ;;  %11189 = vmatprep.mubr.f32.mxu1 %v3110_v7  ;;  %v2853_v34 = vpop.f32.mrf.mxu0  ;;  %v17092_v45 = vld [vmem:[#allocation67_spill] sm:$0xff]  ;;  %v17097_v35 = vld [vmem:[#allocation72_spill] sm:$0xff] }
 0x244   : > { %11272 = vmatprep.mubr.f32.mxu0 %v3110_v7  ;;  %v11046_v62 = vpop.f32.mrf.mxu1  ;;  %11190 = vmatmul.mubr.f32.vlgmr.msra.gmra.mxu1 %v3111_v51  ;;  %v1582_v49 = vadd.f32 %v17091_v41, %v14155_v28  ;;  %v2437_v53 = vadd.f32 %v17092_v45, %v2127_v50  ;;  %v3641_v50 = vld [vmem:[#allocation7 + $0x368] sm:$0xff]  ;;  %v2128_v55 = vadd.f32 %v17097_v35, %v1854_v24  ;;  %v17101_v41 = vld [vmem:[#allocation38_spill] sm:$0xff] }
 0x245   : > { %11273 = vmatmul.mubr.f32.gmra.mxu0 %v3111_v51  ;;  %3083 = vst [vmem:[#allocation3 + $0x69] sm:$0xff] %v16931_v61  ;;  %v16932_v43 = vmax.f32 %v14228_v6, 0.0  ;;  %v14238_v25 = vadd.f32 %v14132_v10, %v2981_v17  ;;  %v2980_v26 = vadd.f32 %v2853_v34, %v2706_v32  ;;  %v2709_v0 = vadd.f32 %v11046_v62, %v2435_v20  ;;  %v11126_v36 = vpop.f32.mrf.mxu0  ;;  %v17095_v7 = vld [vmem:[#allocation23_spill] sm:$0xff]  ;;  %v17096_v17 = vld [vmem:[#allocation69_spill] sm:$0xff]  ;;  %v17102_v45 = vld [vmem:[#allocation74_spill] sm:$0xff] }
 0x246   : > { %11318 = vmatpush3.msra.mxu1 %v17089_v37  ;;  %v2589_v58 = vpop.f32.mrf.mxu1  ;;  %v14247_v4 = vld [vmem:[#allocation3 + $0x30] sm:$0xff]  ;;  %v14249_v29 = vld [vmem:[#allocation3 + $0x38] sm:$0xff]  ;;  %v14258_v51 = vadd.f32 %v17095_v7, %v976_v5  ;;  %v2436_v32 = vadd.f32 %v17096_v17, %v2126_v52  ;;  %v2131_v38 = vadd.f32 %v17102_v45, %v17101_v41  ;;  %v17105_v17 = vld [vmem:[#allocation73_spill] sm:$0xff] }
 0x247   : > { %11319 = vmatprep.subr.mxu1 %v3642_v60  ;;  %3082 = vst [vmem:[#allocation3 + $0x61] sm:$0xff] %v16932_v43  ;;  %v16930_v56 = vmax.f32 %v14238_v25, 0.0  ;;  %v3019_v20 = vadd.f32 %v14132_v10, %v2980_v26  ;;  %v2983_v28 = vadd.f32 %v11126_v36, %v2709_v0  ;;  %v2708_v33 = vadd.f32 %v2589_v58, %v2434_v57  ;;  %v2863_v27 = vpop.f32.mrf.mxu0  ;;  %v17098_v26 = vld [vmem:[#allocation39_spill] sm:$0xff]  ;;  %v17099_v0 = vld [vmem:[#allocation40_spill] sm:$0xff] }
 0x248   : > { %11192 = vmatprep.mubr.f32.mxu1 %v14247_v4  ;;  %11275 = vmatprep.mubr.f32.mxu0 %v14247_v4  ;;  %v11049_v40 = vpop.f32.mrf.mxu1  ;;  %v1856_v52 = vadd.f32 %v17098_v26, %v1582_v49  ;;  %v1584_v37 = vadd.f32 %v17099_v0, %v14158_v22  ;;  %v17100_v59 = vld [vmem:[#allocation71_spill] sm:$0xff]  ;;  %v2438_v35 = vadd.f32 %v17105_v17, %v2128_v55 }
 0x249   : > { %11193 = vmatmul.mubr.f32.gmra.mxu1 %v14249_v29  ;;  %11276 = vmatmul.mubr.f32.gmra.mxu0 %v14249_v29  ;;  %3085 = vst [vmem:[#allocation3 + $0x81] sm:$0xff] %v16930_v56  ;;  %v14266_v57 = vmax.f32 %v3019_v20, 0.0  ;;  %v3022_v34 = vadd.f32 %v14132_v10, %v2983_v28  ;;  %v2982_v62 = vadd.f32 %v2863_v27, %v2708_v33  ;;  %v11129_v1 = vpop.f32.mrf.mxu0  ;;  %v17103_v28 = vld [vmem:[#allocation16_spill] sm:$0xff]  ;;  %v17108_v55 = vld [vmem:[#allocation43_spill] sm:$0xff] }
 0x24a   : > { %v2711_v5 = vadd.f32 %v11049_v40, %v2437_v53  ;;  %11320 = vmatpush3.msra.mxu1 %v3642_v60  ;;  %v2439_v24 = vadd.f32 %v17100_v59, %v2129_v12  ;;  %v2599_v36 = vpop.f32.mrf.mxu1  ;;  %v14275_v58 = vld [vmem:[#allocation3 + $0x48] sm:$0xff]  ;;  %v14277_v20 = vld [vmem:[#allocation3 + $0x50] sm:$0xff]  ;;  %v17104_v33 = vld [vmem:[#allocation24_spill] sm:$0xff] }
 0x24b   : > { %11321 = vmatprep.subr.mxu1 %v3641_v50  ;;  %3084 = vst [vmem:[#allocation3 + $0x79] sm:$0xff] %v14266_v57  ;;  %v14280_v60 = vmax.f32 %v3022_v34, 0.0  ;;  %v3021_v49 = vadd.f32 %v14132_v10, %v2982_v62  ;;  %v2710_v22 = vadd.f32 %v2599_v36, %v2436_v32  ;;  %11195 = vmatprep.mubr.f32.mxu1 %v14275_v58  ;;  %v3640_v12 = vld [vmem:[#allocation7 + $0x360] sm:$0xff]  ;;  %v17106_v27 = vld [vmem:[#allocation76_spill] sm:$0xff]  ;;  %v2873_v26 = vpop.f32.mrf.mxu0  ;;  %v17109_v45 = vld [vmem:[#allocation75_spill] sm:$0xff] }
 0x24c   : > { %v2985_v53 = vadd.f32 %v11129_v1, %v2711_v5  ;;  %11278 = vmatprep.mubr.f32.mxu0 %v14275_v58  ;;  %v986_v7 = vadd.f32 %v17104_v33, %v17103_v28  ;;  %v2130_v40 = vadd.f32 %v17106_v27, %v1856_v52  ;;  %v11052_v0 = vpop.f32.mrf.mxu1  ;;  %11322 = vmatpush3.msra.mxu1 %v3641_v50  ;;  %v17107_v59 = vld [vmem:[#allocation42_spill] sm:$0xff]  ;;  %v17110_v36 = vld [vmem:[#allocation41_spill] sm:$0xff] }
 0x24d   : > { %11196 = vmatmul.mubr.f32.gmra.mxu1 %v14277_v20  ;;  %11279 = vmatmul.mubr.f32.gmra.mxu0 %v14277_v20  ;;  %3087 = vst [vmem:[#allocation3 + $0x99] sm:$0xff] %v14280_v60  ;;  %v14292_v32 = vmax.f32 %v3021_v49, 0.0  ;;  %v2984_v62 = vadd.f32 %v2873_v26, %v2710_v22  ;;  %v2713_v5 = vadd.f32 %v11052_v0, %v2439_v24  ;;  %v17111_v28 = vld [vmem:[#allocation78_spill] sm:$0xff]  ;;  %v11132_v17 = vpop.f32.mrf.mxu0  ;;  %v17114_v26 = vld [vmem:[#allocation77_spill] sm:$0xff] }
 0x24e   : > { %v3024_v34 = vadd.f32 %v14132_v10, %v2985_v53  ;;  %v1858_v41 = vadd.f32 %v17107_v59, %v1584_v37  ;;  %v1586_v52 = vadd.f32 %v17108_v55, %v14205_v3  ;;  %v2441_v1 = vadd.f32 %v17109_v45, %v2131_v38  ;;  %v2609_v27 = vpop.f32.mrf.mxu1  ;;  %v14301_v56 = vld [vmem:[#allocation3 + $0x60] sm:$0xff]  ;;  %v14303_v49 = vld [vmem:[#allocation3 + $0x68] sm:$0xff]  ;;  %11323 = vmatprep.subr.mxu1 %v3640_v12 }
 0x24f   : > { %v2133_v33 = vadd.f32 %v17111_v28, %v17110_v36  ;;  %3086 = vst [vmem:[#allocation3 + $0x91] sm:$0xff] %v14292_v32  ;;  %v3023_v37 = vadd.f32 %v14132_v10, %v2984_v62  ;;  %v2987_v24 = vadd.f32 %v11132_v17, %v2713_v5  ;;  %v2712_v3 = vadd.f32 %v2609_v27, %v2438_v35  ;;  %v3639_v38 = vld [vmem:[#allocation7 + $0x358] sm:$0xff]  ;;  %v17115_v59 = vld [vmem:[#allocation80_spill] sm:$0xff]  ;;  %v2883_v45 = vpop.f32.mrf.mxu0  ;;  %v17118_v17 = vld [vmem:[#allocation79_spill] sm:$0xff] }
 0x250   : > { %v14306_v50 = vmax.f32 %v3024_v34, 0.0  ;;  %11198 = vmatprep.mubr.f32.mxu1 %v14301_v56  ;;  %11281 = vmatprep.mubr.f32.mxu0 %v14301_v56  ;;  %v17113_v53 = vld [vmem:[#allocation25_spill] sm:$0xff]  ;;  %v2440_v0 = vadd.f32 %v17114_v26, %v2130_v40  ;;  %v2132_v55 = vadd.f32 %v17115_v59, %v1858_v41  ;;  %v11055_v36 = vpop.f32.mrf.mxu1  ;;  %v17117_v40 = vld [vmem:[#allocation46_spill] sm:$0xff] }
 0x251   : > { %v14312_v22 = vadd.f32 %v17113_v53, %v986_v7  ;;  %11199 = vmatmul.mubr.f32.gmra.mxu1 %v14303_v49  ;;  %11282 = vmatmul.mubr.f32.gmra.mxu0 %v14303_v49  ;;  %v14319_v35 = vmax.f32 %v3023_v37, 0.0  ;;  %v3026_v34 = vadd.f32 %v14132_v10, %v2987_v24  ;;  %v2986_v62 = vadd.f32 %v2883_v45, %v2712_v3  ;;  %v17116_v7 = vld [vmem:[#allocation45_spill] sm:$0xff]  ;;  %v17119_v53 = vld [vmem:[#allocation44_spill] sm:$0xff]  ;;  %v11135_v59 = vpop.f32.mrf.mxu0  ;;  %v17122_v24 = vld [vmem:[#allocation26_spill] sm:$0xff] }
 0x252   : > { %17112 = vst [vmem:[#allocation14_spill] sm:$0xff] %v14306_v50  ;;  %3089 = vst [vmem:[#allocation3 + $0xb1] sm:$0xff] %v14306_v50  ;;  %v2715_v5 = vadd.f32 %v11055_v36, %v2441_v1  ;;  %11324 = vmatpush3.msra.mxu1 %v3640_v12  ;;  %v1860_v28 = vadd.f32 %v17116_v7, %v1586_v52  ;;  %v1588_v41 = vadd.f32 %v17117_v40, %v14208_v11  ;;  %v2619_v61 = vpop.f32.mrf.mxu1  ;;  %v14328_v43 = vld [vmem:[#allocation3 + $0x78] sm:$0xff]  ;;  %v14330_v37 = vld [vmem:[#allocation3 + $0x80] sm:$0xff] }
 0x253   : > { %v2443_v27 = vadd.f32 %v17118_v17, %v2133_v33  ;;  %v2135_v26 = vadd.f32 %v14057_v21, %v17119_v53  ;;  %11325 = vmatprep.subr.mxu1 %v3639_v38  ;;  %3088 = vst [vmem:[#allocation3 + $0xa9] sm:$0xff] %v14319_v35  ;;  %v14333_v12 = vmax.f32 %v3026_v34, 0.0  ;;  %v3025_v52 = vadd.f32 %v14132_v10, %v2986_v62  ;;  %v3638_v21 = vld [vmem:[#allocation7 + $0x350] sm:$0xff]  ;;  %v17121_v33 = vld [vmem:[#allocation17_spill] sm:$0xff]  ;;  %v17124_v7 = vld [vmem:[#allocation83_spill] sm:$0xff]  ;;  %v2893_v17 = vpop.f32.mrf.mxu0 }
 0x254   : > { %v2989_v1 = vadd.f32 %v11135_v59, %v2715_v5  ;;  %v2714_v11 = vadd.f32 %v2619_v61, %v2440_v0  ;;  %11201 = vmatprep.mubr.f32.mxu1 %v14328_v43  ;;  %11284 = vmatprep.mubr.f32.mxu0 %v14328_v43  ;;  %v996_v3 = vadd.f32 %v17122_v24, %v17121_v33  ;;  %v17123_v45 = vld [vmem:[#allocation81_spill] sm:$0xff]  ;;  %v11058_v53 = vpop.f32.mrf.mxu1  ;;  %v17126_v5 = vld [vmem:[#allocation48_spill] sm:$0xff]  ;;  %v17128_v33 = vld [vmem:[#allocation82_spill] sm:$0xff] }
 0x255   : > { %17120 = vst [vmem:[#allocation30_spill] sm:$0xff] %v14333_v12  ;;  %v2442_v36 = vadd.f32 %v17123_v45, %v2132_v55  ;;  %v2134_v40 = vadd.f32 %v17124_v7, %v1860_v28  ;;  %11202 = vmatmul.mubr.f32.gmra.mxu1 %v14330_v37  ;;  %11285 = vmatmul.mubr.f32.gmra.mxu0 %v14330_v37  ;;  %3091 = vst [vmem:[#allocation3 + $0xc9] sm:$0xff] %v14333_v12  ;;  %v14345_v61 = vmax.f32 %v3025_v52, 0.0  ;;  %v17127_v55 = vld [vmem:[#allocation49_spill] sm:$0xff]  ;;  %v17129_v45 = vld [vmem:[#allocation47_spill] sm:$0xff]  ;;  %v11138_v23 = vpop.f32.mrf.mxu0 }
 0x256   : > { %v3028_v0 = vadd.f32 %v14132_v10, %v2989_v1  ;;  %v2988_v34 = vadd.f32 %v2893_v17, %v2714_v11  ;;  %v2717_v62 = vadd.f32 %v11058_v53, %v2443_v27  ;;  %11326 = vmatpush3.msra.mxu1 %v3639_v38  ;;  %v1862_v59 = vadd.f32 %v17126_v5, %v1588_v41  ;;  %v17130_v7 = vld [vmem:[#allocation85_spill] sm:$0xff]  ;;  %v2629_v63 = vpop.f32.mrf.mxu1  ;;  %v14354_v18 = vld [vmem:[#allocation3 + $0x90] sm:$0xff]  ;;  %v14356_v52 = vld [vmem:[#allocation3 + $0x98] sm:$0xff] }
 0x257   : > { %17125 = vst [vmem:[#allocation62_spill] sm:$0xff] %v14345_v61  ;;  %v1590_v28 = vadd.f32 %v17127_v55, %v14258_v51  ;;  %v2445_v24 = vadd.f32 %v17128_v33, %v2135_v26  ;;  %v2137_v46 = vadd.f32 %v17130_v7, %v17129_v45  ;;  %11327 = vmatprep.subr.mxu1 %v3638_v21  ;;  %3090 = vst [vmem:[#allocation3 + $0xc1] sm:$0xff] %v14345_v61  ;;  %v3637_v26 = vld [vmem:[#allocation7 + $0x348] sm:$0xff]  ;;  %v17133_v17 = vld [vmem:[#allocation84_spill] sm:$0xff]  ;;  %v2903_v33 = vpop.f32.mrf.mxu0 }
 0x258   : > { %v14359_v38 = vmax.f32 %v3028_v0, 0.0  ;;  %v3027_v41 = vadd.f32 %v14132_v10, %v2988_v34  ;;  %v2991_v27 = vadd.f32 %v11138_v23, %v2717_v62  ;;  %v2716_v51 = vadd.f32 %v2629_v63, %v2442_v36  ;;  %11204 = vmatprep.mubr.f32.mxu1 %v14354_v18  ;;  %11287 = vmatprep.mubr.f32.mxu0 %v14354_v18  ;;  %v17132_v1 = vld [vmem:[#allocation27_spill] sm:$0xff]  ;;  %v11061_v45 = vpop.f32.mrf.mxu1 }
 0x259   : > { %v1284_v11 = vadd.f32 %v17132_v1, %v996_v3  ;;  %v2444_v53 = vadd.f32 %v17133_v17, %v2134_v40  ;;  %v17134_v5 = vld [vmem:[#allocation87_spill] sm:$0xff]  ;;  %11205 = vmatmul.mubr.f32.gmra.mxu1 %v14356_v52  ;;  %11288 = vmatmul.mubr.f32.gmra.mxu0 %v14356_v52  ;;  %v2719_v0 = vadd.f32 %v11061_v45, %v2445_v24  ;;  %v17137_v40 = vld [vmem:[#allocation52_spill] sm:$0xff]  ;;  %v17139_v1 = vld [vmem:[#allocation50_spill] sm:$0xff]  ;;  %v11141_v13 = vpop.f32.mrf.mxu0 }
 0x25a   : > { %17131 = vst [vmem:[#allocation20_spill] sm:$0xff] %v14359_v38  ;;  %v2136_v55 = vadd.f32 %v17134_v5, %v1862_v59  ;;  %3093 = vst [vmem:[#allocation3 + $0xe1] sm:$0xff] %v14359_v38  ;;  %v14370_v63 = vmax.f32 %v3027_v41, 0.0  ;;  %v3030_v23 = vadd.f32 %v14132_v10, %v2991_v27  ;;  %v2990_v36 = vadd.f32 %v2903_v33, %v2716_v51  ;;  %v17136_v3 = vld [vmem:[#allocation51_spill] sm:$0xff]  ;;  %v17138_v59 = vld [vmem:[#allocation86_spill] sm:$0xff]  ;;  %v2639_v39 = vpop.f32.mrf.mxu1 }
 0x25b   : > { %11328 = vmatpush3.msra.mxu1 %v3638_v21  ;;  %v1864_v34 = vadd.f32 %v17136_v3, %v1590_v28  ;;  %v1592_v62 = vadd.f32 %v17137_v40, %v14312_v22  ;;  %v2447_v7 = vadd.f32 %v17138_v59, %v2137_v46  ;;  %v17140_v17 = vld [vmem:[#allocation89_spill] sm:$0xff]  ;;  %v14381_v41 = vld [vmem:[#allocation3 + $0xb0] sm:$0xff]  ;;  %v2993_v24 = vadd.f32 %v11141_v13, %v2719_v0  ;;  %v17143_v51 = vld [vmem:[#allocation28_spill] sm:$0xff] }
 0x25c   : > { %17135 = vst [vmem:[#allocation21_spill] sm:$0xff] %v14370_v63  ;;  %v2139_v5 = vadd.f32 %v17140_v17, %v17139_v1  ;;  %v14379_v38 = vld [vmem:[#allocation3 + $0xa8] sm:$0xff]  ;;  %11329 = vmatprep.subr.mxu1 %v3637_v26  ;;  %3092 = vst [vmem:[#allocation3 + $0xd9] sm:$0xff] %v14370_v63  ;;  %v14384_v21 = vmax.f32 %v3030_v23, 0.0  ;;  %v3029_v28 = vadd.f32 %v14132_v10, %v2990_v36  ;;  %v3636_v46 = vld [vmem:[#allocation7 + $0x340] sm:$0xff]  ;;  %v2913_v1 = vpop.f32.mrf.mxu0  ;;  %v11064_v17 = vpop.f32.mrf.mxu1 }
 0x25d   : > { %v2718_v22 = vadd.f32 %v2639_v39, %v2444_v53  ;;  %11207 = vmatprep.mubr.f32.mxu1 %v14379_v38  ;;  %11290 = vmatprep.mubr.f32.mxu0 %v14379_v38  ;;  %v17142_v27 = vld [vmem:[#allocation18_spill] sm:$0xff]  ;;  %v17144_v45 = vld [vmem:[#allocation88_spill] sm:$0xff]  ;;  %v3032_v39 = vadd.f32 %v14132_v10, %v2993_v24  ;;  %v2721_v23 = vadd.f32 %v11064_v17, %v2447_v7  ;;  %v17152_v24 = vld [vmem:[#allocation29_spill] sm:$0xff] }
 0x25e   : > { %17141 = vst [vmem:[#allocation61_spill] sm:$0xff] %v14384_v21  ;;  %v1006_v33 = vadd.f32 %v17143_v51, %v17142_v27  ;;  %v2446_v3 = vadd.f32 %v17144_v45, %v2136_v55  ;;  %v17145_v40 = vld [vmem:[#allocation92_spill] sm:$0xff]  ;;  %11208 = vmatmul.mubr.f32.gmra.mxu1 %v14381_v41  ;;  %11291 = vmatmul.mubr.f32.gmra.mxu0 %v14381_v41  ;;  %3095 = vst [vmem:[#allocation3 + $0xf9] sm:$0xff] %v14384_v21  ;;  %v14396_v13 = vmax.f32 %v3029_v28, 0.0  ;;  %v17147_v36 = vld [vmem:[#allocation54_spill] sm:$0xff]  ;;  %v11144_v12 = vpop.f32.mrf.mxu0  ;;  %v2649_v61 = vpop.f32.mrf.mxu1 }
 0x25f   : > { %v2138_v59 = vadd.f32 %v17145_v40, %v1864_v34  ;;  %v2992_v53 = vadd.f32 %v2913_v1, %v2718_v22  ;;  %11330 = vmatpush3.msra.mxu1 %v3637_v26  ;;  %v1866_v0 = vadd.f32 %v17147_v36, %v1592_v62  ;;  %v17148_v55 = vld [vmem:[#allocation55_spill] sm:$0xff]  ;;  %v17150_v45 = vld [vmem:[#allocation53_spill] sm:$0xff]  ;;  %v17151_v40 = vld [vmem:[#allocation94_spill] sm:$0xff]  ;;  %v14409_v7 = vmax.f32 %v3032_v39, 0.0 }
 0x260   : > { %17146 = vst [vmem:[#allocation64_spill] sm:$0xff] %v14396_v13  ;;  %v1594_v27 = vadd.f32 %v17148_v55, %v1284_v11  ;;  %v17149_v34 = vld [vmem:[#allocation91_spill] sm:$0xff]  ;;  %v2141_v63 = vadd.f32 %v17151_v40, %v17150_v45  ;;  %v14404_v50 = vld [vmem:[#allocation3 + $0xc0] sm:$0xff]  ;;  %v14406_v28 = vld [vmem:[#allocation3 + $0xc8] sm:$0xff]  ;;  %11331 = vmatprep.subr.mxu1 %v3636_v46  ;;  %v2995_v62 = vadd.f32 %v11144_v12, %v2721_v23  ;;  %v11067_v45 = vpop.f32.mrf.mxu1 }
 0x261   : > { %v2449_v51 = vadd.f32 %v17149_v34, %v2139_v5  ;;  %3094 = vst [vmem:[#allocation3 + $0xf1] sm:$0xff] %v14396_v13  ;;  %v3031_v26 = vadd.f32 %v14132_v10, %v2992_v53  ;;  %v2720_v11 = vadd.f32 %v2649_v61, %v2446_v3  ;;  %11210 = vmatprep.mubr.f32.mxu1 %v14404_v50  ;;  %v3635_v5 = vld [vmem:[#allocation7 + $0x338] sm:$0xff]  ;;  %v17154_v36 = vld [vmem:[#allocation96_spill] sm:$0xff]  ;;  %v2923_v34 = vpop.f32.mrf.mxu0  ;;  %3097 = vst [vmem:[#allocation3 + $0x111] sm:$0xff] %v14409_v7 }
 0x262   : > { %11293 = vmatprep.mubr.f32.mxu0 %v14404_v50  ;;  %v1286_v22 = vadd.f32 %v17152_v24, %v1006_v33  ;;  %v17153_v1 = vld [vmem:[#allocation93_spill] sm:$0xff]  ;;  %v2140_v55 = vadd.f32 %v17154_v36, %v1866_v0  ;;  %11211 = vmatmul.mubr.f32.gmra.mxu1 %v14406_v28  ;;  %v3034_v61 = vadd.f32 %v14132_v10, %v2995_v62  ;;  %v17157_v0 = vld [vmem:[#allocation95_spill] sm:$0xff]  ;;  %v17158_v24 = vld [vmem:[#allocation56_spill] sm:$0xff]  ;;  %v2659_v21 = vpop.f32.mrf.mxu1 }
 0x263   : > { %v2448_v17 = vadd.f32 %v17153_v1, %v2138_v59  ;;  %11294 = vmatmul.mubr.f32.gmra.mxu0 %v14406_v28  ;;  %v14420_v12 = vmax.f32 %v3031_v26, 0.0  ;;  %v2994_v3 = vadd.f32 %v2923_v34, %v2720_v11  ;;  %v2723_v39 = vadd.f32 %v11067_v45, %v2449_v51  ;;  %11332 = vmatpush3.msra.mxu1 %v3636_v46  ;;  %v17155_v33 = vld [vmem:[#allocation57_spill] sm:$0xff]  ;;  %v17156_v59 = vld [vmem:[#allocation58_spill] sm:$0xff]  ;;  %v11147_v36 = vpop.f32.mrf.mxu0  ;;  %v14428_v13 = vld [vmem:[#allocation3 + $0xd8] sm:$0xff] }
 0x264   : > { %v1868_v53 = vadd.f32 %v17155_v33, %v1594_v27  ;;  %v1596_v23 = vadd.f32 %v17156_v59, %v1286_v22  ;;  %v2451_v40 = vadd.f32 %v17157_v0, %v2141_v63  ;;  %v2143_v1 = vadd.f32 %v14094_v2, %v17158_v24  ;;  %v14430_v26 = vld [vmem:[#allocation3 + $0xe0] sm:$0xff]  ;;  %11333 = vmatprep.subr.mxu1 %v3635_v5  ;;  %v17159_v11 = vld [vmem:[#allocation98_spill] sm:$0xff]  ;;  %v11070_v45 = vpop.f32.mrf.mxu1 }
 0x265   : > { %3096 = vst [vmem:[#allocation3 + $0x109] sm:$0xff] %v14420_v12  ;;  %v14433_v51 = vmax.f32 %v3034_v61, 0.0  ;;  %v3033_v46 = vadd.f32 %v14132_v10, %v2994_v3  ;;  %v2997_v27 = vadd.f32 %v11147_v36, %v2723_v39  ;;  %v2722_v62 = vadd.f32 %v2659_v21, %v2448_v17  ;;  %11213 = vmatprep.mubr.f32.mxu1 %v14428_v13  ;;  %v3634_v2 = vld [vmem:[#allocation7 + $0x330] sm:$0xff]  ;;  %v2933_v34 = vpop.f32.mrf.mxu0 }
 0x266   : > { %11296 = vmatprep.mubr.f32.mxu0 %v14428_v13  ;;  %v2450_v63 = vadd.f32 %v14092_v44, %v2140_v55  ;;  %v2142_v22 = vadd.f32 %v17159_v11, %v1868_v53  ;;  %11214 = vmatmul.mubr.f32.gmra.mxu1 %v14430_v26  ;;  %v2725_v3 = vadd.f32 %v11070_v45, %v2451_v40  ;;  %v17160_v39 = vld [vmem:[#allocation60_spill] sm:$0xff]  ;;  %v17161_v44 = vld [vmem:[#allocation97_spill] sm:$0xff]  ;;  %v17162_v53 = vld [vmem:[#allocation59_spill] sm:$0xff]  ;;  %v2669_v24 = vpop.f32.mrf.mxu1 }
 0x267   : > { %11297 = vmatmul.mubr.f32.gmra.mxu0 %v14430_v26  ;;  %3099 = vst [vmem:[#allocation3 + $0x129] sm:$0xff] %v14433_v51  ;;  %v14443_v61 = vmax.f32 %v3033_v46, 0.0  ;;  %v3036_v21 = vadd.f32 %v14132_v10, %v2997_v27  ;;  %v2996_v17 = vadd.f32 %v2933_v34, %v2722_v62  ;;  %11334 = vmatpush3.msra.mxu1 %v3635_v5  ;;  %v11150_v0 = vpop.f32.mrf.mxu0 }
 0x268   : > { %v1870_v33 = vadd.f32 %v17160_v39, %v1596_v23  ;;  %v2453_v55 = vadd.f32 %v17161_v44, %v2143_v1  ;;  %v2145_v59 = vadd.f32 %v14107_v9, %v17162_v53  ;;  %v14450_v36 = vld [vmem:[#allocation3 + $0xf0] sm:$0xff]  ;;  %v14452_v11 = vld [vmem:[#allocation3 + $0xf8] sm:$0xff]  ;;  %11335 = vmatprep.subr.mxu1 %v3634_v2  ;;  %v2999_v40 = vadd.f32 %v11150_v0, %v2725_v3  ;;  %v11073_v34 = vpop.f32.mrf.mxu1 }
 0x269   : > { %3098 = vst [vmem:[#allocation3 + $0x121] sm:$0xff] %v14443_v61  ;;  %v14455_v46 = vmax.f32 %v3036_v21, 0.0  ;;  %v3035_v5 = vadd.f32 %v14132_v10, %v2996_v17  ;;  %v2724_v23 = vadd.f32 %v2669_v24, %v2450_v63  ;;  %11216 = vmatprep.mubr.f32.mxu1 %v14450_v36  ;;  %11299 = vmatprep.mubr.f32.mxu0 %v14450_v36  ;;  %v3633_v9 = vld [vmem:[#allocation7 + $0x328] sm:$0xff]  ;;  %v2943_v62 = vpop.f32.mrf.mxu0 }
 0x26a   : > { %v2452_v1 = vadd.f32 %v14105_v19, %v2142_v22  ;;  %v2144_v27 = vadd.f32 %v14114_v16, %v1870_v33  ;;  %11217 = vmatmul.mubr.f32.gmra.mxu1 %v14452_v11  ;;  %v3038_v63 = vadd.f32 %v14132_v10, %v2999_v40  ;;  %v2727_v17 = vadd.f32 %v11073_v34, %v2453_v55  ;;  %v2679_v22 = vpop.f32.mrf.mxu1 }
 0x26b   : > { %11300 = vmatmul.mubr.f32.gmra.mxu0 %v14452_v11  ;;  %3101 = vst [vmem:[#allocation3 + $0x141] sm:$0xff] %v14455_v46  ;;  %v14465_v45 = vmax.f32 %v3035_v5, 0.0  ;;  %v2998_v21 = vadd.f32 %v2943_v62, %v2724_v23  ;;  %11336 = vmatpush3.msra.mxu1 %v3634_v2  ;;  %v2455_v3 = vadd.f32 %v14112_v54, %v2145_v59  ;;  %v11153_v19 = vpop.f32.mrf.mxu0  ;;  %v3632_v54 = vld [vmem:[#allocation7 + $0x320] sm:$0xff] }
 0x26c   : > { %v14469_v16 = vld [vmem:[#allocation3 + $0x108] sm:$0xff]  ;;  %v14471_v39 = vld [vmem:[#allocation3 + $0x110] sm:$0xff]  ;;  %11337 = vmatprep.subr.mxu1 %v3633_v9  ;;  %v14474_v33 = vmax.f32 %v3038_v63, 0.0  ;;  %v3001_v53 = vadd.f32 %v11153_v19, %v2727_v17  ;;  %v2726_v0 = vadd.f32 %v2679_v22, %v2452_v1  ;;  %v2454_v2 = vadd.f32 %v14120_v14, %v2144_v27  ;;  %v11076_v59 = vpop.f32.mrf.mxu1 }
 0x26d   : > { %3100 = vst [vmem:[#allocation3 + $0x139] sm:$0xff] %v14465_v45  ;;  %v3037_v44 = vadd.f32 %v14132_v10, %v2998_v21  ;;  %11219 = vmatprep.mubr.f32.mxu1 %v14469_v16  ;;  %11302 = vmatprep.mubr.f32.mxu0 %v14469_v16  ;;  %v2953_v55 = vpop.f32.mrf.mxu0  ;;  %v2729_v23 = vadd.f32 %v11076_v59, %v2455_v3  ;;  %v3630_v59 = vld [vmem:[#allocation7 + $0x310] sm:$0xff] }
 0x26e   : > { %11220 = vmatmul.mubr.f32.gmra.mxu1 %v14471_v39  ;;  %3103 = vst [vmem:[#allocation3 + $0x159] sm:$0xff] %v14474_v33  ;;  %v3040_v5 = vadd.f32 %v14132_v10, %v3001_v53  ;;  %v3000_v40 = vadd.f32 %v2953_v55, %v2726_v0  ;;  %v2689_v62 = vpop.f32.mrf.mxu1 }
 0x26f   : > { %11303 = vmatmul.mubr.f32.gmra.mxu0 %v14471_v39  ;;  %v14483_v24 = vmax.f32 %v3037_v44, 0.0  ;;  %11338 = vmatpush3.msra.mxu1 %v3633_v9  ;;  %v11156_v1 = vpop.f32.mrf.mxu0  ;;  %v2728_v17 = vadd.f32 %v2689_v62, %v2454_v2  ;;  %v3631_v9 = vld [vmem:[#allocation7 + $0x318] sm:$0xff] }
 0x270   : > { %v14486_v34 = vld [vmem:[#allocation3 + $0x120] sm:$0xff]  ;;  %v14488_v14 = vld [vmem:[#allocation3 + $0x128] sm:$0xff]  ;;  %11339 = vmatprep.subr.mxu1 %v3632_v54  ;;  %v14491_v27 = vmax.f32 %v3040_v5, 0.0  ;;  %v3039_v63 = vadd.f32 %v14132_v10, %v3000_v40  ;;  %v3003_v21 = vadd.f32 %v11156_v1, %v2729_v23 }
 0x271   : > { %3102 = vst [vmem:[#allocation3 + $0x151] sm:$0xff] %v14483_v24  ;;  %11222 = vmatprep.mubr.f32.mxu1 %v14486_v34  ;;  %11305 = vmatprep.mubr.f32.mxu0 %v14486_v34  ;;  %v2963_v3 = vpop.f32.mrf.mxu0  ;;  %v3901_v62 = vld [vmem:[#allocation3 + $0x1] sm:$0xff] }
 0x272   : > { %11223 = vmatmul.mubr.f32.gmra.mxu1 %v14488_v14  ;;  %3105 = vst [vmem:[#allocation3 + $0x171] sm:$0xff] %v14491_v27  ;;  %v14499_v19 = vmax.f32 %v3039_v63, 0.0  ;;  %v3042_v22 = vadd.f32 %v14132_v10, %v3003_v21  ;;  %v3002_v44 = vadd.f32 %v2963_v3, %v2728_v17  ;;  %v3628_v63 = vld [vmem:[#allocation7 + $0x300] sm:$0xff]  ;;  %v4227_v3 = vld [vmem:[#allocation7 + $0x278] sm:$0xff] }
 0x273   : > { %11306 = vmatmul.mubr.f32.gmra.mxu0 %v14488_v14  ;;  %11340 = vmatpush3.msra.mxu1 %v3632_v54  ;;  %v3902_v21 = vld [vmem:[#allocation3 + $0x9] sm:$0xff] }
 0x274   : > { %v14502_v53 = vld [vmem:[#allocation3 + $0x138] sm:$0xff]  ;;  %v14504_v0 = vld [vmem:[#allocation3 + $0x140] sm:$0xff]  ;;  %11341 = vmatprep.subr.mxu1 %v3631_v9  ;;  %3104 = vst [vmem:[#allocation3 + $0x169] sm:$0xff] %v14499_v19  ;;  %v14507_v2 = vmax.f32 %v3042_v22, 0.0  ;;  %v3041_v55 = vadd.f32 %v14132_v10, %v3002_v44  ;;  %v17163_v44 = vmax.f32 %v14152_v8, 0.0  ;;  %v17167_v8 = vmax.f32 %v14166_v15, 0.0 }
 0x275   : > { %11225 = vmatprep.mubr.f32.mxu1 %v14502_v53  ;;  %11308 = vmatprep.mubr.f32.mxu0 %v14502_v53  ;;  %v3629_v10 = vld [vmem:[#allocation7 + $0x308] sm:$0xff]  ;;  %v4500_v22 = vld [vmem:[#allocation7 + $0x3f0] sm:$0xff]  ;;  %v17170_v15 = vmax.f32 %v14228_v6, 0.0 }
 0x276   : > { %11226 = vmatmul.mubr.f32.gmra.mxu1 %v14504_v0  ;;  %3107 = vst [vmem:[#allocation3 + $0x189] sm:$0xff] %v14507_v2  ;;  %v14515_v54 = vmax.f32 %v3041_v55, 0.0  ;;  %v17164_v55 = vld [vmem:[#allocation90_spill] sm:$0xff]  ;;  %v4222_v6 = vld [vmem:[#allocation7 + $0x250] sm:$0xff] }
 0x277   : > { %11309 = vmatmul.mubr.f32.gmra.mxu0 %v14504_v0  ;;  %11342 = vmatpush3.msra.mxu1 %v3631_v9 }
 0x278   : > { %v14517_v5 = vld [vmem:[#allocation3 + $0x150] sm:$0xff]  ;;  %v14519_v40 = vld [vmem:[#allocation3 + $0x158] sm:$0xff]  ;;  %11343 = vmatprep.subr.mxu1 %v3630_v59  ;;  %3106 = vst [vmem:[#allocation3 + $0x181] sm:$0xff] %v14515_v54 }
 0x279   : > { %11228 = vmatprep.mubr.f32.mxu1 %v14517_v5  ;;  %11311 = vmatprep.mubr.f32.mxu0 %v14517_v5 }
 0x27a   : > { %11229 = vmatmul.mubr.f32.gmra.mxu1 %v14519_v40 }
 0x27b   : > { %11312 = vmatmul.mubr.f32.gmra.mxu0 %v14519_v40  ;;  %11344 = vmatpush3.msra.mxu1 %v3630_v59  ;;  %v14526_v23 = vld [vmem:[#allocation3 + $0x168] sm:$0xff]  ;;  %v14528_v1 = vld [vmem:[#allocation3 + $0x170] sm:$0xff]  ;;  %v17165_v59 = vmax.f32 %v14142_v30, 0.0  ;;  %v17168_v30 = vmax.f32 %v14202_v31, 0.0  ;;  %v17171_v31 = vmax.f32 %v14216_v47, 0.0 }
 0x27c   : > { %11345 = vmatprep.subr.mxu1 %v3629_v10  ;;  %11231 = vmatprep.mubr.f32.mxu1 %v14526_v23  ;;  %v4494_v47 = vld [vmem:[#allocation7 + $0x3c0] sm:$0xff] }
 0x27d   : > { %11314 = vmatprep.mubr.f32.mxu0 %v14526_v23  ;;  %11346 = vmatpush3.msra.mxu1 %v3629_v10  ;;  %v4226_v10 = vld [vmem:[#allocation7 + $0x270] sm:$0xff] }
 0x27e   : > { %11232 = vmatmul.mubr.f32.gmra.mxu1 %v14528_v1  ;;  %11347 = vmatprep.subr.mxu1 %v3628_v63 }
 0x27f   : > { %11315 = vmatmul.mubr.f32.gmra.mxu0 %v14528_v1  ;;  %v14534_v17 = vld [vmem:[#allocation3 + $0x180] sm:$0xff]  ;;  %v14536_v9 = vld [vmem:[#allocation3 + $0x188] sm:$0xff]  ;;  %11348 = vmatpush3.msra.mxu1 %v3628_v63  ;;  %v17166_v63 = vmax.f32 %v14178_v48, 0.0  ;;  %v17169_v48 = vmax.f32 %v14190_v42, 0.0  ;;  %v17172_v42 = vmax.f32 %v14238_v25, 0.0  ;;  %v17173_v25 = vld [vmem:[#allocation14_spill] sm:$0xff] }
 0x280   : > { %11429 = vmatprep.mubr.f32.mxu0 %v3901_v62  ;;  %11234 = vmatprep.mubr.f32.mxu1 %v14534_v17  ;;  %v4499_v62 = vld [vmem:[#allocation7 + $0x3e8] sm:$0xff] }
 0x281   : > { %11477 = vmatprep.subr.mxu1 %v4227_v3 }
 0x282   : > { %11235 = vmatmul.mubr.f32.gmra.mxu1 %v14536_v9 }
 0x283   : > { %11430 = vmatmul.mubr.f32.vlgmr.msra.gmra.mxu0 %v3902_v21  ;;  %11349 = vmatprep.mubr.f32.mxu1 %v14247_v4  ;;  %v4225_v4 = vld [vmem:[#allocation7 + $0x268] sm:$0xff]  ;;  %v4492_v21 = vld [vmem:[#allocation7 + $0x3b0] sm:$0xff] }
 0x284   : > { %11432 = vmatprep.mubr.f32.mxu0 %v17163_v44  ;;  %11558 = vmatpush3.msra.mxu0 %v17164_v55  ;;  %v4217_v44 = vld [vmem:[#allocation7 + $0x228] sm:$0xff]  ;;  %v4490_v55 = vld [vmem:[#allocation7 + $0x3a0] sm:$0xff] }
 0x285   : > { %11559 = vmatprep.subr.mxu0 %v4500_v22 }
 0x286   : > { %11350 = vmatmul.mubr.f32.vlgmr.msra.gmra.mxu1 %v14249_v29  ;;  %11560 = vmatpush3.msra.mxu0 %v4500_v22  ;;  %v4498_v29 = vld [vmem:[#allocation7 + $0x3e0] sm:$0xff]  ;;  %v4491_v22 = vld [vmem:[#allocation7 + $0x3a8] sm:$0xff] }
 0x287   : > { %11433 = vmatmul.mubr.f32.gmra.mxu0 %v17165_v59  ;;  %11352 = vmatprep.mubr.f32.mxu1 %v14275_v58  ;;  %v4224_v58 = vld [vmem:[#allocation7 + $0x260] sm:$0xff] }
 0x288   : > { %11435 = vmatprep.mubr.f32.mxu0 %v17166_v63  ;;  %11478 = vmatpush3.msra.mxu1 %v4227_v3  ;;  %v4218_v3 = vld [vmem:[#allocation7 + $0x230] sm:$0xff]  ;;  %v12723_v59 = vld [vmem:[#allocation2] sm:$0xff] }
 0x289   : > { %11479 = vmatprep.subr.mxu1 %v4226_v10  ;;  %11561 = vmatprep.subr.mxu0 %v4499_v62  ;;  %v5084_v63 = vld [vmem:[#allocation7 + $0x2f0] sm:$0xff] }
 0x28a   : > { %11353 = vmatmul.mubr.f32.gmra.mxu1 %v14277_v20  ;;  %11562 = vmatpush3.msra.mxu0 %v4499_v62  ;;  %v4497_v20 = vld [vmem:[#allocation7 + $0x3d8] sm:$0xff]  ;;  %v12725_v62 = vld [vmem:[#allocation3 + $0x19] sm:$0xff] }
 0x28b   : > { %11436 = vmatmul.mubr.f32.gmra.mxu0 %v17167_v8  ;;  %11355 = vmatprep.mubr.f32.mxu1 %v14301_v56  ;;  %v4223_v56 = vld [vmem:[#allocation7 + $0x258] sm:$0xff] }
 0x28c   : > { %11438 = vmatprep.mubr.f32.mxu0 %v17168_v30  ;;  %11480 = vmatpush3.msra.mxu1 %v4226_v10  ;;  %v12724_v10 = vld [vmem:[#allocation3 + $0x39] sm:$0xff]  ;;  %v12727_v8 = vld [vmem:[#allocation3 + $0x21] sm:$0xff] }
 0x28d   : > { %11481 = vmatprep.subr.mxu1 %v4225_v4  ;;  %11563 = vmatprep.subr.mxu0 %v4498_v29  ;;  %v12729_v30 = vld [vmem:[#allocation3 + $0x61] sm:$0xff] }
 0x28e   : > { %11356 = vmatmul.mubr.f32.gmra.mxu1 %v14303_v49  ;;  %11564 = vmatpush3.msra.mxu0 %v4498_v29  ;;  %v4496_v49 = vld [vmem:[#allocation7 + $0x3d0] sm:$0xff] }
 0x28f   : > { %11439 = vmatmul.mubr.f32.gmra.mxu0 %v17169_v48  ;;  %11358 = vmatprep.mubr.f32.mxu1 %v14328_v43  ;;  %v4495_v43 = vld [vmem:[#allocation7 + $0x3c8] sm:$0xff]  ;;  %v4810_v29 = vld [vmem:[#allocation7 + $0x170] sm:$0xff] }
 0x290   : > { %11441 = vmatprep.mubr.f32.mxu0 %v17170_v15  ;;  %11482 = vmatpush3.msra.mxu1 %v4225_v4  ;;  %v12728_v4 = vld [vmem:[#allocation3 + $0x51] sm:$0xff] }
 0x291   : > { %11483 = vmatprep.subr.mxu1 %v4224_v58  ;;  %11565 = vmatprep.subr.mxu0 %v4497_v20  ;;  %v5083_v48 = vld [vmem:[#allocation7 + $0x2e8] sm:$0xff]  ;;  %v5082_v15 = vld [vmem:[#allocation7 + $0x2e0] sm:$0xff] }
 0x292   : > { %11359 = vmatmul.mubr.f32.gmra.mxu1 %v14330_v37  ;;  %11566 = vmatpush3.msra.mxu0 %v4497_v20  ;;  %v4220_v37 = vld [vmem:[#allocation7 + $0x240] sm:$0xff]  ;;  %v4809_v20 = vld [vmem:[#allocation7 + $0x168] sm:$0xff] }
 0x293   : > { %11442 = vmatmul.mubr.f32.gmra.mxu0 %v17171_v31  ;;  %11361 = vmatprep.mubr.f32.mxu1 %v14354_v18  ;;  %v4221_v18 = vld [vmem:[#allocation7 + $0x248] sm:$0xff]  ;;  %v12731_v31 = vld [vmem:[#allocation3 + $0x81] sm:$0xff] }
 0x294   : > { %11444 = vmatprep.mubr.f32.mxu0 %v14266_v57  ;;  %11484 = vmatpush3.msra.mxu1 %v4224_v58  ;;  %v12730_v58 = vld [vmem:[#allocation3 + $0x69] sm:$0xff] }
 0x295   : > { %11485 = vmatprep.subr.mxu1 %v4223_v56  ;;  %11567 = vmatprep.subr.mxu0 %v4496_v49 }
 0x296   : > { %11362 = vmatmul.mubr.f32.gmra.mxu1 %v14356_v52  ;;  %11568 = vmatpush3.msra.mxu0 %v4496_v49  ;;  %v4493_v52 = vld [vmem:[#allocation7 + $0x3b8] sm:$0xff] }
 0x297   : > { %11445 = vmatmul.mubr.f32.gmra.mxu0 %v17172_v42  ;;  %11364 = vmatprep.mubr.f32.mxu1 %v14379_v38  ;;  %v17174_v38 = vld [vmem:[#allocation62_spill] sm:$0xff]  ;;  %v5081_v49 = vld [vmem:[#allocation7 + $0x2d8] sm:$0xff]  ;;  %v12732_v42 = vld [vmem:[#allocation3 + $0x79] sm:$0xff] }
 0x298   : > { %11447 = vmatprep.mubr.f32.mxu0 %v14292_v32  ;;  %11486 = vmatpush3.msra.mxu1 %v4223_v56  ;;  %v4808_v56 = vld [vmem:[#allocation7 + $0x160] sm:$0xff] }
 0x299   : > { %11487 = vmatprep.subr.mxu1 %v4222_v6  ;;  %11569 = vmatprep.subr.mxu0 %v4495_v43 }
 0x29a   : > { %11365 = vmatmul.mubr.f32.gmra.mxu1 %v14381_v41  ;;  %11570 = vmatpush3.msra.mxu0 %v4495_v43  ;;  %v4219_v41 = vld [vmem:[#allocation7 + $0x238] sm:$0xff]  ;;  %v4806_v43 = vld [vmem:[#allocation7 + $0x150] sm:$0xff] }
 0x29b   : > { %11448 = vmatmul.mubr.f32.gmra.mxu0 %v14280_v60  ;;  %11367 = vmatprep.mubr.f32.mxu1 %v14404_v50  ;;  %v17175_v50 = vld [vmem:[#allocation30_spill] sm:$0xff] }
 0x29c   : > { %11450 = vmatprep.mubr.f32.mxu0 %v14319_v35  ;;  %11488 = vmatpush3.msra.mxu1 %v4222_v6  ;;  %v5080_v6 = vld [vmem:[#allocation7 + $0x2d0] sm:$0xff] }
 0x29d   : > { %11489 = vmatprep.subr.mxu1 %v4221_v18  ;;  %11571 = vmatprep.subr.mxu0 %v4494_v47 }
 0x29e   : > { %11368 = vmatmul.mubr.f32.gmra.mxu1 %v14406_v28  ;;  %11572 = vmatpush3.msra.mxu0 %v4494_v47  ;;  %v17176_v28 = vld [vmem:[#allocation21_spill] sm:$0xff]  ;;  %v4805_v47 = vld [vmem:[#allocation7 + $0x148] sm:$0xff] }
 0x29f   : > { %11451 = vmatmul.mubr.f32.gmra.mxu0 %v17173_v25  ;;  %11370 = vmatprep.mubr.f32.mxu1 %v14428_v13  ;;  %v17177_v13 = vld [vmem:[#allocation20_spill] sm:$0xff] }
 0x2a0   : > { %11453 = vmatprep.mubr.f32.mxu0 %v17174_v38  ;;  %11490 = vmatpush3.msra.mxu1 %v4221_v18  ;;  %v12733_v18 = vld [vmem:[#allocation3 + $0x99] sm:$0xff] }
 0x2a1   : > { %11491 = vmatprep.subr.mxu1 %v4220_v37  ;;  %11573 = vmatprep.subr.mxu0 %v4493_v52 }
 0x2a2   : > { %11371 = vmatmul.mubr.f32.gmra.mxu1 %v14430_v26  ;;  %11574 = vmatpush3.msra.mxu0 %v4493_v52  ;;  %v17178_v26 = vld [vmem:[#allocation64_spill] sm:$0xff]  ;;  %v4803_v52 = vld [vmem:[#allocation7 + $0x138] sm:$0xff] }
 0x2a3   : > { %11454 = vmatmul.mubr.f32.gmra.mxu0 %v17175_v50  ;;  %11373 = vmatprep.mubr.f32.mxu1 %v14450_v36  ;;  %v17179_v36 = vld [vmem:[#allocation61_spill] sm:$0xff] }
 0x2a4   : > { %11456 = vmatprep.mubr.f32.mxu0 %v17176_v28  ;;  %11492 = vmatpush3.msra.mxu1 %v4220_v37  ;;  %v4804_v37 = vld [vmem:[#allocation7 + $0x140] sm:$0xff] }
 0x2a5   : > { %11493 = vmatprep.subr.mxu1 %v4219_v41  ;;  %11575 = vmatprep.subr.mxu0 %v4492_v21 }
 0x2a6   : > { %11374 = vmatmul.mubr.f32.gmra.mxu1 %v14452_v11  ;;  %11576 = vmatpush3.msra.mxu0 %v4492_v21  ;;  %v4216_v11 = vld [vmem:[#allocation7 + $0x220] sm:$0xff] }
 0x2a7   : > { %11457 = vmatmul.mubr.f32.gmra.mxu0 %v17177_v13  ;;  %11376 = vmatprep.mubr.f32.mxu1 %v14469_v16  ;;  %v4489_v16 = vld [vmem:[#allocation7 + $0x398] sm:$0xff]  ;;  %v5074_v21 = vld [vmem:[#allocation7 + $0x2a0] sm:$0xff] }
 0x2a8   : > { %11459 = vmatprep.mubr.f32.mxu0 %v17178_v26  ;;  %11494 = vmatpush3.msra.mxu1 %v4219_v41  ;;  %v4801_v41 = vld [vmem:[#allocation7 + $0x128] sm:$0xff] }
 0x2a9   : > { %11495 = vmatprep.subr.mxu1 %v4218_v3  ;;  %11577 = vmatprep.subr.mxu0 %v4491_v22 }
 0x2aa   : > { %11377 = vmatmul.mubr.f32.gmra.mxu1 %v14471_v39  ;;  %11578 = vmatpush3.msra.mxu0 %v4491_v22  ;;  %v4215_v39 = vld [vmem:[#allocation7 + $0x218] sm:$0xff]  ;;  %v14652_v22 = vpop.f32.mrf.mxu0 }
 0x2ab   : > { %11460 = vmatmul.mubr.f32.gmra.mxu0 %v17179_v36  ;;  %11379 = vmatprep.mubr.f32.mxu1 %v14486_v34  ;;  %v4488_v34 = vld [vmem:[#allocation7 + $0x390] sm:$0xff] }
 0x2ac   : > { %11462 = vmatprep.mubr.f32.mxu0 %v14420_v12  ;;  %11496 = vmatpush3.msra.mxu1 %v4218_v3  ;;  %v5071_v3 = vld [vmem:[#allocation7 + $0x288] sm:$0xff] }
 0x2ad   : > { %11497 = vmatprep.subr.mxu1 %v4217_v44  ;;  %11579 = vmatprep.subr.mxu0 %v4490_v55 }
 0x2ae   : > { %11380 = vmatmul.mubr.f32.gmra.mxu1 %v14488_v14  ;;  %11580 = vmatpush3.msra.mxu0 %v4490_v55  ;;  %v4214_v14 = vld [vmem:[#allocation7 + $0x210] sm:$0xff]  ;;  %v14656_v55 = vld [vmem:[#allocation3 + $0x32] sm:$0xff] }
 0x2af   : > { %11463 = vmatmul.mubr.f32.gmra.mxu0 %v14409_v7  ;;  %11382 = vmatprep.mubr.f32.mxu1 %v14502_v53  ;;  %v4487_v53 = vld [vmem:[#allocation7 + $0x388] sm:$0xff] }
 0x2b0   : > { %11465 = vmatprep.mubr.f32.mxu0 %v14443_v61  ;;  %11498 = vmatpush3.msra.mxu1 %v4217_v44  ;;  %v5359_v44 = vld [vmem:[#allocation7 + $0x478] sm:$0xff] }
 0x2b1   : > { %11499 = vmatprep.subr.mxu1 %v4216_v11  ;;  %11581 = vmatprep.subr.mxu0 %v4489_v16 }
 0x2b2   : > { %11383 = vmatmul.mubr.f32.gmra.mxu1 %v14504_v0  ;;  %11582 = vmatpush3.msra.mxu0 %v4489_v16  ;;  %v4213_v0 = vld [vmem:[#allocation7 + $0x208] sm:$0xff] }
 0x2b3   : > { %11466 = vmatmul.mubr.f32.gmra.mxu0 %v14433_v51  ;;  %11385 = vmatprep.mubr.f32.mxu1 %v14517_v5  ;;  %v4486_v5 = vld [vmem:[#allocation7 + $0x380] sm:$0xff] }
 0x2b4   : > { %11468 = vmatprep.mubr.f32.mxu0 %v14465_v45  ;;  %11500 = vmatpush3.msra.mxu1 %v4216_v11  ;;  %v4760_v11 = vld [vmem:[#allocation3 + $0xa] sm:$0xff] }
 0x2b5   : > { %11501 = vmatprep.subr.mxu1 %v4215_v39  ;;  %11583 = vmatprep.subr.mxu0 %v4488_v34 }
 0x2b6   : > { %11386 = vmatmul.mubr.f32.gmra.mxu1 %v14519_v40  ;;  %11584 = vmatpush3.msra.mxu0 %v4488_v34  ;;  %v4212_v40 = vld [vmem:[#allocation7 + $0x200] sm:$0xff] }
 0x2b7   : > { %11469 = vmatmul.mubr.f32.gmra.mxu0 %v14455_v46  ;;  %11388 = vmatprep.mubr.f32.mxu1 %v14526_v23  ;;  %v5085_v23 = vld [vmem:[#allocation7 + $0x2f8] sm:$0xff] }
 0x2b8   : > { %11471 = vmatprep.mubr.f32.mxu0 %v14483_v24  ;;  %11502 = vmatpush3.msra.mxu1 %v4215_v39  ;;  %v14664_v34 = vld [vmem:[#allocation3 + $0x4a] sm:$0xff] }
 0x2b9   : > { %11503 = vmatprep.subr.mxu1 %v4214_v14  ;;  %11585 = vmatprep.subr.mxu0 %v4487_v53 }
 0x2ba   : > { %11389 = vmatmul.mubr.f32.gmra.mxu1 %v14528_v1  ;;  %11586 = vmatpush3.msra.mxu0 %v4487_v53  ;;  %v12722_v1 = vld [vmem:[#allocation3 + $0x31] sm:$0xff] }
 0x2bb   : > { %11472 = vmatmul.mubr.f32.gmra.mxu0 %v14474_v33  ;;  %11391 = vmatprep.mubr.f32.mxu1 %v14534_v17  ;;  %v4811_v17 = vld [vmem:[#allocation7 + $0x178] sm:$0xff] }
 0x2bc   : > { %11474 = vmatprep.mubr.f32.mxu0 %v14499_v19  ;;  %11504 = vmatpush3.msra.mxu1 %v4214_v14 }
 0x2bd   : > { %11505 = vmatprep.subr.mxu1 %v4213_v0  ;;  %11587 = vmatprep.subr.mxu0 %v4486_v5 }
 0x2be   : > { %11392 = vmatmul.mubr.f32.gmra.mxu1 %v14536_v9  ;;  %11588 = vmatpush3.msra.mxu0 %v4486_v5  ;;  %v12726_v9 = vld [vmem:[#allocation3 + $0x49] sm:$0xff]  ;;  %v14669_v5 = vld [vmem:[#allocation3 + $0x52] sm:$0xff] }
 0x2bf   : > { %11475 = vmatmul.mubr.f32.gmra.mxu0 %v14491_v27  ;;  %11506 = vmatpush3.msra.mxu1 %v4213_v0 }
 0x2c0   : > { %11589 = vmatprep.mubr.f32.mxu0 %v12722_v1  ;;  %11394 = vmatprep.mubr.f32.mxu1 %v12723_v59 }
 0x2c1   : > { %11507 = vmatprep.subr.mxu1 %v4212_v40  ;;  %11717 = vmatprep.subr.mxu0 %v5085_v23 }
 0x2c2   : > { %11395 = vmatmul.mubr.f32.gmra.mxu1 %v12723_v59  ;;  %v5357_v59 = vld [vmem:[#allocation7 + $0x468] sm:$0xff] }
 0x2c3   : > { %11590 = vmatmul.mubr.f32.vlgmr.msra.gmra.mxu0 %v12724_v10  ;;  %11508 = vmatpush3.msra.mxu1 %v4212_v40 }
 0x2c4   : > { %11509 = vmatprep.mubr.f32.mxu1 %v12725_v62  ;;  %11592 = vmatprep.mubr.f32.mxu0 %v12726_v9 }
 0x2c5   : > { %11637 = vmatprep.subr.mxu1 %v4811_v17  ;;  %11718 = vmatpush3.msra.mxu0 %v5085_v23 }
 0x2c6   : > { %11510 = vmatmul.mubr.f32.vlgmr.msra.gmra.mxu1 %v12727_v8  ;;  %11719 = vmatprep.subr.mxu0 %v5084_v63 }
 0x2c7   : > { %11593 = vmatmul.mubr.f32.gmra.mxu0 %v12728_v4  ;;  %11512 = vmatprep.mubr.f32.mxu1 %v12722_v1  ;;  %v14672_v1 = vld [vmem:[#allocation3 + $0x62] sm:$0xff] }
 0x2c8   : > { %11595 = vmatprep.mubr.f32.mxu0 %v12729_v30  ;;  %11638 = vmatpush3.msra.mxu1 %v4811_v17 }
 0x2c9   : > { %11639 = vmatprep.subr.mxu1 %v4810_v29  ;;  %11720 = vmatpush3.msra.mxu0 %v5084_v63  ;;  %v14680_v63 = vld [vmem:[#allocation3 + $0x6a] sm:$0xff] }
 0x2ca   : > { %11513 = vmatmul.mubr.f32.gmra.mxu1 %v12724_v10  ;;  %11721 = vmatprep.subr.mxu0 %v5083_v48 }
 0x2cb   : > { %11596 = vmatmul.mubr.f32.gmra.mxu0 %v12730_v58  ;;  %11515 = vmatprep.mubr.f32.mxu1 %v12726_v9 }
 0x2cc   : > { %11598 = vmatprep.mubr.f32.mxu0 %v14266_v57  ;;  %11640 = vmatpush3.msra.mxu1 %v4810_v29  ;;  %v4807_v57 = vld [vmem:[#allocation7 + $0x158] sm:$0xff]  ;;  %v14684_v29 = vld [vmem:[#allocation3 + $0x7a] sm:$0xff] }
 0x2cd   : > { %11641 = vmatprep.subr.mxu1 %v4809_v20  ;;  %11722 = vmatpush3.msra.mxu0 %v5083_v48 }
 0x2ce   : > { %11516 = vmatmul.mubr.f32.gmra.mxu1 %v12728_v4  ;;  %11723 = vmatprep.subr.mxu0 %v5082_v15 }
 0x2cf   : > { %11599 = vmatmul.mubr.f32.gmra.mxu0 %v12731_v31  ;;  %11518 = vmatprep.mubr.f32.mxu1 %v12729_v30  ;;  %v5356_v30 = vld [vmem:[#allocation7 + $0x460] sm:$0xff] }
 0x2d0   : > { %11601 = vmatprep.mubr.f32.mxu0 %v14292_v32  ;;  %11642 = vmatpush3.msra.mxu1 %v4809_v20 }
 0x2d1   : > { %11643 = vmatprep.subr.mxu1 %v4808_v56  ;;  %11724 = vmatpush3.msra.mxu0 %v5082_v15 }
 0x2d2   : > { %11519 = vmatmul.mubr.f32.gmra.mxu1 %v12730_v58  ;;  %11725 = vmatprep.subr.mxu0 %v5081_v49 }
 0x2d3   : > { %11602 = vmatmul.mubr.f32.gmra.mxu0 %v14280_v60  ;;  %11521 = vmatprep.mubr.f32.mxu1 %v12732_v42  ;;  %v5079_v60 = vld [vmem:[#allocation7 + $0x2c8] sm:$0xff]  ;;  %v5355_v42 = vld [vmem:[#allocation7 + $0x458] sm:$0xff] }
 0x2d4   : > { %11604 = vmatprep.mubr.f32.mxu0 %v14319_v35  ;;  %11644 = vmatpush3.msra.mxu1 %v4808_v56 }
 0x2d5   : > { %11645 = vmatprep.subr.mxu1 %v4807_v57  ;;  %11726 = vmatpush3.msra.mxu0 %v5081_v49 }
 0x2d6   : > { %11522 = vmatmul.mubr.f32.gmra.mxu1 %v12731_v31  ;;  %11727 = vmatprep.subr.mxu0 %v5080_v6  ;;  %v14692_v31 = vld [vmem:[#allocation3 + $0x82] sm:$0xff] }
 0x2d7   : > { %11605 = vmatmul.mubr.f32.gmra.mxu0 %v17173_v25  ;;  %11524 = vmatprep.mubr.f32.mxu1 %v14292_v32  ;;  %v5078_v32 = vld [vmem:[#allocation7 + $0x2c0] sm:$0xff] }
 0x2d8   : > { %11607 = vmatprep.mubr.f32.mxu0 %v17174_v38  ;;  %11646 = vmatpush3.msra.mxu1 %v4807_v57  ;;  %v14696_v57 = vld [vmem:[#allocation3 + $0x92] sm:$0xff] }
 0x2d9   : > { %11647 = vmatprep.subr.mxu1 %v4806_v43  ;;  %11728 = vmatpush3.msra.mxu0 %v5080_v6 }
 0x2da   : > { %11525 = vmatmul.mubr.f32.gmra.mxu1 %v12733_v18  ;;  %11729 = vmatprep.subr.mxu0 %v5079_v60 }
 0x2db   : > { %11608 = vmatmul.mubr.f32.gmra.mxu0 %v17175_v50  ;;  %11527 = vmatprep.mubr.f32.mxu1 %v14319_v35  ;;  %v5077_v35 = vld [vmem:[#allocation7 + $0x2b8] sm:$0xff] }
 0x2dc   : > { %11610 = vmatprep.mubr.f32.mxu0 %v17176_v28  ;;  %11648 = vmatpush3.msra.mxu1 %v4806_v43 }
 0x2dd   : > { %11649 = vmatprep.subr.mxu1 %v4805_v47  ;;  %11730 = vmatpush3.msra.mxu0 %v5079_v60 }
 0x2de   : > { %11528 = vmatmul.mubr.f32.gmra.mxu1 %v17173_v25  ;;  %11731 = vmatprep.subr.mxu0 %v5078_v32  ;;  %v5076_v25 = vld [vmem:[#allocation7 + $0x2b0] sm:$0xff] }
 0x2df   : > { %11611 = vmatmul.mubr.f32.gmra.mxu0 %v17177_v13  ;;  %11530 = vmatprep.mubr.f32.mxu1 %v17174_v38  ;;  %v4802_v38 = vld [vmem:[#allocation7 + $0x130] sm:$0xff] }
 0x2e0   : > { %11613 = vmatprep.mubr.f32.mxu0 %v17178_v26  ;;  %11650 = vmatpush3.msra.mxu1 %v4805_v47  ;;  %v14704_v47 = vld [vmem:[#allocation3 + $0x9a] sm:$0xff] }
 0x2e1   : > { %11651 = vmatprep.subr.mxu1 %v4804_v37  ;;  %11732 = vmatpush3.msra.mxu0 %v5078_v32 }
 0x2e2   : > { %11531 = vmatmul.mubr.f32.gmra.mxu1 %v17175_v50  ;;  %11733 = vmatprep.subr.mxu0 %v5077_v35  ;;  %v5075_v50 = vld [vmem:[#allocation7 + $0x2a8] sm:$0xff] }
 0x2e3   : > { %11614 = vmatmul.mubr.f32.gmra.mxu0 %v17179_v36  ;;  %11533 = vmatprep.mubr.f32.mxu1 %v17176_v28  ;;  %v4800_v28 = vld [vmem:[#allocation7 + $0x120] sm:$0xff] }
 0x2e4   : > { %11616 = vmatprep.mubr.f32.mxu0 %v14420_v12  ;;  %11652 = vmatpush3.msra.mxu1 %v4804_v37 }
 0x2e5   : > { %11653 = vmatprep.subr.mxu1 %v4803_v52  ;;  %11734 = vmatpush3.msra.mxu0 %v5077_v35  ;;  %v14708_v35 = vld [vmem:[#allocation3 + $0xaa] sm:$0xff] }
 0x2e6   : > { %11534 = vmatmul.mubr.f32.gmra.mxu1 %v17177_v13  ;;  %11735 = vmatprep.subr.mxu0 %v5076_v25  ;;  %v4799_v13 = vld [vmem:[#allocation7 + $0x118] sm:$0xff] }
 0x2e7   : > { %11617 = vmatmul.mubr.f32.gmra.mxu0 %v14409_v7  ;;  %11536 = vmatprep.mubr.f32.mxu1 %v17178_v26  ;;  %v4796_v26 = vld [vmem:[#allocation7 + $0x100] sm:$0xff] }
 0x2e8   : > { %11619 = vmatprep.mubr.f32.mxu0 %v14443_v61  ;;  %11654 = vmatpush3.msra.mxu1 %v4803_v52  ;;  %v5354_v52 = vld [vmem:[#allocation7 + $0x450] sm:$0xff] }
 0x2e9   : > { %11655 = vmatprep.subr.mxu1 %v4802_v38  ;;  %11736 = vmatpush3.msra.mxu0 %v5076_v25 }
 0x2ea   : > { %11537 = vmatmul.mubr.f32.gmra.mxu1 %v17179_v36  ;;  %11737 = vmatprep.subr.mxu0 %v5075_v50  ;;  %v4759_v36 = vld [vmem:[#allocation3 + $0x2] sm:$0xff] }
 0x2eb   : > { %11620 = vmatmul.mubr.f32.gmra.mxu0 %v14433_v51  ;;  %11539 = vmatprep.mubr.f32.mxu1 %v14420_v12  ;;  %v5073_v12 = vld [vmem:[#allocation7 + $0x298] sm:$0xff] }
 0x2ec   : > { %11622 = vmatprep.mubr.f32.mxu0 %v14465_v45  ;;  %11656 = vmatpush3.msra.mxu1 %v4802_v38 }
 0x2ed   : > { %11657 = vmatprep.subr.mxu1 %v4801_v41  ;;  %11738 = vmatpush3.msra.mxu0 %v5075_v50 }
 0x2ee   : > { %11540 = vmatmul.mubr.f32.gmra.mxu1 %v14409_v7  ;;  %11739 = vmatprep.subr.mxu0 %v5074_v21  ;;  %v5072_v7 = vld [vmem:[#allocation7 + $0x290] sm:$0xff] }
 0x2ef   : > { %11623 = vmatmul.mubr.f32.gmra.mxu0 %v14455_v46  ;;  %11542 = vmatprep.mubr.f32.mxu1 %v14443_v61  ;;  %v4798_v61 = vld [vmem:[#allocation7 + $0x110] sm:$0xff] }
 0x2f0   : > { %11625 = vmatprep.mubr.f32.mxu0 %v14483_v24  ;;  %11658 = vmatpush3.msra.mxu1 %v4801_v41 }
 0x2f1   : > { %11659 = vmatprep.subr.mxu1 %v4800_v28  ;;  %11740 = vmatpush3.msra.mxu0 %v5074_v21  ;;  %v14716_v21 = vld [vmem:[#allocation3 + $0xb2] sm:$0xff] }
 0x2f2   : > { %11543 = vmatmul.mubr.f32.gmra.mxu1 %v14433_v51  ;;  %11741 = vmatprep.subr.mxu0 %v5073_v12  ;;  %v3935_v51 = vld [vmem:[#allocation3 + $0x199] sm:$0xff] }
 0x2f3   : > { %11626 = vmatmul.mubr.f32.gmra.mxu0 %v14474_v33  ;;  %11545 = vmatprep.mubr.f32.mxu1 %v14465_v45  ;;  %v4797_v45 = vld [vmem:[#allocation7 + $0x108] sm:$0xff] }
 0x2f4   : > { %11628 = vmatprep.mubr.f32.mxu0 %v14499_v19  ;;  %11660 = vmatpush3.msra.mxu1 %v4800_v28 }
 0x2f5   : > { %11661 = vmatprep.subr.mxu1 %v4799_v13  ;;  %11742 = vmatpush3.msra.mxu0 %v5073_v12 }
 0x2f6   : > { %11546 = vmatmul.mubr.f32.gmra.mxu1 %v14455_v46  ;;  %11743 = vmatprep.subr.mxu0 %v5072_v7  ;;  %v3936_v46 = vld [vmem:[#allocation3 + $0x1a1] sm:$0xff] }
 0x2f7   : > { %11629 = vmatmul.mubr.f32.gmra.mxu0 %v14491_v27  ;;  %11548 = vmatprep.mubr.f32.mxu1 %v14483_v24  ;;  %v5070_v24 = vld [vmem:[#allocation7 + $0x280] sm:$0xff] }
 0x2f8   : > { %11631 = vmatprep.mubr.f32.mxu0 %v14515_v54  ;;  %11662 = vmatpush3.msra.mxu1 %v4799_v13  ;;  %v14720_v13 = vld [vmem:[#allocation3 + $0xc2] sm:$0xff] }
 0x2f9   : > { %11663 = vmatprep.subr.mxu1 %v4798_v61  ;;  %11744 = vmatpush3.msra.mxu0 %v5072_v7  ;;  %v5353_v7 = vld [vmem:[#allocation7 + $0x448] sm:$0xff] }
 0x2fa   : > { %11549 = vmatmul.mubr.f32.gmra.mxu1 %v14474_v33  ;;  %11745 = vmatprep.subr.mxu0 %v5071_v3  ;;  %v4761_v33 = vld [vmem:[#allocation3 + $0x1a] sm:$0xff] }
 0x2fb   : > { %11632 = vmatmul.mubr.f32.gmra.mxu0 %v14507_v2  ;;  %11551 = vmatprep.mubr.f32.mxu1 %v14499_v19  ;;  %v4762_v19 = vld [vmem:[#allocation3 + $0x22] sm:$0xff] }
 0x2fc   : > { %11664 = vmatpush3.msra.mxu1 %v4798_v61  ;;  %11634 = vmatprep.mubr.f32.mxu0 %v3935_v51 }
 0x2fd   : > { %11665 = vmatprep.subr.mxu1 %v4797_v45  ;;  %11746 = vmatpush3.msra.mxu0 %v5071_v3 }
 0x2fe   : > { %11666 = vmatpush3.msra.mxu1 %v4797_v45  ;;  %11747 = vmatprep.subr.mxu0 %v5070_v24 }
 0x2ff   : > { %11552 = vmatmul.mubr.f32.gmra.mxu1 %v14491_v27  ;;  %11635 = vmatmul.mubr.f32.gmra.mxu0 %v3936_v46  ;;  %v3468_v27 = vpop.f32.mrf.mxu0  ;;  %v14728_v46 = vld [vmem:[#allocation3 + $0xca] sm:$0xff] }
 0x300   : > { %11554 = vmatprep.mubr.f32.mxu1 %v14515_v54  ;;  %11749 = vmatprep.mubr.f32.mxu0 %v4761_v33  ;;  %v14659_v54 = vld [vmem:[#allocation3 + $0x3a] sm:$0xff] }
 0x301   : > { %11748 = vmatpush3.msra.mxu0 %v5070_v24  ;;  %11667 = vmatprep.subr.mxu1 %v4796_v26 }
 0x302   : > { %11668 = vmatpush3.msra.mxu1 %v4796_v26 }
 0x303   : > { %11555 = vmatmul.mubr.f32.gmra.mxu1 %v14507_v2  ;;  %11750 = vmatmul.mubr.f32.vlgmr.msra.gmra.mxu0 %v4762_v19  ;;  %v5358_v2 = vld [vmem:[#allocation7 + $0x470] sm:$0xff] }
 0x304   : > { %11752 = vmatprep.mubr.f32.mxu0 %v14656_v55  ;;  %11669 = vmatprep.mubr.f32.mxu1 %v4759_v36  ;;  %v14661_v16 = vpop.f32.mrf.mxu1 }
 0x305   : > { %11797 = vmatprep.subr.mxu1 %v5359_v44  ;;  %v11274_v39 = vpop.f32.mrf.mxu0 }
 0x306   : > { %v3243_v14 = vpop.f32.mrf.mxu1 }
 0x307   : > { %11670 = vmatmul.mubr.f32.vlgmr.msra.gmra.mxu1 %v4760_v11  ;;  %11753 = vmatmul.mubr.f32.gmra.mxu0 %v14659_v54  ;;  %v3478_v53 = vpop.f32.mrf.mxu0  ;;  %v14667_v0 = vadd.f32 %v3468_v27, %v3243_v14 }
 0x308   : > { %11672 = vmatprep.mubr.f32.mxu1 %v4761_v33  ;;  %11755 = vmatprep.mubr.f32.mxu0 %v14664_v34  ;;  %v14732_v33 = vld [vmem:[#allocation3 + $0xda] sm:$0xff] }
 0x309   : > { %11798 = vmatpush3.msra.mxu1 %v5359_v44  ;;  %v11194_v40 = vpop.f32.mrf.mxu1  ;;  %v11277_v23 = vpop.f32.mrf.mxu0 }
 0x30a   : > { %11799 = vmatprep.subr.mxu1 %v5358_v2  ;;  %v14674_v17 = vadd.f32 %v11274_v39, %v11194_v40  ;;  %v14740_v39 = vld [vmem:[#allocation3 + $0xe2] sm:$0xff] }
 0x30b   : > { %11673 = vmatmul.mubr.f32.gmra.mxu1 %v4762_v19  ;;  %11756 = vmatmul.mubr.f32.gmra.mxu0 %v14669_v5  ;;  %v3253_v10 = vpop.f32.mrf.mxu1  ;;  %v3488_v62 = vpop.f32.mrf.mxu0  ;;  %v5352_v19 = vld [vmem:[#allocation7 + $0x440] sm:$0xff]  ;;  %v5351_v40 = vld [vmem:[#allocation7 + $0x438] sm:$0xff] }
 0x30c   : > { %11675 = vmatprep.mubr.f32.mxu1 %v14656_v55  ;;  %11758 = vmatprep.mubr.f32.mxu0 %v14672_v1  ;;  %v14678_v9 = vadd.f32 %v3478_v53, %v3253_v10  ;;  %v14744_v53 = vld [vmem:[#allocation3 + $0xf2] sm:$0xff] }
 0x30d   : > { %11800 = vmatpush3.msra.mxu1 %v5358_v2  ;;  %v11197_v8 = vpop.f32.mrf.mxu1  ;;  %v11280_v4 = vpop.f32.mrf.mxu0 }
 0x30e   : > { %11801 = vmatprep.subr.mxu1 %v5357_v59  ;;  %v14686_v48 = vadd.f32 %v11277_v23, %v11197_v8  ;;  %v14754_v8 = vld [vmem:[#allocation3 + $0xfa] sm:$0xff] }
 0x30f   : > { %11676 = vmatmul.mubr.f32.gmra.mxu1 %v14659_v54  ;;  %11759 = vmatmul.mubr.f32.gmra.mxu0 %v14680_v63  ;;  %v3263_v58 = vpop.f32.mrf.mxu1  ;;  %v3498_v20 = vpop.f32.mrf.mxu0 }
 0x310   : > { %11678 = vmatprep.mubr.f32.mxu1 %v14664_v34  ;;  %11761 = vmatprep.mubr.f32.mxu0 %v14684_v29  ;;  %v14690_v15 = vadd.f32 %v3488_v62, %v3263_v58  ;;  %v14758_v58 = vld [vmem:[#allocation3 + $0x10a] sm:$0xff] }
 0x311   : > { %11802 = vmatpush3.msra.mxu1 %v5357_v59  ;;  %v11200_v56 = vpop.f32.mrf.mxu1  ;;  %v11283_v49 = vpop.f32.mrf.mxu0 }
 0x312   : > { %11803 = vmatprep.subr.mxu1 %v5356_v30  ;;  %v14698_v6 = vadd.f32 %v11280_v4, %v11200_v56 }
 0x313   : > { %11679 = vmatmul.mubr.f32.gmra.mxu1 %v14669_v5  ;;  %11762 = vmatmul.mubr.f32.gmra.mxu0 %v14692_v31  ;;  %v3273_v43 = vpop.f32.mrf.mxu1  ;;  %v3508_v60 = vpop.f32.mrf.mxu0 }
 0x314   : > { %11681 = vmatprep.mubr.f32.mxu1 %v14672_v1  ;;  %11764 = vmatprep.mubr.f32.mxu0 %v14696_v57  ;;  %v14702_v18 = vadd.f32 %v3498_v20, %v3273_v43  ;;  %v5350_v20 = vld [vmem:[#allocation7 + $0x430] sm:$0xff]  ;;  %v14768_v43 = vld [vmem:[#allocation3 + $0x112] sm:$0xff] }
 0x315   : > { %11804 = vmatpush3.msra.mxu1 %v5356_v30  ;;  %v11203_v32 = vpop.f32.mrf.mxu1  ;;  %v11286_v37 = vpop.f32.mrf.mxu0 }
 0x316   : > { %11805 = vmatprep.subr.mxu1 %v5355_v42  ;;  %v14710_v25 = vadd.f32 %v11283_v49, %v11203_v32 }
 0x317   : > { %11682 = vmatmul.mubr.f32.gmra.mxu1 %v14680_v63  ;;  %11765 = vmatmul.mubr.f32.gmra.mxu0 %v14704_v47  ;;  %v3283_v38 = vpop.f32.mrf.mxu1  ;;  %v3518_v50 = vpop.f32.mrf.mxu0 }
 0x318   : > { %11684 = vmatprep.mubr.f32.mxu1 %v14684_v29  ;;  %11767 = vmatprep.mubr.f32.mxu0 %v14708_v35  ;;  %v14714_v41 = vadd.f32 %v3508_v60, %v3283_v38 }
 0x319   : > { %11806 = vmatpush3.msra.mxu1 %v5355_v42  ;;  %v11206_v28 = vpop.f32.mrf.mxu1  ;;  %v11289_v12 = vpop.f32.mrf.mxu0 }
 0x31a   : > { %11807 = vmatprep.subr.mxu1 %v5354_v52  ;;  %v14722_v61 = vadd.f32 %v11286_v37, %v11206_v28  ;;  %v14772_v37 = vld [vmem:[#allocation3 + $0x122] sm:$0xff] }
 0x31b   : > { %11685 = vmatmul.mubr.f32.gmra.mxu1 %v14692_v31  ;;  %11768 = vmatmul.mubr.f32.gmra.mxu0 %v14716_v21  ;;  %v3293_v51 = vpop.f32.mrf.mxu1  ;;  %v3528_v45 = vpop.f32.mrf.mxu0 }
 0x31c   : > { %11687 = vmatprep.mubr.f32.mxu1 %v14696_v57  ;;  %11770 = vmatprep.mubr.f32.mxu0 %v14720_v13  ;;  %v14726_v3 = vadd.f32 %v3518_v50, %v3293_v51 }
 0x31d   : > { %11808 = vmatpush3.msra.mxu1 %v5354_v52  ;;  %v5349_v52 = vld [vmem:[#allocation7 + $0x428] sm:$0xff] }
 0x31e   : > { %11809 = vmatprep.subr.mxu1 %v5353_v7  ;;  %v11209_v24 = vpop.f32.mrf.mxu1  ;;  %v11292_v26 = vpop.f32.mrf.mxu0 }
 0x31f   : > { %11688 = vmatmul.mubr.f32.gmra.mxu1 %v14704_v47  ;;  %11771 = vmatmul.mubr.f32.gmra.mxu0 %v14728_v46  ;;  %v14734_v36 = vadd.f32 %v11289_v12, %v11209_v24  ;;  %v14782_v12 = vld [vmem:[#allocation3 + $0x12a] sm:$0xff] }
 0x320   : > { %11690 = vmatprep.mubr.f32.mxu1 %v14708_v35  ;;  %11773 = vmatprep.mubr.f32.mxu0 %v14732_v33  ;;  %v3303_v44 = vpop.f32.mrf.mxu1  ;;  %v3538_v27 = vpop.f32.mrf.mxu0  ;;  %v5348_v24 = vld [vmem:[#allocation7 + $0x420] sm:$0xff] }
 0x321   : > { %11810 = vmatpush3.msra.mxu1 %v5353_v7  ;;  %v14738_v11 = vadd.f32 %v3528_v45, %v3303_v44  ;;  %v14786_v45 = vld [vmem:[#allocation3 + $0x13a] sm:$0xff] }
 0x322   : > { %11811 = vmatprep.subr.mxu1 %v5352_v19  ;;  %v11212_v2 = vpop.f32.mrf.mxu1 }
 0x323   : > { %v11295_v14 = vpop.f32.mrf.mxu0  ;;  %11691 = vmatmul.mubr.f32.gmra.mxu1 %v14716_v21  ;;  %11774 = vmatmul.mubr.f32.gmra.mxu0 %v14740_v39  ;;  %v14746_v23 = vadd.f32 %v11292_v26, %v11212_v2 }
 0x324   : > { %11693 = vmatprep.mubr.f32.mxu1 %v14720_v13  ;;  %11776 = vmatprep.mubr.f32.mxu0 %v14744_v53  ;;  %v3313_v59 = vpop.f32.mrf.mxu1 }
 0x325   : > { %11812 = vmatpush3.msra.mxu1 %v5352_v19  ;;  %v14750_v10 = vpop.f32.mrf.mxu0  ;;  %v14752_v62 = vadd.f32 %v3538_v27, %v3313_v59  ;;  %v14796_v27 = vld [vmem:[#allocation3 + $0x142] sm:$0xff] }
 0x326   : > { %11813 = vmatprep.subr.mxu1 %v5351_v40  ;;  %v11215_v4 = vpop.f32.mrf.mxu1  ;;  %v5347_v59 = vld [vmem:[#allocation7 + $0x418] sm:$0xff] }
 0x327   : > { %v11298_v30 = vpop.f32.mrf.mxu0  ;;  %11694 = vmatmul.mubr.f32.gmra.mxu1 %v14728_v46  ;;  %11777 = vmatmul.mubr.f32.gmra.mxu0 %v14754_v8  ;;  %v14760_v56 = vadd.f32 %v11295_v14, %v11215_v4 }
 0x328   : > { %11696 = vmatprep.mubr.f32.mxu1 %v14732_v33  ;;  %11779 = vmatprep.mubr.f32.mxu0 %v14758_v58  ;;  %v14764_v49 = vpop.f32.mrf.mxu1 }
 0x329   : > { %11814 = vmatpush3.msra.mxu1 %v5351_v40  ;;  %v14766_v42 = vpop.f32.mrf.mxu0  ;;  %v14800_v40 = vld [vmem:[#allocation3 + $0x152] sm:$0xff] }
 0x32a   : > { %17180 = vst [vmem:[#allocation33_spill] sm:$0xff] %v14766_v42  ;;  %11815 = vmatprep.subr.mxu1 %v5350_v20  ;;  %v11218_v60 = vpop.f32.mrf.mxu1  ;;  %v5344_v42 = vld [vmem:[#allocation7 + $0x400] sm:$0xff] }
 0x32b   : > { %v11301_v32 = vpop.f32.mrf.mxu0  ;;  %11697 = vmatmul.mubr.f32.gmra.mxu1 %v14740_v39  ;;  %11780 = vmatmul.mubr.f32.gmra.mxu0 %v14768_v43  ;;  %v14774_v38 = vadd.f32 %v11298_v30, %v11218_v60  ;;  %v14810_v60 = vld [vmem:[#allocation3 + $0x15a] sm:$0xff] }
 0x32c   : > { %11699 = vmatprep.mubr.f32.mxu1 %v14744_v53  ;;  %11782 = vmatprep.mubr.f32.mxu0 %v14772_v37  ;;  %v14778_v50 = vpop.f32.mrf.mxu1 }
 0x32d   : > { %11816 = vmatpush3.msra.mxu1 %v5350_v20  ;;  %17181 = vst [vmem:[#allocation19_spill] sm:$0xff] %v14778_v50  ;;  %v14780_v28 = vpop.f32.mrf.mxu0 }
 0x32e   : > { %17182 = vst [vmem:[#allocation34_spill] sm:$0xff] %v14780_v28  ;;  %11817 = vmatprep.subr.mxu1 %v5349_v52  ;;  %v11221_v7 = vpop.f32.mrf.mxu1 }
 0x32f   : > { %v11304_v51 = vpop.f32.mrf.mxu0  ;;  %11700 = vmatmul.mubr.f32.gmra.mxu1 %v14754_v8  ;;  %11783 = vmatmul.mubr.f32.gmra.mxu0 %v14782_v12  ;;  %v14788_v26 = vadd.f32 %v11301_v32, %v11221_v7  ;;  %v14814_v7 = vld [vmem:[#allocation3 + $0x16a] sm:$0xff] }
 0x330   : > { %11702 = vmatprep.mubr.f32.mxu1 %v14758_v58  ;;  %11785 = vmatprep.mubr.f32.mxu0 %v14786_v45  ;;  %v14792_v19 = vpop.f32.mrf.mxu1 }
 0x331   : > { %11818 = vmatpush3.msra.mxu1 %v5349_v52  ;;  %17183 = vst [vmem:[#allocation63_spill] sm:$0xff] %v14792_v19  ;;  %v14794_v44 = vpop.f32.mrf.mxu0 }
 0x332   : > { %17184 = vst [vmem:[#allocation31_spill] sm:$0xff] %v14794_v44  ;;  %11819 = vmatprep.subr.mxu1 %v5348_v24  ;;  %v11224_v2 = vpop.f32.mrf.mxu1  ;;  %v14824_v44 = vld [vmem:[#allocation3 + $0x172] sm:$0xff] }
 0x333   : > { %v11307_v14 = vpop.f32.mrf.mxu0  ;;  %11703 = vmatmul.mubr.f32.gmra.mxu1 %v14768_v43  ;;  %11786 = vmatmul.mubr.f32.gmra.mxu0 %v14796_v27  ;;  %v14802_v4 = vadd.f32 %v11304_v51, %v11224_v2  ;;  %v5346_v51 = vld [vmem:[#allocation7 + $0x410] sm:$0xff] }
 0x334   : > { %11705 = vmatprep.mubr.f32.mxu1 %v14772_v37  ;;  %11788 = vmatprep.mubr.f32.mxu0 %v14800_v40  ;;  %v14806_v30 = vpop.f32.mrf.mxu1 }
 0x335   : > { %11820 = vmatpush3.msra.mxu1 %v5348_v24  ;;  %17185 = vst [vmem:[#allocation66_spill] sm:$0xff] %v14806_v30  ;;  %v14808_v20 = vpop.f32.mrf.mxu0 }
 0x336   : > { %17186 = vst [vmem:[#allocation15_spill] sm:$0xff] %v14808_v20  ;;  %11821 = vmatprep.subr.mxu1 %v5347_v59  ;;  %v11227_v32 = vpop.f32.mrf.mxu1 }
 0x337   : > { %v11310_v52 = vpop.f32.mrf.mxu0  ;;  %11706 = vmatmul.mubr.f32.gmra.mxu1 %v14782_v12  ;;  %11789 = vmatmul.mubr.f32.gmra.mxu0 %v14810_v60  ;;  %v14816_v2 = vadd.f32 %v11307_v14, %v11227_v32  ;;  %v14828_v14 = vld [vmem:[#allocation3 + $0x182] sm:$0xff]  ;;  %v5345_v32 = vld [vmem:[#allocation7 + $0x408] sm:$0xff] }
 0x338   : > { %11708 = vmatprep.mubr.f32.mxu1 %v14786_v45  ;;  %11791 = vmatprep.mubr.f32.mxu0 %v14814_v7  ;;  %v14820_v24 = vpop.f32.mrf.mxu1  ;;  %17190 = vst [vmem:[#allocation32_spill] sm:$0xff] %v14828_v14 }
 0x339   : > { %17187 = vst [vmem:[#allocation22_spill] sm:$0xff] %v14816_v2  ;;  %11822 = vmatpush3.msra.mxu1 %v5347_v59  ;;  %17188 = vst [vmem:[#allocation65_spill] sm:$0xff] %v14820_v24  ;;  %v14822_v20 = vpop.f32.mrf.mxu0  ;;  %v14838_v24 = vld [vmem:[#allocation3 + $0x18a] sm:$0xff] }
 0x33a   : > { %17189 = vst [vmem:[#allocation68_spill] sm:$0xff] %v14822_v20  ;;  %11823 = vmatprep.subr.mxu1 %v5346_v51  ;;  %v11230_v30 = vpop.f32.mrf.mxu1  ;;  %17193 = vst [vmem:[#allocation67_spill] sm:$0xff] %v14838_v24 }
 0x33b   : > { %v11313_v28 = vpop.f32.mrf.mxu0  ;;  %11709 = vmatmul.mubr.f32.gmra.mxu1 %v14796_v27  ;;  %11792 = vmatmul.mubr.f32.gmra.mxu0 %v14824_v44  ;;  %v14830_v19 = vadd.f32 %v11310_v52, %v11230_v30 }
 0x33c   : > { %11711 = vmatprep.mubr.f32.mxu1 %v14800_v40  ;;  %11794 = vmatprep.mubr.f32.mxu0 %v14828_v14  ;;  %v14834_v59 = vpop.f32.mrf.mxu1 }
 0x33d   : > { %11824 = vmatpush3.msra.mxu1 %v5346_v51  ;;  %17191 = vst [vmem:[#allocation36_spill] sm:$0xff] %v14834_v59  ;;  %v14836_v20 = vpop.f32.mrf.mxu0 }
 0x33e   : > { %17192 = vst [vmem:[#allocation37_spill] sm:$0xff] %v14836_v20  ;;  %11825 = vmatprep.subr.mxu1 %v5345_v32  ;;  %v11233_v50 = vpop.f32.mrf.mxu1 }
 0x33f   : > { %v11316_v2 = vpop.f32.mrf.mxu0  ;;  %11712 = vmatmul.mubr.f32.gmra.mxu1 %v14810_v60  ;;  %11795 = vmatmul.mubr.f32.gmra.mxu0 %v14838_v24  ;;  %v14842_v30 = vadd.f32 %v11313_v28, %v11233_v50  ;;  %v3474_v28 = vadd.f32 %v14652_v22, %v14661_v16 }
 0x340   : > { %11714 = vmatprep.mubr.f32.mxu1 %v14814_v7  ;;  %11826 = vmatpush3.msra.mxu1 %v5345_v32  ;;  %v14845_v52 = vpop.f32.mrf.mxu1 }
 0x341   : > { %17194 = vst [vmem:[#allocation35_spill] sm:$0xff] %v14842_v30  ;;  %17195 = vst [vmem:[#allocation70_spill] sm:$0xff] %v14845_v52  ;;  %v14847_v51 = vpop.f32.mrf.mxu0  ;;  %11827 = vmatprep.subr.mxu1 %v5344_v42 }
 0x342   : > { %17196 = vst [vmem:[#allocation23_spill] sm:$0xff] %v14847_v51  ;;  %11828 = vmatpush3.msra.mxu1 %v5344_v42  ;;  %v11236_v20 = vpop.f32.mrf.mxu1 }
 0x343   : > { %v11431_v59 = vpop.f32.mrf.mxu0  ;;  %11715 = vmatmul.mubr.f32.gmra.mxu1 %v14824_v44  ;;  %v14850_v14 = vadd.f32 %v11316_v2, %v11236_v20 }
 0x344   : > { %11829 = vmatprep.mubr.f32.mxu1 %v14656_v55  ;;  %v14853_v24 = vpop.f32.mrf.mxu1 }
 0x345   : > { %17197 = vst [vmem:[#allocation69_spill] sm:$0xff] %v14853_v24  ;;  %v14855_v50 = vpop.f32.mrf.mxu0 }
 0x346   : > { %v11351_v32 = vpop.f32.mrf.mxu1 }
 0x347   : > { %v11434_v52 = vpop.f32.mrf.mxu0  ;;  %11830 = vmatmul.mubr.f32.vlgmr.msra.gmra.mxu1 %v14659_v54  ;;  %v3870_v42 = vadd.f32 %v11351_v32, %v3474_v28 }
 0x348   : > { %11832 = vmatprep.mubr.f32.mxu1 %v14664_v34  ;;  %v3710_v51 = vpop.f32.mrf.mxu1 }
 0x349   : > { %v14861_v30 = vpop.f32.mrf.mxu0  ;;  %v14864_v20 = vadd.f32 %v3710_v51, %v14667_v0  ;;  %v14866_v55 = vadd.f32 %v11431_v59, %v3870_v42 }
 0x34a   : > { %v11354_v2 = vpop.f32.mrf.mxu1 }
 0x34b   : > { %v11437_v24 = vpop.f32.mrf.mxu0  ;;  %11833 = vmatmul.mubr.f32.gmra.mxu1 %v14669_v5  ;;  %v3872_v22 = vadd.f32 %v11354_v2, %v14674_v17 }
 0x34c   : > { %11835 = vmatprep.mubr.f32.mxu1 %v14672_v1  ;;  %v3720_v54 = vpop.f32.mrf.mxu1 }
 0x34d   : > { %v14871_v16 = vpop.f32.mrf.mxu0  ;;  %v14874_v34 = vadd.f32 %v3720_v54, %v14678_v9  ;;  %v14876_v28 = vadd.f32 %v11434_v52, %v3872_v22 }
 0x34e   : > { %v11357_v0 = vpop.f32.mrf.mxu1 }
 0x34f   : > { %v11440_v51 = vpop.f32.mrf.mxu0  ;;  %11836 = vmatmul.mubr.f32.gmra.mxu1 %v14680_v63  ;;  %v3874_v59 = vadd.f32 %v11357_v0, %v14686_v48 }
 0x350   : > { %11838 = vmatprep.mubr.f32.mxu1 %v14684_v29  ;;  %v3730_v5 = vpop.f32.mrf.mxu1 }
 0x351   : > { %v14881_v17 = vpop.f32.mrf.mxu0  ;;  %v14884_v1 = vadd.f32 %v3730_v5, %v14690_v15  ;;  %v14886_v32 = vadd.f32 %v11437_v24, %v3874_v59  ;;  %v5787_v5 = vld [vmem:[#allocation9 + $0x1f0] sm:$0xff] }
 0x352   : > { %v11360_v9 = vpop.f32.mrf.mxu1 }
 0x353   : > { %v11443_v42 = vpop.f32.mrf.mxu0  ;;  %11839 = vmatmul.mubr.f32.gmra.mxu1 %v14692_v31  ;;  %v3876_v52 = vadd.f32 %v11360_v9, %v14698_v6 }
 0x354   : > { %11841 = vmatprep.mubr.f32.mxu1 %v14696_v57  ;;  %v3740_v63 = vpop.f32.mrf.mxu1 }
 0x355   : > { %v14891_v48 = vpop.f32.mrf.mxu0  ;;  %v14894_v29 = vadd.f32 %v3740_v63, %v14702_v18  ;;  %v14896_v2 = vadd.f32 %v11440_v51, %v3876_v52  ;;  %v5788_v18 = vld [vmem:[#allocation9 + $0x1f8] sm:$0xff]  ;;  %v5786_v63 = vld [vmem:[#allocation9 + $0x1e8] sm:$0xff] }
 0x356   : > { %v11363_v15 = vpop.f32.mrf.mxu1  ;;  %11877 = vmatprep.subr.mxu0 %v5788_v18 }
 0x357   : > { %v11446_v22 = vpop.f32.mrf.mxu0  ;;  %11842 = vmatmul.mubr.f32.gmra.mxu1 %v14704_v47  ;;  %v3878_v24 = vadd.f32 %v11363_v15, %v14710_v25  ;;  %11878 = vmatpush3.msra.mxu0 %v5788_v18 }
 0x358   : > { %11844 = vmatprep.mubr.f32.mxu1 %v14708_v35  ;;  %v3750_v31 = vpop.f32.mrf.mxu1  ;;  %11879 = vmatprep.subr.mxu0 %v5787_v5 }
 0x359   : > { %v14901_v6 = vpop.f32.mrf.mxu0  ;;  %v14904_v57 = vadd.f32 %v3750_v31, %v14714_v41  ;;  %v14906_v54 = vadd.f32 %v11443_v42, %v3878_v24  ;;  %11880 = vmatpush3.msra.mxu0 %v5787_v5  ;;  %v5785_v31 = vld [vmem:[#allocation9 + $0x1e0] sm:$0xff] }
 0x35a   : > { %v11366_v0 = vpop.f32.mrf.mxu1  ;;  %11881 = vmatprep.subr.mxu0 %v5786_v63 }
 0x35b   : > { %v11449_v51 = vpop.f32.mrf.mxu0  ;;  %11845 = vmatmul.mubr.f32.gmra.mxu1 %v14716_v21  ;;  %v3880_v47 = vadd.f32 %v11366_v0, %v14722_v61  ;;  %11882 = vmatpush3.msra.mxu0 %v5786_v63  ;;  %v5782_v63 = vld [vmem:[#allocation9 + $0x1c8] sm:$0xff] }
 0x35c   : > { %11847 = vmatprep.mubr.f32.mxu1 %v14720_v13  ;;  %v3760_v35 = vpop.f32.mrf.mxu1  ;;  %11883 = vmatprep.subr.mxu0 %v5785_v31 }
 0x35d   : > { %v14911_v25 = vpop.f32.mrf.mxu0  ;;  %v14914_v59 = vadd.f32 %v3760_v35, %v14726_v3  ;;  %v14916_v41 = vadd.f32 %v11446_v22, %v3880_v47  ;;  %11884 = vmatpush3.msra.mxu0 %v5785_v31  ;;  %v5784_v35 = vld [vmem:[#allocation9 + $0x1d8] sm:$0xff] }
 0x35e   : > { %v11369_v9 = vpop.f32.mrf.mxu1  ;;  %11885 = vmatprep.subr.mxu0 %v5784_v35  ;;  %v5771_v31 = vld [vmem:[#allocation9 + $0x78] sm:$0xff] }
 0x35f   : > { %v11452_v42 = vpop.f32.mrf.mxu0  ;;  %11848 = vmatmul.mubr.f32.gmra.mxu1 %v14728_v46  ;;  %v3882_v21 = vadd.f32 %v11369_v9, %v14734_v36  ;;  %11886 = vmatpush3.msra.mxu0 %v5784_v35  ;;  %v5780_v35 = vld [vmem:[#allocation9 + $0x1b8] sm:$0xff] }
 0x360   : > { %11850 = vmatprep.mubr.f32.mxu1 %v14732_v33  ;;  %v3770_v13 = vpop.f32.mrf.mxu1  ;;  %11957 = vmatprep.subr.mxu1 %v5771_v31 }
 0x361   : > { %v14921_v61 = vpop.f32.mrf.mxu0  ;;  %v14924_v52 = vadd.f32 %v3770_v13, %v14738_v11  ;;  %v14926_v3 = vadd.f32 %v11449_v51, %v3882_v21  ;;  %11958 = vmatpush3.msra.mxu1 %v5771_v31 }
 0x362   : > { %17198 = vst [vmem:[#allocation72_spill] sm:$0xff] %v14921_v61  ;;  %v11372_v15 = vpop.f32.mrf.mxu1 }
 0x363   : > { %v11455_v22 = vpop.f32.mrf.mxu0  ;;  %11851 = vmatmul.mubr.f32.gmra.mxu1 %v14740_v39  ;;  %v3884_v46 = vadd.f32 %v11372_v15, %v14746_v23  ;;  %v3549_v39 = vadd.f32 %v14750_v10, %v14764_v49  ;;  %v5783_v49 = vld [vmem:[#allocation9 + $0x1d0] sm:$0xff] }
 0x364   : > { %11853 = vmatprep.mubr.f32.mxu1 %v14744_v53  ;;  %v3780_v33 = vpop.f32.mrf.mxu1  ;;  %11887 = vmatprep.subr.mxu0 %v5783_v49 }
 0x365   : > { %v14931_v36 = vpop.f32.mrf.mxu0  ;;  %v14934_v24 = vadd.f32 %v3780_v33, %v14752_v62  ;;  %v14936_v11 = vadd.f32 %v11452_v42, %v3884_v46  ;;  %11888 = vmatpush3.msra.mxu0 %v5783_v49  ;;  %v5781_v33 = vld [vmem:[#allocation9 + $0x1c0] sm:$0xff] }
 0x366   : > { %17199 = vst [vmem:[#allocation39_spill] sm:$0xff] %v14931_v36  ;;  %v11375_v18 = vpop.f32.mrf.mxu1  ;;  %11889 = vmatprep.subr.mxu0 %v5782_v63  ;;  %v5768_v49 = vld [vmem:[#allocation9 + $0x60] sm:$0xff] }
 0x367   : > { %17200 = vst [vmem:[#allocation40_spill] sm:$0xff] %v14934_v24  ;;  %v11458_v0 = vpop.f32.mrf.mxu0  ;;  %11854 = vmatmul.mubr.f32.gmra.mxu1 %v14754_v8  ;;  %v3886_v53 = vadd.f32 %v11375_v18, %v14760_v56  ;;  %11890 = vmatpush3.msra.mxu0 %v5782_v63 }
 0x368   : > { %11856 = vmatprep.mubr.f32.mxu1 %v14758_v58  ;;  %v3790_v23 = vpop.f32.mrf.mxu1  ;;  %11891 = vmatprep.subr.mxu0 %v5781_v33 }
 0x369   : > { %v14943_v51 = vpop.f32.mrf.mxu0  ;;  %v14945_v62 = vadd.f32 %v3790_v23, %v3549_v39  ;;  %v14947_v47 = vadd.f32 %v11455_v22, %v3886_v53  ;;  %11892 = vmatpush3.msra.mxu0 %v5781_v33  ;;  %v17215_v33 = vld [vmem:[#allocation67_spill] sm:$0xff] }
 0x36a   : > { %17201 = vst [vmem:[#allocation71_spill] sm:$0xff] %v14943_v51  ;;  %v11378_v5 = vpop.f32.mrf.mxu1  ;;  %11893 = vmatprep.subr.mxu0 %v5780_v35  ;;  %v15074_v51 = vld [vmem:[#allocation9 + $0x378] sm:$0xff] }
 0x36b   : > { %17202 = vst [vmem:[#allocation38_spill] sm:$0xff] %v14945_v62  ;;  %v11461_v9 = vpop.f32.mrf.mxu0  ;;  %11857 = vmatmul.mubr.f32.gmra.mxu1 %v14768_v43  ;;  %v3888_v10 = vadd.f32 %v11378_v5, %v14774_v38  ;;  %v5769_v5 = vld [vmem:[#allocation9 + $0x68] sm:$0xff]  ;;  %11894 = vmatpush3.msra.mxu0 %v5780_v35  ;;  %17226 = vst [vmem:[#allocation81_spill] sm:$0xff] %v15074_v51 }
 0x36c   : > { %11859 = vmatprep.mubr.f32.mxu1 %v14772_v37  ;;  %v14952_v8 = vpop.f32.mrf.mxu1  ;;  %v5778_v35 = vld [vmem:[#allocation9 + $0x1a8] sm:$0xff] }
 0x36d   : > { %17203 = vst [vmem:[#allocation74_spill] sm:$0xff] %v14952_v8  ;;  %v14954_v58 = vpop.f32.mrf.mxu0  ;;  %v14956_v56 = vadd.f32 %v11458_v0, %v3888_v10  ;;  %v17212_v10 = vld [vmem:[#allocation32_spill] sm:$0xff] }
 0x36e   : > { %17204 = vst [vmem:[#allocation16_spill] sm:$0xff] %v14954_v58  ;;  %v11381_v42 = vpop.f32.mrf.mxu1 }
 0x36f   : > { %v11464_v21 = vpop.f32.mrf.mxu0  ;;  %11860 = vmatmul.mubr.f32.gmra.mxu1 %v14782_v12  ;;  %v3890_v43 = vadd.f32 %v11381_v42, %v14788_v26 }
 0x370   : > { %11862 = vmatprep.mubr.f32.mxu1 %v14786_v45  ;;  %v14961_v38 = vpop.f32.mrf.mxu1 }
 0x371   : > { %17205 = vst [vmem:[#allocation24_spill] sm:$0xff] %v14961_v38  ;;  %v14963_v37 = vpop.f32.mrf.mxu0  ;;  %v14965_v13 = vadd.f32 %v11461_v9, %v3890_v43  ;;  %v4793_v43 = vld [vmem:[#allocation3 + $0x19a] sm:$0xff] }
 0x372   : > { %17206 = vst [vmem:[#allocation73_spill] sm:$0xff] %v14963_v37  ;;  %v11384_v15 = vpop.f32.mrf.mxu1 }
 0x373   : > { %v11467_v22 = vpop.f32.mrf.mxu0  ;;  %11863 = vmatmul.mubr.f32.gmra.mxu1 %v14796_v27  ;;  %v3892_v12 = vadd.f32 %v11384_v15, %v14802_v4  ;;  %v17209_v27 = vld [vmem:[#allocation22_spill] sm:$0xff]  ;;  %v5779_v15 = vld [vmem:[#allocation9 + $0x1b0] sm:$0xff] }
 0x374   : > { %11865 = vmatprep.mubr.f32.mxu1 %v14800_v40  ;;  %v14970_v26 = vpop.f32.mrf.mxu1  ;;  %v5770_v40 = vld [vmem:[#allocation9 + $0x70] sm:$0xff]  ;;  %11895 = vmatprep.subr.mxu0 %v5779_v15 }
 0x375   : > { %17207 = vst [vmem:[#allocation76_spill] sm:$0xff] %v14970_v26  ;;  %v14972_v45 = vpop.f32.mrf.mxu0  ;;  %v14974_v46 = vadd.f32 %v11464_v21, %v3892_v12  ;;  %11959 = vmatprep.subr.mxu1 %v5770_v40  ;;  %11896 = vmatpush3.msra.mxu0 %v5779_v15  ;;  %v5777_v15 = vld [vmem:[#allocation9 + $0x1a0] sm:$0xff] }
 0x376   : > { %17208 = vst [vmem:[#allocation42_spill] sm:$0xff] %v14972_v45  ;;  %v11387_v18 = vpop.f32.mrf.mxu1  ;;  %11960 = vmatpush3.msra.mxu1 %v5770_v40  ;;  %11897 = vmatprep.subr.mxu0 %v5778_v35 }
 0x377   : > { %v11470_v0 = vpop.f32.mrf.mxu0  ;;  %11866 = vmatmul.mubr.f32.gmra.mxu1 %v14810_v60  ;;  %v3894_v39 = vadd.f32 %v11387_v18, %v17209_v27  ;;  %11961 = vmatprep.subr.mxu1 %v5769_v5  ;;  %v4794_v18 = vld [vmem:[#allocation3 + $0x1a2] sm:$0xff] }
 0x378   : > { %11868 = vmatprep.mubr.f32.mxu1 %v14814_v7  ;;  %v14979_v4 = vpop.f32.mrf.mxu1  ;;  %11962 = vmatpush3.msra.mxu1 %v5769_v5  ;;  %v5766_v27 = vld [vmem:[#allocation9 + $0x50] sm:$0xff]  ;;  %v5765_v5 = vld [vmem:[#allocation9 + $0x48] sm:$0xff] }
 0x379   : > { %17210 = vst [vmem:[#allocation43_spill] sm:$0xff] %v14979_v4  ;;  %v14981_v53 = vpop.f32.mrf.mxu0  ;;  %v14983_v23 = vadd.f32 %v11467_v22, %v3894_v39  ;;  %v5767_v22 = vld [vmem:[#allocation9 + $0x58] sm:$0xff]  ;;  %11963 = vmatprep.subr.mxu1 %v5768_v49  ;;  %11898 = vmatpush3.msra.mxu0 %v5778_v35  ;;  %v5761_v35 = vld [vmem:[#allocation9 + $0x28] sm:$0xff] }
 0x37a   : > { %17211 = vst [vmem:[#allocation75_spill] sm:$0xff] %v14981_v53  ;;  %v11390_v9 = vpop.f32.mrf.mxu1  ;;  %11964 = vmatpush3.msra.mxu1 %v5768_v49  ;;  %v5764_v49 = vld [vmem:[#allocation9 + $0x40] sm:$0xff]  ;;  %11899 = vmatprep.subr.mxu0 %v5777_v15 }
 0x37b   : > { %v11473_v60 = vpop.f32.mrf.mxu0  ;;  %11869 = vmatmul.mubr.f32.gmra.mxu1 %v14824_v44  ;;  %v3896_v7 = vadd.f32 %v11390_v9, %v14830_v19  ;;  %v17216_v19 = vld [vmem:[#allocation35_spill] sm:$0xff]  ;;  %11965 = vmatprep.subr.mxu1 %v5767_v22 }
 0x37c   : > { %11871 = vmatprep.mubr.f32.mxu1 %v17212_v10  ;;  %v14988_v42 = vpop.f32.mrf.mxu1  ;;  %11966 = vmatpush3.msra.mxu1 %v5767_v22  ;;  %v5763_v22 = vld [vmem:[#allocation9 + $0x38] sm:$0xff] }
 0x37d   : > { %17213 = vst [vmem:[#allocation41_spill] sm:$0xff] %v14988_v42  ;;  %v14990_v21 = vpop.f32.mrf.mxu0  ;;  %v14992_v63 = vadd.f32 %v11470_v0, %v3896_v7  ;;  %11967 = vmatprep.subr.mxu1 %v5766_v27  ;;  %11900 = vmatpush3.msra.mxu0 %v5777_v15  ;;  %v5759_v15 = vld [vmem:[#allocation9 + $0x18] sm:$0xff] }
 0x37e   : > { %17214 = vst [vmem:[#allocation78_spill] sm:$0xff] %v14990_v21  ;;  %v11393_v44 = vpop.f32.mrf.mxu1  ;;  %11968 = vmatpush3.msra.mxu1 %v5766_v27 }
 0x37f   : > { %v11476_v12 = vpop.f32.mrf.mxu0  ;;  %11872 = vmatmul.mubr.f32.gmra.mxu1 %v17215_v33  ;;  %v3898_v31 = vadd.f32 %v11393_v44, %v17216_v19  ;;  %11969 = vmatprep.subr.mxu1 %v5765_v5  ;;  %v15011_v33 = vld [vmem:[#allocation2] sm:$0xff] }
 0x380   : > { %11874 = vmatprep.mubr.f32.mxu1 %v4793_v43  ;;  %v14996_v39 = vpop.f32.mrf.mxu1  ;;  %11970 = vmatpush3.msra.mxu1 %v5765_v5 }
 0x381   : > { %17217 = vst [vmem:[#allocation25_spill] sm:$0xff] %v14996_v39  ;;  %v14998_v40 = vpop.f32.mrf.mxu0  ;;  %v15000_v0 = vadd.f32 %v11473_v60, %v3898_v31  ;;  %11971 = vmatprep.subr.mxu1 %v5764_v49 }
 0x382   : > { %17218 = vst [vmem:[#allocation77_spill] sm:$0xff] %v14998_v40  ;;  %v11396_v9 = vpop.f32.mrf.mxu1  ;;  %11972 = vmatpush3.msra.mxu1 %v5764_v49 }
 0x383   : > { %v15002_v7 = vpop.f32.mrf.mxu0  ;;  %11875 = vmatmul.mubr.f32.gmra.mxu1 %v4794_v18  ;;  %v3900_v10 = vadd.f32 %v11396_v9, %v14850_v14  ;;  %v5762_v18 = vld [vmem:[#allocation9 + $0x30] sm:$0xff]  ;;  %11973 = vmatprep.subr.mxu1 %v5763_v22 }
 0x384   : > { %v15005_v43 = vpop.f32.mrf.mxu1  ;;  %11989 = vmatprep.mubr.f32.mxu1 %v15011_v33  ;;  %11974 = vmatpush3.msra.mxu1 %v5763_v22 }
 0x385   : > { %17219 = vst [vmem:[#allocation80_spill] sm:$0xff] %v15005_v43  ;;  %v15007_v44 = vpop.f32.mrf.mxu0  ;;  %v15009_v60 = vadd.f32 %v11476_v12, %v3900_v10  ;;  %11975 = vmatprep.subr.mxu1 %v5762_v18  ;;  %v5776_v43 = vld [vmem:[#allocation9 + $0x198] sm:$0xff] }
 0x386   : > { %v11511_v19 = vpop.f32.mrf.mxu1  ;;  %11976 = vmatpush3.msra.mxu1 %v5762_v18  ;;  %11901 = vmatprep.subr.mxu0 %v5776_v43 }
 0x387   : > { %v15014_v14 = vpop.f32.mrf.mxu0  ;;  %v15017_v31 = vadd.f32 %v11511_v19, %v14866_v55  ;;  %v5760_v55 = vld [vmem:[#allocation9 + $0x20] sm:$0xff]  ;;  %11977 = vmatprep.subr.mxu1 %v5761_v35  ;;  %11902 = vmatpush3.msra.mxu0 %v5776_v43  ;;  %v5774_v43 = vld [vmem:[#allocation9 + $0x188] sm:$0xff] }
 0x388   : > { %v15019_v12 = vpop.f32.mrf.mxu1  ;;  %11978 = vmatpush3.msra.mxu1 %v5761_v35  ;;  %v5757_v35 = vld [vmem:[#allocation9 + $0x8] sm:$0xff] }
 0x389   : > { %v15021_v27 = vpop.f32.mrf.mxu0  ;;  %11979 = vmatprep.subr.mxu1 %v5760_v55 }
 0x38a   : > { %v11514_v5 = vpop.f32.mrf.mxu1  ;;  %11980 = vmatpush3.msra.mxu1 %v5760_v55 }
 0x38b   : > { %v15023_v9 = vpop.f32.mrf.mxu0  ;;  %v15026_v10 = vadd.f32 %v11514_v5, %v14876_v28  ;;  %v5758_v28 = vld [vmem:[#allocation9 + $0x10] sm:$0xff]  ;;  %11981 = vmatprep.subr.mxu1 %v5759_v15 }
 0x38c   : > { %v15028_v19 = vpop.f32.mrf.mxu1  ;;  %11982 = vmatpush3.msra.mxu1 %v5759_v15 }
 0x38d   : > { %v15030_v49 = vpop.f32.mrf.mxu0  ;;  %11983 = vmatprep.subr.mxu1 %v5758_v28 }
 0x38e   : > { %v11517_v40 = vpop.f32.mrf.mxu1  ;;  %11984 = vmatpush3.msra.mxu1 %v5758_v28 }
 0x38f   : > { %v15032_v21 = vpop.f32.mrf.mxu0  ;;  %v15035_v22 = vadd.f32 %v11517_v40, %v14886_v32  ;;  %v5775_v32 = vld [vmem:[#allocation9 + $0x190] sm:$0xff]  ;;  %v5756_v40 = vld [vmem:[#allocation9] sm:$0xff]  ;;  %11985 = vmatprep.subr.mxu1 %v5757_v35 }
 0x390   : > { %v15037_v5 = vpop.f32.mrf.mxu1  ;;  %11903 = vmatprep.subr.mxu0 %v5775_v32  ;;  %11986 = vmatpush3.msra.mxu1 %v5757_v35 }
 0x391   : > { %v15039_v18 = vpop.f32.mrf.mxu0  ;;  %11904 = vmatpush3.msra.mxu0 %v5775_v32  ;;  %11987 = vmatprep.subr.mxu1 %v5756_v40 }
 0x392   : > { %v11520_v53 = vpop.f32.mrf.mxu1  ;;  %11905 = vmatprep.subr.mxu0 %v5774_v43  ;;  %11988 = vmatpush3.msra.mxu1 %v5756_v40 }
 0x393   : > { %v15041_v39 = vpop.f32.mrf.mxu0  ;;  %v15044_v45 = vadd.f32 %v11520_v53, %v14896_v2  ;;  %11906 = vmatpush3.msra.mxu0 %v5774_v43  ;;  %v5773_v53 = vld [vmem:[#allocation9 + $0x180] sm:$0xff]  ;;  %11990 = vmatmul.mubr.f32.vlgmr.msra.gmra.mxu1 %v15011_v33 }
 0x394   : > { %v15046_v55 = vpop.f32.mrf.mxu1  ;;  %11907 = vmatprep.subr.mxu0 %v5773_v53 }
 0x395   : > { %v15048_v42 = vpop.f32.mrf.mxu0  ;;  %11908 = vmatpush3.msra.mxu0 %v5773_v53 }
 0x396   : > { %v11523_v15 = vpop.f32.mrf.mxu1  ;;  %12037 = vmatprep.subr.mxu0 %v15074_v51 }
 0x397   : > { %v15050_v37 = vpop.f32.mrf.mxu0  ;;  %v15053_v2 = vadd.f32 %v11523_v15, %v14906_v54 }
 0x398   : > { %17220 = vst [vmem:[#allocation45_spill] sm:$0xff] %v15050_v37  ;;  %v15055_v28 = vpop.f32.mrf.mxu1 }
 0x399   : > { %v15057_v4 = vpop.f32.mrf.mxu0 }
 0x39a   : > { %17221 = vst [vmem:[#allocation46_spill] sm:$0xff] %v15057_v4  ;;  %v11526_v35 = vpop.f32.mrf.mxu1 }
 0x39b   : > { %v15060_v32 = vpop.f32.mrf.mxu0  ;;  %v15063_v58 = vadd.f32 %v11526_v35, %v14916_v41 }
 0x39c   : > { %17222 = vst [vmem:[#allocation79_spill] sm:$0xff] %v15060_v32  ;;  %v15065_v26 = vpop.f32.mrf.mxu1 }
 0x39d   : > { %v15067_v54 = vpop.f32.mrf.mxu0 }
 0x39e   : > { %17223 = vst [vmem:[#allocation44_spill] sm:$0xff] %v15067_v54  ;;  %v11529_v40 = vpop.f32.mrf.mxu1 }
 0x39f   : > { %v15069_v43 = vpop.f32.mrf.mxu0  ;;  %v15072_v15 = vadd.f32 %v11529_v40, %v14926_v3 }
 0x3a0   : > { %17224 = vst [vmem:[#allocation17_spill] sm:$0xff] %v15069_v43  ;;  %v15076_v33 = vpop.f32.mrf.mxu1 }
 0x3a1   : > { %17225 = vst [vmem:[#allocation26_spill] sm:$0xff] %v15072_v15  ;;  %17227 = vst [vmem:[#allocation83_spill] sm:$0xff] %v15076_v33  ;;  %v15078_v53 = vpop.f32.mrf.mxu0 }
 0x3a2   : > { %17228 = vst [vmem:[#allocation48_spill] sm:$0xff] %v15078_v53  ;;  %v11532_v41 = vpop.f32.mrf.mxu1 }
 0x3a3   : > { %v15081_v35 = vpop.f32.mrf.mxu0  ;;  %v15084_v38 = vadd.f32 %v11532_v41, %v14936_v11 }
 0x3a4   : > { %17229 = vst [vmem:[#allocation49_spill] sm:$0xff] %v15081_v35  ;;  %v15086_v36 = vpop.f32.mrf.mxu1 }
 0x3a5   : > { %17230 = vst [vmem:[#allocation82_spill] sm:$0xff] %v15084_v38  ;;  %17231 = vst [vmem:[#allocation47_spill] sm:$0xff] %v15086_v36  ;;  %v15088_v43 = vpop.f32.mrf.mxu0 }
 0x3a6   : > { %17232 = vst [vmem:[#allocation85_spill] sm:$0xff] %v15088_v43  ;;  %v11535_v3 = vpop.f32.mrf.mxu1 }
 0x3a7   : > { %v15090_v40 = vpop.f32.mrf.mxu0  ;;  %v15093_v62 = vadd.f32 %v11535_v3, %v14947_v47 }
 0x3a8   : > { %17233 = vst [vmem:[#allocation27_spill] sm:$0xff] %v15090_v40  ;;  %v15095_v8 = vpop.f32.mrf.mxu1 }
 0x3a9   : > { %17234 = vst [vmem:[#allocation84_spill] sm:$0xff] %v15093_v62  ;;  %17235 = vst [vmem:[#allocation87_spill] sm:$0xff] %v15095_v8  ;;  %v15097_v53 = vpop.f32.mrf.mxu0 }
 0x3aa   : > { %17236 = vst [vmem:[#allocation51_spill] sm:$0xff] %v15097_v53  ;;  %v11538_v51 = vpop.f32.mrf.mxu1 }
 0x3ab   : > { %v15099_v54 = vpop.f32.mrf.mxu0  ;;  %v15102_v11 = vadd.f32 %v11538_v51, %v14956_v56 }
 0x3ac   : > { %17237 = vst [vmem:[#allocation52_spill] sm:$0xff] %v15099_v54  ;;  %v15104_v41 = vpop.f32.mrf.mxu1 }
 0x3ad   : > { %17238 = vst [vmem:[#allocation86_spill] sm:$0xff] %v15102_v11  ;;  %17239 = vst [vmem:[#allocation50_spill] sm:$0xff] %v15104_v41  ;;  %v15106_v35 = vpop.f32.mrf.mxu0 }
 0x3ae   : > { %17240 = vst [vmem:[#allocation89_spill] sm:$0xff] %v15106_v35  ;;  %v11541_v43 = vpop.f32.mrf.mxu1  ;;  %v6565_v35 = vld [vmem:[#allocation9 + $0xf8] sm:$0xff] }
 0x3af   : > { %v15108_v38 = vpop.f32.mrf.mxu0  ;;  %v15111_v47 = vadd.f32 %v11541_v43, %v14965_v13  ;;  %12117 = vmatprep.subr.mxu1 %v6565_v35  ;;  %v6564_v43 = vld [vmem:[#allocation9 + $0xf0] sm:$0xff] }
 0x3b0   : > { %17241 = vst [vmem:[#allocation18_spill] sm:$0xff] %v15108_v38  ;;  %v15113_v3 = vpop.f32.mrf.mxu1  ;;  %12118 = vmatpush3.msra.mxu1 %v6565_v35 }
 0x3b1   : > { %17242 = vst [vmem:[#allocation28_spill] sm:$0xff] %v15111_v47  ;;  %17243 = vst [vmem:[#allocation88_spill] sm:$0xff] %v15113_v3  ;;  %v15115_v40 = vpop.f32.mrf.mxu0  ;;  %12119 = vmatprep.subr.mxu1 %v6564_v43 }
 0x3b2   : > { %17244 = vst [vmem:[#allocation92_spill] sm:$0xff] %v15115_v40  ;;  %v11544_v53 = vpop.f32.mrf.mxu1  ;;  %12120 = vmatpush3.msra.mxu1 %v6564_v43 }
 0x3b3   : > { %v15117_v62 = vpop.f32.mrf.mxu0  ;;  %v15120_v51 = vadd.f32 %v11544_v53, %v14974_v46  ;;  %v6563_v46 = vld [vmem:[#allocation9 + $0xe8] sm:$0xff] }
 0x3b4   : > { %17245 = vst [vmem:[#allocation54_spill] sm:$0xff] %v15117_v62  ;;  %v15122_v56 = vpop.f32.mrf.mxu1  ;;  %12121 = vmatprep.subr.mxu1 %v6563_v46 }
 0x3b5   : > { %17246 = vst [vmem:[#allocation55_spill] sm:$0xff] %v15120_v51  ;;  %17247 = vst [vmem:[#allocation91_spill] sm:$0xff] %v15122_v56  ;;  %v15124_v54 = vpop.f32.mrf.mxu0  ;;  %12122 = vmatpush3.msra.mxu1 %v6563_v46  ;;  %v6559_v46 = vld [vmem:[#allocation9 + $0xc8] sm:$0xff] }
 0x3b6   : > { %17248 = vst [vmem:[#allocation53_spill] sm:$0xff] %v15124_v54  ;;  %v11547_v11 = vpop.f32.mrf.mxu1 }
 0x3b7   : > { %v15126_v38 = vpop.f32.mrf.mxu0  ;;  %v15129_v13 = vadd.f32 %v11547_v11, %v14983_v23  ;;  %v6561_v11 = vld [vmem:[#allocation9 + $0xd8] sm:$0xff] }
 0x3b8   : > { %17249 = vst [vmem:[#allocation94_spill] sm:$0xff] %v15126_v38  ;;  %v15131_v40 = vpop.f32.mrf.mxu1  ;;  %v6562_v38 = vld [vmem:[#allocation9 + $0xe0] sm:$0xff] }
 0x3b9   : > { %17250 = vst [vmem:[#allocation29_spill] sm:$0xff] %v15129_v13  ;;  %17251 = vst [vmem:[#allocation93_spill] sm:$0xff] %v15131_v40  ;;  %v15133_v62 = vpop.f32.mrf.mxu0  ;;  %12123 = vmatprep.subr.mxu1 %v6562_v38  ;;  %v6550_v40 = vld [vmem:[#allocation9 + $0x80] sm:$0xff] }
 0x3ba   : > { %17252 = vst [vmem:[#allocation96_spill] sm:$0xff] %v15133_v62  ;;  %v11550_v53 = vpop.f32.mrf.mxu1  ;;  %12124 = vmatpush3.msra.mxu1 %v6562_v38 }
 0x3bb   : > { %v15135_v51 = vpop.f32.mrf.mxu0  ;;  %v15138_v54 = vadd.f32 %v11550_v53, %v14992_v63  ;;  %12125 = vmatprep.subr.mxu1 %v6561_v11 }
 0x3bc   : > { %17253 = vst [vmem:[#allocation57_spill] sm:$0xff] %v15135_v51  ;;  %v15140_v23 = vpop.f32.mrf.mxu1  ;;  %12126 = vmatpush3.msra.mxu1 %v6561_v11  ;;  %v6560_v51 = vld [vmem:[#allocation9 + $0xd0] sm:$0xff] }
 0x3bd   : > { %17254 = vst [vmem:[#allocation58_spill] sm:$0xff] %v15138_v54  ;;  %17255 = vst [vmem:[#allocation95_spill] sm:$0xff] %v15140_v23  ;;  %v15142_v35 = vpop.f32.mrf.mxu0  ;;  %12127 = vmatprep.subr.mxu1 %v6560_v51  ;;  %v6551_v23 = vld [vmem:[#allocation9 + $0x88] sm:$0xff] }
 0x3be   : > { %17256 = vst [vmem:[#allocation56_spill] sm:$0xff] %v15142_v35  ;;  %12128 = vmatpush3.msra.mxu1 %v6560_v51  ;;  %v6556_v51 = vld [vmem:[#allocation9 + $0xb0] sm:$0xff] }
 0x3bf   : > { %v11553_v62 = vpop.f32.mrf.mxu1  ;;  %v15144_v13 = vpop.f32.mrf.mxu0  ;;  %12129 = vmatprep.subr.mxu1 %v6559_v46 }
 0x3c0   : > { %17257 = vst [vmem:[#allocation98_spill] sm:$0xff] %v15144_v13  ;;  %v15147_v43 = vadd.f32 %v11553_v62, %v15000_v0  ;;  %12130 = vmatpush3.msra.mxu1 %v6559_v46  ;;  %v6558_v13 = vld [vmem:[#allocation9 + $0xc0] sm:$0xff]  ;;  %v6557_v62 = vld [vmem:[#allocation9 + $0xb8] sm:$0xff] }
 0x3c1   : > { %v15149_v63 = vpop.f32.mrf.mxu1  ;;  %v15151_v53 = vpop.f32.mrf.mxu0  ;;  %12131 = vmatprep.subr.mxu1 %v6558_v13 }
 0x3c2   : > { %17258 = vst [vmem:[#allocation60_spill] sm:$0xff] %v15147_v43  ;;  %17259 = vst [vmem:[#allocation97_spill] sm:$0xff] %v15149_v63  ;;  %12132 = vmatpush3.msra.mxu1 %v6558_v13  ;;  %v6554_v13 = vld [vmem:[#allocation9 + $0xa0] sm:$0xff]  ;;  %v6552_v43 = vld [vmem:[#allocation9 + $0x90] sm:$0xff] }
 0x3c3   : > { %17260 = vst [vmem:[#allocation59_spill] sm:$0xff] %v15151_v53  ;;  %v11556_v35 = vpop.f32.mrf.mxu1  ;;  %v15158_v0 = vpop.f32.mrf.mxu0  ;;  %12133 = vmatprep.subr.mxu1 %v6557_v62 }
 0x3c4   : > { %v15154_v38 = vadd.f32 %v11556_v35, %v15009_v60  ;;  %12134 = vmatpush3.msra.mxu1 %v6557_v62  ;;  %v6555_v60 = vld [vmem:[#allocation9 + $0xa8] sm:$0xff] }
 0x3c5   : > { %v15156_v54 = vpop.f32.mrf.mxu1  ;;  %12135 = vmatprep.subr.mxu1 %v6556_v51  ;;  %v15164_v35 = vpop.f32.mrf.mxu0 }
 0x3c6   : > { %17261 = vst [vmem:[#allocation90_spill] sm:$0xff] %v15154_v38  ;;  %17262 = vst [vmem:[#allocation14_spill] sm:$0xff] %v15156_v54  ;;  %12136 = vmatpush3.msra.mxu1 %v6556_v51  ;;  %v6553_v54 = vld [vmem:[#allocation9 + $0x98] sm:$0xff] }
 0x3c7   : > { %v15160_v11 = vpop.f32.mrf.mxu1  ;;  %12137 = vmatprep.subr.mxu1 %v6555_v60  ;;  %v15170_v62 = vpop.f32.mrf.mxu0 }
 0x3c8   : > { %12138 = vmatpush3.msra.mxu1 %v6555_v60 }
 0x3c9   : > { %v15162_v53 = vpop.f32.mrf.mxu1  ;;  %12139 = vmatprep.subr.mxu1 %v6554_v13  ;;  %v15176_v60 = vpop.f32.mrf.mxu0 }
 0x3ca   : > { %12140 = vmatpush3.msra.mxu1 %v6554_v13 }
 0x3cb   : > { %v15166_v46 = vpop.f32.mrf.mxu1  ;;  %12141 = vmatprep.subr.mxu1 %v6553_v54  ;;  %v15182_v47 = vpop.f32.mrf.mxu0 }
 0x3cc   : > { %12142 = vmatpush3.msra.mxu1 %v6553_v54 }
 0x3cd   : > { %v15168_v38 = vpop.f32.mrf.mxu1  ;;  %12143 = vmatprep.subr.mxu1 %v6552_v43  ;;  %v15188_v41 = vpop.f32.mrf.mxu0 }
 0x3ce   : > { %12144 = vmatpush3.msra.mxu1 %v6552_v43 }
 0x3cf   : > { %v15172_v63 = vpop.f32.mrf.mxu1  ;;  %12145 = vmatprep.subr.mxu1 %v6551_v23  ;;  %v15194_v36 = vpop.f32.mrf.mxu0 }
 0x3d0   : > { %12146 = vmatpush3.msra.mxu1 %v6551_v23 }
 0x3d1   : > { %v15174_v51 = vpop.f32.mrf.mxu1  ;;  %12147 = vmatprep.subr.mxu1 %v6550_v40  ;;  %v15200_v15 = vpop.f32.mrf.mxu0 }
 0x3d2   : > { %12148 = vmatpush3.msra.mxu1 %v6550_v40  ;;  %17267 = vst [vmem:[#allocation64_spill] sm:$0xff] %v15200_v15 }
 0x3d3   : > { %v15178_v56 = vpop.f32.mrf.mxu1  ;;  %v15206_v24 = vpop.f32.mrf.mxu0 }
 0x3d4   : > { %17270 = vst [vmem:[#allocation32_spill] sm:$0xff] %v15206_v24 }
 0x3d5   : > { %v15180_v13 = vpop.f32.mrf.mxu1 }
 0x3d7   : > { %v15184_v3 = vpop.f32.mrf.mxu1 }
 0x3d9   : > { %v15186_v54 = vpop.f32.mrf.mxu1 }
 0x3db   : > { %v15190_v43 = vpop.f32.mrf.mxu1 }
 0x3dc   : > { %17263 = vst [vmem:[#allocation62_spill] sm:$0xff] %v15190_v43  ;;  %v15212_v43 = vpop.f32.mrf.mxu0 }
 0x3dd   : > { %v15192_v8 = vpop.f32.mrf.mxu1 }
 0x3de   : > { %17264 = vst [vmem:[#allocation30_spill] sm:$0xff] %v15192_v8 }
 0x3df   : > { %v15196_v32 = vpop.f32.mrf.mxu1 }
 0x3e0   : > { %17265 = vst [vmem:[#allocation21_spill] sm:$0xff] %v15196_v32  ;;  %v15218_v32 = vpop.f32.mrf.mxu0 }
 0x3e1   : > { %v15198_v23 = vpop.f32.mrf.mxu1  ;;  %17275 = vst [vmem:[#allocation101_spill] sm:$0xff] %v15218_v32 }
 0x3e2   : > { %17266 = vst [vmem:[#allocation20_spill] sm:$0xff] %v15198_v23 }
 0x3e3   : > { %v15202_v40 = vpop.f32.mrf.mxu1 }
 0x3e4   : > { %17268 = vst [vmem:[#allocation61_spill] sm:$0xff] %v15202_v40  ;;  %v15224_v40 = vpop.f32.mrf.mxu0 }
 0x3e5   : > { %v15204_v61 = vpop.f32.mrf.mxu1  ;;  %17278 = vst [vmem:[#allocation104_spill] sm:$0xff] %v15224_v40 }
 0x3e6   : > { %17269 = vst [vmem:[#allocation22_spill] sm:$0xff] %v15204_v61 }
 0x3e7   : > { %v15208_v4 = vpop.f32.mrf.mxu1 }
 0x3e8   : > { %17271 = vst [vmem:[#allocation67_spill] sm:$0xff] %v15208_v4  ;;  %v15230_v4 = vld [vmem:[#allocation9 + $0x3f8] sm:$0xff] }
 0x3e9   : > { %v15210_v33 = vpop.f32.mrf.mxu1  ;;  %17281 = vst [vmem:[#allocation107_spill] sm:$0xff] %v15230_v4  ;;  %12277 = vmatprep.subr.mxu1 %v15230_v4 }
 0x3ea   : > { %17272 = vst [vmem:[#allocation35_spill] sm:$0xff] %v15210_v33  ;;  %v15233_v33 = vpop.f32.mrf.mxu0 }
 0x3eb   : > { %v15214_v8 = vpop.f32.mrf.mxu1 }
 0x3ec   : > { %17273 = vst [vmem:[#allocation99_spill] sm:$0xff] %v15214_v8  ;;  %v15239_v32 = vpop.f32.mrf.mxu0 }
 0x3ed   : > { %v15216_v37 = vpop.f32.mrf.mxu1  ;;  %17284 = vst [vmem:[#allocation110_spill] sm:$0xff] %v15239_v32 }
 0x3ee   : > { %17274 = vst [vmem:[#allocation100_spill] sm:$0xff] %v15216_v37  ;;  %v15248_v40 = vpop.f32.mrf.mxu0 }
 0x3ef   : > { %v15220_v23 = vpop.f32.mrf.mxu1 }
 0x3f0   : > { %17276 = vst [vmem:[#allocation102_spill] sm:$0xff] %v15220_v23 }
 0x3f1   : > { %v15222_v15 = vpop.f32.mrf.mxu1 }
 0x3f2   : > { %17277 = vst [vmem:[#allocation103_spill] sm:$0xff] %v15222_v15  ;;  %v4179_v15 = vadd.f32 %v14855_v50, %v14864_v20 }
 0x3f3   : > { %v15226_v61 = vpop.f32.mrf.mxu1 }
 0x3f4   : > { %17279 = vst [vmem:[#allocation105_spill] sm:$0xff] %v15226_v61 }
 0x3f5   : > { %v15228_v24 = vpop.f32.mrf.mxu1 }
 0x3f6   : > { %17280 = vst [vmem:[#allocation106_spill] sm:$0xff] %v15228_v24  ;;  %v4453_v24 = vadd.f32 %v15019_v12, %v4179_v15  ;;  %v4183_v12 = vadd.f32 %v14871_v16, %v14884_v1  ;;  %v15263_v15 = vpop.f32.mrf.mxu0  ;;  %v4185_v16 = vadd.f32 %v14881_v17, %v14894_v29  ;;  %v4732_v1 = vadd.f32 %v15023_v9, %v15035_v22 }
 0x3f7   : > { %v15235_v8 = vpop.f32.mrf.mxu1 }
 0x3f8   : > { %17282 = vst [vmem:[#allocation108_spill] sm:$0xff] %v15235_v8  ;;  %v4181_v8 = vadd.f32 %v14861_v30, %v14874_v34  ;;  %v4727_v20 = vadd.f32 %v15007_v44, %v4453_v24  ;;  %v4730_v34 = vadd.f32 %v15014_v14, %v15026_v10  ;;  %v15280_v44 = vpop.f32.mrf.mxu0  ;;  %v15285_v14 = vld [vmem:[%s16923_s5] ss:$0 sm:$0xff]  ;;  %v5042_v17 = vadd.f32 %v15172_v63, %v4732_v1  ;;  %v17292_v1 = vld [vmem:[#allocation31_spill] sm:$0xff] }
 0x3f9   : > { %v15237_v37 = vpop.f32.mrf.mxu1  ;;  %v4734_v63 = vadd.f32 %v15032_v21, %v15044_v45 }
 0x3fa   : > { %17283 = vst [vmem:[#allocation109_spill] sm:$0xff] %v15237_v37  ;;  %v4728_v37 = vadd.f32 %v15002_v7, %v15017_v31  ;;  %v5037_v30 = vadd.f32 %v15162_v53, %v4727_v20  ;;  %v4457_v7 = vadd.f32 %v15037_v5, %v4183_v12  ;;  %v4459_v53 = vadd.f32 %v15046_v55, %v4185_v16  ;;  %v17291_v16 = vld [vmem:[#allocation66_spill] sm:$0xff] }
 0x3fb   : > { %v15241_v23 = vpop.f32.mrf.mxu1  ;;  %v5316_v21 = vadd.f32 %v15182_v47, %v5042_v17 }
 0x3fc   : > { %17285 = vst [vmem:[#allocation111_spill] sm:$0xff] %v15241_v23  ;;  %v4455_v23 = vadd.f32 %v15028_v19, %v4181_v8  ;;  %v5038_v50 = vadd.f32 %v15160_v11, %v4728_v37  ;;  %v5040_v8 = vadd.f32 %v15166_v46, %v4730_v34  ;;  %v4731_v29 = vadd.f32 %v15030_v49, %v4457_v7  ;;  %v17287_v46 = vld [vmem:[#allocation19_spill] sm:$0xff]  ;;  %v15305_v49 = vpop.f32.mrf.mxu0  ;;  %v17290_v7 = vld [vmem:[#allocation34_spill] sm:$0xff] }
 0x3fd   : > { %v15245_v61 = vpop.f32.mrf.mxu1  ;;  %v17289_v34 = vld [vmem:[#allocation63_spill] sm:$0xff] }
 0x3fe   : > { %v4729_v24 = vadd.f32 %v15021_v27, %v4455_v23  ;;  %v5312_v37 = vadd.f32 %v15158_v0, %v5038_v50  ;;  %v5311_v27 = vadd.f32 %v15164_v35, %v5037_v30  ;;  %v5314_v11 = vadd.f32 %v15170_v62, %v5040_v8  ;;  %v17288_v23 = vld [vmem:[#allocation33_spill] sm:$0xff]  ;;  %v15334_v47 = vpop.f32.mrf.mxu0 }
 0x3ff   : > { %v15250_v4 = vpop.f32.mrf.mxu1  ;;  %v15298_v50 = vadd.f32 %v17288_v23, %v17287_v46  ;;  %v5041_v55 = vadd.f32 %v15174_v51, %v4731_v29  ;;  %v15314_v8 = vadd.f32 %v17290_v7, %v17289_v34  ;;  %v5044_v51 = vadd.f32 %v15178_v56, %v4734_v63  ;;  %v17295_v23 = vld [vmem:[#allocation36_spill] sm:$0xff] }
 0x400   : > { %17286 = vst [vmem:[#allocation112_spill] sm:$0xff] %v15250_v4  ;;  %v5039_v10 = vadd.f32 %v15168_v38, %v4729_v24  ;;  %v4187_v38 = vadd.f32 %v14891_v48, %v14904_v57  ;;  %v4733_v57 = vadd.f32 %v15039_v18, %v4459_v53  ;;  %v4189_v18 = vadd.f32 %v14901_v6, %v14914_v59  ;;  %v17293_v6 = vld [vmem:[#allocation65_spill] sm:$0xff]  ;;  %v17294_v59 = vld [vmem:[#allocation15_spill] sm:$0xff]  ;;  %v17298_v7 = vld [vmem:[#allocation64_spill] sm:$0xff] }
 0x401   : > { %v15256_v32 = vpop.f32.mrf.mxu1  ;;  %v15346_v29 = vadd.f32 %v17294_v59, %v17293_v6  ;;  %v5318_v46 = vadd.f32 %v15194_v36, %v5044_v51  ;;  %v17307_v59 = vld [vmem:[#allocation40_spill] sm:$0xff] }
 0x402   : > { %v5313_v30 = vadd.f32 %v15176_v60, %v5039_v10  ;;  %v4461_v48 = vadd.f32 %v15055_v28, %v4187_v38  ;;  %v4736_v28 = vadd.f32 %v15041_v39, %v15053_v2  ;;  %v5315_v10 = vadd.f32 %v15188_v41, %v5041_v55  ;;  %v17296_v38 = vld [vmem:[#allocation68_spill] sm:$0xff] }
 0x403   : > { %v15265_v4 = vpop.f32.mrf.mxu1  ;;  %v4463_v39 = vadd.f32 %v15065_v26, %v4189_v18  ;;  %v15360_v55 = vadd.f32 %v17296_v38, %v17295_v23  ;;  %v4191_v26 = vadd.f32 %v14911_v25, %v14924_v52  ;;  %v17299_v25 = vld [vmem:[#allocation70_spill] sm:$0xff]  ;;  %v17300_v52 = vld [vmem:[#allocation37_spill] sm:$0xff] }
 0x404   : > { %v5046_v2 = vadd.f32 %v15184_v3, %v4736_v28  ;;  %v4735_v41 = vadd.f32 %v15048_v42, %v4461_v48  ;;  %v17297_v3 = vld [vmem:[#allocation45_spill] sm:$0xff] }
 0x405   : > { %v15271_v31 = vpop.f32.mrf.mxu1  ;;  %v4738_v63 = vadd.f32 %v17297_v3, %v15063_v58 }
 0x406   : > { %v5045_v42 = vadd.f32 %v15186_v54, %v4735_v41  ;;  %v15378_v54 = vadd.f32 %v17300_v52, %v17299_v25  ;;  %v6254_v25 = vld [vmem:[#allocation9 + $0x370] sm:$0xff]  ;;  %v17312_v52 = vld [vmem:[#allocation47_spill] sm:$0xff] }
 0x407   : > { %v11831_v19 = vpop.f32.mrf.mxu1 }
 0x408   : > { %v5586_v5 = vadd.f32 %v11831_v19, %v5312_v37  ;;  %v15328_v19 = vadd.f32 %v17292_v1, %v17291_v16  ;;  %v17304_v1 = vld [vmem:[#allocation62_spill] sm:$0xff] }
 0x409   : > { %v5426_v9 = vpop.f32.mrf.mxu1  ;;  %v5048_v18 = vadd.f32 %v17304_v1, %v4738_v63  ;;  %v17311_v63 = vld [vmem:[#allocation30_spill] sm:$0xff] }
 0x40a   : > { %v15293_v22 = vadd.f32 %v15285_v14, %v5586_v5  ;;  %v5585_v0 = vadd.f32 %v5426_v9, %v5311_v27  ;;  %v5043_v5 = vadd.f32 %v15180_v13, %v4733_v57  ;;  %v17301_v57 = vld [vmem:[#allocation83_spill] sm:$0xff] }
 0x40b   : > { %v11834_v35 = vpop.f32.mrf.mxu1  ;;  %v4465_v58 = vadd.f32 %v17301_v57, %v4191_v26  ;;  %v5319_v26 = vadd.f32 %v15212_v43, %v5045_v42 }
 0x40c   : > { %v16962_v20 = vmax.f32 %v15293_v22, 0.0  ;;  %v15309_v12 = vadd.f32 %v15285_v14, %v5585_v0  ;;  %v5588_v62 = vadd.f32 %v11834_v35, %v5314_v11  ;;  %v15367_v35 = vpop.f32.mrf.mxu0  ;;  %v5317_v48 = vadd.f32 %v17298_v7, %v5043_v5  ;;  %v17305_v5 = vld [vmem:[#allocation69_spill] sm:$0xff] }
 0x40d   : > { %v5436_v45 = vpop.f32.mrf.mxu1 }
 0x40e   : > { %5689 = vst [vmem:[#allocation2 + $0x21] sm:$0xff] %v16962_v20  ;;  %v16963_v24 = vmax.f32 %v15309_v12, 0.0  ;;  %v15324_v60 = vadd.f32 %v15285_v14, %v5588_v62  ;;  %v5587_v37 = vadd.f32 %v5436_v45, %v5313_v30  ;;  %v17302_v45 = vld [vmem:[#allocation46_spill] sm:$0xff] }
 0x40f   : > { %v11837_v56 = vpop.f32.mrf.mxu1 }
 0x410   : > { %5688 = vst [vmem:[#allocation2 + $0x19] sm:$0xff] %v16963_v24  ;;  %v16960_v27 = vmax.f32 %v15324_v60, 0.0  ;;  %v15342_v53 = vadd.f32 %v15285_v14, %v5587_v37  ;;  %v5590_v17 = vadd.f32 %v11837_v56, %v5316_v21  ;;  %v4737_v21 = vadd.f32 %v17302_v45, %v4463_v39  ;;  %v17303_v37 = vld [vmem:[#allocation32_spill] sm:$0xff]  ;;  %v17313_v45 = vld [vmem:[#allocation21_spill] sm:$0xff] }
 0x411   : > { %v5446_v13 = vpop.f32.mrf.mxu1  ;;  %v5320_v16 = vadd.f32 %v17303_v37, %v5046_v2  ;;  %v17308_v39 = vld [vmem:[#allocation72_spill] sm:$0xff]  ;;  %v17310_v2 = vld [vmem:[#allocation79_spill] sm:$0xff] }
 0x412   : > { %5691 = vst [vmem:[#allocation2 + $0x39] sm:$0xff] %v16960_v27  ;;  %v16961_v9 = vmax.f32 %v15342_v53, 0.0  ;;  %v15355_v0 = vadd.f32 %v15285_v14, %v5590_v17  ;;  %v5589_v11 = vadd.f32 %v5446_v13, %v5315_v10  ;;  %v17306_v17 = vld [vmem:[#allocation23_spill] sm:$0xff]  ;;  %v4193_v41 = vadd.f32 %v17308_v39, %v17307_v59  ;;  %v17309_v13 = vld [vmem:[#allocation26_spill] sm:$0xff]  ;;  %v17314_v37 = vld [vmem:[#allocation44_spill] sm:$0xff] }
 0x413   : > { %v11840_v62 = vpop.f32.mrf.mxu1  ;;  %v15392_v6 = vadd.f32 %v17306_v17, %v17305_v5  ;;  %v4739_v43 = vadd.f32 %v17314_v37, %v4465_v58  ;;  %v17316_v5 = vld [vmem:[#allocation101_spill] sm:$0xff]  ;;  %v17317_v59 = vld [vmem:[#allocation74_spill] sm:$0xff]  ;;  %v17319_v58 = vld [vmem:[#allocation39_spill] sm:$0xff] }
 0x414   : > { %5690 = vst [vmem:[#allocation2 + $0x31] sm:$0xff] %v16961_v9  ;;  %v16958_v36 = vmax.f32 %v15355_v0, 0.0  ;;  %v15373_v30 = vadd.f32 %v15285_v14, %v5589_v11  ;;  %v5592_v34 = vadd.f32 %v11840_v62, %v5318_v46  ;;  %v4740_v11 = vadd.f32 %v17310_v2, %v17309_v13  ;;  %v15398_v46 = vpop.f32.mrf.mxu0  ;;  %v17320_v2 = vld [vmem:[#allocation20_spill] sm:$0xff] }
 0x415   : > { %v5456_v51 = vpop.f32.mrf.mxu1  ;;  %v5047_v62 = vadd.f32 %v17311_v63, %v4737_v21  ;;  %v4467_v57 = vadd.f32 %v17312_v52, %v4193_v41  ;;  %v5322_v17 = vadd.f32 %v17316_v5, %v5048_v18  ;;  %v3887_v39 = vadd.f32 %v17317_v59, %v15298_v50  ;;  %v17318_v41 = vld [vmem:[#allocation38_spill] sm:$0xff]  ;;  %v17325_v5 = vld [vmem:[#allocation48_spill] sm:$0xff] }
 0x416   : > { %5693 = vst [vmem:[#allocation2 + $0x51] sm:$0xff] %v16958_v36  ;;  %v16959_v28 = vmax.f32 %v15373_v30, 0.0  ;;  %v15388_v56 = vadd.f32 %v15285_v14, %v5592_v34  ;;  %v5591_v10 = vadd.f32 %v5456_v51, %v5317_v48  ;;  %v5050_v51 = vadd.f32 %v17313_v45, %v4740_v11  ;;  %v15423_v63 = vpop.f32.mrf.mxu0  ;;  %v17323_v45 = vld [vmem:[#allocation104_spill] sm:$0xff] }
 0x417   : > { %v11843_v23 = vpop.f32.mrf.mxu1  ;;  %v5722_v38 = vld [vmem:[#allocation2 + $0x18] sm:$0xff]  ;;  %v5723_v3 = vld [vmem:[#allocation2 + $0x20] sm:$0xff]  ;;  %v4195_v13 = vadd.f32 %v17319_v58, %v17318_v41  ;;  %v5049_v11 = vadd.f32 %v17320_v2, %v4739_v43  ;;  %v5321_v37 = vadd.f32 %v17323_v45, %v5047_v62  ;;  %v6253_v43 = vld [vmem:[#allocation9 + $0x368] sm:$0xff]  ;;  %v4741_v59 = vadd.f32 %v17325_v5, %v4467_v57 }
 0x418   : > { %5692 = vst [vmem:[#allocation2 + $0x49] sm:$0xff] %v16959_v28  ;;  %v16957_v34 = vmax.f32 %v15388_v56, 0.0  ;;  %v5630_v7 = vadd.f32 %v15285_v14, %v5591_v10  ;;  %v5594_v48 = vadd.f32 %v11843_v23, %v5320_v16  ;;  %11909 = vmatprep.mubr.f32.mxu0 %v5722_v38  ;;  %11992 = vmatprep.mubr.f32.mxu1 %v5722_v38  ;;  %v17315_v10 = vld [vmem:[#allocation81_spill] sm:$0xff]  ;;  %v17321_v23 = vld [vmem:[#allocation82_spill] sm:$0xff]  ;;  %v15451_v5 = vpop.f32.mrf.mxu0 }
 0x419   : > { %v5466_v42 = vpop.f32.mrf.mxu1  ;;  %11910 = vmatmul.mubr.f32.vlgmr.msra.gmra.mxu0 %v5723_v3  ;;  %11993 = vmatmul.mubr.f32.gmra.mxu1 %v5723_v3  ;;  %v17322_v38 = vld [vmem:[#allocation17_spill] sm:$0xff] }
 0x41a   : > { %5695 = vst [vmem:[#allocation2 + $0x69] sm:$0xff] %v16957_v34  ;;  %v15411_v21 = vmax.f32 %v5630_v7, 0.0  ;;  %v5633_v1 = vadd.f32 %v15285_v14, %v5594_v48  ;;  %v5593_v16 = vadd.f32 %v5466_v42, %v5319_v26  ;;  %12038 = vmatpush3.msra.mxu0 %v17315_v10  ;;  %v4742_v3 = vadd.f32 %v17322_v38, %v17321_v23  ;;  %v17324_v42 = vld [vmem:[#allocation87_spill] sm:$0xff]  ;;  %v17330_v45 = vld [vmem:[#allocation49_spill] sm:$0xff]  ;;  %v15481_v28 = vpop.f32.mrf.mxu0 }
 0x41b   : > { %v11846_v7 = vpop.f32.mrf.mxu1  ;;  %v15425_v48 = vld [vmem:[#allocation2 + $0x30] sm:$0xff]  ;;  %v15427_v26 = vld [vmem:[#allocation2 + $0x38] sm:$0xff]  ;;  %12039 = vmatprep.subr.mxu0 %v6254_v25  ;;  %v4469_v10 = vadd.f32 %v17324_v42, %v4195_v13  ;;  %v17328_v23 = vld [vmem:[#allocation71_spill] sm:$0xff] }
 0x41c   : > { %5694 = vst [vmem:[#allocation2 + $0x61] sm:$0xff] %v15411_v21  ;;  %v15430_v18 = vmax.f32 %v5633_v1, 0.0  ;;  %v5632_v50 = vadd.f32 %v15285_v14, %v5593_v16  ;;  %v5596_v52 = vadd.f32 %v11846_v7, %v5322_v17  ;;  %11912 = vmatprep.mubr.f32.mxu0 %v15425_v48  ;;  %11995 = vmatprep.mubr.f32.mxu1 %v15425_v48  ;;  %v17326_v16 = vld [vmem:[#allocation61_spill] sm:$0xff]  ;;  %v17327_v13 = vld [vmem:[#allocation24_spill] sm:$0xff]  ;;  %v15509_v9 = vpop.f32.mrf.mxu0 }
 0x41d   : > { %v5476_v41 = vpop.f32.mrf.mxu1  ;;  %11913 = vmatmul.mubr.f32.gmra.mxu0 %v15427_v26  ;;  %11996 = vmatmul.mubr.f32.gmra.mxu1 %v15427_v26  ;;  %v5324_v1 = vadd.f32 %v15233_v33, %v5050_v51  ;;  %v5052_v17 = vadd.f32 %v17326_v16, %v4742_v3  ;;  %v3889_v57 = vadd.f32 %v17327_v13, %v15314_v8  ;;  %v17329_v7 = vld [vmem:[#allocation84_spill] sm:$0xff]  ;;  %v17331_v3 = vld [vmem:[#allocation110_spill] sm:$0xff] }
 0x41e   : > { %5697 = vst [vmem:[#allocation2 + $0x81] sm:$0xff] %v15430_v18  ;;  %v15443_v58 = vmax.f32 %v5632_v50, 0.0  ;;  %v5635_v62 = vadd.f32 %v15285_v14, %v5596_v52  ;;  %v5595_v2 = vadd.f32 %v5476_v41, %v5321_v37  ;;  %12040 = vmatpush3.msra.mxu0 %v6254_v25  ;;  %v4197_v38 = vadd.f32 %v17328_v23, %v3887_v39  ;;  %v17332_v52 = vld [vmem:[#allocation22_spill] sm:$0xff]  ;;  %v15539_v24 = vpop.f32.mrf.mxu0 }
 0x41f   : > { %v4744_v42 = vadd.f32 %v17330_v45, %v17329_v7  ;;  %v11849_v33 = vpop.f32.mrf.mxu1  ;;  %v15453_v51 = vld [vmem:[#allocation2 + $0x48] sm:$0xff]  ;;  %v5323_v50 = vadd.f32 %v17331_v3, %v5049_v11  ;;  %v15456_v16 = vld [vmem:[#allocation2 + $0x50] sm:$0xff]  ;;  %12041 = vmatprep.subr.mxu0 %v6253_v43  ;;  %v5051_v25 = vadd.f32 %v17332_v52, %v4741_v59  ;;  %v6252_v41 = vld [vmem:[#allocation9 + $0x360] sm:$0xff] }
 0x420   : > { %5696 = vst [vmem:[#allocation2 + $0x79] sm:$0xff] %v15443_v58  ;;  %v15460_v8 = vmax.f32 %v5635_v62, 0.0  ;;  %v5634_v39 = vadd.f32 %v15285_v14, %v5595_v2  ;;  %v5598_v37 = vadd.f32 %v11849_v33, %v5324_v1  ;;  %11915 = vmatprep.mubr.f32.mxu0 %v15453_v51  ;;  %11998 = vmatprep.mubr.f32.mxu1 %v15453_v51  ;;  %v17333_v13 = vld [vmem:[#allocation50_spill] sm:$0xff]  ;;  %v17334_v11 = vld [vmem:[#allocation67_spill] sm:$0xff]  ;;  %v17335_v45 = vld [vmem:[#allocation85_spill] sm:$0xff] }
 0x421   : > { %v4471_v23 = vadd.f32 %v17333_v13, %v4197_v38  ;;  %v5054_v7 = vadd.f32 %v17334_v11, %v4744_v42  ;;  %v4743_v3 = vadd.f32 %v17335_v45, %v4469_v10  ;;  %v5486_v34 = vpop.f32.mrf.mxu1  ;;  %11916 = vmatmul.mubr.f32.gmra.mxu0 %v15456_v16  ;;  %11999 = vmatmul.mubr.f32.gmra.mxu1 %v15456_v16  ;;  %v17336_v38 = vld [vmem:[#allocation76_spill] sm:$0xff]  ;;  %v17338_v52 = vld [vmem:[#allocation35_spill] sm:$0xff]  ;;  %v17339_v11 = vld [vmem:[#allocation86_spill] sm:$0xff] }
 0x422   : > { %5699 = vst [vmem:[#allocation2 + $0x99] sm:$0xff] %v15460_v8  ;;  %v15471_v59 = vmax.f32 %v5634_v39, 0.0  ;;  %v5637_v1 = vadd.f32 %v15285_v14, %v5598_v37  ;;  %v5597_v62 = vadd.f32 %v5486_v34, %v5323_v50  ;;  %12042 = vmatpush3.msra.mxu0 %v6253_v43  ;;  %v5326_v2 = vadd.f32 %v15248_v40, %v5052_v17  ;;  %v17337_v33 = vld [vmem:[#allocation16_spill] sm:$0xff]  ;;  %v17340_v45 = vld [vmem:[#allocation27_spill] sm:$0xff]  ;;  %v6251_v17 = vld [vmem:[#allocation9 + $0x358] sm:$0xff] }
 0x423   : > { %v3891_v42 = vadd.f32 %v17336_v38, %v15328_v19  ;;  %v4199_v10 = vadd.f32 %v17337_v33, %v3889_v57  ;;  %v5053_v13 = vadd.f32 %v17338_v52, %v4743_v3  ;;  %v4746_v36 = vadd.f32 %v17340_v45, %v17339_v11  ;;  %v11852_v39 = vpop.f32.mrf.mxu1  ;;  %v15483_v27 = vld [vmem:[#allocation2 + $0x60] sm:$0xff]  ;;  %v15485_v37 = vld [vmem:[#allocation2 + $0x68] sm:$0xff]  ;;  %12043 = vmatprep.subr.mxu0 %v6252_v41  ;;  %v17341_v57 = vld [vmem:[#allocation88_spill] sm:$0xff] }
 0x424   : > { %5698 = vst [vmem:[#allocation2 + $0x91] sm:$0xff] %v15471_v59  ;;  %v15488_v40 = vmax.f32 %v5637_v1, 0.0  ;;  %v5636_v19 = vadd.f32 %v15285_v14, %v5597_v62  ;;  %v5600_v34 = vadd.f32 %v11852_v39, %v5326_v2  ;;  %11918 = vmatprep.mubr.f32.mxu0 %v15483_v27  ;;  %12001 = vmatprep.mubr.f32.mxu1 %v15483_v27  ;;  %v17342_v3 = vld [vmem:[#allocation51_spill] sm:$0xff]  ;;  %v17345_v11 = vld [vmem:[#allocation73_spill] sm:$0xff]  ;;  %v17346_v39 = vld [vmem:[#allocation28_spill] sm:$0xff] }
 0x425   : > { %v5325_v43 = vadd.f32 %v15263_v15, %v5051_v25  ;;  %v4473_v50 = vadd.f32 %v17341_v57, %v4199_v10  ;;  %v4745_v38 = vadd.f32 %v17342_v3, %v4471_v23  ;;  %v5496_v33 = vpop.f32.mrf.mxu1  ;;  %11919 = vmatmul.mubr.f32.gmra.mxu0 %v15485_v37  ;;  %12002 = vmatmul.mubr.f32.gmra.mxu1 %v15485_v37  ;;  %v17343_v62 = vld [vmem:[#allocation99_spill] sm:$0xff]  ;;  %v17347_v57 = vld [vmem:[#allocation52_spill] sm:$0xff] }
 0x426   : > { %v5328_v1 = vadd.f32 %v15280_v44, %v5054_v7  ;;  %v5056_v2 = vadd.f32 %v17343_v62, %v4746_v36  ;;  %5701 = vst [vmem:[#allocation2 + $0xb1] sm:$0xff] %v15488_v40  ;;  %v15501_v52 = vmax.f32 %v5636_v19, 0.0  ;;  %v5639_v15 = vadd.f32 %v15285_v14, %v5600_v34  ;;  %12044 = vmatpush3.msra.mxu0 %v6252_v41  ;;  %v17344_v10 = vld [vmem:[#allocation43_spill] sm:$0xff]  ;;  %v17348_v34 = vld [vmem:[#allocation100_spill] sm:$0xff] }
 0x427   : > { %v5599_v25 = vadd.f32 %v5496_v33, %v5325_v43  ;;  %v3893_v23 = vadd.f32 %v17344_v10, %v15346_v29  ;;  %v4201_v45 = vadd.f32 %v17345_v11, %v3891_v42  ;;  %v4748_v3 = vadd.f32 %v17347_v57, %v17346_v39  ;;  %v11855_v44 = vpop.f32.mrf.mxu1  ;;  %v15511_v36 = vld [vmem:[#allocation2 + $0x78] sm:$0xff]  ;;  %v15514_v19 = vld [vmem:[#allocation2 + $0x80] sm:$0xff]  ;;  %12045 = vmatprep.subr.mxu0 %v6251_v17  ;;  %v6250_v33 = vld [vmem:[#allocation9 + $0x350] sm:$0xff] }
 0x428   : > { %v5327_v7 = vadd.f32 %v15305_v49, %v5053_v13  ;;  %v5055_v41 = vadd.f32 %v17348_v34, %v4745_v38  ;;  %5700 = vst [vmem:[#allocation2 + $0xa9] sm:$0xff] %v15501_v52  ;;  %v15518_v29 = vmax.f32 %v5639_v15, 0.0  ;;  %v5602_v43 = vadd.f32 %v11855_v44, %v5328_v1  ;;  %11921 = vmatprep.mubr.f32.mxu0 %v15511_v36  ;;  %v17350_v62 = vld [vmem:[#allocation91_spill] sm:$0xff]  ;;  %v17351_v49 = vld [vmem:[#allocation102_spill] sm:$0xff]  ;;  %v17352_v11 = vld [vmem:[#allocation89_spill] sm:$0xff] }
 0x429   : > { %v5638_v42 = vadd.f32 %v15285_v14, %v5599_v25  ;;  %12004 = vmatprep.mubr.f32.mxu1 %v15511_v36  ;;  %v4475_v10 = vadd.f32 %v17350_v62, %v4201_v45  ;;  %v5058_v13 = vadd.f32 %v17351_v49, %v4748_v3  ;;  %v4747_v39 = vadd.f32 %v17352_v11, %v4473_v50  ;;  %v5506_v57 = vpop.f32.mrf.mxu1  ;;  %v17354_v45 = vld [vmem:[#allocation41_spill] sm:$0xff]  ;;  %v17355_v44 = vld [vmem:[#allocation42_spill] sm:$0xff]  ;;  %v17356_v34 = vld [vmem:[#allocation103_spill] sm:$0xff] }
 0x42a   : > { %17349 = vst [vmem:[#allocation19_spill] sm:$0xff] %v15518_v29  ;;  %11922 = vmatmul.mubr.f32.gmra.mxu0 %v15514_v19  ;;  %12005 = vmatmul.mubr.f32.gmra.mxu1 %v15514_v19  ;;  %5703 = vst [vmem:[#allocation2 + $0xc9] sm:$0xff] %v15518_v29  ;;  %v5641_v1 = vadd.f32 %v15285_v14, %v5602_v43  ;;  %v5601_v15 = vadd.f32 %v5506_v57, %v5327_v7  ;;  %v17357_v49 = vld [vmem:[#allocation55_spill] sm:$0xff]  ;;  %v17358_v11 = vld [vmem:[#allocation18_spill] sm:$0xff] }
 0x42b   : > { %v15529_v38 = vmax.f32 %v5638_v42, 0.0  ;;  %12046 = vmatpush3.msra.mxu0 %v6251_v17  ;;  %v5330_v25 = vadd.f32 %v15334_v47, %v5056_v2  ;;  %v3895_v3 = vadd.f32 %v17354_v45, %v15360_v55  ;;  %v4203_v50 = vadd.f32 %v17355_v44, %v3893_v23  ;;  %v11858_v42 = vpop.f32.mrf.mxu1  ;;  %v15541_v29 = vld [vmem:[#allocation2 + $0x90] sm:$0xff]  ;;  %v15543_v43 = vld [vmem:[#allocation2 + $0x98] sm:$0xff]  ;;  %v6249_v23 = vld [vmem:[#allocation9 + $0x348] sm:$0xff] }
 0x42c   : > { %v5057_v62 = vadd.f32 %v17356_v34, %v4747_v39  ;;  %v4750_v20 = vadd.f32 %v17358_v11, %v17357_v49  ;;  %12047 = vmatprep.subr.mxu0 %v6250_v33  ;;  %v15546_v47 = vmax.f32 %v5641_v1, 0.0  ;;  %v5640_v55 = vadd.f32 %v15285_v14, %v5601_v15  ;;  %11924 = vmatprep.mubr.f32.mxu0 %v15541_v29  ;;  %v17360_v7 = vld [vmem:[#allocation93_spill] sm:$0xff]  ;;  %v17361_v57 = vld [vmem:[#allocation92_spill] sm:$0xff]  ;;  %v17365_v49 = vld [vmem:[#allocation75_spill] sm:$0xff] }
 0x42d   : > { %17353 = vst [vmem:[#allocation33_spill] sm:$0xff] %v15529_v38  ;;  %5702 = vst [vmem:[#allocation2 + $0xc1] sm:$0xff] %v15529_v38  ;;  %v5604_v17 = vadd.f32 %v11858_v42, %v5330_v25  ;;  %12007 = vmatprep.mubr.f32.mxu1 %v15541_v29  ;;  %v5329_v2 = vadd.f32 %v15367_v35, %v5055_v41  ;;  %v4477_v39 = vadd.f32 %v17360_v7, %v4203_v50  ;;  %v5516_v44 = vpop.f32.mrf.mxu1  ;;  %v17362_v15 = vld [vmem:[#allocation105_spill] sm:$0xff]  ;;  %v17367_v7 = vld [vmem:[#allocation54_spill] sm:$0xff]  ;;  %v15567_v38 = vpop.f32.mrf.mxu0 }
 0x42e   : > { %17359 = vst [vmem:[#allocation63_spill] sm:$0xff] %v15546_v47  ;;  %v4749_v45 = vadd.f32 %v17361_v57, %v4475_v10  ;;  %11925 = vmatmul.mubr.f32.gmra.mxu0 %v15543_v43  ;;  %12008 = vmatmul.mubr.f32.gmra.mxu1 %v15543_v43  ;;  %v5332_v1 = vadd.f32 %v15398_v46, %v5058_v13  ;;  %5705 = vst [vmem:[#allocation2 + $0xe1] sm:$0xff] %v15546_v47  ;;  %v15559_v34 = vmax.f32 %v5640_v55, 0.0  ;;  %v17364_v50 = vld [vmem:[#allocation25_spill] sm:$0xff]  ;;  %v17378_v47 = vld [vmem:[#allocation94_spill] sm:$0xff] }
 0x42f   : > { %v5060_v25 = vadd.f32 %v17362_v15, %v4750_v20  ;;  %v5643_v35 = vadd.f32 %v15285_v14, %v5604_v17  ;;  %v5603_v41 = vadd.f32 %v5516_v44, %v5329_v2  ;;  %12048 = vmatpush3.msra.mxu0 %v6250_v33  ;;  %v3897_v10 = vadd.f32 %v17364_v50, %v15378_v54  ;;  %v17366_v42 = vld [vmem:[#allocation29_spill] sm:$0xff]  ;;  %v11861_v46 = vpop.f32.mrf.mxu1  ;;  %v15569_v20 = vld [vmem:[#allocation2 + $0xa8] sm:$0xff]  ;;  %v15572_v55 = vld [vmem:[#allocation2 + $0xb0] sm:$0xff] }
 0x430   : > { %17363 = vst [vmem:[#allocation34_spill] sm:$0xff] %v15559_v34  ;;  %v4205_v11 = vadd.f32 %v17365_v49, %v3895_v3  ;;  %v4752_v57 = vadd.f32 %v17367_v7, %v17366_v42  ;;  %v5331_v13 = vadd.f32 %v15423_v63, %v5057_v62  ;;  %12049 = vmatprep.subr.mxu0 %v6249_v23  ;;  %v17368_v17 = vld [vmem:[#allocation106_spill] sm:$0xff]  ;;  %5704 = vst [vmem:[#allocation2 + $0xd9] sm:$0xff] %v15559_v34  ;;  %v17370_v15 = vld [vmem:[#allocation95_spill] sm:$0xff] }
 0x431   : > { %v5059_v33 = vadd.f32 %v17368_v17, %v4749_v45  ;;  %v15576_v54 = vmax.f32 %v5643_v35, 0.0  ;;  %v5642_v3 = vadd.f32 %v15285_v14, %v5603_v41  ;;  %v5606_v2 = vadd.f32 %v11861_v46, %v5332_v1  ;;  %11927 = vmatprep.mubr.f32.mxu0 %v15569_v20  ;;  %12010 = vmatprep.mubr.f32.mxu1 %v15569_v20  ;;  %v6248_v44 = vld [vmem:[#allocation9 + $0x340] sm:$0xff]  ;;  %v17371_v63 = vld [vmem:[#allocation108_spill] sm:$0xff]  ;;  %v17372_v49 = vld [vmem:[#allocation53_spill] sm:$0xff]  ;;  %v5526_v7 = vpop.f32.mrf.mxu1 }
 0x432   : > { %v4479_v50 = vadd.f32 %v17370_v15, %v4205_v11  ;;  %v5062_v62 = vadd.f32 %v17371_v63, %v4752_v57  ;;  %v4751_v42 = vadd.f32 %v17372_v49, %v4477_v39  ;;  %11928 = vmatmul.mubr.f32.gmra.mxu0 %v15572_v55  ;;  %12011 = vmatmul.mubr.f32.gmra.mxu1 %v15572_v55  ;;  %v17374_v11 = vld [vmem:[#allocation80_spill] sm:$0xff]  ;;  %v17375_v46 = vld [vmem:[#allocation78_spill] sm:$0xff]  ;;  %v17376_v17 = vld [vmem:[#allocation109_spill] sm:$0xff]  ;;  %v15595_v63 = vpop.f32.mrf.mxu0 }
 0x433   : > { %17369 = vst [vmem:[#allocation66_spill] sm:$0xff] %v15576_v54  ;;  %5707 = vst [vmem:[#allocation2 + $0xf9] sm:$0xff] %v15576_v54  ;;  %v15587_v45 = vmax.f32 %v5642_v3, 0.0  ;;  %v5645_v1 = vadd.f32 %v15285_v14, %v5606_v2  ;;  %v5605_v35 = vadd.f32 %v5526_v7, %v5331_v13  ;;  %12050 = vmatpush3.msra.mxu0 %v6249_v23  ;;  %v17377_v49 = vld [vmem:[#allocation58_spill] sm:$0xff]  ;;  %v11864_v3 = vpop.f32.mrf.mxu1 }
 0x434   : > { %v5334_v41 = vadd.f32 %v15451_v5, %v5060_v25  ;;  %v3899_v57 = vadd.f32 %v17374_v11, %v15392_v6  ;;  %v4207_v39 = vadd.f32 %v17375_v46, %v3897_v10  ;;  %v5061_v15 = vadd.f32 %v17376_v17, %v4751_v42  ;;  %v15599_v34 = vld [vmem:[#allocation2 + $0xc0] sm:$0xff]  ;;  %v15601_v2 = vld [vmem:[#allocation2 + $0xc8] sm:$0xff]  ;;  %12051 = vmatprep.subr.mxu0 %v6248_v44  ;;  %v17379_v10 = vld [vmem:[#allocation97_spill] sm:$0xff] }
 0x435   : > { %17373 = vst [vmem:[#allocation31_spill] sm:$0xff] %v15587_v45  ;;  %v4754_v54 = vadd.f32 %v17378_v47, %v17377_v49  ;;  %5706 = vst [vmem:[#allocation2 + $0xf1] sm:$0xff] %v15587_v45  ;;  %v15604_v5 = vmax.f32 %v5645_v1, 0.0  ;;  %v5644_v6 = vadd.f32 %v15285_v14, %v5605_v35  ;;  %11930 = vmatprep.mubr.f32.mxu0 %v15599_v34  ;;  %12013 = vmatprep.mubr.f32.mxu1 %v15599_v34  ;;  %v6247_v47 = vld [vmem:[#allocation9 + $0x338] sm:$0xff]  ;;  %v17380_v42 = vld [vmem:[#allocation96_spill] sm:$0xff]  ;;  %v5536_v11 = vpop.f32.mrf.mxu1 }
 0x436   : > { %v5608_v23 = vadd.f32 %v11864_v3, %v5334_v41  ;;  %v5333_v25 = vadd.f32 %v15481_v28, %v5059_v33  ;;  %v4481_v13 = vadd.f32 %v17379_v10, %v4207_v39  ;;  %v4753_v7 = vadd.f32 %v17380_v42, %v4479_v50  ;;  %11931 = vmatmul.mubr.f32.gmra.mxu0 %v15601_v2  ;;  %v17381_v35 = vld [vmem:[#allocation111_spill] sm:$0xff]  ;;  %v17382_v39 = vld [vmem:[#allocation77_spill] sm:$0xff]  ;;  %v11793_v50 = vpop.f32.mrf.mxu0  ;;  %v17383_v49 = vld [vmem:[#allocation60_spill] sm:$0xff] }
 0x437   : > { %12014 = vmatmul.mubr.f32.gmra.mxu1 %v15601_v2  ;;  %v5336_v1 = vadd.f32 %v15509_v9, %v5062_v62  ;;  %v5064_v41 = vadd.f32 %v17381_v35, %v4754_v54  ;;  %5709 = vst [vmem:[#allocation2 + $0x111] sm:$0xff] %v15604_v5  ;;  %v15617_v46 = vmax.f32 %v5644_v6, 0.0  ;;  %12052 = vmatpush3.msra.mxu0 %v6248_v44  ;;  %v17384_v3 = vld [vmem:[#allocation57_spill] sm:$0xff]  ;;  %v11867_v42 = vpop.f32.mrf.mxu1  ;;  %v15626_v54 = vld [vmem:[#allocation2 + $0xe0] sm:$0xff]  ;;  %v17387_v35 = vld [vmem:[#allocation56_spill] sm:$0xff] }
 0x438   : > { %v5647_v28 = vadd.f32 %v15285_v14, %v5608_v23  ;;  %v5607_v33 = vadd.f32 %v5536_v11, %v5333_v25  ;;  %v4209_v17 = vadd.f32 %v17382_v39, %v3899_v57  ;;  %v4756_v10 = vadd.f32 %v17384_v3, %v17383_v49  ;;  %v15623_v45 = vld [vmem:[#allocation2 + $0xd8] sm:$0xff]  ;;  %12053 = vmatprep.subr.mxu0 %v6247_v47  ;;  %v6246_v23 = vld [vmem:[#allocation9 + $0x330] sm:$0xff]  ;;  %v17385_v25 = vld [vmem:[#allocation14_spill] sm:$0xff] }
 0x439   : > { %v5335_v9 = vadd.f32 %v15539_v24, %v5061_v15  ;;  %v5063_v62 = vadd.f32 %v15245_v61, %v4753_v7  ;;  %5708 = vst [vmem:[#allocation2 + $0x109] sm:$0xff] %v15617_v46  ;;  %v5610_v57 = vadd.f32 %v11867_v42, %v5336_v1  ;;  %11933 = vmatprep.mubr.f32.mxu0 %v15623_v45  ;;  %v17386_v24 = vld [vmem:[#allocation112_spill] sm:$0xff]  ;;  %v5546_v49 = vpop.f32.mrf.mxu1  ;;  %v17388_v3 = vld [vmem:[#allocation90_spill] sm:$0xff] }
 0x43a   : > { %v15630_v6 = vmax.f32 %v5647_v28, 0.0  ;;  %v5646_v44 = vadd.f32 %v15285_v14, %v5607_v33  ;;  %12016 = vmatprep.mubr.f32.mxu1 %v15623_v45  ;;  %v4483_v11 = vadd.f32 %v17385_v25, %v4209_v17  ;;  %v5066_v15 = vadd.f32 %v17386_v24, %v4756_v10  ;;  %11934 = vmatmul.mubr.f32.gmra.mxu0 %v15626_v54  ;;  %v5292_v33 = vpop.f32.mrf.mxu0 }
 0x43b   : > { %v4755_v39 = vadd.f32 %v17387_v35, %v4481_v13  ;;  %12017 = vmatmul.mubr.f32.gmra.mxu1 %v15626_v54  ;;  %v5649_v7 = vadd.f32 %v15285_v14, %v5610_v57  ;;  %v5609_v1 = vadd.f32 %v5546_v49, %v5335_v9  ;;  %12054 = vmatpush3.msra.mxu0 %v6247_v47  ;;  %v17389_v13 = vld [vmem:[#allocation98_spill] sm:$0xff]  ;;  %v11870_v42 = vpop.f32.mrf.mxu1 }
 0x43c   : > { %5711 = vst [vmem:[#allocation2 + $0x129] sm:$0xff] %v15630_v6  ;;  %v15641_v61 = vmax.f32 %v5646_v44, 0.0  ;;  %v5338_v28 = vadd.f32 %v15567_v38, %v5064_v41  ;;  %v4758_v10 = vadd.f32 %v17389_v13, %v17388_v3  ;;  %v15648_v25 = vld [vmem:[#allocation2 + $0xf0] sm:$0xff]  ;;  %v15650_v24 = vld [vmem:[#allocation2 + $0xf8] sm:$0xff]  ;;  %12055 = vmatprep.subr.mxu0 %v6246_v23  ;;  %v6245_v38 = vld [vmem:[#allocation9 + $0x328] sm:$0xff] }
 0x43d   : > { %v5065_v17 = vadd.f32 %v15256_v32, %v4755_v39  ;;  %v15653_v44 = vmax.f32 %v5649_v7, 0.0  ;;  %v5648_v47 = vadd.f32 %v15285_v14, %v5609_v1  ;;  %11936 = vmatprep.mubr.f32.mxu0 %v15648_v25  ;;  %12019 = vmatprep.mubr.f32.mxu1 %v15648_v25  ;;  %v5337_v32 = vadd.f32 %v15595_v63, %v5063_v62  ;;  %v17390_v41 = vld [vmem:[#allocation59_spill] sm:$0xff]  ;;  %v5556_v35 = vpop.f32.mrf.mxu1  ;;  %v11796_v63 = vpop.f32.mrf.mxu0 }
 0x43e   : > { %5710 = vst [vmem:[#allocation2 + $0x121] sm:$0xff] %v15641_v61  ;;  %v5612_v9 = vadd.f32 %v11870_v42, %v5338_v28  ;;  %v4757_v57 = vadd.f32 %v17390_v41, %v4483_v11  ;;  %11937 = vmatmul.mubr.f32.gmra.mxu0 %v15650_v24  ;;  %v5340_v39 = vadd.f32 %v11793_v50, %v5066_v15 }
 0x43f   : > { %12020 = vmatmul.mubr.f32.gmra.mxu1 %v15650_v24  ;;  %v5068_v49 = vadd.f32 %v15265_v4, %v4758_v10  ;;  %5713 = vst [vmem:[#allocation2 + $0x141] sm:$0xff] %v15653_v44  ;;  %v15664_v7 = vmax.f32 %v5648_v47, 0.0  ;;  %v5611_v28 = vadd.f32 %v5556_v35, %v5337_v32  ;;  %12056 = vmatpush3.msra.mxu0 %v6246_v23  ;;  %v11873_v62 = vpop.f32.mrf.mxu1  ;;  %v6244_v23 = vld [vmem:[#allocation9 + $0x320] sm:$0xff] }
 0x440   : > { %v5651_v1 = vadd.f32 %v15285_v14, %v5612_v9  ;;  %v15667_v3 = vld [vmem:[#allocation2 + $0x108] sm:$0xff]  ;;  %v5339_v11 = vadd.f32 %v5292_v33, %v5065_v17  ;;  %v15669_v13 = vld [vmem:[#allocation2 + $0x110] sm:$0xff]  ;;  %12057 = vmatprep.subr.mxu0 %v6245_v38  ;;  %v5067_v50 = vadd.f32 %v15271_v31, %v4757_v57  ;;  %v5614_v10 = vadd.f32 %v11873_v62, %v5340_v39  ;;  %v5302_v9 = vpop.f32.mrf.mxu0 }
 0x441   : > { %5712 = vst [vmem:[#allocation2 + $0x139] sm:$0xff] %v15664_v7  ;;  %v5650_v15 = vadd.f32 %v15285_v14, %v5611_v28  ;;  %11939 = vmatprep.mubr.f32.mxu0 %v15667_v3  ;;  %12022 = vmatprep.mubr.f32.mxu1 %v15667_v3  ;;  %v5566_v42 = vpop.f32.mrf.mxu1  ;;  %v5342_v47 = vadd.f32 %v11796_v63, %v5068_v49  ;;  %v6243_v49 = vld [vmem:[#allocation9 + $0x318] sm:$0xff] }
 0x442   : > { %v15673_v4 = vmax.f32 %v5651_v1, 0.0  ;;  %11940 = vmatmul.mubr.f32.gmra.mxu0 %v15669_v13  ;;  %v5653_v33 = vadd.f32 %v15285_v14, %v5614_v10  ;;  %v5613_v17 = vadd.f32 %v5566_v42, %v5339_v11 }
 0x443   : > { %12023 = vmatmul.mubr.f32.gmra.mxu1 %v15669_v13  ;;  %v15681_v31 = vmax.f32 %v5650_v15, 0.0  ;;  %12058 = vmatpush3.msra.mxu0 %v6245_v38  ;;  %v11876_v32 = vpop.f32.mrf.mxu1  ;;  %v5341_v38 = vadd.f32 %v5302_v9, %v5067_v50 }
 0x444   : > { %5715 = vst [vmem:[#allocation2 + $0x159] sm:$0xff] %v15673_v4  ;;  %12059 = vmatprep.subr.mxu0 %v6244_v23  ;;  %v15689_v35 = vmax.f32 %v5653_v33, 0.0  ;;  %v5652_v39 = vadd.f32 %v15285_v14, %v5613_v17  ;;  %v5616_v1 = vadd.f32 %v11876_v32, %v5342_v47  ;;  %v6242_v33 = vld [vmem:[#allocation9 + $0x310] sm:$0xff] }
 0x445   : > { %v15684_v41 = vld [vmem:[#allocation2 + $0x120] sm:$0xff]  ;;  %v15686_v57 = vld [vmem:[#allocation2 + $0x128] sm:$0xff]  ;;  %5714 = vst [vmem:[#allocation2 + $0x151] sm:$0xff] %v15681_v31  ;;  %v5576_v28 = vpop.f32.mrf.mxu1  ;;  %12060 = vmatpush3.msra.mxu0 %v6244_v23 }
 0x446   : > { %11942 = vmatprep.mubr.f32.mxu0 %v15684_v41  ;;  %12025 = vmatprep.mubr.f32.mxu1 %v15684_v41  ;;  %5717 = vst [vmem:[#allocation2 + $0x171] sm:$0xff] %v15689_v35  ;;  %v15697_v63 = vmax.f32 %v5652_v39, 0.0  ;;  %v5655_v62 = vadd.f32 %v15285_v14, %v5616_v1  ;;  %v5615_v11 = vadd.f32 %v5576_v28, %v5341_v38  ;;  %v6513_v39 = vld [vmem:[#allocation2 + $0x1] sm:$0xff]  ;;  %v6514_v38 = vld [vmem:[#allocation2 + $0x9] sm:$0xff] }
 0x447   : > { %11943 = vmatmul.mubr.f32.gmra.mxu0 %v15686_v57  ;;  %12026 = vmatmul.mubr.f32.gmra.mxu1 %v15686_v57  ;;  %v6240_v1 = vld [vmem:[#allocation9 + $0x300] sm:$0xff] }
 0x448   : > { %v15700_v15 = vld [vmem:[#allocation2 + $0x138] sm:$0xff]  ;;  %v15702_v10 = vld [vmem:[#allocation2 + $0x140] sm:$0xff]  ;;  %12061 = vmatprep.subr.mxu0 %v6243_v49  ;;  %5716 = vst [vmem:[#allocation2 + $0x169] sm:$0xff] %v15697_v63  ;;  %v15705_v50 = vmax.f32 %v5655_v62, 0.0  ;;  %v5654_v42 = vadd.f32 %v15285_v14, %v5615_v11  ;;  %v6241_v14 = vld [vmem:[#allocation9 + $0x308] sm:$0xff] }
 0x449   : > { %11945 = vmatprep.mubr.f32.mxu0 %v15700_v15  ;;  %12028 = vmatprep.mubr.f32.mxu1 %v15700_v15  ;;  %v6839_v62 = vld [vmem:[#allocation9 + $0x278] sm:$0xff]  ;;  %v7112_v11 = vld [vmem:[#allocation9 + $0x3f0] sm:$0xff] }
 0x44a   : > { %5719 = vst [vmem:[#allocation2 + $0x189] sm:$0xff] %v15705_v50  ;;  %v15713_v23 = vmax.f32 %v5654_v42, 0.0  ;;  %12062 = vmatpush3.msra.mxu0 %v6243_v49  ;;  %v17391_v42 = vmax.f32 %v15309_v12, 0.0  ;;  %v17395_v12 = vmax.f32 %v15324_v60, 0.0  ;;  %v17398_v60 = vmax.f32 %v15388_v56, 0.0  ;;  %v6833_v56 = vld [vmem:[#allocation9 + $0x248] sm:$0xff] }
 0x44b   : > { %11946 = vmatmul.mubr.f32.gmra.mxu0 %v15702_v10  ;;  %12029 = vmatmul.mubr.f32.gmra.mxu1 %v15702_v10 }
 0x44c   : > { %v15715_v17 = vld [vmem:[#allocation2 + $0x150] sm:$0xff]  ;;  %v15717_v47 = vld [vmem:[#allocation2 + $0x158] sm:$0xff]  ;;  %12063 = vmatprep.subr.mxu0 %v6242_v33  ;;  %5718 = vst [vmem:[#allocation2 + $0x181] sm:$0xff] %v15713_v23 }
 0x44d   : > { %11948 = vmatprep.mubr.f32.mxu0 %v15715_v17  ;;  %12031 = vmatprep.mubr.f32.mxu1 %v15715_v17 }
 0x44e   : > { %12064 = vmatpush3.msra.mxu0 %v6242_v33  ;;  %v17392_v33 = vld [vmem:[#allocation107_spill] sm:$0xff] }
 0x44f   : > { %11949 = vmatmul.mubr.f32.gmra.mxu0 %v15717_v47  ;;  %12032 = vmatmul.mubr.f32.gmra.mxu1 %v15717_v47  ;;  %v15724_v9 = vld [vmem:[#allocation2 + $0x168] sm:$0xff]  ;;  %v15726_v32 = vld [vmem:[#allocation2 + $0x170] sm:$0xff] }
 0x450   : > { %12065 = vmatprep.subr.mxu0 %v6241_v14  ;;  %11951 = vmatprep.mubr.f32.mxu0 %v15724_v9 }
 0x451   : > { %12034 = vmatprep.mubr.f32.mxu1 %v15724_v9  ;;  %12066 = vmatpush3.msra.mxu0 %v6241_v14  ;;  %v17393_v14 = vmax.f32 %v15293_v22, 0.0  ;;  %v17396_v22 = vmax.f32 %v15373_v30, 0.0  ;;  %v7108_v30 = vld [vmem:[#allocation9 + $0x3d0] sm:$0xff] }
 0x452   : > { %12067 = vmatprep.subr.mxu0 %v6240_v1 }
 0x453   : > { %11952 = vmatmul.mubr.f32.gmra.mxu0 %v15726_v32  ;;  %12035 = vmatmul.mubr.f32.gmra.mxu1 %v15726_v32  ;;  %v15732_v49 = vld [vmem:[#allocation2 + $0x180] sm:$0xff]  ;;  %v15734_v28 = vld [vmem:[#allocation2 + $0x188] sm:$0xff] }
 0x454   : > { %12149 = vmatprep.mubr.f32.mxu1 %v6513_v39  ;;  %11954 = vmatprep.mubr.f32.mxu0 %v15732_v49  ;;  %v6838_v39 = vld [vmem:[#allocation9 + $0x270] sm:$0xff] }
 0x455   : > { %12068 = vmatpush3.msra.mxu0 %v6240_v1  ;;  %v7111_v1 = vld [vmem:[#allocation9 + $0x3e8] sm:$0xff] }
 0x456   : > { %12197 = vmatprep.subr.mxu0 %v6839_v62 }
 0x457   : > { %11955 = vmatmul.mubr.f32.gmra.mxu0 %v15734_v28  ;;  %12150 = vmatmul.mubr.f32.vlgmr.msra.gmra.mxu1 %v6514_v38  ;;  %v17394_v38 = vmax.f32 %v15342_v53, 0.0  ;;  %v17397_v53 = vmax.f32 %v15355_v0, 0.0  ;;  %v6834_v0 = vld [vmem:[#allocation9 + $0x250] sm:$0xff] }
 0x458   : > { %12069 = vmatprep.mubr.f32.mxu0 %v15425_v48  ;;  %12152 = vmatprep.mubr.f32.mxu1 %v17391_v42  ;;  %v6837_v48 = vld [vmem:[#allocation9 + $0x268] sm:$0xff] }
 0x459   : > { %12278 = vmatpush3.msra.mxu1 %v17392_v33  ;;  %v6829_v42 = vld [vmem:[#allocation9 + $0x228] sm:$0xff]  ;;  %v7102_v33 = vld [vmem:[#allocation9 + $0x3a0] sm:$0xff] }
 0x45a   : > { %12279 = vmatprep.subr.mxu1 %v7112_v11 }
 0x45b   : > { %12070 = vmatmul.mubr.f32.vlgmr.msra.gmra.mxu0 %v15427_v26  ;;  %12153 = vmatmul.mubr.f32.gmra.mxu1 %v17393_v14  ;;  %v7110_v26 = vld [vmem:[#allocation9 + $0x3e0] sm:$0xff] }
 0x45c   : > { %12072 = vmatprep.mubr.f32.mxu0 %v15453_v51  ;;  %12155 = vmatprep.mubr.f32.mxu1 %v17394_v38  ;;  %v6836_v51 = vld [vmem:[#allocation9 + $0x260] sm:$0xff]  ;;  %v7696_v38 = vld [vmem:[#allocation9 + $0x2f0] sm:$0xff] }
 0x45d   : > { %12198 = vmatpush3.msra.mxu0 %v6839_v62  ;;  %12280 = vmatpush3.msra.mxu1 %v7112_v11  ;;  %v6830_v62 = vld [vmem:[#allocation9 + $0x230] sm:$0xff]  ;;  %v7103_v11 = vld [vmem:[#allocation9 + $0x3a8] sm:$0xff]  ;;  %v12736_v14 = vld [vmem:[#allocation2] sm:$0xff] }
 0x45e   : > { %12199 = vmatprep.subr.mxu0 %v6838_v39  ;;  %12281 = vmatprep.subr.mxu1 %v7111_v1 }
 0x45f   : > { %12073 = vmatmul.mubr.f32.gmra.mxu0 %v15456_v16  ;;  %12156 = vmatmul.mubr.f32.gmra.mxu1 %v17395_v12  ;;  %v7109_v16 = vld [vmem:[#allocation9 + $0x3d8] sm:$0xff]  ;;  %v12740_v12 = vld [vmem:[#allocation2 + $0x21] sm:$0xff] }
 0x460   : > { %12075 = vmatprep.mubr.f32.mxu0 %v15483_v27  ;;  %12158 = vmatprep.mubr.f32.mxu1 %v17396_v22  ;;  %v6835_v27 = vld [vmem:[#allocation9 + $0x258] sm:$0xff]  ;;  %v7695_v22 = vld [vmem:[#allocation9 + $0x2e8] sm:$0xff] }
 0x461   : > { %12200 = vmatpush3.msra.mxu0 %v6838_v39  ;;  %12282 = vmatpush3.msra.mxu1 %v7111_v1  ;;  %v12737_v39 = vld [vmem:[#allocation2 + $0x39] sm:$0xff] }
 0x462   : > { %12201 = vmatprep.subr.mxu0 %v6837_v48  ;;  %12283 = vmatprep.subr.mxu1 %v7110_v26  ;;  %v12738_v1 = vld [vmem:[#allocation2 + $0x19] sm:$0xff] }
 0x463   : > { %12076 = vmatmul.mubr.f32.gmra.mxu0 %v15485_v37  ;;  %12159 = vmatmul.mubr.f32.gmra.mxu1 %v17397_v53  ;;  %v7107_v37 = vld [vmem:[#allocation9 + $0x3c8] sm:$0xff] }
 0x464   : > { %12078 = vmatprep.mubr.f32.mxu0 %v15511_v36  ;;  %12161 = vmatprep.mubr.f32.mxu1 %v15411_v21  ;;  %v7106_v36 = vld [vmem:[#allocation9 + $0x3c0] sm:$0xff]  ;;  %v12742_v53 = vld [vmem:[#allocation2 + $0x69] sm:$0xff] }
 0x465   : > { %12202 = vmatpush3.msra.mxu0 %v6837_v48  ;;  %12284 = vmatpush3.msra.mxu1 %v7110_v26  ;;  %v12741_v48 = vld [vmem:[#allocation2 + $0x51] sm:$0xff] }
 0x466   : > { %12203 = vmatprep.subr.mxu0 %v6836_v51  ;;  %12285 = vmatprep.subr.mxu1 %v7109_v16  ;;  %v7422_v26 = vld [vmem:[#allocation9 + $0x170] sm:$0xff] }
 0x467   : > { %12079 = vmatmul.mubr.f32.gmra.mxu0 %v15514_v19  ;;  %12162 = vmatmul.mubr.f32.gmra.mxu1 %v17398_v60  ;;  %v6832_v19 = vld [vmem:[#allocation9 + $0x240] sm:$0xff] }
 0x468   : > { %12081 = vmatprep.mubr.f32.mxu0 %v15541_v29  ;;  %12164 = vmatprep.mubr.f32.mxu1 %v15443_v58  ;;  %v7105_v29 = vld [vmem:[#allocation9 + $0x3b8] sm:$0xff]  ;;  %v12743_v60 = vld [vmem:[#allocation2 + $0x61] sm:$0xff] }
 0x469   : > { %12204 = vmatpush3.msra.mxu0 %v6836_v51  ;;  %12286 = vmatpush3.msra.mxu1 %v7109_v16  ;;  %v7421_v51 = vld [vmem:[#allocation9 + $0x168] sm:$0xff]  ;;  %v7694_v16 = vld [vmem:[#allocation9 + $0x2e0] sm:$0xff] }
 0x46a   : > { %12205 = vmatprep.subr.mxu0 %v6835_v27  ;;  %12287 = vmatprep.subr.mxu1 %v7108_v30 }
 0x46b   : > { %12082 = vmatmul.mubr.f32.gmra.mxu0 %v15543_v43  ;;  %12165 = vmatmul.mubr.f32.gmra.mxu1 %v15430_v18  ;;  %v17399_v43 = vld [vmem:[#allocation33_spill] sm:$0xff] }
 0x46c   : > { %12084 = vmatprep.mubr.f32.mxu0 %v15569_v20  ;;  %12167 = vmatprep.mubr.f32.mxu1 %v15471_v59  ;;  %v6831_v20 = vld [vmem:[#allocation9 + $0x238] sm:$0xff] }
 0x46d   : > { %12206 = vmatpush3.msra.mxu0 %v6835_v27  ;;  %12288 = vmatpush3.msra.mxu1 %v7108_v30  ;;  %v7693_v27 = vld [vmem:[#allocation9 + $0x2d8] sm:$0xff] }
 0x46e   : > { %12207 = vmatprep.subr.mxu0 %v6834_v0  ;;  %12289 = vmatprep.subr.mxu1 %v7107_v37  ;;  %v7419_v30 = vld [vmem:[#allocation9 + $0x158] sm:$0xff] }
 0x46f   : > { %12085 = vmatmul.mubr.f32.gmra.mxu0 %v15572_v55  ;;  %12168 = vmatmul.mubr.f32.gmra.mxu1 %v15460_v8  ;;  %v7104_v55 = vld [vmem:[#allocation9 + $0x3b0] sm:$0xff] }
 0x470   : > { %12087 = vmatprep.mubr.f32.mxu0 %v15599_v34  ;;  %12170 = vmatprep.mubr.f32.mxu1 %v15501_v52  ;;  %v17400_v34 = vld [vmem:[#allocation19_spill] sm:$0xff] }
 0x471   : > { %12208 = vmatpush3.msra.mxu0 %v6834_v0  ;;  %12290 = vmatpush3.msra.mxu1 %v7107_v37  ;;  %v12744_v0 = vld [vmem:[#allocation2 + $0x81] sm:$0xff]  ;;  %v7418_v37 = vld [vmem:[#allocation9 + $0x150] sm:$0xff] }
 0x472   : > { %12209 = vmatprep.subr.mxu0 %v6833_v56  ;;  %12291 = vmatprep.subr.mxu1 %v7106_v36 }
 0x473   : > { %12088 = vmatmul.mubr.f32.gmra.mxu0 %v15601_v2  ;;  %12171 = vmatmul.mubr.f32.gmra.mxu1 %v15488_v40  ;;  %v17401_v2 = vld [vmem:[#allocation34_spill] sm:$0xff] }
 0x474   : > { %12090 = vmatprep.mubr.f32.mxu0 %v15623_v45  ;;  %12173 = vmatprep.mubr.f32.mxu1 %v17399_v43  ;;  %v17402_v45 = vld [vmem:[#allocation63_spill] sm:$0xff] }
 0x475   : > { %12210 = vmatpush3.msra.mxu0 %v6833_v56  ;;  %12292 = vmatpush3.msra.mxu1 %v7106_v36  ;;  %v7417_v56 = vld [vmem:[#allocation9 + $0x148] sm:$0xff]  ;;  %v7416_v36 = vld [vmem:[#allocation9 + $0x140] sm:$0xff] }
 0x476   : > { %12211 = vmatprep.subr.mxu0 %v6832_v19  ;;  %12293 = vmatprep.subr.mxu1 %v7105_v29 }
 0x477   : > { %12091 = vmatmul.mubr.f32.gmra.mxu0 %v15626_v54  ;;  %12174 = vmatmul.mubr.f32.gmra.mxu1 %v17400_v34  ;;  %v17403_v54 = vld [vmem:[#allocation31_spill] sm:$0xff] }
 0x478   : > { %12093 = vmatprep.mubr.f32.mxu0 %v15648_v25  ;;  %12176 = vmatprep.mubr.f32.mxu1 %v17401_v2  ;;  %v17404_v25 = vld [vmem:[#allocation66_spill] sm:$0xff] }
 0x479   : > { %12212 = vmatpush3.msra.mxu0 %v6832_v19  ;;  %12294 = vmatpush3.msra.mxu1 %v7105_v29  ;;  %v7414_v19 = vld [vmem:[#allocation9 + $0x130] sm:$0xff]  ;;  %v7687_v29 = vld [vmem:[#allocation9 + $0x2a8] sm:$0xff] }
 0x47a   : > { %12213 = vmatprep.subr.mxu0 %v6831_v20  ;;  %12295 = vmatprep.subr.mxu1 %v7104_v55 }
 0x47b   : > { %12094 = vmatmul.mubr.f32.gmra.mxu0 %v15650_v24  ;;  %12177 = vmatmul.mubr.f32.gmra.mxu1 %v17402_v45  ;;  %v6828_v24 = vld [vmem:[#allocation9 + $0x220] sm:$0xff] }
 0x47c   : > { %12096 = vmatprep.mubr.f32.mxu0 %v15667_v3  ;;  %12179 = vmatprep.mubr.f32.mxu1 %v17403_v54  ;;  %v7101_v3 = vld [vmem:[#allocation9 + $0x398] sm:$0xff] }
 0x47d   : > { %12214 = vmatpush3.msra.mxu0 %v6831_v20  ;;  %12296 = vmatpush3.msra.mxu1 %v7104_v55  ;;  %v7412_v20 = vld [vmem:[#allocation9 + $0x120] sm:$0xff]  ;;  %v7411_v55 = vld [vmem:[#allocation9 + $0x118] sm:$0xff] }
 0x47e   : > { %12215 = vmatprep.subr.mxu0 %v6830_v62  ;;  %12297 = vmatprep.subr.mxu1 %v7103_v11 }
 0x47f   : > { %12097 = vmatmul.mubr.f32.gmra.mxu0 %v15669_v13  ;;  %12180 = vmatmul.mubr.f32.gmra.mxu1 %v17404_v25  ;;  %v6827_v13 = vld [vmem:[#allocation9 + $0x218] sm:$0xff] }
 0x480   : > { %12099 = vmatprep.mubr.f32.mxu0 %v15684_v41  ;;  %12182 = vmatprep.mubr.f32.mxu1 %v15617_v46  ;;  %v7100_v41 = vld [vmem:[#allocation9 + $0x390] sm:$0xff] }
 0x481   : > { %12216 = vmatpush3.msra.mxu0 %v6830_v62  ;;  %12298 = vmatpush3.msra.mxu1 %v7103_v11  ;;  %v7408_v62 = vld [vmem:[#allocation9 + $0x100] sm:$0xff] }
 0x482   : > { %12217 = vmatprep.subr.mxu0 %v6829_v42  ;;  %12299 = vmatprep.subr.mxu1 %v7102_v33  ;;  %v7371_v11 = vld [vmem:[#allocation2 + $0x2] sm:$0xff] }
 0x483   : > { %12100 = vmatmul.mubr.f32.gmra.mxu0 %v15686_v57  ;;  %12183 = vmatmul.mubr.f32.gmra.mxu1 %v15604_v5  ;;  %v6826_v57 = vld [vmem:[#allocation9 + $0x210] sm:$0xff] }
 0x484   : > { %12102 = vmatprep.mubr.f32.mxu0 %v15700_v15  ;;  %12185 = vmatprep.mubr.f32.mxu1 %v15641_v61  ;;  %v7099_v15 = vld [vmem:[#allocation9 + $0x388] sm:$0xff] }
 0x485   : > { %12218 = vmatpush3.msra.mxu0 %v6829_v42  ;;  %12300 = vmatpush3.msra.mxu1 %v7102_v33  ;;  %v7372_v42 = vld [vmem:[#allocation2 + $0xa] sm:$0xff] }
 0x486   : > { %12219 = vmatprep.subr.mxu0 %v6828_v24  ;;  %12301 = vmatprep.subr.mxu1 %v7101_v3 }
 0x487   : > { %12103 = vmatmul.mubr.f32.gmra.mxu0 %v15702_v10  ;;  %12186 = vmatmul.mubr.f32.gmra.mxu1 %v15630_v6  ;;  %v6825_v10 = vld [vmem:[#allocation9 + $0x208] sm:$0xff] }
 0x488   : > { %12105 = vmatprep.mubr.f32.mxu0 %v15715_v17  ;;  %12188 = vmatprep.mubr.f32.mxu1 %v15664_v7  ;;  %v7098_v17 = vld [vmem:[#allocation9 + $0x380] sm:$0xff] }
 0x489   : > { %12220 = vmatpush3.msra.mxu0 %v6828_v24  ;;  %12302 = vmatpush3.msra.mxu1 %v7101_v3  ;;  %v15864_v3 = vld [vmem:[#allocation2 + $0x4a] sm:$0xff] }
 0x48a   : > { %12221 = vmatprep.subr.mxu0 %v6827_v13  ;;  %12303 = vmatprep.subr.mxu1 %v7100_v41 }
 0x48b   : > { %12106 = vmatmul.mubr.f32.gmra.mxu0 %v15717_v47  ;;  %12189 = vmatmul.mubr.f32.gmra.mxu1 %v15653_v44  ;;  %v6824_v47 = vld [vmem:[#allocation9 + $0x200] sm:$0xff] }
 0x48c   : > { %12108 = vmatprep.mubr.f32.mxu0 %v15724_v9  ;;  %12191 = vmatprep.mubr.f32.mxu1 %v15681_v31  ;;  %v7697_v9 = vld [vmem:[#allocation9 + $0x2f8] sm:$0xff] }
 0x48d   : > { %12222 = vmatpush3.msra.mxu0 %v6827_v13  ;;  %12304 = vmatpush3.msra.mxu1 %v7100_v41 }
 0x48e   : > { %12223 = vmatprep.subr.mxu0 %v6826_v57  ;;  %12305 = vmatprep.subr.mxu1 %v7099_v15 }
 0x48f   : > { %12109 = vmatmul.mubr.f32.gmra.mxu0 %v15726_v32  ;;  %12192 = vmatmul.mubr.f32.gmra.mxu1 %v15673_v4  ;;  %v12735_v32 = vld [vmem:[#allocation2 + $0x31] sm:$0xff] }
 0x490   : > { %12111 = vmatprep.mubr.f32.mxu0 %v15732_v49  ;;  %12194 = vmatprep.mubr.f32.mxu1 %v15697_v63  ;;  %v7423_v49 = vld [vmem:[#allocation9 + $0x178] sm:$0xff] }
 0x491   : > { %12224 = vmatpush3.msra.mxu0 %v6826_v57  ;;  %12306 = vmatpush3.msra.mxu1 %v7099_v15  ;;  %v15869_v15 = vld [vmem:[#allocation2 + $0x52] sm:$0xff] }
 0x492   : > { %12225 = vmatprep.subr.mxu0 %v6825_v10  ;;  %12307 = vmatprep.subr.mxu1 %v7098_v17 }
 0x493   : > { %12112 = vmatmul.mubr.f32.gmra.mxu0 %v15734_v28  ;;  %12195 = vmatmul.mubr.f32.gmra.mxu1 %v15689_v35  ;;  %v12739_v28 = vld [vmem:[#allocation2 + $0x49] sm:$0xff] }
 0x494   : > { %12226 = vmatpush3.msra.mxu0 %v6825_v10  ;;  %12309 = vmatprep.mubr.f32.mxu1 %v12735_v32 }
 0x495   : > { %12114 = vmatprep.mubr.f32.mxu0 %v12736_v14  ;;  %12308 = vmatpush3.msra.mxu1 %v7098_v17 }
 0x496   : > { %12227 = vmatprep.subr.mxu0 %v6824_v47  ;;  %12437 = vmatprep.subr.mxu1 %v7697_v9 }
 0x497   : > { %12115 = vmatmul.mubr.f32.gmra.mxu0 %v12736_v14  ;;  %12310 = vmatmul.mubr.f32.vlgmr.msra.gmra.mxu1 %v12737_v39 }
 0x498   : > { %12228 = vmatpush3.msra.mxu0 %v6824_v47  ;;  %12229 = vmatprep.mubr.f32.mxu0 %v12738_v1  ;;  %v15872_v47 = vld [vmem:[#allocation2 + $0x62] sm:$0xff]  ;;  %v15880_v1 = vld [vmem:[#allocation2 + $0x6a] sm:$0xff] }
 0x499   : > { %12312 = vmatprep.mubr.f32.mxu1 %v12739_v28  ;;  %12357 = vmatprep.subr.mxu0 %v7423_v49 }
 0x49a   : > { %12438 = vmatpush3.msra.mxu1 %v7697_v9  ;;  %v7969_v9 = vld [vmem:[#allocation9 + $0x468] sm:$0xff] }
 0x49b   : > { %12230 = vmatmul.mubr.f32.vlgmr.msra.gmra.mxu0 %v12740_v12  ;;  %12313 = vmatmul.mubr.f32.gmra.mxu1 %v12741_v48  ;;  %v15884_v12 = vld [vmem:[#allocation2 + $0x7a] sm:$0xff] }
 0x49c   : > { %12232 = vmatprep.mubr.f32.mxu0 %v12735_v32  ;;  %12315 = vmatprep.mubr.f32.mxu1 %v15411_v21  ;;  %v7420_v21 = vld [vmem:[#allocation9 + $0x160] sm:$0xff] }
 0x49d   : > { %12358 = vmatpush3.msra.mxu0 %v7423_v49  ;;  %12439 = vmatprep.subr.mxu1 %v7696_v38 }
 0x49e   : > { %12359 = vmatprep.subr.mxu0 %v7422_v26  ;;  %12440 = vmatpush3.msra.mxu1 %v7696_v38 }
 0x49f   : > { %12233 = vmatmul.mubr.f32.gmra.mxu0 %v12737_v39  ;;  %12316 = vmatmul.mubr.f32.gmra.mxu1 %v12742_v53 }
 0x4a0   : > { %12235 = vmatprep.mubr.f32.mxu0 %v12739_v28  ;;  %12318 = vmatprep.mubr.f32.mxu1 %v15443_v58 }
 0x4a1   : > { %12360 = vmatpush3.msra.mxu0 %v7422_v26  ;;  %12441 = vmatprep.subr.mxu1 %v7695_v22 }
 0x4a2   : > { %12361 = vmatprep.subr.mxu0 %v7421_v51  ;;  %12442 = vmatpush3.msra.mxu1 %v7695_v22 }
 0x4a3   : > { %12236 = vmatmul.mubr.f32.gmra.mxu0 %v12741_v48  ;;  %12319 = vmatmul.mubr.f32.gmra.mxu1 %v15430_v18  ;;  %v7692_v18 = vld [vmem:[#allocation9 + $0x2d0] sm:$0xff]  ;;  %v7968_v48 = vld [vmem:[#allocation9 + $0x460] sm:$0xff] }
 0x4a4   : > { %12238 = vmatprep.mubr.f32.mxu0 %v12743_v60  ;;  %12321 = vmatprep.mubr.f32.mxu1 %v15471_v59 }
 0x4a5   : > { %12362 = vmatpush3.msra.mxu0 %v7421_v51  ;;  %12443 = vmatprep.subr.mxu1 %v7694_v16 }
 0x4a6   : > { %12363 = vmatprep.subr.mxu0 %v7420_v21  ;;  %12444 = vmatpush3.msra.mxu1 %v7694_v16  ;;  %v15892_v16 = vld [vmem:[#allocation2 + $0x82] sm:$0xff] }
 0x4a7   : > { %12239 = vmatmul.mubr.f32.gmra.mxu0 %v12742_v53  ;;  %12322 = vmatmul.mubr.f32.gmra.mxu1 %v15460_v8 }
 0x4a8   : > { %12241 = vmatprep.mubr.f32.mxu0 %v15443_v58  ;;  %12324 = vmatprep.mubr.f32.mxu1 %v15501_v52  ;;  %v7691_v58 = vld [vmem:[#allocation9 + $0x2c8] sm:$0xff] }
 0x4a9   : > { %12364 = vmatpush3.msra.mxu0 %v7420_v21  ;;  %12445 = vmatprep.subr.mxu1 %v7693_v27 }
 0x4aa   : > { %12365 = vmatprep.subr.mxu0 %v7419_v30  ;;  %12446 = vmatpush3.msra.mxu1 %v7693_v27  ;;  %v15896_v27 = vld [vmem:[#allocation2 + $0x92] sm:$0xff] }
 0x4ab   : > { %12242 = vmatmul.mubr.f32.gmra.mxu0 %v12744_v0  ;;  %12325 = vmatmul.mubr.f32.gmra.mxu1 %v15488_v40 }
 0x4ac   : > { %12244 = vmatprep.mubr.f32.mxu0 %v15471_v59  ;;  %12327 = vmatprep.mubr.f32.mxu1 %v17399_v43  ;;  %v7690_v59 = vld [vmem:[#allocation9 + $0x2c0] sm:$0xff] }
 0x4ad   : > { %12366 = vmatpush3.msra.mxu0 %v7419_v30  ;;  %12447 = vmatprep.subr.mxu1 %v7692_v18  ;;  %v7967_v30 = vld [vmem:[#allocation9 + $0x458] sm:$0xff] }
 0x4ae   : > { %12367 = vmatprep.subr.mxu0 %v7418_v37  ;;  %12448 = vmatpush3.msra.mxu1 %v7692_v18 }
 0x4af   : > { %12245 = vmatmul.mubr.f32.gmra.mxu0 %v15460_v8  ;;  %12328 = vmatmul.mubr.f32.gmra.mxu1 %v17400_v34  ;;  %v7689_v8 = vld [vmem:[#allocation9 + $0x2b8] sm:$0xff] }
 0x4b0   : > { %12247 = vmatprep.mubr.f32.mxu0 %v15501_v52  ;;  %12330 = vmatprep.mubr.f32.mxu1 %v17401_v2  ;;  %v7415_v52 = vld [vmem:[#allocation9 + $0x138] sm:$0xff] }
 0x4b1   : > { %12368 = vmatpush3.msra.mxu0 %v7418_v37  ;;  %12449 = vmatprep.subr.mxu1 %v7691_v58 }
 0x4b2   : > { %12369 = vmatprep.subr.mxu0 %v7417_v56  ;;  %12450 = vmatpush3.msra.mxu1 %v7691_v58 }
 0x4b3   : > { %12248 = vmatmul.mubr.f32.gmra.mxu0 %v15488_v40  ;;  %12331 = vmatmul.mubr.f32.gmra.mxu1 %v17402_v45  ;;  %v7688_v40 = vld [vmem:[#allocation9 + $0x2b0] sm:$0xff] }
 0x4b4   : > { %12250 = vmatprep.mubr.f32.mxu0 %v17399_v43  ;;  %12333 = vmatprep.mubr.f32.mxu1 %v17403_v54  ;;  %v7413_v43 = vld [vmem:[#allocation9 + $0x128] sm:$0xff] }
 0x4b5   : > { %12370 = vmatpush3.msra.mxu0 %v7417_v56  ;;  %12451 = vmatprep.subr.mxu1 %v7690_v59  ;;  %v15904_v56 = vld [vmem:[#allocation2 + $0x9a] sm:$0xff] }
 0x4b6   : > { %12371 = vmatprep.subr.mxu0 %v7416_v36  ;;  %12452 = vmatpush3.msra.mxu1 %v7690_v59 }
 0x4b7   : > { %12251 = vmatmul.mubr.f32.gmra.mxu0 %v17400_v34  ;;  %12334 = vmatmul.mubr.f32.gmra.mxu1 %v17404_v25  ;;  %v7686_v34 = vld [vmem:[#allocation9 + $0x2a0] sm:$0xff] }
 0x4b8   : > { %12253 = vmatprep.mubr.f32.mxu0 %v17401_v2  ;;  %12336 = vmatprep.mubr.f32.mxu1 %v15617_v46  ;;  %v7683_v2 = vld [vmem:[#allocation9 + $0x288] sm:$0xff] }
 0x4b9   : > { %12372 = vmatpush3.msra.mxu0 %v7416_v36  ;;  %12453 = vmatprep.subr.mxu1 %v7689_v8 }
 0x4ba   : > { %12373 = vmatprep.subr.mxu0 %v7415_v52  ;;  %12454 = vmatpush3.msra.mxu1 %v7689_v8  ;;  %v15908_v8 = vld [vmem:[#allocation2 + $0xaa] sm:$0xff] }
 0x4bb   : > { %12254 = vmatmul.mubr.f32.gmra.mxu0 %v17402_v45  ;;  %12337 = vmatmul.mubr.f32.gmra.mxu1 %v15604_v5  ;;  %v15852_v45 = vpop.f32.mrf.mxu1 }
 0x4bc   : > { %12256 = vmatprep.mubr.f32.mxu0 %v17403_v54  ;;  %12339 = vmatprep.mubr.f32.mxu1 %v15641_v61  ;;  %v7971_v54 = vld [vmem:[#allocation9 + $0x478] sm:$0xff] }
 0x4bd   : > { %12374 = vmatpush3.msra.mxu0 %v7415_v52  ;;  %12455 = vmatprep.subr.mxu1 %v7688_v40  ;;  %v7966_v52 = vld [vmem:[#allocation9 + $0x450] sm:$0xff] }
 0x4be   : > { %12375 = vmatprep.subr.mxu0 %v7414_v19  ;;  %12456 = vmatpush3.msra.mxu1 %v7688_v40 }
 0x4bf   : > { %12257 = vmatmul.mubr.f32.gmra.mxu0 %v17404_v25  ;;  %12340 = vmatmul.mubr.f32.gmra.mxu1 %v15630_v6  ;;  %v15856_v25 = vld [vmem:[#allocation2 + $0x32] sm:$0xff] }
 0x4c0   : > { %12259 = vmatprep.mubr.f32.mxu0 %v15617_v46  ;;  %12342 = vmatprep.mubr.f32.mxu1 %v15664_v7  ;;  %v7685_v46 = vld [vmem:[#allocation9 + $0x298] sm:$0xff] }
 0x4c1   : > { %12376 = vmatpush3.msra.mxu0 %v7414_v19  ;;  %12457 = vmatprep.subr.mxu1 %v7687_v29 }
 0x4c2   : > { %12377 = vmatprep.subr.mxu0 %v7413_v43  ;;  %12458 = vmatpush3.msra.mxu1 %v7687_v29 }
 0x4c3   : > { %12260 = vmatmul.mubr.f32.gmra.mxu0 %v15604_v5  ;;  %12343 = vmatmul.mubr.f32.gmra.mxu1 %v15653_v44  ;;  %v7684_v5 = vld [vmem:[#allocation9 + $0x290] sm:$0xff] }
 0x4c4   : > { %12262 = vmatprep.mubr.f32.mxu0 %v15641_v61  ;;  %12345 = vmatprep.mubr.f32.mxu1 %v15681_v31  ;;  %v7410_v61 = vld [vmem:[#allocation9 + $0x110] sm:$0xff] }
 0x4c5   : > { %12378 = vmatpush3.msra.mxu0 %v7413_v43  ;;  %12459 = vmatprep.subr.mxu1 %v7686_v34 }
 0x4c6   : > { %12379 = vmatprep.subr.mxu0 %v7412_v20  ;;  %12460 = vmatpush3.msra.mxu1 %v7686_v34  ;;  %v15916_v34 = vld [vmem:[#allocation2 + $0xb2] sm:$0xff] }
 0x4c7   : > { %12263 = vmatmul.mubr.f32.gmra.mxu0 %v15630_v6  ;;  %12346 = vmatmul.mubr.f32.gmra.mxu1 %v15673_v4  ;;  %v6547_v6 = vld [vmem:[#allocation2 + $0x199] sm:$0xff] }
 0x4c8   : > { %12265 = vmatprep.mubr.f32.mxu0 %v15664_v7  ;;  %12348 = vmatprep.mubr.f32.mxu1 %v15697_v63  ;;  %v7409_v7 = vld [vmem:[#allocation9 + $0x108] sm:$0xff] }
 0x4c9   : > { %12380 = vmatpush3.msra.mxu0 %v7412_v20  ;;  %12461 = vmatprep.subr.mxu1 %v7685_v46 }
 0x4ca   : > { %12381 = vmatprep.subr.mxu0 %v7411_v55  ;;  %12462 = vmatpush3.msra.mxu1 %v7685_v46 }
 0x4cb   : > { %12266 = vmatmul.mubr.f32.gmra.mxu0 %v15653_v44  ;;  %12349 = vmatmul.mubr.f32.gmra.mxu1 %v15689_v35  ;;  %v6548_v44 = vld [vmem:[#allocation2 + $0x1a1] sm:$0xff] }
 0x4cc   : > { %12268 = vmatprep.mubr.f32.mxu0 %v15681_v31  ;;  %12351 = vmatprep.mubr.f32.mxu1 %v15713_v23  ;;  %v7682_v31 = vld [vmem:[#allocation9 + $0x280] sm:$0xff] }
 0x4cd   : > { %12382 = vmatpush3.msra.mxu0 %v7411_v55  ;;  %12463 = vmatprep.subr.mxu1 %v7684_v5  ;;  %v15920_v55 = vld [vmem:[#allocation2 + $0xc2] sm:$0xff] }
 0x4ce   : > { %12383 = vmatprep.subr.mxu0 %v7410_v61  ;;  %12464 = vmatpush3.msra.mxu1 %v7684_v5  ;;  %v7965_v5 = vld [vmem:[#allocation9 + $0x448] sm:$0xff] }
 0x4cf   : > { %12269 = vmatmul.mubr.f32.gmra.mxu0 %v15673_v4  ;;  %12352 = vmatmul.mubr.f32.gmra.mxu1 %v15705_v50  ;;  %v7373_v4 = vld [vmem:[#allocation2 + $0x1a] sm:$0xff] }
 0x4d0   : > { %12271 = vmatprep.mubr.f32.mxu0 %v15697_v63  ;;  %12384 = vmatpush3.msra.mxu0 %v7410_v61  ;;  %v7374_v63 = vld [vmem:[#allocation2 + $0x22] sm:$0xff] }
 0x4d1   : > { %12354 = vmatprep.mubr.f32.mxu1 %v6547_v6  ;;  %12385 = vmatprep.subr.mxu0 %v7409_v7 }
 0x4d2   : > { %12465 = vmatprep.subr.mxu1 %v7683_v2  ;;  %12386 = vmatpush3.msra.mxu0 %v7409_v7 }
 0x4d3   : > { %12272 = vmatmul.mubr.f32.gmra.mxu0 %v15689_v35  ;;  %12355 = vmatmul.mubr.f32.gmra.mxu1 %v6548_v44  ;;  %v6080_v35 = vpop.f32.mrf.mxu1  ;;  %v15928_v44 = vld [vmem:[#allocation2 + $0xca] sm:$0xff] }
 0x4d4   : > { %12274 = vmatprep.mubr.f32.mxu0 %v15713_v23  ;;  %12466 = vmatpush3.msra.mxu1 %v7683_v2  ;;  %v15859_v23 = vld [vmem:[#allocation2 + $0x3a] sm:$0xff] }
 0x4d5   : > { %12469 = vmatprep.mubr.f32.mxu1 %v7373_v4  ;;  %12467 = vmatprep.subr.mxu1 %v7682_v31 }
 0x4d6   : > { %12468 = vmatpush3.msra.mxu1 %v7682_v31  ;;  %12387 = vmatprep.subr.mxu0 %v7408_v62 }
 0x4d7   : > { %12275 = vmatmul.mubr.f32.gmra.mxu0 %v15705_v50  ;;  %12470 = vmatmul.mubr.f32.vlgmr.msra.gmra.mxu1 %v7374_v63  ;;  %v7970_v50 = vld [vmem:[#allocation9 + $0x470] sm:$0xff] }
 0x4d8   : > { %12388 = vmatpush3.msra.mxu0 %v7408_v62  ;;  %12472 = vmatprep.mubr.f32.mxu1 %v15856_v25 }
 0x4d9   : > { %12389 = vmatprep.mubr.f32.mxu0 %v7371_v11  ;;  %12517 = vmatprep.subr.mxu0 %v7971_v54  ;;  %v15861_v33 = vpop.f32.mrf.mxu0  ;;  %v11994_v24 = vpop.f32.mrf.mxu1 }
 0x4db   : > { %12390 = vmatmul.mubr.f32.vlgmr.msra.gmra.mxu0 %v7372_v42  ;;  %12473 = vmatmul.mubr.f32.gmra.mxu1 %v15859_v23  ;;  %v5855_v13 = vpop.f32.mrf.mxu0  ;;  %v6090_v41 = vpop.f32.mrf.mxu1 }
 0x4dc   : > { %12392 = vmatprep.mubr.f32.mxu0 %v7373_v4  ;;  %12475 = vmatprep.mubr.f32.mxu1 %v15864_v3  ;;  %v15867_v57 = vadd.f32 %v6080_v35, %v5855_v13  ;;  %v15932_v4 = vld [vmem:[#allocation2 + $0xda] sm:$0xff] }
 0x4dd   : > { %12518 = vmatpush3.msra.mxu0 %v7971_v54  ;;  %v11914_v10 = vpop.f32.mrf.mxu0  ;;  %v11997_v17 = vpop.f32.mrf.mxu1 }
 0x4de   : > { %12519 = vmatprep.subr.mxu0 %v7970_v50  ;;  %v15874_v32 = vadd.f32 %v11994_v24, %v11914_v10  ;;  %v15940_v24 = vld [vmem:[#allocation2 + $0xe2] sm:$0xff]  ;;  %v7963_v10 = vld [vmem:[#allocation9 + $0x438] sm:$0xff] }
 0x4df   : > { %12393 = vmatmul.mubr.f32.gmra.mxu0 %v7374_v63  ;;  %12476 = vmatmul.mubr.f32.gmra.mxu1 %v15869_v15  ;;  %v5865_v14 = vpop.f32.mrf.mxu0  ;;  %v6100_v49 = vpop.f32.mrf.mxu1  ;;  %v7964_v63 = vld [vmem:[#allocation9 + $0x440] sm:$0xff] }
 0x4e0   : > { %12395 = vmatprep.mubr.f32.mxu0 %v15856_v25  ;;  %12478 = vmatprep.mubr.f32.mxu1 %v15872_v47  ;;  %v15878_v39 = vadd.f32 %v6090_v41, %v5865_v14  ;;  %v15944_v41 = vld [vmem:[#allocation2 + $0xf2] sm:$0xff] }
 0x4e1   : > { %12520 = vmatpush3.msra.mxu0 %v7970_v50  ;;  %v11917_v28 = vpop.f32.mrf.mxu0  ;;  %v12000_v38 = vpop.f32.mrf.mxu1 }
 0x4e2   : > { %12521 = vmatprep.subr.mxu0 %v7969_v9  ;;  %v15886_v26 = vadd.f32 %v11997_v17, %v11917_v28  ;;  %v15952_v28 = vld [vmem:[#allocation2 + $0xfa] sm:$0xff] }
 0x4e3   : > { %12396 = vmatmul.mubr.f32.gmra.mxu0 %v15859_v23  ;;  %12479 = vmatmul.mubr.f32.gmra.mxu1 %v15880_v1  ;;  %v5875_v22 = vpop.f32.mrf.mxu0  ;;  %v6110_v53 = vpop.f32.mrf.mxu1 }
 0x4e4   : > { %12398 = vmatprep.mubr.f32.mxu0 %v15864_v3  ;;  %12481 = vmatprep.mubr.f32.mxu1 %v15884_v12  ;;  %v15890_v51 = vadd.f32 %v6100_v49, %v5875_v22  ;;  %v15956_v22 = vld [vmem:[#allocation2 + $0x10a] sm:$0xff] }
 0x4e5   : > { %12522 = vmatpush3.msra.mxu0 %v7969_v9  ;;  %v11920_v21 = vpop.f32.mrf.mxu0  ;;  %v12003_v60 = vpop.f32.mrf.mxu1 }
 0x4e6   : > { %12523 = vmatprep.subr.mxu0 %v7968_v48  ;;  %v15898_v18 = vadd.f32 %v12000_v38, %v11920_v21 }
 0x4e7   : > { %12399 = vmatmul.mubr.f32.gmra.mxu0 %v15869_v15  ;;  %12482 = vmatmul.mubr.f32.gmra.mxu1 %v15892_v16  ;;  %v5885_v0 = vpop.f32.mrf.mxu0  ;;  %v6120_v37 = vpop.f32.mrf.mxu1 }
 0x4e8   : > { %12401 = vmatprep.mubr.f32.mxu0 %v15872_v47  ;;  %12484 = vmatprep.mubr.f32.mxu1 %v15896_v27  ;;  %v15902_v58 = vadd.f32 %v6110_v53, %v5885_v0  ;;  %v7962_v53 = vld [vmem:[#allocation9 + $0x430] sm:$0xff] }
 0x4e9   : > { %12524 = vmatpush3.msra.mxu0 %v7968_v48 }
 0x4ea   : > { %12525 = vmatprep.subr.mxu0 %v7967_v30  ;;  %v11923_v59 = vpop.f32.mrf.mxu0  ;;  %v12006_v36 = vpop.f32.mrf.mxu1 }
 0x4eb   : > { %12402 = vmatmul.mubr.f32.gmra.mxu0 %v15880_v1  ;;  %12485 = vmatmul.mubr.f32.gmra.mxu1 %v15904_v56  ;;  %v15910_v40 = vadd.f32 %v12003_v60, %v11923_v59 }
 0x4ec   : > { %12404 = vmatprep.mubr.f32.mxu0 %v15884_v12  ;;  %12487 = vmatprep.mubr.f32.mxu1 %v15908_v8  ;;  %v5895_v19 = vpop.f32.mrf.mxu0  ;;  %v6130_v29 = vpop.f32.mrf.mxu1 }
 0x4ed   : > { %12526 = vmatpush3.msra.mxu0 %v7967_v30  ;;  %v15914_v43 = vadd.f32 %v6120_v37, %v5895_v19  ;;  %v15964_v37 = vld [vmem:[#allocation2 + $0x112] sm:$0xff]  ;;  %v7961_v19 = vld [vmem:[#allocation9 + $0x428] sm:$0xff] }
 0x4ee   : > { %12527 = vmatprep.subr.mxu0 %v7966_v52  ;;  %v11926_v20 = vpop.f32.mrf.mxu0  ;;  %v12009_v46 = vpop.f32.mrf.mxu1 }
 0x4ef   : > { %12405 = vmatmul.mubr.f32.gmra.mxu0 %v15892_v16  ;;  %12488 = vmatmul.mubr.f32.gmra.mxu1 %v15916_v34  ;;  %v15922_v61 = vadd.f32 %v12006_v36, %v11926_v20 }
 0x4f0   : > { %12407 = vmatprep.mubr.f32.mxu0 %v15896_v27  ;;  %12490 = vmatprep.mubr.f32.mxu1 %v15920_v55  ;;  %v5905_v6 = vpop.f32.mrf.mxu0  ;;  %v6140_v7 = vpop.f32.mrf.mxu1 }
 0x4f1   : > { %12528 = vmatpush3.msra.mxu0 %v7966_v52  ;;  %v15926_v2 = vadd.f32 %v6130_v29, %v5905_v6  ;;  %v15968_v52 = vld [vmem:[#allocation2 + $0x122] sm:$0xff]  ;;  %v15976_v6 = vld [vmem:[#allocation2 + $0x12a] sm:$0xff] }
 0x4f2   : > { %12529 = vmatprep.subr.mxu0 %v7965_v5  ;;  %v11929_v31 = vpop.f32.mrf.mxu0  ;;  %v12012_v62 = vpop.f32.mrf.mxu1 }
 0x4f3   : > { %12408 = vmatmul.mubr.f32.gmra.mxu0 %v15904_v56  ;;  %12491 = vmatmul.mubr.f32.gmra.mxu1 %v15928_v44  ;;  %v15934_v11 = vadd.f32 %v12009_v46, %v11929_v31 }
 0x4f4   : > { %12410 = vmatprep.mubr.f32.mxu0 %v15908_v8  ;;  %12493 = vmatprep.mubr.f32.mxu1 %v15932_v4  ;;  %v5915_v54 = vpop.f32.mrf.mxu0  ;;  %v6150_v35 = vpop.f32.mrf.mxu1 }
 0x4f5   : > { %12530 = vmatpush3.msra.mxu0 %v7965_v5  ;;  %v15938_v42 = vadd.f32 %v6140_v7, %v5915_v54 }
 0x4f6   : > { %12531 = vmatprep.subr.mxu0 %v7964_v63  ;;  %v11932_v50 = vpop.f32.mrf.mxu0 }
 0x4f7   : > { %v12015_v13 = vpop.f32.mrf.mxu1  ;;  %12411 = vmatmul.mubr.f32.gmra.mxu0 %v15916_v34  ;;  %12494 = vmatmul.mubr.f32.gmra.mxu1 %v15940_v24  ;;  %v15946_v17 = vadd.f32 %v12012_v62, %v11932_v50  ;;  %v15980_v62 = vld [vmem:[#allocation2 + $0x13a] sm:$0xff] }
 0x4f8   : > { %12413 = vmatprep.mubr.f32.mxu0 %v15920_v55  ;;  %12496 = vmatprep.mubr.f32.mxu1 %v15944_v41  ;;  %v5925_v9 = vpop.f32.mrf.mxu0 }
 0x4f9   : > { %12532 = vmatpush3.msra.mxu0 %v7964_v63  ;;  %v6160_v14 = vpop.f32.mrf.mxu1  ;;  %v15950_v49 = vadd.f32 %v6150_v35, %v5925_v9  ;;  %v7960_v63 = vld [vmem:[#allocation9 + $0x420] sm:$0xff] }
 0x4fa   : > { %12533 = vmatprep.subr.mxu0 %v7963_v10  ;;  %v11935_v38 = vpop.f32.mrf.mxu0 }
 0x4fb   : > { %v12018_v48 = vpop.f32.mrf.mxu1  ;;  %12414 = vmatmul.mubr.f32.gmra.mxu0 %v15928_v44  ;;  %12497 = vmatmul.mubr.f32.gmra.mxu1 %v15952_v28  ;;  %v15958_v21 = vadd.f32 %v12015_v13, %v11935_v38  ;;  %v15992_v38 = vld [vmem:[#allocation2 + $0x152] sm:$0xff] }
 0x4fc   : > { %12416 = vmatprep.mubr.f32.mxu0 %v15932_v4  ;;  %12499 = vmatprep.mubr.f32.mxu1 %v15956_v22  ;;  %v5935_v60 = vpop.f32.mrf.mxu0 }
 0x4fd   : > { %12534 = vmatpush3.msra.mxu0 %v7963_v10  ;;  %v6170_v30 = vpop.f32.mrf.mxu1  ;;  %v15962_v0 = vadd.f32 %v6160_v14, %v5935_v60  ;;  %v15988_v10 = vld [vmem:[#allocation2 + $0x142] sm:$0xff] }
 0x4fe   : > { %12535 = vmatprep.subr.mxu0 %v7962_v53  ;;  %v11938_v59 = vpop.f32.mrf.mxu0  ;;  %17406 = vst [vmem:[#allocation15_spill] sm:$0xff] %v15988_v10 }
 0x4ff   : > { %v12021_v36 = vpop.f32.mrf.mxu1  ;;  %12417 = vmatmul.mubr.f32.gmra.mxu0 %v15940_v24  ;;  %12500 = vmatmul.mubr.f32.gmra.mxu1 %v15964_v37  ;;  %v15970_v29 = vadd.f32 %v12018_v48, %v11938_v59  ;;  %v7959_v48 = vld [vmem:[#allocation9 + $0x418] sm:$0xff] }
 0x500   : > { %12419 = vmatprep.mubr.f32.mxu0 %v15944_v41  ;;  %12502 = vmatprep.mubr.f32.mxu1 %v15968_v52  ;;  %v5945_v20 = vpop.f32.mrf.mxu0 }
 0x501   : > { %12536 = vmatpush3.msra.mxu0 %v7962_v53  ;;  %v6180_v46 = vpop.f32.mrf.mxu1  ;;  %v15974_v5 = vadd.f32 %v6170_v30, %v5945_v20 }
 0x502   : > { %12537 = vmatprep.subr.mxu0 %v7961_v19  ;;  %v11941_v7 = vpop.f32.mrf.mxu0 }
 0x503   : > { %v12024_v31 = vpop.f32.mrf.mxu1  ;;  %12420 = vmatmul.mubr.f32.gmra.mxu0 %v15952_v28  ;;  %12503 = vmatmul.mubr.f32.gmra.mxu1 %v15976_v6  ;;  %v15982_v54 = vadd.f32 %v12021_v36, %v11941_v7  ;;  %v16000_v36 = vld [vmem:[#allocation2 + $0x15a] sm:$0xff]  ;;  %v7958_v7 = vld [vmem:[#allocation9 + $0x410] sm:$0xff] }
 0x504   : > { %12422 = vmatprep.mubr.f32.mxu0 %v15956_v22  ;;  %12505 = vmatprep.mubr.f32.mxu1 %v15980_v62  ;;  %v5955_v35 = vpop.f32.mrf.mxu0 }
 0x505   : > { %12538 = vmatpush3.msra.mxu0 %v7961_v19  ;;  %v6190_v50 = vpop.f32.mrf.mxu1  ;;  %v15986_v13 = vadd.f32 %v6180_v46, %v5955_v35  ;;  %v16004_v46 = vld [vmem:[#allocation2 + $0x16a] sm:$0xff] }
 0x506   : > { %12539 = vmatprep.subr.mxu0 %v7960_v63 }
 0x507   : > { %17405 = vst [vmem:[#allocation65_spill] sm:$0xff] %v15986_v13  ;;  %v11944_v9 = vpop.f32.mrf.mxu0  ;;  %v12027_v14 = vpop.f32.mrf.mxu1  ;;  %12423 = vmatmul.mubr.f32.gmra.mxu0 %v15964_v37  ;;  %12506 = vmatmul.mubr.f32.gmra.mxu1 %v15988_v10 }
 0x508   : > { %v15994_v53 = vadd.f32 %v12024_v31, %v11944_v9  ;;  %12425 = vmatprep.mubr.f32.mxu0 %v15968_v52  ;;  %12508 = vmatprep.mubr.f32.mxu1 %v15992_v38  ;;  %v16012_v9 = vld [vmem:[#allocation2 + $0x172] sm:$0xff] }
 0x509   : > { %12540 = vmatpush3.msra.mxu0 %v7960_v63  ;;  %v5965_v60 = vpop.f32.mrf.mxu0  ;;  %v6200_v30 = vpop.f32.mrf.mxu1 }
 0x50a   : > { %17407 = vst [vmem:[#allocation36_spill] sm:$0xff] %v15994_v53  ;;  %v15998_v59 = vadd.f32 %v6190_v50, %v5965_v60  ;;  %12541 = vmatprep.subr.mxu0 %v7959_v48  ;;  %v7956_v53 = vld [vmem:[#allocation9 + $0x400] sm:$0xff] }
 0x50b   : > { %v11947_v19 = vpop.f32.mrf.mxu0  ;;  %v12030_v20 = vpop.f32.mrf.mxu1  ;;  %12426 = vmatmul.mubr.f32.gmra.mxu0 %v15976_v6  ;;  %12509 = vmatmul.mubr.f32.gmra.mxu1 %v16000_v36 }
 0x50c   : > { %17408 = vst [vmem:[#allocation68_spill] sm:$0xff] %v15998_v59  ;;  %v16006_v31 = vadd.f32 %v12027_v14, %v11947_v19  ;;  %12428 = vmatprep.mubr.f32.mxu0 %v15980_v62  ;;  %12511 = vmatprep.mubr.f32.mxu1 %v16004_v46  ;;  %v16016_v14 = vld [vmem:[#allocation2 + $0x182] sm:$0xff] }
 0x50d   : > { %12542 = vmatpush3.msra.mxu0 %v7959_v48  ;;  %v5975_v63 = vpop.f32.mrf.mxu0  ;;  %v6210_v35 = vpop.f32.mrf.mxu1  ;;  %17411 = vst [vmem:[#allocation70_spill] sm:$0xff] %v16016_v14  ;;  %v7957_v19 = vld [vmem:[#allocation9 + $0x408] sm:$0xff] }
 0x50e   : > { %17409 = vst [vmem:[#allocation45_spill] sm:$0xff] %v16006_v31  ;;  %v16010_v50 = vadd.f32 %v6200_v30, %v5975_v63  ;;  %12543 = vmatprep.subr.mxu0 %v7958_v7 }
 0x50f   : > { %v11950_v60 = vpop.f32.mrf.mxu0  ;;  %v12033_v59 = vpop.f32.mrf.mxu1  ;;  %12429 = vmatmul.mubr.f32.gmra.mxu0 %v15988_v10  ;;  %12512 = vmatmul.mubr.f32.gmra.mxu1 %v16012_v9 }
 0x510   : > { %17410 = vst [vmem:[#allocation64_spill] sm:$0xff] %v16010_v50  ;;  %v16018_v31 = vadd.f32 %v12030_v20, %v11950_v60  ;;  %12431 = vmatprep.mubr.f32.mxu0 %v15992_v38  ;;  %12514 = vmatprep.mubr.f32.mxu1 %v16016_v14  ;;  %v16024_v50 = vld [vmem:[#allocation2 + $0x18a] sm:$0xff] }
 0x511   : > { %12544 = vmatpush3.msra.mxu0 %v7958_v7  ;;  %v5985_v48 = vpop.f32.mrf.mxu0  ;;  %v6220_v30 = vpop.f32.mrf.mxu1  ;;  %17414 = vst [vmem:[#allocation46_spill] sm:$0xff] %v16024_v50 }
 0x512   : > { %17412 = vst [vmem:[#allocation37_spill] sm:$0xff] %v16018_v31  ;;  %v16022_v63 = vadd.f32 %v6210_v35, %v5985_v48  ;;  %12545 = vmatprep.subr.mxu0 %v7957_v19 }
 0x513   : > { %v11953_v10 = vpop.f32.mrf.mxu0  ;;  %v12036_v13 = vpop.f32.mrf.mxu1  ;;  %12432 = vmatmul.mubr.f32.gmra.mxu0 %v16000_v36  ;;  %12515 = vmatmul.mubr.f32.gmra.mxu1 %v16024_v50 }
 0x514   : > { %17413 = vst [vmem:[#allocation83_spill] sm:$0xff] %v16022_v63  ;;  %v16028_v20 = vadd.f32 %v12033_v59, %v11953_v10  ;;  %12434 = vmatprep.mubr.f32.mxu0 %v16004_v46  ;;  %12546 = vmatpush3.msra.mxu0 %v7957_v19  ;;  %v6086_v59 = vadd.f32 %v15852_v45, %v15861_v33 }
 0x515   : > { %v5995_v7 = vpop.f32.mrf.mxu0  ;;  %v6230_v60 = vpop.f32.mrf.mxu1  ;;  %12547 = vmatprep.subr.mxu0 %v7956_v53 }
 0x516   : > { %17415 = vst [vmem:[#allocation32_spill] sm:$0xff] %v16028_v20  ;;  %v16031_v35 = vadd.f32 %v6220_v30, %v5995_v7  ;;  %12548 = vmatpush3.msra.mxu0 %v7956_v53 }
 0x517   : > { %v11956_v48 = vpop.f32.mrf.mxu0  ;;  %v12151_v63 = vpop.f32.mrf.mxu1  ;;  %12435 = vmatmul.mubr.f32.gmra.mxu0 %v16012_v9 }
 0x518   : > { %v16034_v14 = vadd.f32 %v12036_v13, %v11956_v48  ;;  %12549 = vmatprep.mubr.f32.mxu0 %v15856_v25 }
 0x519   : > { %v6005_v50 = vpop.f32.mrf.mxu0  ;;  %v6632_v10 = vpop.f32.mrf.mxu1 }
 0x51a   : > { %17416 = vst [vmem:[#allocation62_spill] sm:$0xff] %v16034_v14  ;;  %v16039_v19 = vadd.f32 %v6230_v60, %v6005_v50 }
 0x51b   : > { %v12071_v20 = vpop.f32.mrf.mxu0  ;;  %v12154_v31 = vpop.f32.mrf.mxu1  ;;  %12550 = vmatmul.mubr.f32.vlgmr.msra.gmra.mxu0 %v15859_v23 }
 0x51c   : > { %v6482_v53 = vadd.f32 %v12071_v20, %v6086_v59  ;;  %12552 = vmatprep.mubr.f32.mxu0 %v15864_v3 }
 0x51d   : > { %v6322_v30 = vpop.f32.mrf.mxu0  ;;  %v6642_v7 = vpop.f32.mrf.mxu1 }
 0x51e   : > { %v6481_v13 = vadd.f32 %v6322_v30, %v15867_v57  ;;  %v16044_v48 = vadd.f32 %v12151_v63, %v6482_v53 }
 0x51f   : > { %v12074_v25 = vpop.f32.mrf.mxu0  ;;  %v12157_v14 = vpop.f32.mrf.mxu1  ;;  %12553 = vmatmul.mubr.f32.gmra.mxu0 %v15869_v15 }
 0x520   : > { %v6484_v45 = vadd.f32 %v12074_v25, %v15874_v32  ;;  %12555 = vmatprep.mubr.f32.mxu0 %v15872_v47  ;;  %v16049_v33 = vadd.f32 %v6632_v10, %v6481_v13 }
 0x521   : > { %v6332_v23 = vpop.f32.mrf.mxu0  ;;  %v6652_v50 = vpop.f32.mrf.mxu1 }
 0x522   : > { %v6483_v3 = vadd.f32 %v6332_v23, %v15878_v39  ;;  %v16052_v20 = vadd.f32 %v12154_v31, %v6484_v45 }
 0x523   : > { %v12077_v60 = vpop.f32.mrf.mxu0  ;;  %v12160_v57 = vpop.f32.mrf.mxu1  ;;  %12556 = vmatmul.mubr.f32.gmra.mxu0 %v15880_v1 }
 0x524   : > { %v6486_v63 = vadd.f32 %v12077_v60, %v15886_v26  ;;  %12558 = vmatprep.mubr.f32.mxu0 %v15884_v12  ;;  %v16057_v15 = vadd.f32 %v6642_v7, %v6483_v3 }
 0x525   : > { %v6342_v32 = vpop.f32.mrf.mxu0  ;;  %v6662_v47 = vpop.f32.mrf.mxu1 }
 0x526   : > { %v6485_v10 = vadd.f32 %v6342_v32, %v15890_v51  ;;  %v16060_v59 = vadd.f32 %v12157_v14, %v6486_v63 }
 0x527   : > { %v12080_v53 = vpop.f32.mrf.mxu0  ;;  %v12163_v39 = vpop.f32.mrf.mxu1  ;;  %12559 = vmatmul.mubr.f32.gmra.mxu0 %v15892_v16 }
 0x528   : > { %v6488_v31 = vadd.f32 %v12080_v53, %v15898_v18  ;;  %12561 = vmatprep.mubr.f32.mxu0 %v15896_v27  ;;  %v16065_v1 = vadd.f32 %v6652_v50, %v6485_v10 }
 0x529   : > { %v6352_v26 = vpop.f32.mrf.mxu0  ;;  %v6672_v12 = vpop.f32.mrf.mxu1 }
 0x52a   : > { %v6487_v30 = vadd.f32 %v6352_v26, %v15902_v58  ;;  %v16068_v7 = vadd.f32 %v12160_v57, %v6488_v31 }
 0x52b   : > { %v12083_v13 = vpop.f32.mrf.mxu0  ;;  %v12166_v51 = vpop.f32.mrf.mxu1  ;;  %12562 = vmatmul.mubr.f32.gmra.mxu0 %v15904_v56 }
 0x52c   : > { %v6490_v14 = vadd.f32 %v12083_v13, %v15910_v40  ;;  %12564 = vmatprep.mubr.f32.mxu0 %v15908_v8  ;;  %v16073_v16 = vadd.f32 %v6662_v47, %v6487_v30 }
 0x52d   : > { %v6362_v18 = vpop.f32.mrf.mxu0  ;;  %v6682_v27 = vpop.f32.mrf.mxu1 }
 0x52e   : > { %v6489_v25 = vadd.f32 %v6362_v18, %v15914_v43  ;;  %v16076_v45 = vadd.f32 %v12163_v39, %v6490_v14 }
 0x52f   : > { %v12086_v23 = vpop.f32.mrf.mxu0  ;;  %v12169_v58 = vpop.f32.mrf.mxu1  ;;  %12565 = vmatmul.mubr.f32.gmra.mxu0 %v15916_v34 }
 0x530   : > { %v6492_v50 = vadd.f32 %v12086_v23, %v15922_v61  ;;  %12567 = vmatprep.mubr.f32.mxu0 %v15920_v55  ;;  %v16081_v56 = vadd.f32 %v6672_v12, %v6489_v25 }
 0x531   : > { %v6372_v40 = vpop.f32.mrf.mxu0  ;;  %v6692_v8 = vpop.f32.mrf.mxu1 }
 0x532   : > { %v6491_v3 = vadd.f32 %v6372_v40, %v15926_v2  ;;  %v16084_v60 = vadd.f32 %v12166_v51, %v6492_v50 }
 0x533   : > { %v12089_v57 = vpop.f32.mrf.mxu0  ;;  %v12172_v43 = vpop.f32.mrf.mxu1  ;;  %12568 = vmatmul.mubr.f32.gmra.mxu0 %v15928_v44 }
 0x534   : > { %v6494_v63 = vadd.f32 %v12089_v57, %v15934_v11  ;;  %12570 = vmatprep.mubr.f32.mxu0 %v15932_v4  ;;  %v16089_v34 = vadd.f32 %v6682_v27, %v6491_v3  ;;  %v17418_v3 = vld [vmem:[#allocation15_spill] sm:$0xff]  ;;  %v17419_v57 = vld [vmem:[#allocation36_spill] sm:$0xff] }
 0x535   : > { %v6382_v61 = vpop.f32.mrf.mxu0  ;;  %v6702_v55 = vpop.f32.mrf.mxu1 }
 0x536   : > { %v6493_v32 = vadd.f32 %v6382_v61, %v15938_v42  ;;  %v16092_v47 = vadd.f32 %v12169_v58, %v6494_v63  ;;  %v17417_v58 = vld [vmem:[#allocation65_spill] sm:$0xff]  ;;  %v17420_v63 = vld [vmem:[#allocation68_spill] sm:$0xff] }
 0x537   : > { %v12092_v10 = vpop.f32.mrf.mxu0  ;;  %v12175_v2 = vpop.f32.mrf.mxu1  ;;  %12571 = vmatmul.mubr.f32.gmra.mxu0 %v15940_v24 }
 0x538   : > { %v6496_v53 = vadd.f32 %v12092_v10, %v15946_v17  ;;  %12573 = vmatprep.mubr.f32.mxu0 %v15944_v41  ;;  %v16097_v44 = vadd.f32 %v6692_v8, %v6493_v32 }
 0x539   : > { %v6392_v11 = vpop.f32.mrf.mxu0  ;;  %v6712_v4 = vpop.f32.mrf.mxu1 }
 0x53a   : > { %v6495_v39 = vadd.f32 %v6392_v11, %v15950_v49  ;;  %v16100_v31 = vadd.f32 %v12172_v43, %v6496_v53 }
 0x53b   : > { %v12095_v26 = vpop.f32.mrf.mxu0  ;;  %v12178_v42 = vpop.f32.mrf.mxu1  ;;  %12574 = vmatmul.mubr.f32.gmra.mxu0 %v15952_v28 }
 0x53c   : > { %v6498_v12 = vadd.f32 %v12095_v26, %v15958_v21  ;;  %12576 = vmatprep.mubr.f32.mxu0 %v15956_v22  ;;  %v16105_v24 = vadd.f32 %v6702_v55, %v6495_v39  ;;  %v17422_v39 = vld [vmem:[#allocation64_spill] sm:$0xff] }
 0x53d   : > { %v6402_v17 = vpop.f32.mrf.mxu0  ;;  %v6722_v41 = vpop.f32.mrf.mxu1 }
 0x53e   : > { %v6497_v30 = vadd.f32 %v6402_v17, %v15962_v0  ;;  %v16108_v13 = vadd.f32 %v12175_v2, %v6498_v12  ;;  %v17421_v2 = vld [vmem:[#allocation45_spill] sm:$0xff] }
 0x53f   : > { %v12098_v51 = vpop.f32.mrf.mxu0  ;;  %v12181_v49 = vpop.f32.mrf.mxu1  ;;  %12577 = vmatmul.mubr.f32.gmra.mxu0 %v15964_v37 }
 0x540   : > { %v6500_v14 = vadd.f32 %v12098_v51, %v15970_v29  ;;  %12579 = vmatprep.mubr.f32.mxu0 %v15968_v52  ;;  %v16113_v28 = vadd.f32 %v6712_v4, %v6497_v30  ;;  %v17424_v51 = vld [vmem:[#allocation70_spill] sm:$0xff] }
 0x541   : > { %v6412_v21 = vpop.f32.mrf.mxu0  ;;  %v6732_v22 = vpop.f32.mrf.mxu1 }
 0x542   : > { %v6499_v18 = vadd.f32 %v6412_v21, %v15974_v5  ;;  %v16116_v27 = vadd.f32 %v12178_v42, %v6500_v14  ;;  %v7405_v14 = vld [vmem:[#allocation2 + $0x19a] sm:$0xff]  ;;  %v17425_v21 = vld [vmem:[#allocation83_spill] sm:$0xff] }
 0x543   : > { %v12101_v25 = vpop.f32.mrf.mxu0  ;;  %v12184_v0 = vpop.f32.mrf.mxu1  ;;  %12580 = vmatmul.mubr.f32.gmra.mxu0 %v15976_v6 }
 0x544   : > { %v6502_v23 = vadd.f32 %v12101_v25, %v15982_v54  ;;  %12582 = vmatprep.mubr.f32.mxu0 %v15980_v62  ;;  %v16121_v37 = vadd.f32 %v6722_v41, %v6499_v18  ;;  %v17423_v41 = vld [vmem:[#allocation37_spill] sm:$0xff] }
 0x545   : > { %v6422_v29 = vpop.f32.mrf.mxu0  ;;  %v6742_v52 = vpop.f32.mrf.mxu1 }
 0x546   : > { %v6501_v50 = vadd.f32 %v6422_v29, %v17417_v58  ;;  %v16124_v40 = vadd.f32 %v12181_v49, %v6502_v23  ;;  %v17426_v23 = vld [vmem:[#allocation46_spill] sm:$0xff]  ;;  %v17427_v29 = vld [vmem:[#allocation32_spill] sm:$0xff] }
 0x547   : > { %v12104_v8 = vpop.f32.mrf.mxu0  ;;  %v12187_v5 = vpop.f32.mrf.mxu1  ;;  %12583 = vmatmul.mubr.f32.gmra.mxu0 %v17418_v3 }
 0x548   : > { %v6504_v43 = vadd.f32 %v12104_v8, %v17419_v57  ;;  %12585 = vmatprep.mubr.f32.mxu0 %v15992_v38  ;;  %v16129_v6 = vadd.f32 %v6732_v22, %v6501_v50 }
 0x549   : > { %v6432_v54 = vpop.f32.mrf.mxu0  ;;  %v6752_v62 = vpop.f32.mrf.mxu1 }
 0x54a   : > { %v6503_v61 = vadd.f32 %v6432_v54, %v17420_v63  ;;  %v16132_v55 = vadd.f32 %v12184_v0, %v6504_v43  ;;  %v17428_v54 = vld [vmem:[#allocation62_spill] sm:$0xff] }
 0x54b   : > { %v12107_v32 = vpop.f32.mrf.mxu0  ;;  %v12190_v10 = vpop.f32.mrf.mxu1  ;;  %12586 = vmatmul.mubr.f32.gmra.mxu0 %v16000_v36 }
 0x54c   : > { %v6506_v53 = vadd.f32 %v12107_v32, %v17421_v2  ;;  %12588 = vmatprep.mubr.f32.mxu0 %v16004_v46  ;;  %v16137_v11 = vadd.f32 %v6742_v52, %v6503_v61 }
 0x54d   : > { %v6442_v4 = vpop.f32.mrf.mxu0  ;;  %v6762_v38 = vpop.f32.mrf.mxu1 }
 0x54e   : > { %v6505_v26 = vadd.f32 %v6442_v4, %v17422_v39  ;;  %v16140_v42 = vadd.f32 %v12187_v5, %v6506_v53 }
 0x54f   : > { %v12110_v12 = vpop.f32.mrf.mxu0  ;;  %v12193_v17 = vpop.f32.mrf.mxu1  ;;  %12589 = vmatmul.mubr.f32.gmra.mxu0 %v16012_v9  ;;  %v7406_v9 = vld [vmem:[#allocation2 + $0x1a2] sm:$0xff] }
 0x550   : > { %v6508_v30 = vadd.f32 %v12110_v12, %v17423_v41  ;;  %12591 = vmatprep.mubr.f32.mxu0 %v17424_v51  ;;  %v16145_v36 = vadd.f32 %v6752_v62, %v6505_v26 }
 0x551   : > { %v6452_v49 = vpop.f32.mrf.mxu0  ;;  %v6772_v46 = vpop.f32.mrf.mxu1 }
 0x552   : > { %v6507_v22 = vadd.f32 %v6452_v49, %v17425_v21  ;;  %v16148_v18 = vadd.f32 %v12190_v10, %v6508_v30 }
 0x553   : > { %v12113_v25 = vpop.f32.mrf.mxu0  ;;  %v12196_v0 = vpop.f32.mrf.mxu1  ;;  %12592 = vmatmul.mubr.f32.gmra.mxu0 %v17426_v23 }
 0x554   : > { %v6510_v52 = vadd.f32 %v12113_v25, %v17427_v29  ;;  %12594 = vmatprep.mubr.f32.mxu0 %v7405_v14  ;;  %v16152_v58 = vadd.f32 %v6762_v38, %v6507_v22 }
 0x555   : > { %v6462_v50 = vpop.f32.mrf.mxu0  ;;  %v6782_v8 = vpop.f32.mrf.mxu1 }
 0x556   : > { %v6509_v5 = vadd.f32 %v6462_v50, %v16031_v35  ;;  %v16155_v3 = vadd.f32 %v12193_v17, %v6510_v52 }
 0x557   : > { %v12116_v57 = vpop.f32.mrf.mxu0  ;;  %v12311_v43 = vpop.f32.mrf.mxu1  ;;  %12595 = vmatmul.mubr.f32.gmra.mxu0 %v7406_v9 }
 0x558   : > { %v6512_v62 = vadd.f32 %v12116_v57, %v17428_v54  ;;  %v16158_v63 = vadd.f32 %v6772_v46, %v6509_v5 }
 0x559   : > { %v6472_v61 = vpop.f32.mrf.mxu0  ;;  %v7180_v32 = vpop.f32.mrf.mxu1 }
 0x55a   : > { %v6511_v10 = vadd.f32 %v6472_v61, %v16039_v19  ;;  %v16161_v2 = vadd.f32 %v12196_v0, %v6512_v62 }
 0x55b   : > { %v12231_v53 = vpop.f32.mrf.mxu0  ;;  %v12314_v4 = vpop.f32.mrf.mxu1 }
 0x55c   : > { %v7066_v38 = vadd.f32 %v12231_v53, %v16044_v48  ;;  %v16164_v35 = vadd.f32 %v6782_v8, %v6511_v10 }
 0x55d   : > { %v6906_v39 = vpop.f32.mrf.mxu0  ;;  %v7190_v26 = vpop.f32.mrf.mxu1 }
 0x55e   : > { %v7065_v12 = vadd.f32 %v6906_v39, %v16049_v33  ;;  %v16167_v17 = vadd.f32 %v12311_v43, %v7066_v38 }
 0x55f   : > { %v12234_v41 = vpop.f32.mrf.mxu0  ;;  %v12317_v30 = vpop.f32.mrf.mxu1 }
 0x560   : > { %v7068_v51 = vadd.f32 %v12234_v41, %v16052_v20  ;;  %v16170_v49 = vadd.f32 %v7180_v32, %v7065_v12 }
 0x561   : > { %v6916_v19 = vpop.f32.mrf.mxu0  ;;  %v7200_v46 = vpop.f32.mrf.mxu1 }
 0x562   : > { %v7067_v14 = vadd.f32 %v6916_v19, %v16057_v15  ;;  %v16173_v21 = vadd.f32 %v12314_v4, %v7068_v51 }
 0x563   : > { %v12237_v48 = vpop.f32.mrf.mxu0  ;;  %v12320_v22 = vpop.f32.mrf.mxu1 }
 0x564   : > { %v7070_v25 = vadd.f32 %v12237_v48, %v16060_v59  ;;  %v16176_v0 = vadd.f32 %v7190_v26, %v7067_v14 }
 0x565   : > { %v6926_v33 = vpop.f32.mrf.mxu0  ;;  %v7210_v23 = vpop.f32.mrf.mxu1 }
 0x566   : > { %v7069_v29 = vadd.f32 %v6926_v33, %v16065_v1  ;;  %v16179_v52 = vadd.f32 %v12317_v30, %v7070_v25 }
 0x567   : > { %v12240_v20 = vpop.f32.mrf.mxu0  ;;  %v12323_v9 = vpop.f32.mrf.mxu1 }
 0x568   : > { %v7072_v50 = vadd.f32 %v12240_v20, %v16068_v7  ;;  %v16182_v8 = vadd.f32 %v7200_v46, %v7069_v29 }
 0x569   : > { %v6936_v15 = vpop.f32.mrf.mxu0  ;;  %v7220_v5 = vpop.f32.mrf.mxu1 }
 0x56a   : > { %v7071_v57 = vadd.f32 %v6936_v15, %v16073_v16  ;;  %v16185_v43 = vadd.f32 %v12320_v22, %v7072_v50 }
 0x56b   : > { %v12243_v59 = vpop.f32.mrf.mxu0  ;;  %v12326_v54 = vpop.f32.mrf.mxu1 }
 0x56c   : > { %v7074_v62 = vadd.f32 %v12243_v59, %v16076_v45  ;;  %v16188_v61 = vadd.f32 %v7210_v23, %v7071_v57 }
 0x56d   : > { %v6946_v1 = vpop.f32.mrf.mxu0  ;;  %v7230_v32 = vpop.f32.mrf.mxu1 }
 0x56e   : > { %v7073_v10 = vadd.f32 %v6946_v1, %v16081_v56  ;;  %v16191_v53 = vadd.f32 %v12323_v9, %v7074_v62 }
 0x56f   : > { %v12246_v7 = vpop.f32.mrf.mxu0  ;;  %v12329_v4 = vpop.f32.mrf.mxu1 }
 0x570   : > { %v7076_v38 = vadd.f32 %v12246_v7, %v16084_v60  ;;  %v16194_v39 = vadd.f32 %v7220_v5, %v7073_v10 }
 0x571   : > { %v6956_v16 = vpop.f32.mrf.mxu0  ;;  %v7240_v26 = vpop.f32.mrf.mxu1 }
 0x572   : > { %v7075_v12 = vadd.f32 %v6956_v16, %v16089_v34  ;;  %v16197_v41 = vadd.f32 %v12326_v54, %v7076_v38 }
 0x573   : > { %v12249_v45 = vpop.f32.mrf.mxu0  ;;  %v16199_v30 = vpop.f32.mrf.mxu1 }
 0x574   : > { %v7078_v51 = vadd.f32 %v12249_v45, %v16092_v47  ;;  %v16202_v56 = vadd.f32 %v7230_v32, %v7075_v12 }
 0x575   : > { %v6966_v19 = vpop.f32.mrf.mxu0  ;;  %v16204_v46 = vpop.f32.mrf.mxu1 }
 0x576   : > { %v7077_v60 = vadd.f32 %v6966_v19, %v16097_v44  ;;  %v16207_v14 = vadd.f32 %v12329_v4, %v7078_v51 }
 0x577   : > { %v12252_v48 = vpop.f32.mrf.mxu0  ;;  %v12335_v22 = vpop.f32.mrf.mxu1 }
 0x578   : > { %v16210_v34 = vadd.f32 %v12252_v48, %v16100_v31  ;;  %v16212_v25 = vadd.f32 %v7240_v26, %v7077_v60 }
 0x579   : > { %v6976_v33 = vpop.f32.mrf.mxu0  ;;  %v7260_v23 = vpop.f32.mrf.mxu1 }
 0x57a   : > { %v16215_v47 = vadd.f32 %v6976_v33, %v16105_v24 }
 0x57b   : > { %v12255_v29 = vpop.f32.mrf.mxu0  ;;  %v12338_v20 = vpop.f32.mrf.mxu1 }
 0x57c   : > { %v7082_v9 = vadd.f32 %v12255_v29, %v16108_v13 }
 0x57d   : > { %v6986_v50 = vpop.f32.mrf.mxu0  ;;  %v7270_v44 = vpop.f32.mrf.mxu1 }
 0x57e   : > { %v7081_v15 = vadd.f32 %v6986_v50, %v16113_v28  ;;  %v16219_v5 = vadd.f32 %v12335_v22, %v7082_v9 }
 0x57f   : > { %v12258_v57 = vpop.f32.mrf.mxu0  ;;  %v12341_v31 = vpop.f32.mrf.mxu1 }
 0x580   : > { %v7084_v59 = vadd.f32 %v12258_v57, %v16116_v27  ;;  %v16222_v54 = vadd.f32 %v7260_v23, %v7081_v15 }
 0x581   : > { %v6996_v62 = vpop.f32.mrf.mxu0  ;;  %v7280_v1 = vpop.f32.mrf.mxu1 }
 0x582   : > { %v7083_v24 = vadd.f32 %v6996_v62, %v16121_v37  ;;  %v16225_v32 = vadd.f32 %v12338_v20, %v7084_v59 }
 0x583   : > { %v12261_v10 = vpop.f32.mrf.mxu0  ;;  %v12344_v13 = vpop.f32.mrf.mxu1 }
 0x584   : > { %v7086_v7 = vadd.f32 %v12261_v10, %v16124_v40  ;;  %v16228_v4 = vadd.f32 %v7270_v44, %v7083_v24 }
 0x585   : > { %v7006_v28 = vpop.f32.mrf.mxu0  ;;  %v7290_v38 = vpop.f32.mrf.mxu1 }
 0x586   : > { %v7085_v16 = vadd.f32 %v7006_v28, %v16129_v6  ;;  %v16231_v26 = vadd.f32 %v12341_v31, %v7086_v7 }
 0x587   : > { %v12264_v27 = vpop.f32.mrf.mxu0  ;;  %v12347_v12 = vpop.f32.mrf.mxu1 }
 0x588   : > { %v7088_v45 = vadd.f32 %v12264_v27, %v16132_v55  ;;  %v16234_v51 = vadd.f32 %v7280_v1, %v7085_v16 }
 0x589   : > { %v7016_v37 = vpop.f32.mrf.mxu0  ;;  %v7300_v19 = vpop.f32.mrf.mxu1 }
 0x58a   : > { %v7087_v60 = vadd.f32 %v7016_v37, %v16137_v11  ;;  %v16237_v48 = vadd.f32 %v12344_v13, %v7088_v45 }
 0x58b   : > { %v12267_v40 = vpop.f32.mrf.mxu0  ;;  %v12350_v22 = vpop.f32.mrf.mxu1 }
 0x58c   : > { %v7090_v33 = vadd.f32 %v12267_v40, %v16140_v42  ;;  %v16240_v23 = vadd.f32 %v7290_v38, %v7087_v60 }
 0x58d   : > { %v7026_v6 = vpop.f32.mrf.mxu0  ;;  %v7310_v29 = vpop.f32.mrf.mxu1 }
 0x58e   : > { %v7089_v20 = vadd.f32 %v7026_v6, %v16145_v36  ;;  %v16243_v9 = vadd.f32 %v12347_v12, %v7090_v33 }
 0x58f   : > { %v12270_v55 = vpop.f32.mrf.mxu0  ;;  %v12353_v50 = vpop.f32.mrf.mxu1 }
 0x590   : > { %v7092_v44 = vadd.f32 %v12270_v55, %v16148_v18  ;;  %v16246_v15 = vadd.f32 %v7300_v19, %v7089_v20 }
 0x591   : > { %v7036_v11 = vpop.f32.mrf.mxu0  ;;  %v7320_v57 = vpop.f32.mrf.mxu1 }
 0x592   : > { %v7091_v31 = vadd.f32 %v7036_v11, %v16152_v58  ;;  %v16249_v59 = vadd.f32 %v12350_v22, %v7092_v44 }
 0x593   : > { %v12273_v42 = vpop.f32.mrf.mxu0  ;;  %v16251_v62 = vpop.f32.mrf.mxu1 }
 0x594   : > { %v7094_v1 = vadd.f32 %v12273_v42, %v16155_v3  ;;  %v16254_v36 = vadd.f32 %v7310_v29, %v7091_v31 }
 0x595   : > { %v7046_v24 = vpop.f32.mrf.mxu0  ;;  %v7330_v10 = vpop.f32.mrf.mxu1 }
 0x596   : > { %v7093_v13 = vadd.f32 %v7046_v24, %v16158_v63  ;;  %v16257_v18 = vadd.f32 %v12353_v50, %v7094_v1 }
 0x597   : > { %v12276_v7 = vpop.f32.mrf.mxu0  ;;  %v16259_v28 = vpop.f32.mrf.mxu1 }
 0x598   : > { %v16262_v58 = vadd.f32 %v12276_v7, %v16161_v2  ;;  %v16264_v38 = vadd.f32 %v7320_v57, %v7093_v13 }
 0x599   : > { %v7056_v16 = vpop.f32.mrf.mxu0  ;;  %v16266_v27 = vpop.f32.mrf.mxu1 }
 0x59a   : > { %v7095_v3 = vadd.f32 %v7056_v16, %v16164_v35 }
 0x59b   : > { %v12391_v12 = vpop.f32.mrf.mxu0  ;;  %v16269_v45 = vpop.f32.mrf.mxu1 }
 0x59c   : > { %v16272_v63 = vadd.f32 %v12391_v12, %v16167_v17  ;;  %v16274_v37 = vadd.f32 %v7330_v10, %v7095_v3 }
 0x59d   : > { %v7490_v19 = vpop.f32.mrf.mxu0  ;;  %v16276_v60 = vpop.f32.mrf.mxu1 }
 0x59e   : > { %v16279_v2 = vadd.f32 %v7490_v19, %v16170_v49 }
 0x59f   : > { %v12394_v40 = vpop.f32.mrf.mxu0  ;;  %v16281_v22 = vpop.f32.mrf.mxu1 }
 0x5a0   : > { %v16284_v33 = vadd.f32 %v12394_v40, %v16173_v21 }
 0x5a1   : > { %v7500_v35 = vpop.f32.mrf.mxu0  ;;  %v16286_v6 = vpop.f32.mrf.mxu1 }
 0x5a2   : > { %v16289_v17 = vadd.f32 %v7500_v35, %v16176_v0 }
 0x5a3   : > { %v12397_v29 = vpop.f32.mrf.mxu0  ;;  %v16291_v20 = vpop.f32.mrf.mxu1 }
 0x5a4   : > { %v16294_v55 = vadd.f32 %v12397_v29, %v16179_v52 }
 0x5a5   : > { %v7510_v49 = vpop.f32.mrf.mxu0  ;;  %v16296_v50 = vpop.f32.mrf.mxu1 }
 0x5a6   : > { %v16299_v44 = vadd.f32 %v7510_v49, %v16182_v8 }
 0x5a7   : > { %v12400_v21 = vpop.f32.mrf.mxu0  ;;  %v16301_v11 = vpop.f32.mrf.mxu1 }
 0x5a8   : > { %v16304_v57 = vadd.f32 %v12400_v21, %v16185_v43 }
 0x5a9   : > { %v7520_v0 = vpop.f32.mrf.mxu0  ;;  %v16309_v42 = vpop.f32.mrf.mxu1 }
 0x5aa   : > { %v16307_v31 = vadd.f32 %v7520_v0, %v16188_v61 }
 0x5ab   : > { %v12403_v52 = vpop.f32.mrf.mxu0  ;;  %v16314_v10 = vpop.f32.mrf.mxu1 }
 0x5ac   : > { %v16312_v1 = vadd.f32 %v12403_v52, %v16191_v53 }
 0x5ad   : > { %v7530_v24 = vpop.f32.mrf.mxu0  ;;  %v16322_v16 = vpop.f32.mrf.mxu1 }
 0x5ae   : > { %v16317_v8 = vadd.f32 %v7530_v24, %v16194_v39 }
 0x5af   : > { %v12406_v13 = vpop.f32.mrf.mxu0  ;;  %v16330_v19 = vpop.f32.mrf.mxu1 }
 0x5b0   : > { %v16320_v43 = vadd.f32 %v12406_v13, %v16197_v41 }
 0x5b1   : > { %v7540_v7 = vpop.f32.mrf.mxu0  ;;  %v16339_v35 = vpop.f32.mrf.mxu1 }
 0x5b2   : > { %v16325_v61 = vadd.f32 %v7540_v7, %v16202_v56 }
 0x5b3   : > { %v12409_v3 = vpop.f32.mrf.mxu0  ;;  %v16344_v21 = vpop.f32.mrf.mxu1 }
 0x5b4   : > { %v16328_v53 = vadd.f32 %v12409_v3, %v16207_v14 }
 0x5b5   : > { %v7550_v12 = vpop.f32.mrf.mxu0  ;;  %v16352_v24 = vpop.f32.mrf.mxu1 }
 0x5b6   : > { %v16333_v39 = vadd.f32 %v7550_v12, %v16212_v25 }
 0x5b7   : > { %v16335_v40 = vpop.f32.mrf.mxu0  ;;  %v16360_v12 = vpop.f32.mrf.mxu1 }
 0x5b9   : > { %v16337_v41 = vpop.f32.mrf.mxu0 }
 0x5bb   : > { %v12415_v29 = vpop.f32.mrf.mxu0 }
 0x5bc   : > { %v16342_v56 = vadd.f32 %v12415_v29, %v16219_v5 }
 0x5bd   : > { %v7570_v49 = vpop.f32.mrf.mxu0 }
 0x5be   : > { %v16347_v14 = vadd.f32 %v7570_v49, %v16222_v54 }
 0x5bf   : > { %v12418_v0 = vpop.f32.mrf.mxu0 }
 0x5c0   : > { %v16350_v25 = vadd.f32 %v12418_v0, %v16225_v32  ;;  %v16368_v0 = vpop.f32.mrf.mxu1 }
 0x5c1   : > { %v7580_v52 = vpop.f32.mrf.mxu0 }
 0x5c2   : > { %v16355_v13 = vadd.f32 %v7580_v52, %v16228_v4 }
 0x5c3   : > { %v12421_v7 = vpop.f32.mrf.mxu0 }
 0x5c4   : > { %v16358_v5 = vadd.f32 %v12421_v7, %v16231_v26 }
 0x5c5   : > { %v7590_v3 = vpop.f32.mrf.mxu0 }
 0x5c6   : > { %17429 = vst [vmem:[#allocation69_spill] sm:$0xff] %v16358_v5  ;;  %v16363_v54 = vadd.f32 %v7590_v3, %v16234_v51  ;;  %v16376_v5 = vpop.f32.mrf.mxu1 }
 0x5c7   : > { %v12424_v29 = vpop.f32.mrf.mxu0 }
 0x5c8   : > { %17430 = vst [vmem:[#allocation23_spill] sm:$0xff] %v16363_v54  ;;  %v16366_v32 = vadd.f32 %v12424_v29, %v16237_v48 }
 0x5c9   : > { %v7600_v49 = vpop.f32.mrf.mxu0 }
 0x5ca   : > { %17431 = vst [vmem:[#allocation40_spill] sm:$0xff] %v16366_v32  ;;  %v16371_v4 = vadd.f32 %v7600_v49, %v16240_v23  ;;  %v16384_v32 = vpop.f32.mrf.mxu1 }
 0x5cb   : > { %v12427_v52 = vpop.f32.mrf.mxu0 }
 0x5cc   : > { %17432 = vst [vmem:[#allocation72_spill] sm:$0xff] %v16371_v4  ;;  %v16374_v26 = vadd.f32 %v12427_v52, %v16243_v9 }
 0x5cd   : > { %v7610_v7 = vpop.f32.mrf.mxu0 }
 0x5ce   : > { %17433 = vst [vmem:[#allocation26_spill] sm:$0xff] %v16374_v26  ;;  %v16379_v51 = vadd.f32 %v7610_v7, %v16246_v15  ;;  %v16392_v26 = vpop.f32.mrf.mxu1 }
 0x5cf   : > { %v12430_v3 = vpop.f32.mrf.mxu0  ;;  %17438 = vst [vmem:[#allocation44_spill] sm:$0xff] %v16392_v26 }
 0x5d0   : > { %17434 = vst [vmem:[#allocation79_spill] sm:$0xff] %v16379_v51  ;;  %v16382_v48 = vadd.f32 %v12430_v3, %v16249_v59  ;;  %v12899_v3 = vmov 1983009808   ;;  %v8305_v51 = vlaneseq  ;;  %v16399_v4 = vpop.f32.mrf.mxu1 }
 0x5d1   : > { %v7620_v29 = vpop.f32.mrf.mxu0 }
 0x5d2   : > { %17435 = vst [vmem:[#allocation30_spill] sm:$0xff] %v16382_v48  ;;  %v16387_v23 = vadd.f32 %v7620_v29, %v16254_v36  ;;  %v8303_v48 = vunpack.c.l.s4 %v12899_v3  ;;  %v12900_v29 = vmov 1934713408   ;;  %v8306_v54 = vshrl.u32 %v8305_v51, 7  ;;  %v16404_v26 = vpop.f32.mrf.mxu1 }
 0x5d3   : > { %v12433_v49 = vpop.f32.mrf.mxu0  ;;  %v7923_v3 = vadd.f32 %v16266_v27, %v16279_v2  ;;  %v7354_v51 = vadd.f32 %v16199_v30, %v16210_v34  ;;  %v7928_v27 = vadd.f32 %v16281_v22, %v16294_v55  ;;  %v7925_v30 = vadd.f32 %v16276_v60, %v16289_v17 }
 0x5d4   : > { %17436 = vst [vmem:[#allocation47_spill] sm:$0xff] %v16387_v23  ;;  %v16390_v9 = vadd.f32 %v12433_v49, %v16257_v18  ;;  %v8367_v18 = vunpack.c.l.s4 %v12900_v29  ;;  %v8304_v23 = vunpack.c.0.s8 %v8303_v48  ;;  %v7930_v22 = vadd.f32 %v16291_v20, %v16304_v57 }
 0x5d5   : > { %v7630_v52 = vpop.f32.mrf.mxu0  ;;  %v7932_v60 = vadd.f32 %v16301_v11, %v16312_v1  ;;  %v7934_v20 = vadd.f32 %v16314_v10, %v16320_v43  ;;  %v7936_v11 = vadd.f32 %v16330_v19, %v16328_v53  ;;  %v7935_v10 = vadd.f32 %v16339_v35, %v16333_v39 }
 0x5d6   : > { %17437 = vst [vmem:[#allocation21_spill] sm:$0xff] %v16390_v9  ;;  %v16395_v15 = vadd.f32 %v7630_v52, %v16264_v38  ;;  %v7924_v38 = vadd.f32 %v16259_v28, %v16272_v63  ;;  %v8368_v52 = vunpack.c.0.s8 %v8367_v18  ;;  %v16415_v48 = vsub.s32 %v8304_v23, %v8306_v54  ;;  %v16421_v63 = vpop.f32.mrf.mxu1 }
 0x5d7   : > { %v16397_v7 = vpop.f32.mrf.mxu0  ;;  %v7353_v28 = vadd.f32 %v16204_v46, %v16215_v47  ;;  %v16429_v18 = vadd.f32 %v16251_v62, %v16262_v58  ;;  %v7926_v23 = vadd.f32 %v16269_v45, %v16284_v33  ;;  %v7927_v46 = vadd.f32 %v16286_v6, %v16299_v44 }
 0x5d8   : > { %17439 = vst [vmem:[#allocation81_spill] sm:$0xff] %v16395_v15  ;;  %17440 = vst [vmem:[#allocation101_spill] sm:$0xff] %v16397_v7  ;;  %v16425_v2 = vsub.s32 %v8368_v52, %v8306_v54  ;;  %v7929_v62 = vadd.f32 %v16296_v50, %v16307_v31  ;;  %v7664_v58 = vadd.f32 %v16335_v40, %v7354_v51  ;;  %v12507_v17 = vpop.f32.mrf.mxu1 }
 0x5d9   : > { %v7640_v59 = vpop.f32.mrf.mxu0  ;;  %v7931_v54 = vadd.f32 %v16309_v42, %v16317_v8  ;;  %v7663_v50 = vadd.f32 %v16337_v41, %v7353_v28  ;;  %v7933_v40 = vadd.f32 %v16322_v16, %v16325_v61  ;;  %v16470_v51 = vadd.f32 %v16360_v12, %v16342_v56 }
 0x5da   : > { %v16402_v36 = vadd.f32 %v7640_v59, %v16274_v37  ;;  %v16413_v37 = vld [vmem:[%s16924_s6] ss:$0 sm:$0xff]  ;;  %v16461_v43 = vadd.f32 %v16344_v21, %v7664_v58  ;;  %v7884_v41 = vpop.f32.mrf.mxu1  ;;  %v16474_v21 = vadd.f32 %v16368_v0, %v16347_v14  ;;  %v16478_v28 = vadd.f32 %v16376_v5, %v16350_v25  ;;  %v17443_v14 = vld [vmem:[#allocation23_spill] sm:$0xff]  ;;  %v17444_v25 = vld [vmem:[#allocation40_spill] sm:$0xff] }
 0x5db   : > { %v12551_v49 = vpop.f32.mrf.mxu0  ;;  %v16491_v0 = vadd.f32 %v16399_v4, %v17443_v14  ;;  %v16495_v5 = vadd.f32 %v16404_v26, %v17444_v25  ;;  %v17449_v14 = vld [vmem:[#allocation47_spill] sm:$0xff] }
 0x5dc   : > { %v8198_v7 = vadd.f32 %v12551_v49, %v7924_v38  ;;  %v12510_v56 = vpop.f32.mrf.mxu1 }
 0x5dd   : > { %v8038_v9 = vpop.f32.mrf.mxu0 }
 0x5de   : > { %v8197_v59 = vadd.f32 %v8038_v9, %v7923_v3  ;;  %v8237_v47 = vadd.f32 %v16413_v37, %v8198_v7 }
 0x5df   : > { %v12554_v15 = vpop.f32.mrf.mxu0 }
 0x5e0   : > { %v8236_v45 = vadd.f32 %v16413_v37, %v8197_v59  ;;  %v8200_v33 = vadd.f32 %v12554_v15, %v7926_v23  ;;  %v8269_v1 = vmax.f32 %v8237_v47, 0.0  ;;  %v17442_v47 = vld [vmem:[#allocation44_spill] sm:$0xff] }
 0x5e1   : > { %v8048_v29 = vpop.f32.mrf.mxu0 }
 0x5e2   : > { %v8199_v57 = vadd.f32 %v8048_v29, %v7925_v30  ;;  %v8268_v38 = vmax.f32 %v8236_v45, 0.0  ;;  %v8239_v42 = vadd.f32 %v16413_v37, %v8200_v33  ;;  %v16466_v29 = vadd.f32 %v16352_v24, %v7663_v50 }
 0x5e3   : > { %v12557_v34 = vpop.f32.mrf.mxu0 }
 0x5e4   : > { %v8202_v9 = vadd.f32 %v12557_v34, %v7928_v27  ;;  %v8238_v19 = vadd.f32 %v16413_v37, %v8199_v57  ;;  %v8271_v27 = vmax.f32 %v8239_v42, 0.0  ;;  %v16483_v34 = vadd.f32 %v16384_v32, %v16355_v13 }
 0x5e5   : > { %v8058_v55 = vpop.f32.mrf.mxu0 }
 0x5e6   : > { %v8241_v6 = vadd.f32 %v16413_v37, %v8202_v9  ;;  %v8201_v44 = vadd.f32 %v8058_v55, %v7927_v46  ;;  %v17441_v46 = vld [vmem:[#allocation69_spill] sm:$0xff]  ;;  %v17445_v55 = vld [vmem:[#allocation72_spill] sm:$0xff] }
 0x5e7   : > { %v12560_v31 = vpop.f32.mrf.mxu0  ;;  %v16487_v9 = vadd.f32 %v17442_v47, %v17441_v46 }
 0x5e8   : > { %v8273_v15 = vmax.f32 %v8241_v6, 0.0  ;;  %v8240_v7 = vadd.f32 %v16413_v37, %v8201_v44  ;;  %v8204_v49 = vadd.f32 %v12560_v31, %v7930_v22  ;;  %v8270_v22 = vmax.f32 %v8238_v19, 0.0  ;;  %v17446_v6 = vld [vmem:[#allocation26_spill] sm:$0xff] }
 0x5e9   : > { %v8068_v8 = vpop.f32.mrf.mxu0  ;;  %v16503_v44 = vadd.f32 %v12507_v17, %v17446_v6 }
 0x5ea   : > { %v8572_v16 = vcombine.low %v8269_v1, %v8273_v15  ;;  %v8573_v61 = vcombine.high %v8269_v1, %v8273_v15  ;;  %v8272_v52 = vmax.f32 %v8240_v7, 0.0  ;;  %v8243_v53 = vadd.f32 %v16413_v37, %v8204_v49  ;;  %v7894_v1 = vpop.f32.mrf.mxu1 }
 0x5eb   : > { %v8203_v3 = vadd.f32 %v8068_v8, %v7929_v62  ;;  %v12563_v59 = vpop.f32.mrf.mxu0  ;;  %v16535_v25 = vadd.f32 %v7894_v1, %v17449_v14 }
 0x5ec   : > { %v8300_v39 = vcombine.low %v8268_v38, %v8272_v52  ;;  %v8301_v35 = vcombine.high %v8268_v38, %v8272_v52  ;;  %v8275_v23 = vmax.f32 %v8243_v53, 0.0  ;;  %v8206_v12 = vadd.f32 %v12563_v59, %v7932_v60  ;;  %v17447_v59 = vld [vmem:[#allocation79_spill] sm:$0xff] }
 0x5ed   : > { %v8242_v30 = vadd.f32 %v16413_v37, %v8203_v3  ;;  %v8078_v24 = vpop.f32.mrf.mxu0  ;;  %v8580_v32 = vrot.slane %v8572_v16, %v16415_v48  ;;  %v16500_v60 = vadd.f32 %v16421_v63, %v17445_v55  ;;  %v16510_v15 = vrot.slane %v8573_v61, %v16415_v48 }
 0x5ee   : > { %v8588_v62 = vcombine.low %v8271_v27, %v8275_v23  ;;  %v8589_v58 = vcombine.high %v8271_v27, %v8275_v23  ;;  %v8205_v33 = vadd.f32 %v8078_v24, %v7931_v54  ;;  %v8308_v54 = vrot.slane %v8300_v39, %v16415_v48  ;;  %v12513_v23 = vpop.f32.mrf.mxu1 }
 0x5ef   : > { %v8274_v45 = vmax.f32 %v8242_v30, 0.0  ;;  %v12566_v13 = vpop.f32.mrf.mxu0  ;;  %v8245_v63 = vadd.f32 %v16413_v37, %v8206_v12  ;;  %v16519_v16 = vrot.slane %v8301_v35, %v16415_v48  ;;  %v16525_v39 = vadd.f32 %v7884_v41, %v17447_v59  ;;  %v17448_v12 = vld [vmem:[#allocation30_spill] sm:$0xff] }
 0x5f0   : > { %v8596_v4 = vrot.slane %v8588_v62, %v16415_v48  ;;  %v16507_v26 = vrot.slane %v8589_v58, %v16415_v48  ;;  %v8208_v7 = vadd.f32 %v12566_v13, %v7934_v20  ;;  %v8244_v19 = vadd.f32 %v16413_v37, %v8205_v33  ;;  %v17450_v58 = vld [vmem:[#allocation101_spill] sm:$0xff] }
 0x5f1   : > { %v8316_v50 = vcombine.low %v8270_v22, %v8274_v45  ;;  %v8317_v57 = vcombine.high %v8270_v22, %v8274_v45  ;;  %v8088_v31 = vpop.f32.mrf.mxu0  ;;  %v16529_v35 = vadd.f32 %v12510_v56, %v17448_v12  ;;  %v16544_v45 = vadd.f32 %v17450_v58, %v16429_v18  ;;  %v17451_v33 = vld [vmem:[#allocation21_spill] sm:$0xff] }
 0x5f2   : > { %v8636_v42 = vcombine.low %v8580_v32, %v8596_v4  ;;  %v8637_v8 = vcombine.high %v8580_v32, %v8596_v4  ;;  %v8207_v52 = vadd.f32 %v8088_v31, %v7933_v40  ;;  %v8652_v61 = vcombine.low %v16510_v15, %v16507_v26  ;;  %v7904_v4 = vpop.f32.mrf.mxu1 }
 0x5f3   : > { %v8324_v17 = vrot.slane %v8316_v50, %v16415_v48  ;;  %v16516_v49 = vrot.slane %v8317_v57, %v16415_v48  ;;  %v12569_v38 = vpop.f32.mrf.mxu0  ;;  %v8247_v46 = vadd.f32 %v16413_v37, %v8208_v7  ;;  %v8276_v13 = vmax.f32 %v8244_v19, 0.0  ;;  %v17452_v7 = vld [vmem:[#allocation81_spill] sm:$0xff] }
 0x5f4   : > { %v8210_v53 = vadd.f32 %v12569_v38, %v7936_v11  ;;  %v8277_v11 = vmax.f32 %v8245_v63, 0.0  ;;  %v8246_v22 = vadd.f32 %v16413_v37, %v8207_v52  ;;  %v16547_v55 = vadd.f32 %v12513_v23, %v17451_v33 }
 0x5f5   : > { %v8098_v3 = vpop.f32.mrf.mxu0  ;;  %v8365_v20 = vcombine.high %v8308_v54, %v8324_v17  ;;  %v8364_v27 = vcombine.low %v8308_v54, %v8324_v17  ;;  %v8380_v40 = vcombine.low %v16519_v16, %v16516_v49  ;;  %v8381_v41 = vcombine.high %v16519_v16, %v16516_v49 }
 0x5f6   : > { %v8249_v30 = vadd.f32 %v16413_v37, %v8210_v53  ;;  %v8209_v24 = vadd.f32 %v8098_v3, %v7935_v10  ;;  %v8653_v6 = vcombine.high %v16510_v15, %v16507_v26  ;;  %v8279_v54 = vmax.f32 %v8247_v46, 0.0 }
 0x5f7   : > { %v12572_v47 = vpop.f32.mrf.mxu0  ;;  %v16554_v18 = vrot.slane %v8636_v42, %v16425_v2  ;;  %v16557_v17 = vadd.f32 %v7904_v4, %v17452_v7  ;;  %v8278_v38 = vmax.f32 %v8246_v22, 0.0  ;;  %v16560_v19 = vrot.slane %v8637_v8, %v16425_v2 }
 0x5f8   : > { %v8281_v62 = vmax.f32 %v8249_v30, 0.0  ;;  %v8248_v10 = vadd.f32 %v16413_v37, %v8209_v24  ;;  %v8212_v56 = vadd.f32 %v12572_v47, %v16461_v43  ;;  %v16569_v24 = vrot.slane %v8364_v27, %v16425_v2 }
 0x5f9   : > { %v8108_v32 = vpop.f32.mrf.mxu0  ;;  %v16572_v12 = vrot.slane %v8380_v40, %v16425_v2  ;;  %v16575_v8 = vrot.slane %v8652_v61, %v16425_v2 }
 0x5fa   : > { %v8604_v50 = vcombine.low %v8277_v11, %v8281_v62  ;;  %v8605_v57 = vcombine.high %v8277_v11, %v8281_v62  ;;  %v8280_v31 = vmax.f32 %v8248_v10, 0.0  ;;  %v8251_v1 = vadd.f32 %v16413_v37, %v8212_v56 }
 0x5fb   : > { %v8211_v43 = vadd.f32 %v8108_v32, %v16466_v29  ;;  %v12575_v63 = vpop.f32.mrf.mxu0  ;;  %v16565_v29 = vrot.slane %v8365_v20, %v16425_v2 }
 0x5fc   : > { %v8332_v52 = vcombine.low %v8276_v13, %v8280_v31  ;;  %v8333_v53 = vcombine.high %v8276_v13, %v8280_v31  ;;  %v8283_v3 = vmax.f32 %v8251_v1, 0.0  ;;  %v8214_v23 = vadd.f32 %v12575_v63, %v16470_v51 }
 0x5fd   : > { %v8250_v59 = vadd.f32 %v16413_v37, %v8211_v43  ;;  %v8118_v30 = vpop.f32.mrf.mxu0  ;;  %v8612_v20 = vrot.slane %v8604_v50, %v16415_v48  ;;  %v16580_v22 = vrot.slane %v8605_v57, %v16415_v48 }
 0x5fe   : > { %v8213_v42 = vadd.f32 %v8118_v30, %v16474_v21  ;;  %v8620_v11 = vcombine.low %v8279_v54, %v8283_v3  ;;  %v8621_v46 = vcombine.high %v8279_v54, %v8283_v3  ;;  %v8253_v51 = vadd.f32 %v16413_v37, %v8214_v23 }
 0x5ff   : > { %v8282_v47 = vmax.f32 %v8250_v59, 0.0  ;;  %v12578_v14 = vpop.f32.mrf.mxu0  ;;  %v8340_v58 = vrot.slane %v8332_v52, %v16415_v48  ;;  %v16590_v13 = vrot.slane %v8333_v53, %v16415_v48 }
 0x600   : > { %v8252_v21 = vadd.f32 %v16413_v37, %v8213_v42  ;;  %v8216_v27 = vadd.f32 %v12578_v14, %v16478_v28  ;;  %v8628_v40 = vrot.slane %v8620_v11, %v16415_v48  ;;  %v16586_v61 = vrot.slane %v8621_v46, %v16415_v48 }
 0x601   : > { %v8348_v62 = vcombine.low %v8278_v38, %v8282_v47  ;;  %v8349_v10 = vcombine.high %v8278_v38, %v8282_v47  ;;  %v8128_v56 = vpop.f32.mrf.mxu0  ;;  %v8285_v32 = vmax.f32 %v8253_v51, 0.0 }
 0x602   : > { %v8215_v33 = vadd.f32 %v8128_v56, %v16483_v34  ;;  %v8668_v57 = vcombine.low %v8612_v20, %v8628_v40  ;;  %v8669_v31 = vcombine.high %v8612_v20, %v8628_v40  ;;  %v8284_v1 = vmax.f32 %v8252_v21, 0.0 }
 0x603   : > { %v8356_v4 = vrot.slane %v8348_v62, %v16415_v48  ;;  %v16595_v28 = vrot.slane %v8349_v10, %v16415_v48  ;;  %v12581_v50 = vpop.f32.mrf.mxu0  ;;  %v8255_v54 = vadd.f32 %v16413_v37, %v8216_v27  ;;  %v8684_v63 = vcombine.low %v16580_v22, %v16586_v61 }
 0x604   : > { %v8218_v43 = vadd.f32 %v12581_v50, %v16487_v9  ;;  %v8676_v38 = vrot.slane %v8668_v57, %v16425_v2  ;;  %v16603_v52 = vrot.slane %v8669_v31, %v16425_v2  ;;  %v8254_v3 = vadd.f32 %v16413_v37, %v8215_v33 }
 0x605   : > { %v8138_v7 = vpop.f32.mrf.mxu0  ;;  %v8397_v34 = vcombine.high %v8340_v58, %v8356_v4  ;;  %v8396_v53 = vcombine.low %v8340_v58, %v8356_v4  ;;  %v8412_v9 = vcombine.low %v16590_v13, %v16595_v28  ;;  %v16657_v16 = vrot.slane %v8684_v63, %v16425_v2 }
 0x606   : > { %v8257_v59 = vadd.f32 %v16413_v37, %v8218_v43  ;;  %v8217_v23 = vadd.f32 %v8138_v7, %v16491_v0  ;;  %v8700_v42 = vcombine.low %v16554_v18, %v8676_v38  ;;  %v8701_v46 = vcombine.high %v16554_v18, %v8676_v38 }
 0x607   : > { %v12584_v30 = vpop.f32.mrf.mxu0  ;;  %v16612_v11 = vrot.slane %v8397_v34, %v16425_v2  ;;  %v8702_v47 = vcombine.low %v16560_v19, %v16603_v52  ;;  %v8703_v0 = vcombine.high %v16560_v19, %v16603_v52  ;;  %v16625_v18 = vrot.slane %v8396_v53, %v16425_v2 }
 0x608   : > { %v8289_v51 = vmax.f32 %v8257_v59, 0.0  ;;  %v8256_v14 = vadd.f32 %v16413_v37, %v8217_v23  ;;  %v8220_v20 = vadd.f32 %v12584_v30, %v16495_v5  ;;  %8902 = vrot.lane.b32.xlu0 %v8700_v42, %s12901_s15  ;;  %v16630_v62 = vrot.slane %v8412_v9, %v16425_v2 }
 0x609   : > { %v8148_v21 = vpop.f32.mrf.mxu0  ;;  %v8430_v27 = vcombine.low %v16565_v29, %v16612_v11  ;;  %v8431_v40 = vcombine.high %v16565_v29, %v16612_v11  ;;  %v8429_v50 = vcombine.high %v16569_v24, %v16625_v18  ;;  %v8287_v43 = vmax.f32 %v8255_v54, 0.0 }
 0x60a   : > { %v8708_v5 = vcombine.low %v8285_v32, %v8289_v51  ;;  %v8709_v10 = vcombine.high %v8285_v32, %v8289_v51  ;;  %v8288_v56 = vmax.f32 %v8256_v14, 0.0  ;;  %v8259_v58 = vadd.f32 %v16413_v37, %v8220_v20 }
 0x60b   : > { %v8219_v33 = vadd.f32 %v8148_v21, %v16500_v60  ;;  %8854 = vrot.lane.b32.xlu1 %v8430_v27, %s12902_s19  ;;  %v12587_v4 = vpop.f32.mrf.mxu0  ;;  %v8432_v57 = vcombine.low %v16572_v12, %v16630_v62  ;;  %v8433_v31 = vcombine.high %v16572_v12, %v16630_v62  ;;  %v16645_v60 = vrot.slane %v8381_v41, %v16425_v2  ;;  %v12516_v41 = vpop.f32.mrf.mxu1 }
 0x60c   : > { %v8436_v32 = vcombine.low %v8284_v1, %v8288_v56  ;;  %v8437_v7 = vcombine.high %v8284_v1, %v8288_v56  ;;  %v8286_v38 = vmax.f32 %v8254_v3, 0.0  ;;  %v8291_v34 = vmax.f32 %v8259_v58, 0.0  ;;  %8910 = vrot.lane.b32.xlu0 %v8701_v46, %s12903_s21 }
 0x60d   : > { %v8258_v53 = vadd.f32 %v16413_v37, %v8219_v33  ;;  %v8158_v59 = vpop.f32.mrf.mxu0  ;;  %v8413_v23 = vcombine.high %v16590_v13, %v16595_v28  ;;  %v8222_v1 = vadd.f32 %v12587_v4, %v16503_v44  ;;  %v16660_v3 = vrot.slane %v8708_v5, %v16415_v48  ;;  %v7914_v58 = vpop.f32.mrf.mxu1 }
 0x60e   : > { %v16652_v54 = vrot.slane %v8437_v7, %v16415_v48  ;;  %v8221_v49 = vadd.f32 %v8158_v59, %v16525_v39  ;;  %v8724_v9 = vcombine.low %v8287_v43, %v8291_v34  ;;  %v8725_v30 = vcombine.high %v8287_v43, %v8291_v34 }
 0x60f   : > { %v8290_v42 = vmax.f32 %v8258_v53, 0.0  ;;  %v12590_v46 = vpop.f32.mrf.mxu0  ;;  %v16663_v13 = vrot.slane %v8709_v10, %v16415_v48  ;;  %v16666_v28 = vrot.slane %v8436_v32, %v16415_v48  ;;  %v16669_v44 = vrot.slane %v8413_v23, %v16425_v2 }
 0x610   : > { %v8704_v39 = vcombine.low %v16575_v8, %v16657_v16  ;;  %v16674_v63 = vrot.slane %v8724_v9, %v16415_v48  ;;  %v16677_v51 = vrot.slane %v8725_v30, %v16415_v48  ;;  %8918 = vrot.lane.b32.xlu0 %v8702_v47, %s12904_s13  ;;  %v8261_v27 = vadd.f32 %v16413_v37, %v8222_v1 }
 0x611   : > { %v8452_v14 = vcombine.low %v8286_v38, %v8290_v42  ;;  %v8453_v20 = vcombine.high %v8286_v38, %v8290_v42  ;;  %v8168_v21 = vpop.f32.mrf.mxu0  ;;  %v8260_v5 = vadd.f32 %v16413_v37, %v8221_v49  ;;  %v8224_v10 = vadd.f32 %v12590_v46, %v16529_v35 }
 0x612   : > { %v8223_v56 = vadd.f32 %v8168_v21, %v16535_v25  ;;  %v8434_v32 = vcombine.low %v16645_v60, %v16669_v44  ;;  %v8772_v47 = vcombine.low %v16660_v3, %v16674_v63  ;;  %v7954_v38 = vadd.f32 %v12516_v41, %v16544_v45 }
 0x613   : > { %v16685_v33 = vrot.slane %v8452_v14, %v16415_v48  ;;  %v8467_v4 = vrot.slane %v8453_v20, %v16415_v48  ;;  %v12593_v43 = vpop.f32.mrf.mxu0  ;;  %v7953_v35 = vadd.f32 %v7914_v58, %v16402_v36  ;;  %v8435_v25 = vcombine.high %v16645_v60, %v16669_v44 }
 0x614   : > { %v8226_v7 = vadd.f32 %v12593_v43, %v16547_v55  ;;  %8926 = vrot.lane.b32.xlu0 %v8703_v0, %s12905_s16  ;;  %v8773_v53 = vcombine.high %v16660_v3, %v16674_v63  ;;  %v8788_v45 = vcombine.low %v16663_v13, %v16677_v51  ;;  %v16711_v36 = vrot.slane %v8653_v6, %v16425_v2 }
 0x615   : > { %v8178_v34 = vpop.f32.mrf.mxu0  ;;  %v8500_v55 = vcombine.low %v16666_v28, %v16685_v33  ;;  %v8293_v59 = vmax.f32 %v8261_v27, 0.0  ;;  %v8705_v0 = vcombine.high %v16575_v8, %v16657_v16  ;;  %v8292_v23 = vmax.f32 %v8260_v5, 0.0 }
 0x616   : > { %v8265_v19 = vadd.f32 %v16413_v37, %v8226_v7  ;;  %v8225_v52 = vadd.f32 %v8178_v34, %v16557_v17  ;;  %v8263_v1 = vadd.f32 %v16413_v37, %v8224_v10  ;;  %v8262_v49 = vadd.f32 %v16413_v37, %v8223_v56 }
 0x617   : > { %v12596_v41 = vpop.f32.mrf.mxu0  ;;  %v8685_v3 = vcombine.high %v16580_v22, %v16586_v61  ;;  %v8501_v9 = vcombine.high %v16666_v28, %v16685_v33  ;;  %v8516_v42 = vcombine.low %v16652_v54, %v8467_v4  ;;  %v8517_v22 = vcombine.high %v16652_v54, %v8467_v4 }
 0x618   : > { %v8297_v26 = vmax.f32 %v8265_v19, 0.0  ;;  %v8264_v15 = vadd.f32 %v16413_v37, %v8225_v52  ;;  %v8228_v6 = vadd.f32 %v12596_v41, %v7954_v38  ;;  %8846 = vrot.lane.b32.xlu0 %v8429_v50, %s12906_s18  ;;  %v8789_v61 = vcombine.high %v16663_v13, %v16677_v51 }
 0x619   : > { %v8188_v17 = vpop.f32.mrf.mxu0  ;;  %v16729_v30 = vrot.slane %v8685_v3, %v16425_v2  ;;  %v8295_v27 = vmax.f32 %v8263_v1, 0.0  ;;  %v16746_v13 = vrot.slane %v8516_v42, %v16425_v2  ;;  %v16749_v51 = vrot.slane %v8517_v22, %v16425_v2 }
 0x61a   : > { %v8740_v46 = vcombine.low %v8293_v59, %v8297_v26  ;;  %v8741_v63 = vcombine.high %v8293_v59, %v8297_v26  ;;  %v8296_v28 = vmax.f32 %v8264_v15, 0.0  ;;  %v8267_v14 = vadd.f32 %v16413_v37, %v8228_v6 }
 0x61b   : > { %v8227_v20 = vadd.f32 %v8188_v17, %v7953_v35  ;;  %v8706_v50 = vcombine.low %v16711_v36, %v16729_v30  ;;  %v8707_v21 = vcombine.high %v16711_v36, %v16729_v30  ;;  %v8294_v58 = vmax.f32 %v8262_v49, 0.0 }
 0x61c   : > { %v8468_v5 = vcombine.low %v8292_v23, %v8296_v28  ;;  %v8469_v10 = vcombine.high %v8292_v23, %v8296_v28  ;;  %v8299_v56 = vmax.f32 %v8267_v14, 0.0  ;;  %8862 = vrot.lane.b32.xlu0 %v8431_v40, %s12907_s20  ;;  %v16753_v4 = vrot.slane %v8789_v61, %v16425_v2 }
 0x61d   : > { %v8266_v54 = vadd.f32 %v16413_v37, %v8227_v20  ;;  %v8428_v38 = vcombine.low %v16569_v24, %v16625_v18  ;;  %v8748_v29 = vrot.slane %v8740_v46, %v16415_v48  ;;  %v8780_v11 = vrot.slane %v8772_v47, %v16425_v2 }
 0x61e   : > { %v8483_v33 = vrot.slane %v8469_v10, %v16415_v48  ;;  %v8756_v43 = vcombine.low %v8295_v27, %v8299_v56  ;;  %v8757_v37 = vcombine.high %v8295_v27, %v8299_v56  ;;  %v8755_v19 = vrot.slane %v8741_v63, %v16415_v48 }
 0x61f   : > { %v8298_v7 = vmax.f32 %v8266_v54, 0.0  ;;  %v8476_v52 = vrot.slane %v8468_v5, %v16415_v48  ;;  %v8787_v23 = vrot.slane %v8773_v53, %v16425_v2  ;;  %v16769_v47 = vrot.slane %v8500_v55, %v16425_v2 }
 0x620   : > { %v8764_v40 = vrot.slane %v8756_v43, %v16415_v48  ;;  %v8771_v35 = vrot.slane %v8757_v37, %v16415_v48  ;;  %8870 = vrot.lane.b32.xlu0 %v8432_v57, %s12908_s22  ;;  %v8796_v26 = vrot.slane %v8788_v45, %v16425_v2  ;;  %v8515_v57 = vrot.slane %v8501_v9, %v16425_v2 }
 0x621   : > { %v8484_v34 = vcombine.low %v8294_v58, %v8298_v7  ;;  %v8485_v59 = vcombine.high %v8294_v58, %v8298_v7 }
 0x622   : > { %v8804_v41 = vcombine.low %v8748_v29, %v8764_v40  ;;  %v8805_v3 = vcombine.high %v8748_v29, %v8764_v40  ;;  %v8820_v15 = vcombine.low %v8755_v19, %v8771_v35  ;;  %v8821_v6 = vcombine.high %v8755_v19, %v8771_v35 }
 0x623   : > { %v8492_v1 = vrot.slane %v8484_v34, %v16415_v48  ;;  %v8499_v49 = vrot.slane %v8485_v59, %v16415_v48 }
 0x624   : > { %8878 = vrot.lane.b32.xlu0 %v8433_v31, %s12909_s23  ;;  %v8812_v53 = vrot.slane %v8804_v41, %v16425_v2  ;;  %v8819_v55 = vrot.slane %v8805_v3, %v16425_v2  ;;  %v8828_v42 = vrot.slane %v8820_v15, %v16425_v2  ;;  %v8835_v61 = vrot.slane %v8821_v6, %v16425_v2 }
 0x625   : > { %v8532_v17 = vcombine.low %v8476_v52, %v8492_v1  ;;  %v8533_v48 = vcombine.high %v8476_v52, %v8492_v1  ;;  %v8548_v22 = vcombine.low %v8483_v33, %v8499_v49  ;;  %v8549_v45 = vcombine.high %v8483_v33, %v8499_v49 }
 0x626   : > { %v8836_v9 = vcombine.low %v8780_v11, %v8812_v53  ;;  %v8837_v46 = vcombine.high %v8780_v11, %v8812_v53  ;;  %v8838_v63 = vcombine.low %v8787_v23, %v8819_v55  ;;  %v8839_v12 = vcombine.high %v8787_v23, %v8819_v55 }
 0x627   : > { %v16784_v28 = vrot.slane %v8532_v17, %v16425_v2  ;;  %v8840_v62 = vcombine.low %v8796_v26, %v8828_v42  ;;  %v8841_v31 = vcombine.high %v8796_v26, %v8828_v42  ;;  %v8547_v14 = vrot.slane %v8533_v48, %v16425_v2 }
 0x628   : > { %8886 = vrot.lane.b32.xlu0 %v8434_v32, %s12910_s29  ;;  %8904 = vrot.lane.b32.xlu1 %v8836_v9, %s12901_s15  ;;  %v8556_v27 = vrot.slane %v8548_v22, %v16425_v2  ;;  %v8563_v5 = vrot.slane %v8549_v45, %v16425_v2  ;;  %v8842_v54 = vcombine.low %v16753_v4, %v8835_v61  ;;  %s12915_s15 = smov 120  }
 0x629   : > { %v8565_v20 = vcombine.high %v16769_v47, %v16784_v28  ;;  %v8566_v10 = vcombine.low %v8515_v57, %v8547_v14  ;;  %v8567_v56 = vcombine.high %v8515_v57, %v8547_v14  ;;  %v8843_v58 = vcombine.high %v16753_v4, %v8835_v61 }
 0x62a   : > { %v8568_v33 = vcombine.low %v16746_v13, %v8556_v27  ;;  %v8569_v43 = vcombine.high %v16746_v13, %v8556_v27  ;;  %v8570_v32 = vcombine.low %v16749_v51, %v8563_v5  ;;  %v8571_v37 = vcombine.high %v16749_v51, %v8563_v5 }
 0x62b   : > { %v8564_v7 = vcombine.low %v16769_v47, %v16784_v28 }
 0x62c   : > { %8894 = vrot.lane.b32.xlu0 %v8435_v25, %s12911_s8  ;;  %8912 = vrot.lane.b32.xlu1 %v8837_v46, %s12903_s21 }
 0x630   : > { %8920 = vrot.lane.b32.xlu1 %v8838_v63, %s12904_s13  ;;  %8848 = vrot.lane.b32.xlu0 %v8565_v20, %s12906_s18 }
 0x634   : > { %8928 = vrot.lane.b32.xlu1 %v8839_v12, %s12905_s16  ;;  %8934 = vrot.lane.b32.xlu0 %v8704_v39, %s12912_s9 }
 0x638   : > { %8936 = vrot.lane.b32.xlu1 %v8840_v62, %s12912_s9  ;;  %8942 = vrot.lane.b32.xlu0 %v8705_v0, %s12913_s14  ;;  %s12916_s9 = smov [#allocation10]  }
 0x63c   : > { %8944 = vrot.lane.b32.xlu1 %v8841_v31, %s12913_s14  ;;  %8950 = vrot.lane.b32.xlu0 %v8706_v50, %s12914_s17  ;;  %s12827_s14 = sshll.u32 %s12916_s9, 4  ;;  %s12828_s14 = int_to_ptr.vmem [resolvable:$false] %s12827_s14 }
 0x640   : > { %8856 = vrot.lane.b32.xlu1 %v8566_v10, %s12902_s19  ;;  %8958 = vrot.lane.b32.xlu0 %v8707_v21, %s12915_s15  ;;  %s313_s19 = sand.u32 1, %s12883_s25  }
 0x641   : > { %s9128_s21 = sshll.u32 %s313_s19, 4 }
 0x642   : > { %s315_s13 = scalar_lea.vmem [#allocation10], %s9128_s21 }
 0x643   : > { %s9025_s16 = sshll.u32 %s315_s13, 4  ;;  %s16865_s16 = int_to_ptr.vmem [resolvable:$true] %s9025_s16 }
 0x644   : > { %8864 = vrot.lane.b32.xlu1 %v8567_v56, %s12907_s20  ;;  %s9140_s20 = sshll.u32 %s12979_s28, 8  ;;  %s16877_s28 = scalar_lea.sflag [#allocation6], %s313_s19 }
 0x645   : > { %p12830_p7 = scmp.lt.s32.totalorder %s16865_s16, %s12828_s14 }
 0x648   : > { %8872 = vrot.lane.b32.xlu1 %v8568_v33, %s12908_s22 }
 0x64c   : > { %8880 = vrot.lane.b32.xlu1 %v8569_v43, %s12909_s23 }
 0x650   : > { %8888 = vrot.lane.b32.xlu1 %v8570_v32, %s12910_s29  ;;  %s16872_s29 = scalar_lea.hbm %s16925_s7, %s9140_s20 }
 0x654   : > { %8896 = vrot.lane.b32.xlu1 %v8571_v37, %s12911_s8  ;;  %s12823_s8 = scalar_lea.vmem %s16865_s16, 256 }
 0x655   : > { %p12824_p10 = scmp.ne.s32.totalorder %s16865_s16, %s12823_s8 }
 0x657   : > { %p12825_p2 = pnand %p12824_p10, %p17453_p12 }
 0x658   : > { %8952 = vrot.lane.b32.xlu1 %v8842_v54, %s12914_s17  ;;  %s12829_s17 = scalar_lea.vmem %s12828_s14, 512 }
 0x659   : > { %p12826_p4 = pneg %p12825_p2  ;;  %p12831_p8 = scmp.lt.s32.totalorder %s12829_s17, %s12823_s8 }
 0x65b   : > { %p12832_p11 = por %p12831_p8, %p12830_p7 }
 0x65c   : > { %8960 = vrot.lane.b32.xlu1 %v8843_v58, %s12915_s15 }
 0x65d   : > { %p12833_p0 = pnand %p12832_p11, %p12826_p4 }
 0x67a   : > { %v8903_v2 = vpop.permute.xlu0 %8902 }
 0x67d   : > { %v8855_v36 = vpop.permute.xlu1 %8854 }
 0x67e   : > { %v8911_v8 = vpop.permute.xlu0 %8910 }
 0x682   : > { %v8919_v60 = vpop.permute.xlu0 %8918 }
 0x686   : > { %v8927_v16 = vpop.permute.xlu0 %8926 }
 0x68a   : > { %v8847_v44 = vpop.permute.xlu0 %8846 }
 0x68b   : > { %v8965_v21 = vsel %vm8964_vm1, %v8428_v38, %v8847_v44 }
 0x68c   : > { %v8968_v13 = vsel %vm8967_vm2, %v8965_v21, %v8855_v36 }
 0x68e   : > { %v8863_v39 = vpop.permute.xlu0 %8862 }
 0x68f   : > { %v8971_v29 = vsel %vm8970_vm3, %v8968_v13, %v8863_v39 }
 0x692   : > { %v8871_v25 = vpop.permute.xlu0 %8870 }
 0x693   : > { %v8974_v11 = vsel %vm8973_vm4, %v8971_v29, %v8871_v25 }
 0x696   : > { %v8879_v0 = vpop.permute.xlu0 %8878 }
 0x697   : > { %v8977_v40 = vsel %vm8976_vm5, %v8974_v11, %v8879_v0 }
 0x69a   : > { %v8887_v30 = vpop.permute.xlu0 %8886  ;;  %v8905_v50 = vpop.permute.xlu1 %8904 }
 0x69b   : > { %v8980_v24 = vsel %vm8979_vm6, %v8977_v40, %v8887_v30 }
 0x69e   : > { %v8895_v51 = vpop.permute.xlu0 %8894  ;;  %v8913_v4 = vpop.permute.xlu1 %8912 }
 0x69f   : > { %v8983_v35 = vsel %vm8982_vm7, %v8980_v24, %v8895_v51 }
 0x6a0   : > { %v8986_v34 = vsel %vm8985_vm8, %v8983_v35, %v8903_v2 }
 0x6a1   : > { %v8989_v52 = vsel %vm8988_vm9, %v8986_v34, %v8911_v8 }
 0x6a2   : > { %v8921_v18 = vpop.permute.xlu1 %8920  ;;  %v8849_v38 = vpop.permute.xlu0 %8848  ;;  %v8992_v49 = vsel %vm8991_vm10, %v8989_v52, %v8919_v60 }
 0x6a3   : > { %v8995_v26 = vsel %vm8994_vm11, %v8992_v49, %v8927_v16  ;;  %v8966_v45 = vsel %vm8964_vm1, %v8564_v7, %v8849_v38 }
 0x6a6   : > { %v8929_v59 = vpop.permute.xlu1 %8928  ;;  %v8935_v19 = vpop.permute.xlu0 %8934 }
 0x6a7   : > { %v8998_v15 = vsel %vm8997_vm12, %v8995_v26, %v8935_v19 }
 0x6aa   : > { %v8937_v23 = vpop.permute.xlu1 %8936  ;;  %v8943_v1 = vpop.permute.xlu0 %8942 }
 0x6ab   : > { %v9001_v57 = vsel %vm9000_vm13, %v8998_v15, %v8943_v1 }
 0x6ae   : > { %v8945_v41 = vpop.permute.xlu1 %8944  ;;  %v8951_v3 = vpop.permute.xlu0 %8950 }
 0x6af   : > { %v9004_v6 = vsel %vm9003_vm14, %v9001_v57, %v8951_v3 }
 0x6b2   : > { %v8857_v53 = vpop.permute.xlu1 %8856  ;;  %v8959_v55 = vpop.permute.xlu0 %8958 }
 0x6b3   : > { %v9007_v17 = vsel %vm9006_vm15, %v9004_v6, %v8959_v55  ;;  %v8969_v61 = vsel %vm8967_vm2, %v8966_v45, %v8857_v53 }
 0x6b4   : > { %9009 = vst [vmem:[%s315_s13] sm:$0xff] %v9007_v17 }
 0x6b6   : > { %v8865_v48 = vpop.permute.xlu1 %8864 }
 0x6b7   : > { %v8972_v46 = vsel %vm8970_vm3, %v8969_v61, %v8865_v48 }
 0x6ba   : > { %v8873_v42 = vpop.permute.xlu1 %8872 }
 0x6bb   : > { %v8975_v63 = vsel %vm8973_vm4, %v8972_v46, %v8873_v42 }
 0x6be   : > { %v8881_v22 = vpop.permute.xlu1 %8880 }
 0x6bf   : > { %v8978_v12 = vsel %vm8976_vm5, %v8975_v63, %v8881_v22 }
 0x6c2   : > { %v8889_v9 = vpop.permute.xlu1 %8888 }
 0x6c3   : > { %v8981_v62 = vsel %vm8979_vm6, %v8978_v12, %v8889_v9 }
 0x6c6   : > { %v8897_v31 = vpop.permute.xlu1 %8896 }
 0x6c7   : > { %v8984_v14 = vsel %vm8982_vm7, %v8981_v62, %v8897_v31 }
 0x6c8   : > { %v8987_v47 = vsel %vm8985_vm8, %v8984_v14, %v8905_v50 }
 0x6c9   : > { %v8990_v28 = vsel %vm8988_vm9, %v8987_v47, %v8913_v4 }
 0x6ca   : > { %v8993_v20 = vsel %vm8991_vm10, %v8990_v28, %v8921_v18  ;;  %v8953_v27 = vpop.permute.xlu1 %8952 }
 0x6cb   : > { %v8996_v5 = vsel %vm8994_vm11, %v8993_v20, %v8929_v59 }
 0x6cc   : > { %v8999_v10 = vsel %vm8997_vm12, %v8996_v5, %v8937_v23 }
 0x6cd   : > { %v9002_v56 = vsel %vm9000_vm13, %v8999_v10, %v8945_v41 }
 0x6ce   : > { %v9005_v54 = vsel %vm9003_vm14, %v9002_v56, %v8953_v27  ;;  %v8961_v58 = vpop.permute.xlu1 %8960 }
 0x6cf   : > { %v9008_v33 = vsel %vm9006_vm15, %v9005_v54, %v8961_v58 }
 0x6d0   : > { %9010 = vst [vmem:[%s315_s13 + $0x8] sm:$0xff] %v9008_v33 }
 0x6d1   : > { %12836 = shalt.err (!%p12833_p0)
}
 0x6d2   : > { %s12837_s15 = scalar_lea.hbm %s16872_s29, 256  ;;  %s12841_s13 = scalar_lea.hbm %s16925_s7, 512 }
 0x6d3   : > { %p12838_p6 = scmp.ne.s32.totalorder %s16872_s29, %s12837_s15  ;;  %p12842_p1 = scmp.lt.s32.totalorder %s16872_s29, %s16925_s7 }
 0x6d4   : > { %p12843_p5 = scmp.lt.s32.totalorder %s12841_s13, %s12837_s15 }
 0x6d5   : > { %p12839_p9 = pnand %p12838_p6, %p17453_p12 }
 0x6d6   : > { %p12844_p3 = por %p12843_p5, %p12842_p1 }
 0x6d7   : > { %p12840_p13 = pneg %p12839_p9 }
 0x6d9   : > { %p12845_p10 = pnand %p12844_p3, %p12840_p13 }
 0x6db   : > { %12848 = shalt.err (!%p12845_p10)
}
 0x6dc   : > { %s12917_s23 = smov 128  }
 0x6dd   : > { %12641 = dma.vmem_to_hbm [thread:$0]  (%p17453_p12), %s16865_s16, 256, %s16872_s29, %s16877_s28, %s12917_s23, %s12917_s23, %s12906_s18  }
 0x6de PF: > { %p12663_p2 = scmp.ge.s32.totalorder %s12891_s27, 2  ;;  %s9040_s8 = sand.u32 1, %s12879_s24  }
 0x6df   : > { %p17454_p4 = scmp.ne.s32.totalorder %s16980_s12, 0  ;;  %s9041_s9 = scalar_lea.sflag [#allocation6], %s9040_s8 }
 0x6e1   : > { %p12654_p7 = pnand %p12663_p2, %p17454_p4 }
 0x6e3   : > { %p12655_p8 = pneg %p12654_p7 }
 0x6e5   : > { %12874 = dma.done.wait (%p12655_p8), %s9041_s9, 256  }
 0x6e6   : > { %12876 = vsyncadd (%p12655_p8), %s9041_s9, 4294967040  ;;  %p19_p11 = scmp.ge.s32.totalorder %s12983_s30, 4   ;;  %s17455_s24 = smov %s12883_s25 }
 0x6e7   : > { %s17456_s25 = smov %s12887_s26  ;;  %s17457_s26 = smov %s12994_s10 }
 0x6e8   : > { %s17458_s27 = smov %s12983_s30  ;;  %21 = sbr.rel (!%p19_p11) target bundleno = 5 (0x5), region = 122 }
 0x6ed   :  { %9046 = vsyncpa [#allocation5], 1 }
 0x6ee   :  { %9048 = vsyncpa [#allocation5 + $0x1], 1 }
 0x6ef   :  { %9049 = vsyncpa [#allocation8], 1 }
 0x6f0   :  { %9050 = vsyncpa [#allocation6], 1 }
 0x6f1   :  { %9052 = vsyncpa [#allocation6 + $0x1], 1 }

</bundles_post_ra>
